<compile_context>
chip_gen: v5e
topology: v5e:2x2
jax: 0.10.0
libtpu: 0.0.40
codegen_flags: <defaults>
</compile_context>

<pallas_src>
import math

import numpy as np

import jax
import jax.numpy as jnp
from jax.experimental import pallas as pl
from jax.experimental.pallas import tpu as pltpu

EPS = 1e-5
BN_SCALE = 1.0 / math.sqrt(1.0 + EPS)   # inference BatchNorm with fresh stats


# --------------------------------------------------------------------------
# Host-side constant masks (depend only on static spatial sizes)
# --------------------------------------------------------------------------
def _conv2_tap_masks(ho, wo):
    """(9, ho*wo, 1) f32 validity masks for the 9 taps of a 3x3/s1/p1 conv."""
    idx = np.arange(ho * wo)
    oh, ow = idx // wo, idx % wo
    m = np.zeros((9, ho * wo, 1), np.float32)
    for t in range(9):
        doff, woff = t // 3 - 1, t % 3 - 1
        ok = ((oh + doff >= 0) & (oh + doff < ho) &
              (ow + woff >= 0) & (ow + woff < wo))
        m[t, :, 0] = ok.astype(np.float32)
    return jnp.asarray(m)


def _pool_masks(ph, pw):
    """(2, ph*pw, 1) f32: [row>0 mask, col>0 mask] for the 3x3/s2/p1 max-pool."""
    idx = np.arange(ph * pw)
    m = np.zeros((2, ph * pw, 1), np.float32)
    m[0, :, 0] = (idx // pw) > 0
    m[1, :, 0] = (idx % pw) > 0
    return jnp.asarray(m)


# --------------------------------------------------------------------------
# Kernel 1: conv1 (7x7/s2) + BN + ReLU + MaxPool(3,2,1), fused
# --------------------------------------------------------------------------
def _make_conv1_pool_kernel(pq, pw):
    """pq = pooled H*W per batch element, pw = pooled W (row stride per h)."""

    def kernel(p_ref, w_ref, b_ref, m_ref, o_ref, y_ref):
        # Conv output rows are ordered as 4 stride-2 parity planes
        # (h%2, w%2, i, j); the 3x3/s2 pool then only needs flat row shifts.
        y_ref[...] = jnp.maximum(
            jnp.dot(p_ref[0], w_ref[...], preferred_element_type=jnp.float32)
            + b_ref[...], 0.0)
        mh = m_ref[0]                     # 1 if pooled h > 0
        mw = m_ref[1]                     # 1 if pooled w > 0
        mhw = mh * mw
        # Post-ReLU values are >= 0, so masking invalid taps to 0 is a safe
        # lower bound for the max (PyTorch pads with -inf).
        out = y_ref[0:pq, :]                                        # (2i,   2j)
        out = jnp.maximum(out, y_ref[pq:2 * pq, :])                 # (2i,   2j+1)
        out = jnp.maximum(out, y_ref[pq - 1:2 * pq - 1, :] * mw)    # (2i,   2j-1)
        out = jnp.maximum(out, y_ref[2 * pq:3 * pq, :])             # (2i+1, 2j)
        out = jnp.maximum(out, y_ref[2 * pq - pw:3 * pq - pw, :] * mh)   # (2i-1, 2j)
        out = jnp.maximum(out, y_ref[3 * pq:4 * pq, :])             # (2i+1, 2j+1)
        out = jnp.maximum(out, y_ref[3 * pq - 1:4 * pq - 1, :] * mw)     # (2i+1, 2j-1)
        out = jnp.maximum(out, y_ref[3 * pq - pw:4 * pq - pw, :] * mh)   # (2i-1, 2j+1)
        out = jnp.maximum(out, y_ref[3 * pq - pw - 1:4 * pq - pw - 1, :] * mhw)
        o_ref[0] = out.astype(o_ref.dtype)

    return kernel


def conv1_bn_relu_maxpool(p, w, b, masks, *, pq, pw):
    n, rows, k = p.shape
    c = w.shape[1]
    return pl.pallas_call(
        _make_conv1_pool_kernel(pq, pw),
        out_shape=jax.ShapeDtypeStruct((n, pq, c), jnp.bfloat16),
        grid=(n,),
        in_specs=[pl.BlockSpec((1, rows, k), lambda i: (i, 0, 0)),
                  pl.BlockSpec((k, c), lambda i: (0, 0)),
                  pl.BlockSpec((1, c), lambda i: (0, 0)),
                  pl.BlockSpec((2, pq, 1), lambda i: (0, 0, 0))],
        out_specs=pl.BlockSpec((1, pq, c), lambda i: (i, 0, 0)),
        scratch_shapes=[pltpu.VMEM((rows, c), jnp.float32)],
        compiler_params=pltpu.CompilerParams(dimension_semantics=("parallel",)),
    )(p, w, b, masks)


# --------------------------------------------------------------------------
# Kernel 2: fully fused BasicBlock (all ensemble branches packed in lanes)
# --------------------------------------------------------------------------
def _make_block_kernel(mr, wo, cp_in, cp_out, has_ds, post_scale):
    pad = wo + 1

    def _body(p_ref, w1_ref, w2_ref, wd_ref, bd_ref, m_ref, o_ref, hp_ref):
        p = p_ref[0]                                       # (mr, 9*cp_in) bf16
        # conv1 (3x3, stride s) + BN1 (folded) + ReLU
        h = jnp.maximum(
            jnp.dot(p, w1_ref[...], preferred_element_type=jnp.float32), 0.0)
        # identity path: the 1x1/stride-s downsample input is exactly the
        # centre-tap columns of the already-loaded 3x3 im2col tile.
        ctr = p_ref[0, :, 4 * cp_in:5 * cp_in]
        if has_ds:
            ident = (jnp.dot(ctr, wd_ref[...],
                             preferred_element_type=jnp.float32) + bd_ref[...])
        else:
            ident = ctr.astype(jnp.float32)
        # conv2 (3x3, stride 1) + BN2 (folded), in-kernel im2col:
        # zero-padded row buffer + 9 shifted windows, boundary taps masked.
        hp_ref[...] = jnp.zeros(hp_ref.shape, hp_ref.dtype)
        hp_ref[pad:pad + mr, :] = h.astype(hp_ref.dtype)
        acc = ident
        for t in range(9):
            s = (t // 3 - 1) * wo + (t % 3 - 1)
            win = hp_ref[pad + s:pad + s + mr, :]
            if t != 4:                                     # centre tap never masked
                win = win * m_ref[t].astype(win.dtype)
            acc = acc + jnp.dot(win, w2_ref[t * cp_out:(t + 1) * cp_out, :],
                                preferred_element_type=jnp.float32)
        y = jnp.maximum(acc, 0.0)
        if post_scale is not None:                         # fused norm_and_relu_2
            y = y * post_scale
        o_ref[0] = y.astype(o_ref.dtype)

    if has_ds:
        def kernel(p_ref, w1_ref, w2_ref, wd_ref, bd_ref, m_ref, o_ref, hp_ref):
            _body(p_ref, w1_ref, w2_ref, wd_ref, bd_ref, m_ref, o_ref, hp_ref)
    else:
        def kernel(p_ref, w1_ref, w2_ref, m_ref, o_ref, hp_ref):
            _body(p_ref, w1_ref, w2_ref, None, None, m_ref, o_ref, hp_ref)
    return kernel


def fused_basic_block(p, w1, w2, wd, bd, masks, *, wo, post_scale=None,
                      out_dtype=jnp.bfloat16):
    n, mr, k1 = p.shape
    cp_in = k1 // 9
    cp_out = w1.shape[1]
    has_ds = wd is not None
    pad = wo + 1

    in_specs = [
        pl.BlockSpec((1, mr, k1), lambda i: (i, 0, 0)),
        pl.BlockSpec((k1, cp_out), lambda i: (0, 0)),
        pl.BlockSpec((9 * cp_out, cp_out), lambda i: (0, 0)),
    ]
    args = [p, w1, w2]
    if has_ds:
        in_specs += [pl.BlockSpec((cp_in, cp_out), lambda i: (0, 0)),
                     pl.BlockSpec((1, cp_out), lambda i: (0, 0))]
        args += [wd, bd]
    in_specs.append(pl.BlockSpec((9, mr, 1), lambda i: (0, 0, 0)))
    args.append(masks)

    return pl.pallas_call(
        _make_block_kernel(mr, wo, cp_in, cp_out, has_ds, post_scale),
        out_shape=jax.ShapeDtypeStruct((n, mr, cp_out), out_dtype),
        grid=(n,),
        in_specs=in_specs,
        out_specs=pl.BlockSpec((1, mr, cp_out), lambda i: (i, 0, 0)),
        scratch_shapes=[pltpu.VMEM((mr + 2 * pad, cp_out), jnp.bfloat16)],
        compiler_params=pltpu.CompilerParams(dimension_semantics=("parallel",)),
    )(*args)


# --------------------------------------------------------------------------
# Kernel 3: fc (tiny GEMM, f32 logits)
# --------------------------------------------------------------------------
def _fc_kernel(x_ref, w_ref, b_ref, o_ref):
    o_ref[...] = (jnp.dot(x_ref[...], w_ref[...],
                          preferred_element_type=jnp.float32) + b_ref[...])


def fc_layer(x, w, b):
    r, k = x.shape
    nout = w.shape[1]
    return pl.pallas_call(
        _fc_kernel,
        out_shape=jax.ShapeDtypeStruct((r, nout), jnp.float32),
        grid=(1,),
        in_specs=[pl.BlockSpec((r, k), lambda i: (0, 0)),
                  pl.BlockSpec((k, nout), lambda i: (0, 0)),
                  pl.BlockSpec((1, nout), lambda i: (0, 0))],
        out_specs=pl.BlockSpec((r, nout), lambda i: (0, 0)),
    )(x, w, b)


# --------------------------------------------------------------------------
# Host-side im2col (stride-2 windows only; stride-1 conv2 is in-kernel)
# --------------------------------------------------------------------------
def _im2col_3x3(x, stride):
    n, h, w, c = x.shape
    ho = (h + 2 - 3) // stride + 1
    wo = (w + 2 - 3) // stride + 1
    xp = jnp.pad(x, ((0, 0), (1, 1), (1, 1), (0, 0)))
    cols = []
    for i in range(3):
        for j in range(3):
            cols.append(xp[:, i:i + stride * (ho - 1) + 1:stride,
                           j:j + stride * (wo - 1) + 1:stride, :])
    p = jnp.concatenate(cols, axis=-1).reshape(n, ho * wo, 9 * c)
    return p, ho, wo


def _im2col_7x7_s2_parity(x):
    n, h, w, c = x.shape
    ho = (h + 6 - 7) // 2 + 1
    wo = (w + 6 - 7) // 2 + 1
    assert ho % 2 == 0 and wo % 2 == 0
    xp = jnp.pad(x, ((0, 0), (3, 3), (3, 3), (0, 0)))
    cols = []
    for i in range(7):
        for j in range(7):
            cols.append(xp[:, i:i + 2 * (ho - 1) + 1:2,
                           j:j + 2 * (wo - 1) + 1:2, :])
    p = jnp.concatenate(cols, axis=-1)                 # (n, ho, wo, 49*c)
    k = p.shape[-1]
    # Reorder conv-output rows into the 4 stride-2 parity planes (h%2, w%2)
    # expected by the fused max-pool epilogue.
    p = p.reshape(n, ho // 2, 2, wo // 2, 2, k).transpose(0, 2, 4, 1, 3, 5)
    p = p.reshape(n, 4 * (ho // 2) * (wo // 2), k)
    return p, ho // 2, wo // 2


# --------------------------------------------------------------------------
# Forward pass
# --------------------------------------------------------------------------
def run_stage(x, blocks, stride, post_scale=None):
    n = x.shape[0]
    nblk = len(blocks)
    for bi, bp in enumerate(blocks):
        s = stride if bi == 0 else 1
        p, ho, wo = _im2col_3x3(x, s)
        masks = _conv2_tap_masks(ho, wo)
        y = fused_basic_block(
            p, bp["w1"], bp["w2"], bp.get("wd"), bp.get("bd"), masks, wo=wo,
            post_scale=post_scale if bi == nblk - 1 else None)
        x = y.reshape(n, ho, wo, y.shape[-1])
    return x


def ensemble_forward(prep, x_nhwc):
    n = x_nhwc.shape[0]
    x = x_nhwc.astype(jnp.bfloat16)

    # Stem: conv1 (7x7/s2) + norm_and_relu_1 + MaxPool(3,2,1) -> one kernel.
    p, ph, pw = _im2col_7x7_s2_parity(x)
    h = conv1_bn_relu_maxpool(p, prep["conv1_w"], prep["conv1_b"],
                              _pool_masks(ph, pw), pq=ph * pw, pw=pw)
    x = h.reshape(n, ph, pw, prep["conv1_w"].shape[1])

    x = run_stage(x, prep["layer1"], stride=1)                       # 1 group
    x = run_stage(x, prep["layer2"], stride=2)                       # 2 branches in lanes
    x = run_stage(x, prep["layer3"], stride=2)                       # 4 branches in lanes
    x = run_stage(x, prep["layer4"], stride=2, post_scale=BN_SCALE)  # + norm_and_relu_2

    # torch.cat over branches + AdaptiveAvgPool((None,None)) (identity) +
    # view(-1, 4*planes3) + Dropout (inference identity) + fc.
    nb, hf, wf, cp = x.shape
    assert hf == 1 and wf == 1  # TODO(synk): general spatial would need the NCHW transpose
    c = cp // 4
    xf = x.reshape(nb, 4, c).transpose(1, 0, 2).reshape(-1, 4 * c)
    return fc_layer(xf, prep["fc_w"], prep["fc_b"])


# --------------------------------------------------------------------------
# Parameter preparation: fold BN, pack ensemble branches block-diagonally
# --------------------------------------------------------------------------
def _pack_conv(ws, gin, bn_fold):
    """ws: list over G branches of (Cout, Cin, kh, kw); branch g reads packed
    input group g // (G // gin).  Returns (kh*kw*gin*Cin, G*Cout) bf16."""
    g = len(ws)
    cout, cin, kh, kw = ws[0].shape
    ratio = g // gin
    cp_in, cp_out = gin * cin, g * cout
    wp = jnp.zeros((kh, kw, cp_in, cp_out), jnp.float32)
    for gi in range(g):
        src = gi // ratio
        wp = wp.at[:, :, src * cin:(src + 1) * cin,
                   gi * cout:(gi + 1) * cout].set(
                       jnp.transpose(ws[gi], (2, 3, 1, 0)))
    wp = wp.reshape(kh * kw * cp_in, cp_out)
    if bn_fold:
        wp = wp * BN_SCALE
    return wp.astype(jnp.bfloat16)


def _prep_stage(branches, gin):
    g = len(branches)
    out = []
    for b in range(len(branches[0])):
        gin_b = gin if b == 0 else g
        bd = {"w1": _pack_conv([branches[i][b]["w1"] for i in range(g)], gin_b, True),
              "w2": _pack_conv([branches[i][b]["w2"] for i in range(g)], g, True)}
        if "ds_w" in branches[0][b]:
            bd["wd"] = _pack_conv([branches[i][b]["ds_w"] for i in range(g)],
                                  gin_b, False)
            bd["bd"] = jnp.concatenate(
                [branches[i][b]["ds_b"] for i in range(g)]
            ).reshape(1, -1).astype(jnp.float32)
        out.append(bd)
    return out


def prepare_params(params):
    prep = {}
    c0 = params["conv1_w"].shape[0]
    prep["conv1_w"] = (jnp.transpose(params["conv1_w"], (2, 3, 1, 0))
                       .reshape(-1, c0) * BN_SCALE).astype(jnp.bfloat16)
    prep["conv1_b"] = (params["conv1_b"] * BN_SCALE).reshape(1, -1).astype(jnp.float32)
    prep["layer1"] = _prep_stage([params["layer1"]], gin=1)
    prep["layer2"] = _prep_stage([params["layer2a"], params["layer2b"]], gin=1)
    prep["layer3"] = _prep_stage([params["layer3a"], params["layer3b"],
                                  params["layer3c"], params["layer3d"]], gin=2)
    prep["layer4"] = _prep_stage([params["layer4a"], params["layer4b"],
                                  params["layer4c"], params["layer4d"]], gin=4)
    prep["fc_w"] = jnp.transpose(params["fc_w"]).astype(jnp.bfloat16)
    prep["fc_b"] = params["fc_b"].reshape(1, -1).astype(jnp.float32)
    return prep


# --------------------------------------------------------------------------
# Deterministic parameter init (kaiming_normal fan_out, like the module)
# --------------------------------------------------------------------------
def _kaiming(key, shape, fan_out):
    return jax.random.normal(key, shape, jnp.float32) * math.sqrt(2.0 / fan_out)


def _init_conv(key, cout, cin, k, bias):
    kw, kb = jax.random.split(key)
    w = _kaiming(kw, (cout, cin, k, k), cout * k * k)
    b = 0.01 * jax.random.normal(kb, (cout,), jnp.float32) if bias else None
    return w, b


def _init_block(key, inplanes, planes, stride):
    k1, k2, k3 = jax.random.split(key, 3)
    p = {"w1": _init_conv(k1, planes, inplanes, 3, False)[0],
         "w2": _init_conv(k2, planes, planes, 3, False)[0]}
    if stride != 1 or inplanes != planes:
        p["ds_w"], p["ds_b"] = _init_conv(k3, planes, inplanes, 1, True)
    return p


def _init_layer(key, inplanes, planes, blocks, stride):
    keys = jax.random.split(key, blocks)
    bl = [_init_block(keys[0], inplanes, planes, stride)]
    for i in range(1, blocks):
        bl.append(_init_block(keys[i], planes, planes, 1))
    return tuple(bl)


def init_ensemble_net(key, layers=(1, 1, 1, 1), planes=8, num_classes=10):
    pls = [int(planes * 2 ** i) for i in range(4)]
    keys = jax.random.split(key, 14)
    params = {}
    params["conv1_w"], params["conv1_b"] = _init_conv(keys[0], pls[0], 3, 7, True)
    params["layer1"] = _init_layer(keys[1], pls[0], pls[0], layers[0], 1)
    params["layer2a"] = _init_layer(keys[2], pls[0], pls[1], layers[1], 2)
    params["layer2b"] = _init_layer(keys[3], pls[0], pls[1], layers[1], 2)
    params["layer3a"] = _init_layer(keys[4], pls[1], pls[2], layers[2], 2)
    params["layer3b"] = _init_layer(keys[5], pls[1], pls[2], layers[2], 2)
    params["layer3c"] = _init_layer(keys[6], pls[1], pls[2], layers[2], 2)
    params["layer3d"] = _init_layer(keys[7], pls[1], pls[2], layers[2], 2)
    params["layer4a"] = _init_layer(keys[8], pls[2], pls[3], layers[3], 2)
    params["layer4b"] = _init_layer(keys[9], pls[2], pls[3], layers[3], 2)
    params["layer4c"] = _init_layer(keys[10], pls[2], pls[3], layers[3], 2)
    params["layer4d"] = _init_layer(keys[11], pls[2], pls[3], layers[3], 2)
    kfw, kfb = jax.random.split(keys[12])
    params["fc_w"] = _kaiming(kfw, (num_classes, pls[3] * 4), num_classes)
    params["fc_b"] = 0.01 * jax.random.normal(kfb, (num_classes,), jnp.float32)
    return params


# --------------------------------------------------------------------------
if __name__ == "__main__":
    key = jax.random.PRNGKey(0)
    kx, kp = jax.random.split(key)

    # Small shapes: batch=2, 3x32x32 input, planes=8 -> [8,16,32,64], 10 classes.
    N, H, W = 2, 32, 32
    x_nchw = jax.random.normal(kx, (N, 3, H, W), jnp.float32)   # PyTorch-style input
    x_nhwc = jnp.transpose(x_nchw, (0, 2, 3, 1))                # kernel layout

    params = init_ensemble_net(kp, layers=(1, 1, 1, 1), planes=8, num_classes=10)
    prep = prepare_params(params)

    fwd = jax.jit(ensemble_forward)
    out = jax.block_until_ready(fwd(prep, x_nhwc))
    assert out.shape == (2, 10), out.shape
    assert bool(jnp.all(jnp.isfinite(out)))
    print("KERNEL_OK")
</pallas_src>

<mosaic_0001>
module attributes {stable_mosaic.version = 11 : i64} {
  func.func @kernel(%arg0: i32, %arg1: memref<1x256x147xbf16, #tpu.memory_space<vmem>>, %arg2: memref<147x8xbf16, #tpu.memory_space<vmem>>, %arg3: memref<1x8xf32, #tpu.memory_space<vmem>>, %arg4: memref<2x64x1xf32, #tpu.memory_space<vmem>>, %arg5: memref<1x64x8xbf16, #tpu.memory_space<vmem>>, %arg6: memref<256x8xf32, #tpu.memory_space<vmem>>) attributes {dimension_semantics = [#tpu.dimension_semantics<parallel>], iteration_bounds = array<i64: 2>, scalar_prefetch = 0 : i64, scratch_operands = 1 : i64, tpu.core_type = #tpu.core_type<tc>, window_params = [{transform_indices = @transform_0, window_bounds = array<i64: 1, 256, 147>}, {pipeline_mode = #tpu.pipeline_mode<synchronous>, transform_indices = @transform_1, window_bounds = array<i64: 147, 8>}, {pipeline_mode = #tpu.pipeline_mode<synchronous>, transform_indices = @transform_2, window_bounds = array<i64: 1, 8>}, {pipeline_mode = #tpu.pipeline_mode<synchronous>, transform_indices = @transform_3, window_bounds = array<i64: 2, 64, 1>}, {transform_indices = @transform_4, window_bounds = array<i64: 1, 64, 8>}]} {
    %c0 = arith.constant 0 : index
    %c0_0 = arith.constant 0 : index
    %c0_1 = arith.constant 0 : index
    %0 = vector.load %arg1[%c0, %c0_0, %c0_1] : memref<1x256x147xbf16, #tpu.memory_space<vmem>>, vector<1x256x147xbf16>
    %1 = vector.shape_cast %0 : vector<1x256x147xbf16> to vector<256x147xbf16>
    %c0_2 = arith.constant 0 : index
    %c0_3 = arith.constant 0 : index
    %2 = vector.load %arg2[%c0_2, %c0_3] : memref<147x8xbf16, #tpu.memory_space<vmem>>, vector<147x8xbf16>
    %cst = arith.constant dense<0.000000e+00> : vector<256x8xf32>
    %3 = tpu.matmul %1, %2, %cst {dimension_numbers = #tpu.dot_dimension_numbers<[1], [0], [0], [1], [0, 0, 1, 1], [], []>} : vector<256x147xbf16>, vector<147x8xbf16>, vector<256x8xf32> -> vector<256x8xf32>
    %c0_4 = arith.constant 0 : index
    %c0_5 = arith.constant 0 : index
    %4 = vector.load %arg3[%c0_4, %c0_5] : memref<1x8xf32, #tpu.memory_space<vmem>>, vector<1x8xf32>
    %5 = vector.broadcast %4 : vector<1x8xf32> to vector<256x8xf32>
    %6 = arith.addf %3, %5 : vector<256x8xf32>
    %cst_6 = arith.constant 0.000000e+00 : f32
    %7 = vector.broadcast %cst_6 : f32 to vector<256x8xf32>
    %8 = arith.maximumf %6, %7 : vector<256x8xf32>
    %c0_7 = arith.constant 0 : index
    %c0_8 = arith.constant 0 : index
    %9 = vector.load %arg6[%c0_7, %c0_8] : memref<256x8xf32, #tpu.memory_space<vmem>>, vector<256x8xf32>
    tpu.vector_store %arg6[%c0_7, %c0_8], %8 {strides = array<i32>} : memref<256x8xf32, #tpu.memory_space<vmem>>, vector<256x8xf32>,
    %c0_9 = arith.constant 0 : index
    %c0_10 = arith.constant 0 : index
    %c0_11 = arith.constant 0 : index
    %10 = vector.load %arg4[%c0_9, %c0_10, %c0_11] : memref<2x64x1xf32, #tpu.memory_space<vmem>>, vector<1x64x1xf32>
    %11 = vector.shape_cast %10 : vector<1x64x1xf32> to vector<64x1xf32>
    %c1 = arith.constant 1 : index
    %c0_12 = arith.constant 0 : index
    %c0_13 = arith.constant 0 : index
    %12 = vector.load %arg4[%c1, %c0_12, %c0_13] : memref<2x64x1xf32, #tpu.memory_space<vmem>>, vector<1x64x1xf32>
    %13 = vector.shape_cast %12 : vector<1x64x1xf32> to vector<64x1xf32>
    %14 = arith.mulf %11, %13 : vector<64x1xf32>
    %c0_14 = arith.constant 0 : index
    %c0_15 = arith.constant 0 : index
    %15 = vector.load %arg6[%c0_14, %c0_15] : memref<256x8xf32, #tpu.memory_space<vmem>>, vector<64x8xf32>
    %c64 = arith.constant 64 : index
    %c0_16 = arith.constant 0 : index
    %16 = vector.load %arg6[%c64, %c0_16] : memref<256x8xf32, #tpu.memory_space<vmem>>, vector<64x8xf32>
    %17 = arith.maximumf %15, %16 : vector<64x8xf32>
    %c63 = arith.constant 63 : index
    %c0_17 = arith.constant 0 : index
    %18 = vector.load %arg6[%c63, %c0_17] : memref<256x8xf32, #tpu.memory_space<vmem>>, vector<64x8xf32>
    %19 = vector.broadcast %13 : vector<64x1xf32> to vector<64x8xf32>
    %20 = arith.mulf %18, %19 : vector<64x8xf32>
    %21 = arith.maximumf %17, %20 : vector<64x8xf32>
    %c128 = arith.constant 128 : index
    %c0_18 = arith.constant 0 : index
    %22 = vector.load %arg6[%c128, %c0_18] : memref<256x8xf32, #tpu.memory_space<vmem>>, vector<64x8xf32>
    %23 = arith.maximumf %21, %22 : vector<64x8xf32>
    %c120 = arith.constant 120 : index
    %c0_19 = arith.constant 0 : index
    %24 = vector.load %arg6[%c120, %c0_19] : memref<256x8xf32, #tpu.memory_space<vmem>>, vector<64x8xf32>
    %25 = vector.broadcast %11 : vector<64x1xf32> to vector<64x8xf32>
    %26 = arith.mulf %24, %25 : vector<64x8xf32>
    %27 = arith.maximumf %23, %26 : vector<64x8xf32>
    %c192 = arith.constant 192 : index
    %c0_20 = arith.constant 0 : index
    %28 = vector.load %arg6[%c192, %c0_20] : memref<256x8xf32, #tpu.memory_space<vmem>>, vector<64x8xf32>
    %29 = arith.maximumf %27, %28 : vector<64x8xf32>
    %c191 = arith.constant 191 : index
    %c0_21 = arith.constant 0 : index
    %30 = vector.load %arg6[%c191, %c0_21] : memref<256x8xf32, #tpu.memory_space<vmem>>, vector<64x8xf32>
    %31 = vector.broadcast %13 : vector<64x1xf32> to vector<64x8xf32>
    %32 = arith.mulf %30, %31 : vector<64x8xf32>
    %33 = arith.maximumf %29, %32 : vector<64x8xf32>
    %c184 = arith.constant 184 : index
    %c0_22 = arith.constant 0 : index
    %34 = vector.load %arg6[%c184, %c0_22] : memref<256x8xf32, #tpu.memory_space<vmem>>, vector<64x8xf32>
    %35 = vector.broadcast %11 : vector<64x1xf32> to vector<64x8xf32>
    %36 = arith.mulf %34, %35 : vector<64x8xf32>
    %37 = arith.maximumf %33, %36 : vector<64x8xf32>
    %c183 = arith.constant 183 : index
    %c0_23 = arith.constant 0 : index
    %38 = vector.load %arg6[%c183, %c0_23] : memref<256x8xf32, #tpu.memory_space<vmem>>, vector<64x8xf32>
    %39 = vector.broadcast %14 : vector<64x1xf32> to vector<64x8xf32>
    %40 = arith.mulf %38, %39 : vector<64x8xf32>
    %41 = arith.maximumf %37, %40 : vector<64x8xf32>
    %42 = arith.truncf %41 : vector<64x8xf32> to vector<64x8xbf16>
    %c0_24 = arith.constant 0 : index
    %c0_25 = arith.constant 0 : index
    %c0_26 = arith.constant 0 : index
    %43 = vector.load %arg5[%c0_24, %c0_25, %c0_26] : memref<1x64x8xbf16, #tpu.memory_space<vmem>>, vector<1x64x8xbf16>
    %44 = vector.shape_cast %43 : vector<1x64x8xbf16> to vector<64x8xbf16>
    %45 = vector.shape_cast %42 : vector<64x8xbf16> to vector<1x64x8xbf16>
    tpu.vector_store %arg5[%c0_24, %c0_25, %c0_26], %45 {strides = array<i32>} : memref<1x64x8xbf16, #tpu.memory_space<vmem>>, vector<1x64x8xbf16>,
    return
  }
  func.func @transform_0(%arg0: i32) -> (i32, i32, i32) {
    %c0_i32 = arith.constant 0 : i32
    %c0_i32_0 = arith.constant 0 : i32
    %c0_i32_1 = arith.constant 0 : i32
    return %arg0, %c0_i32, %c0_i32_0 : i32, i32, i32
  }
  func.func @transform_1(%arg0: i32) -> (i32, i32) {
    %c0_i32 = arith.constant 0 : i32
    %c0_i32_0 = arith.constant 0 : i32
    %c0_i32_1 = arith.constant 0 : i32
    return %c0_i32, %c0_i32_0 : i32, i32
  }
  func.func @transform_2(%arg0: i32) -> (i32, i32) {
    %c0_i32 = arith.constant 0 : i32
    %c0_i32_0 = arith.constant 0 : i32
    %c0_i32_1 = arith.constant 0 : i32
    return %c0_i32, %c0_i32_0 : i32, i32
  }
  func.func @transform_3(%arg0: i32) -> (i32, i32, i32) {
    %c0_i32 = arith.constant 0 : i32
    %c0_i32_0 = arith.constant 0 : i32
    %c0_i32_1 = arith.constant 0 : i32
    %c0_i32_2 = arith.constant 0 : i32
    return %c0_i32, %c0_i32_0, %c0_i32_1 : i32, i32, i32
  }
  func.func @transform_4(%arg0: i32) -> (i32, i32, i32) {
    %c0_i32 = arith.constant 0 : i32
    %c0_i32_0 = arith.constant 0 : i32
    %c0_i32_1 = arith.constant 0 : i32
    return %arg0, %c0_i32, %c0_i32_0 : i32, i32, i32
  }
}

module attributes {stable_mosaic.version = 11 : i64} {
  func.func @kernel(%arg0: i32, %arg1: memref<1x64x72xbf16, #tpu.memory_space<vmem>>, %arg2: memref<72x8xbf16, #tpu.memory_space<vmem>>, %arg3: memref<72x8xbf16, #tpu.memory_space<vmem>>, %arg4: memref<9x64x1xf32, #tpu.memory_space<vmem>>, %arg5: memref<1x64x8xbf16, #tpu.memory_space<vmem>>, %arg6: memref<82x8xbf16, #tpu.memory_space<vmem>>) attributes {dimension_semantics = [#tpu.dimension_semantics<parallel>], iteration_bounds = array<i64: 2>, scalar_prefetch = 0 : i64, scratch_operands = 1 : i64, tpu.core_type = #tpu.core_type<tc>, window_params = [{transform_indices = @transform_0, window_bounds = array<i64: 1, 64, 72>}, {pipeline_mode = #tpu.pipeline_mode<synchronous>, transform_indices = @transform_1, window_bounds = array<i64: 72, 8>}, {pipeline_mode = #tpu.pipeline_mode<synchronous>, transform_indices = @transform_2, window_bounds = array<i64: 72, 8>}, {pipeline_mode = #tpu.pipeline_mode<synchronous>, transform_indices = @transform_3, window_bounds = array<i64: 9, 64, 1>}, {transform_indices = @transform_4, window_bounds = array<i64: 1, 64, 8>}]} {
    %c0 = arith.constant 0 : index
    %c0_0 = arith.constant 0 : index
    %c0_1 = arith.constant 0 : index
    %0 = vector.load %arg1[%c0, %c0_0, %c0_1] : memref<1x64x72xbf16, #tpu.memory_space<vmem>>, vector<1x64x72xbf16>
    %1 = vector.shape_cast %0 : vector<1x64x72xbf16> to vector<64x72xbf16>
    %c0_2 = arith.constant 0 : index
    %c0_3 = arith.constant 0 : index
    %2 = vector.load %arg2[%c0_2, %c0_3] : memref<72x8xbf16, #tpu.memory_space<vmem>>, vector<72x8xbf16>
    %cst = arith.constant dense<0.000000e+00> : vector<64x8xf32>
    %3 = tpu.matmul %1, %2, %cst {dimension_numbers = #tpu.dot_dimension_numbers<[1], [0], [0], [1], [0, 0, 1, 1], [], []>} : vector<64x72xbf16>, vector<72x8xbf16>, vector<64x8xf32> -> vector<64x8xf32>
    %cst_4 = arith.constant 0.000000e+00 : f32
    %4 = vector.broadcast %cst_4 : f32 to vector<64x8xf32>
    %5 = arith.maximumf %3, %4 : vector<64x8xf32>
    %c0_5 = arith.constant 0 : index
    %c0_6 = arith.constant 0 : index
    %c32 = arith.constant 32 : index
    %6 = vector.load %arg1[%c0_5, %c0_6, %c32] : memref<1x64x72xbf16, #tpu.memory_space<vmem>>, vector<1x64x8xbf16>
    %7 = vector.shape_cast %6 : vector<1x64x8xbf16> to vector<64x8xbf16>
    %8 = arith.extf %7 : vector<64x8xbf16> to vector<64x8xf32>
    %cst_7 = arith.constant 0.000000e+00 : bf16
    %9 = vector.broadcast %cst_7 : bf16 to vector<82x8xbf16>
    %c0_8 = arith.constant 0 : index
    %c0_9 = arith.constant 0 : index
    %10 = vector.load %arg6[%c0_8, %c0_9] : memref<82x8xbf16, #tpu.memory_space<vmem>>, vector<82x8xbf16>
    tpu.vector_store %arg6[%c0_8, %c0_9], %9 {strides = array<i32>} : memref<82x8xbf16, #tpu.memory_space<vmem>>, vector<82x8xbf16>,
    %11 = arith.truncf %5 : vector<64x8xf32> to vector<64x8xbf16>
    %c9 = arith.constant 9 : index
    %c0_10 = arith.constant 0 : index
    %12 = vector.load %arg6[%c9, %c0_10] : memref<82x8xbf16, #tpu.memory_space<vmem>>, vector<64x8xbf16>
    tpu.vector_store %arg6[%c9, %c0_10], %11 {strides = array<i32>} : memref<82x8xbf16, #tpu.memory_space<vmem>>, vector<64x8xbf16>,
    %c0_11 = arith.constant 0 : index
    %c0_12 = arith.constant 0 : index
    %13 = vector.load %arg6[%c0_11, %c0_12] : memref<82x8xbf16, #tpu.memory_space<vmem>>, vector<64x8xbf16>
    %c0_13 = arith.constant 0 : index
    %c0_14 = arith.constant 0 : index
    %c0_15 = arith.constant 0 : index
    %14 = vector.load %arg4[%c0_13, %c0_14, %c0_15] : memref<9x64x1xf32, #tpu.memory_space<vmem>>, vector<1x64x1xf32>
    %15 = vector.shape_cast %14 : vector<1x64x1xf32> to vector<64x1xf32>
    %16 = arith.truncf %15 : vector<64x1xf32> to vector<64x1xbf16>
    %17 = vector.broadcast %16 : vector<64x1xbf16> to vector<64x8xbf16>
    %18 = arith.mulf %13, %17 : vector<64x8xbf16>
    %c0_16 = arith.constant 0 : index
    %c0_17 = arith.constant 0 : index
    %19 = vector.load %arg3[%c0_16, %c0_17] : memref<72x8xbf16, #tpu.memory_space<vmem>>, vector<8x8xbf16>
    %cst_18 = arith.constant dense<0.000000e+00> : vector<64x8xf32>
    %20 = tpu.matmul %18, %19, %cst_18 {dimension_numbers = #tpu.dot_dimension_numbers<[1], [0], [0], [1], [0, 0, 1, 1], [], []>} : vector<64x8xbf16>, vector<8x8xbf16>, vector<64x8xf32> -> vector<64x8xf32>
    %21 = arith.addf %8, %20 : vector<64x8xf32>
    %c1 = arith.constant 1 : index
    %c0_19 = arith.constant 0 : index
    %22 = vector.load %arg6[%c1, %c0_19] : memref<82x8xbf16, #tpu.memory_space<vmem>>, vector<64x8xbf16>
    %c1_20 = arith.constant 1 : index
    %c0_21 = arith.constant 0 : index
    %c0_22 = arith.constant 0 : index
    %23 = vector.load %arg4[%c1_20, %c0_21, %c0_22] : memref<9x64x1xf32, #tpu.memory_space<vmem>>, vector<1x64x1xf32>
    %24 = vector.shape_cast %23 : vector<1x64x1xf32> to vector<64x1xf32>
    %25 = arith.truncf %24 : vector<64x1xf32> to vector<64x1xbf16>
    %26 = vector.broadcast %25 : vector<64x1xbf16> to vector<64x8xbf16>
    %27 = arith.mulf %22, %26 : vector<64x8xbf16>
    %c8 = arith.constant 8 : index
    %c0_23 = arith.constant 0 : index
    %28 = vector.load %arg3[%c8, %c0_23] : memref<72x8xbf16, #tpu.memory_space<vmem>>, vector<8x8xbf16>
    %cst_24 = arith.constant dense<0.000000e+00> : vector<64x8xf32>
    %29 = tpu.matmul %27, %28, %cst_24 {dimension_numbers = #tpu.dot_dimension_numbers<[1], [0], [0], [1], [0, 0, 1, 1], [], []>} : vector<64x8xbf16>, vector<8x8xbf16>, vector<64x8xf32> -> vector<64x8xf32>
    %30 = arith.addf %21, %29 : vector<64x8xf32>
    %c2 = arith.constant 2 : index
    %c0_25 = arith.constant 0 : index
    %31 = vector.load %arg6[%c2, %c0_25] : memref<82x8xbf16, #tpu.memory_space<vmem>>, vector<64x8xbf16>
    %c2_26 = arith.constant 2 : index
    %c0_27 = arith.constant 0 : index
    %c0_28 = arith.constant 0 : index
    %32 = vector.load %arg4[%c2_26, %c0_27, %c0_28] : memref<9x64x1xf32, #tpu.memory_space<vmem>>, vector<1x64x1xf32>
    %33 = vector.shape_cast %32 : vector<1x64x1xf32> to vector<64x1xf32>
    %34 = arith.truncf %33 : vector<64x1xf32> to vector<64x1xbf16>
    %35 = vector.broadcast %34 : vector<64x1xbf16> to vector<64x8xbf16>
    %36 = arith.mulf %31, %35 : vector<64x8xbf16>
    %c16 = arith.constant 16 : index
    %c0_29 = arith.constant 0 : index
    %37 = vector.load %arg3[%c16, %c0_29] : memref<72x8xbf16, #tpu.memory_space<vmem>>, vector<8x8xbf16>
    %cst_30 = arith.constant dense<0.000000e+00> : vector<64x8xf32>
    %38 = tpu.matmul %36, %37, %cst_30 {dimension_numbers = #tpu.dot_dimension_numbers<[1], [0], [0], [1], [0, 0, 1, 1], [], []>} : vector<64x8xbf16>, vector<8x8xbf16>, vector<64x8xf32> -> vector<64x8xf32>
    %39 = arith.addf %30, %38 : vector<64x8xf32>
    %c8_31 = arith.constant 8 : index
    %c0_32 = arith.constant 0 : index
    %40 = vector.load %arg6[%c8_31, %c0_32] : memref<82x8xbf16, #tpu.memory_space<vmem>>, vector<64x8xbf16>
    %c3 = arith.constant 3 : index
    %c0_33 = arith.constant 0 : index
    %c0_34 = arith.constant 0 : index
    %41 = vector.load %arg4[%c3, %c0_33, %c0_34] : memref<9x64x1xf32, #tpu.memory_space<vmem>>, vector<1x64x1xf32>
    %42 = vector.shape_cast %41 : vector<1x64x1xf32> to vector<64x1xf32>
    %43 = arith.truncf %42 : vector<64x1xf32> to vector<64x1xbf16>
    %44 = vector.broadcast %43 : vector<64x1xbf16> to vector<64x8xbf16>
    %45 = arith.mulf %40, %44 : vector<64x8xbf16>
    %c24 = arith.constant 24 : index
    %c0_35 = arith.constant 0 : index
    %46 = vector.load %arg3[%c24, %c0_35] : memref<72x8xbf16, #tpu.memory_space<vmem>>, vector<8x8xbf16>
    %cst_36 = arith.constant dense<0.000000e+00> : vector<64x8xf32>
    %47 = tpu.matmul %45, %46, %cst_36 {dimension_numbers = #tpu.dot_dimension_numbers<[1], [0], [0], [1], [0, 0, 1, 1], [], []>} : vector<64x8xbf16>, vector<8x8xbf16>, vector<64x8xf32> -> vector<64x8xf32>
    %48 = arith.addf %39, %47 : vector<64x8xf32>
    %c9_37 = arith.constant 9 : index
    %c0_38 = arith.constant 0 : index
    %49 = vector.load %arg6[%c9_37, %c0_38] : memref<82x8xbf16, #tpu.memory_space<vmem>>, vector<64x8xbf16>
    %c32_39 = arith.constant 32 : index
    %c0_40 = arith.constant 0 : index
    %50 = vector.load %arg3[%c32_39, %c0_40] : memref<72x8xbf16, #tpu.memory_space<vmem>>, vector<8x8xbf16>
    %cst_41 = arith.constant dense<0.000000e+00> : vector<64x8xf32>
    %51 = tpu.matmul %49, %50, %cst_41 {dimension_numbers = #tpu.dot_dimension_numbers<[1], [0], [0], [1], [0, 0, 1, 1], [], []>} : vector<64x8xbf16>, vector<8x8xbf16>, vector<64x8xf32> -> vector<64x8xf32>
    %52 = arith.addf %48, %51 : vector<64x8xf32>
    %c10 = arith.constant 10 : index
    %c0_42 = arith.constant 0 : index
    %53 = vector.load %arg6[%c10, %c0_42] : memref<82x8xbf16, #tpu.memory_space<vmem>>, vector<64x8xbf16>
    %c5 = arith.constant 5 : index
    %c0_43 = arith.constant 0 : index
    %c0_44 = arith.constant 0 : index
    %54 = vector.load %arg4[%c5, %c0_43, %c0_44] : memref<9x64x1xf32, #tpu.memory_space<vmem>>, vector<1x64x1xf32>
    %55 = vector.shape_cast %54 : vector<1x64x1xf32> to vector<64x1xf32>
    %56 = arith.truncf %55 : vector<64x1xf32> to vector<64x1xbf16>
    %57 = vector.broadcast %56 : vector<64x1xbf16> to vector<64x8xbf16>
    %58 = arith.mulf %53, %57 : vector<64x8xbf16>
    %c40 = arith.constant 40 : index
    %c0_45 = arith.constant 0 : index
    %59 = vector.load %arg3[%c40, %c0_45] : memref<72x8xbf16, #tpu.memory_space<vmem>>, vector<8x8xbf16>
    %cst_46 = arith.constant dense<0.000000e+00> : vector<64x8xf32>
    %60 = tpu.matmul %58, %59, %cst_46 {dimension_numbers = #tpu.dot_dimension_numbers<[1], [0], [0], [1], [0, 0, 1, 1], [], []>} : vector<64x8xbf16>, vector<8x8xbf16>, vector<64x8xf32> -> vector<64x8xf32>
    %61 = arith.addf %52, %60 : vector<64x8xf32>
    %c16_47 = arith.constant 16 : index
    %c0_48 = arith.constant 0 : index
    %62 = vector.load %arg6[%c16_47, %c0_48] : memref<82x8xbf16, #tpu.memory_space<vmem>>, vector<64x8xbf16>
    %c6 = arith.constant 6 : index
    %c0_49 = arith.constant 0 : index
    %c0_50 = arith.constant 0 : index
    %63 = vector.load %arg4[%c6, %c0_49, %c0_50] : memref<9x64x1xf32, #tpu.memory_space<vmem>>, vector<1x64x1xf32>
    %64 = vector.shape_cast %63 : vector<1x64x1xf32> to vector<64x1xf32>
    %65 = arith.truncf %64 : vector<64x1xf32> to vector<64x1xbf16>
    %66 = vector.broadcast %65 : vector<64x1xbf16> to vector<64x8xbf16>
    %67 = arith.mulf %62, %66 : vector<64x8xbf16>
    %c48 = arith.constant 48 : index
    %c0_51 = arith.constant 0 : index
    %68 = vector.load %arg3[%c48, %c0_51] : memref<72x8xbf16, #tpu.memory_space<vmem>>, vector<8x8xbf16>
    %cst_52 = arith.constant dense<0.000000e+00> : vector<64x8xf32>
    %69 = tpu.matmul %67, %68, %cst_52 {dimension_numbers = #tpu.dot_dimension_numbers<[1], [0], [0], [1], [0, 0, 1, 1], [], []>} : vector<64x8xbf16>, vector<8x8xbf16>, vector<64x8xf32> -> vector<64x8xf32>
    %70 = arith.addf %61, %69 : vector<64x8xf32>
    %c17 = arith.constant 17 : index
    %c0_53 = arith.constant 0 : index
    %71 = vector.load %arg6[%c17, %c0_53] : memref<82x8xbf16, #tpu.memory_space<vmem>>, vector<64x8xbf16>
    %c7 = arith.constant 7 : index
    %c0_54 = arith.constant 0 : index
    %c0_55 = arith.constant 0 : index
    %72 = vector.load %arg4[%c7, %c0_54, %c0_55] : memref<9x64x1xf32, #tpu.memory_space<vmem>>, vector<1x64x1xf32>
    %73 = vector.shape_cast %72 : vector<1x64x1xf32> to vector<64x1xf32>
    %74 = arith.truncf %73 : vector<64x1xf32> to vector<64x1xbf16>
    %75 = vector.broadcast %74 : vector<64x1xbf16> to vector<64x8xbf16>
    %76 = arith.mulf %71, %75 : vector<64x8xbf16>
    %c56 = arith.constant 56 : index
    %c0_56 = arith.constant 0 : index
    %77 = vector.load %arg3[%c56, %c0_56] : memref<72x8xbf16, #tpu.memory_space<vmem>>, vector<8x8xbf16>
    %cst_57 = arith.constant dense<0.000000e+00> : vector<64x8xf32>
    %78 = tpu.matmul %76, %77, %cst_57 {dimension_numbers = #tpu.dot_dimension_numbers<[1], [0], [0], [1], [0, 0, 1, 1], [], []>} : vector<64x8xbf16>, vector<8x8xbf16>, vector<64x8xf32> -> vector<64x8xf32>
    %79 = arith.addf %70, %78 : vector<64x8xf32>
    %c18 = arith.constant 18 : index
    %c0_58 = arith.constant 0 : index
    %80 = vector.load %arg6[%c18, %c0_58] : memref<82x8xbf16, #tpu.memory_space<vmem>>, vector<64x8xbf16>
    %c8_59 = arith.constant 8 : index
    %c0_60 = arith.constant 0 : index
    %c0_61 = arith.constant 0 : index
    %81 = vector.load %arg4[%c8_59, %c0_60, %c0_61] : memref<9x64x1xf32, #tpu.memory_space<vmem>>, vector<1x64x1xf32>
    %82 = vector.shape_cast %81 : vector<1x64x1xf32> to vector<64x1xf32>
    %83 = arith.truncf %82 : vector<64x1xf32> to vector<64x1xbf16>
    %84 = vector.broadcast %83 : vector<64x1xbf16> to vector<64x8xbf16>
    %85 = arith.mulf %80, %84 : vector<64x8xbf16>
    %c64 = arith.constant 64 : index
    %c0_62 = arith.constant 0 : index
    %86 = vector.load %arg3[%c64, %c0_62] : memref<72x8xbf16, #tpu.memory_space<vmem>>, vector<8x8xbf16>
    %cst_63 = arith.constant dense<0.000000e+00> : vector<64x8xf32>
    %87 = tpu.matmul %85, %86, %cst_63 {dimension_numbers = #tpu.dot_dimension_numbers<[1], [0], [0], [1], [0, 0, 1, 1], [], []>} : vector<64x8xbf16>, vector<8x8xbf16>, vector<64x8xf32> -> vector<64x8xf32>
    %88 = arith.addf %79, %87 : vector<64x8xf32>
    %cst_64 = arith.constant 0.000000e+00 : f32
    %89 = vector.broadcast %cst_64 : f32 to vector<64x8xf32>
    %90 = arith.maximumf %88, %89 : vector<64x8xf32>
    %91 = arith.truncf %90 : vector<64x8xf32> to vector<64x8xbf16>
    %c0_65 = arith.constant 0 : index
    %c0_66 = arith.constant 0 : index
    %c0_67 = arith.constant 0 : index
    %92 = vector.load %arg5[%c0_65, %c0_66, %c0_67] : memref<1x64x8xbf16, #tpu.memory_space<vmem>>, vector<1x64x8xbf16>
    %93 = vector.shape_cast %92 : vector<1x64x8xbf16> to vector<64x8xbf16>
    %94 = vector.shape_cast %91 : vector<64x8xbf16> to vector<1x64x8xbf16>
    tpu.vector_store %arg5[%c0_65, %c0_66, %c0_67], %94 {strides = array<i32>} : memref<1x64x8xbf16, #tpu.memory_space<vmem>>, vector<1x64x8xbf16>,
    return
  }
  func.func @transform_0(%arg0: i32) -> (i32, i32, i32) {
    %c0_i32 = arith.constant 0 : i32
    %c0_i32_0 = arith.constant 0 : i32
    %c0_i32_1 = arith.constant 0 : i32
    return %arg0, %c0_i32, %c0_i32_0 : i32, i32, i32
  }
  func.func @transform_1(%arg0: i32) -> (i32, i32) {
    %c0_i32 = arith.constant 0 : i32
    %c0_i32_0 = arith.constant 0 : i32
    %c0_i32_1 = arith.constant 0 : i32
    return %c0_i32, %c0_i32_0 : i32, i32
  }
  func.func @transform_2(%arg0: i32) -> (i32, i32) {
    %c0_i32 = arith.constant 0 : i32
    %c0_i32_0 = arith.constant 0 : i32
    %c0_i32_1 = arith.constant 0 : i32
    return %c0_i32, %c0_i32_0 : i32, i32
  }
  func.func @transform_3(%arg0: i32) -> (i32, i32, i32) {
    %c0_i32 = arith.constant 0 : i32
    %c0_i32_0 = arith.constant 0 : i32
    %c0_i32_1 = arith.constant 0 : i32
    %c0_i32_2 = arith.constant 0 : i32
    return %c0_i32, %c0_i32_0, %c0_i32_1 : i32, i32, i32
  }
  func.func @transform_4(%arg0: i32) -> (i32, i32, i32) {
    %c0_i32 = arith.constant 0 : i32
    %c0_i32_0 = arith.constant 0 : i32
    %c0_i32_1 = arith.constant 0 : i32
    return %arg0, %c0_i32, %c0_i32_0 : i32, i32, i32
  }
}

module attributes {stable_mosaic.version = 11 : i64} {
  func.func @kernel(%arg0: i32, %arg1: memref<1x16x72xbf16, #tpu.memory_space<vmem>>, %arg2: memref<72x32xbf16, #tpu.memory_space<vmem>>, %arg3: memref<288x32xbf16, #tpu.memory_space<vmem>>, %arg4: memref<8x32xbf16, #tpu.memory_space<vmem>>, %arg5: memref<1x32xf32, #tpu.memory_space<vmem>>, %arg6: memref<9x16x1xf32, #tpu.memory_space<vmem>>, %arg7: memref<1x16x32xbf16, #tpu.memory_space<vmem>>, %arg8: memref<26x32xbf16, #tpu.memory_space<vmem>>) attributes {dimension_semantics = [#tpu.dimension_semantics<parallel>], iteration_bounds = array<i64: 2>, scalar_prefetch = 0 : i64, scratch_operands = 1 : i64, tpu.core_type = #tpu.core_type<tc>, window_params = [{transform_indices = @transform_0, window_bounds = array<i64: 1, 16, 72>}, {pipeline_mode = #tpu.pipeline_mode<synchronous>, transform_indices = @transform_1, window_bounds = array<i64: 72, 32>}, {pipeline_mode = #tpu.pipeline_mode<synchronous>, transform_indices = @transform_2, window_bounds = array<i64: 288, 32>}, {pipeline_mode = #tpu.pipeline_mode<synchronous>, transform_indices = @transform_3, window_bounds = array<i64: 8, 32>}, {pipeline_mode = #tpu.pipeline_mode<synchronous>, transform_indices = @transform_4, window_bounds = array<i64: 1, 32>}, {pipeline_mode = #tpu.pipeline_mode<synchronous>, transform_indices = @transform_5, window_bounds = array<i64: 9, 16, 1>}, {transform_indices = @transform_6, window_bounds = array<i64: 1, 16, 32>}]} {
    %c0 = arith.constant 0 : index
    %c0_0 = arith.constant 0 : index
    %c0_1 = arith.constant 0 : index
    %0 = vector.load %arg1[%c0, %c0_0, %c0_1] : memref<1x16x72xbf16, #tpu.memory_space<vmem>>, vector<1x16x72xbf16>
    %1 = vector.shape_cast %0 : vector<1x16x72xbf16> to vector<16x72xbf16>
    %c0_2 = arith.constant 0 : index
    %c0_3 = arith.constant 0 : index
    %2 = vector.load %arg2[%c0_2, %c0_3] : memref<72x32xbf16, #tpu.memory_space<vmem>>, vector<72x32xbf16>
    %cst = arith.constant dense<0.000000e+00> : vector<16x32xf32>
    %3 = tpu.matmul %1, %2, %cst {dimension_numbers = #tpu.dot_dimension_numbers<[1], [0], [0], [1], [0, 0, 1, 1], [], []>} : vector<16x72xbf16>, vector<72x32xbf16>, vector<16x32xf32> -> vector<16x32xf32>
    %cst_4 = arith.constant 0.000000e+00 : f32
    %4 = vector.broadcast %cst_4 : f32 to vector<16x32xf32>
    %5 = arith.maximumf %3, %4 : vector<16x32xf32>
    %c0_5 = arith.constant 0 : index
    %c0_6 = arith.constant 0 : index
    %c32 = arith.constant 32 : index
    %6 = vector.load %arg1[%c0_5, %c0_6, %c32] : memref<1x16x72xbf16, #tpu.memory_space<vmem>>, vector<1x16x8xbf16>
    %7 = vector.shape_cast %6 : vector<1x16x8xbf16> to vector<16x8xbf16>
    %c0_7 = arith.constant 0 : index
    %c0_8 = arith.constant 0 : index
    %8 = vector.load %arg4[%c0_7, %c0_8] : memref<8x32xbf16, #tpu.memory_space<vmem>>, vector<8x32xbf16>
    %cst_9 = arith.constant dense<0.000000e+00> : vector<16x32xf32>
    %9 = tpu.matmul %7, %8, %cst_9 {dimension_numbers = #tpu.dot_dimension_numbers<[1], [0], [0], [1], [0, 0, 1, 1], [], []>} : vector<16x8xbf16>, vector<8x32xbf16>, vector<16x32xf32> -> vector<16x32xf32>
    %c0_10 = arith.constant 0 : index
    %c0_11 = arith.constant 0 : index
    %10 = vector.load %arg5[%c0_10, %c0_11] : memref<1x32xf32, #tpu.memory_space<vmem>>, vector<1x32xf32>
    %11 = vector.broadcast %10 : vector<1x32xf32> to vector<16x32xf32>
    %12 = arith.addf %9, %11 : vector<16x32xf32>
    %cst_12 = arith.constant 0.000000e+00 : bf16
    %13 = vector.broadcast %cst_12 : bf16 to vector<26x32xbf16>
    %c0_13 = arith.constant 0 : index
    %c0_14 = arith.constant 0 : index
    %14 = vector.load %arg8[%c0_13, %c0_14] : memref<26x32xbf16, #tpu.memory_space<vmem>>, vector<26x32xbf16>
    tpu.vector_store %arg8[%c0_13, %c0_14], %13 {strides = array<i32>} : memref<26x32xbf16, #tpu.memory_space<vmem>>, vector<26x32xbf16>,
    %15 = arith.truncf %5 : vector<16x32xf32> to vector<16x32xbf16>
    %c5 = arith.constant 5 : index
    %c0_15 = arith.constant 0 : index
    %16 = vector.load %arg8[%c5, %c0_15] : memref<26x32xbf16, #tpu.memory_space<vmem>>, vector<16x32xbf16>
    tpu.vector_store %arg8[%c5, %c0_15], %15 {strides = array<i32>} : memref<26x32xbf16, #tpu.memory_space<vmem>>, vector<16x32xbf16>,
    %c0_16 = arith.constant 0 : index
    %c0_17 = arith.constant 0 : index
    %17 = vector.load %arg8[%c0_16, %c0_17] : memref<26x32xbf16, #tpu.memory_space<vmem>>, vector<16x32xbf16>
    %c0_18 = arith.constant 0 : index
    %c0_19 = arith.constant 0 : index
    %c0_20 = arith.constant 0 : index
    %18 = vector.load %arg6[%c0_18, %c0_19, %c0_20] : memref<9x16x1xf32, #tpu.memory_space<vmem>>, vector<1x16x1xf32>
    %19 = vector.shape_cast %18 : vector<1x16x1xf32> to vector<16x1xf32>
    %20 = arith.truncf %19 : vector<16x1xf32> to vector<16x1xbf16>
    %21 = vector.broadcast %20 : vector<16x1xbf16> to vector<16x32xbf16>
    %22 = arith.mulf %17, %21 : vector<16x32xbf16>
    %c0_21 = arith.constant 0 : index
    %c0_22 = arith.constant 0 : index
    %23 = vector.load %arg3[%c0_21, %c0_22] : memref<288x32xbf16, #tpu.memory_space<vmem>>, vector<32x32xbf16>
    %cst_23 = arith.constant dense<0.000000e+00> : vector<16x32xf32>
    %24 = tpu.matmul %22, %23, %cst_23 {dimension_numbers = #tpu.dot_dimension_numbers<[1], [0], [0], [1], [0, 0, 1, 1], [], []>} : vector<16x32xbf16>, vector<32x32xbf16>, vector<16x32xf32> -> vector<16x32xf32>
    %25 = arith.addf %12, %24 : vector<16x32xf32>
    %c1 = arith.constant 1 : index
    %c0_24 = arith.constant 0 : index
    %26 = vector.load %arg8[%c1, %c0_24] : memref<26x32xbf16, #tpu.memory_space<vmem>>, vector<16x32xbf16>
    %c1_25 = arith.constant 1 : index
    %c0_26 = arith.constant 0 : index
    %c0_27 = arith.constant 0 : index
    %27 = vector.load %arg6[%c1_25, %c0_26, %c0_27] : memref<9x16x1xf32, #tpu.memory_space<vmem>>, vector<1x16x1xf32>
    %28 = vector.shape_cast %27 : vector<1x16x1xf32> to vector<16x1xf32>
    %29 = arith.truncf %28 : vector<16x1xf32> to vector<16x1xbf16>
    %30 = vector.broadcast %29 : vector<16x1xbf16> to vector<16x32xbf16>
    %31 = arith.mulf %26, %30 : vector<16x32xbf16>
    %c32_28 = arith.constant 32 : index
    %c0_29 = arith.constant 0 : index
    %32 = vector.load %arg3[%c32_28, %c0_29] : memref<288x32xbf16, #tpu.memory_space<vmem>>, vector<32x32xbf16>
    %cst_30 = arith.constant dense<0.000000e+00> : vector<16x32xf32>
    %33 = tpu.matmul %31, %32, %cst_30 {dimension_numbers = #tpu.dot_dimension_numbers<[1], [0], [0], [1], [0, 0, 1, 1], [], []>} : vector<16x32xbf16>, vector<32x32xbf16>, vector<16x32xf32> -> vector<16x32xf32>
    %34 = arith.addf %25, %33 : vector<16x32xf32>
    %c2 = arith.constant 2 : index
    %c0_31 = arith.constant 0 : index
    %35 = vector.load %arg8[%c2, %c0_31] : memref<26x32xbf16, #tpu.memory_space<vmem>>, vector<16x32xbf16>
    %c2_32 = arith.constant 2 : index
    %c0_33 = arith.constant 0 : index
    %c0_34 = arith.constant 0 : index
    %36 = vector.load %arg6[%c2_32, %c0_33, %c0_34] : memref<9x16x1xf32, #tpu.memory_space<vmem>>, vector<1x16x1xf32>
    %37 = vector.shape_cast %36 : vector<1x16x1xf32> to vector<16x1xf32>
    %38 = arith.truncf %37 : vector<16x1xf32> to vector<16x1xbf16>
    %39 = vector.broadcast %38 : vector<16x1xbf16> to vector<16x32xbf16>
    %40 = arith.mulf %35, %39 : vector<16x32xbf16>
    %c64 = arith.constant 64 : index
    %c0_35 = arith.constant 0 : index
    %41 = vector.load %arg3[%c64, %c0_35] : memref<288x32xbf16, #tpu.memory_space<vmem>>, vector<32x32xbf16>
    %cst_36 = arith.constant dense<0.000000e+00> : vector<16x32xf32>
    %42 = tpu.matmul %40, %41, %cst_36 {dimension_numbers = #tpu.dot_dimension_numbers<[1], [0], [0], [1], [0, 0, 1, 1], [], []>} : vector<16x32xbf16>, vector<32x32xbf16>, vector<16x32xf32> -> vector<16x32xf32>
    %43 = arith.addf %34, %42 : vector<16x32xf32>
    %c4 = arith.constant 4 : index
    %c0_37 = arith.constant 0 : index
    %44 = vector.load %arg8[%c4, %c0_37] : memref<26x32xbf16, #tpu.memory_space<vmem>>, vector<16x32xbf16>
    %c3 = arith.constant 3 : index
    %c0_38 = arith.constant 0 : index
    %c0_39 = arith.constant 0 : index
    %45 = vector.load %arg6[%c3, %c0_38, %c0_39] : memref<9x16x1xf32, #tpu.memory_space<vmem>>, vector<1x16x1xf32>
    %46 = vector.shape_cast %45 : vector<1x16x1xf32> to vector<16x1xf32>
    %47 = arith.truncf %46 : vector<16x1xf32> to vector<16x1xbf16>
    %48 = vector.broadcast %47 : vector<16x1xbf16> to vector<16x32xbf16>
    %49 = arith.mulf %44, %48 : vector<16x32xbf16>
    %c96 = arith.constant 96 : index
    %c0_40 = arith.constant 0 : index
    %50 = vector.load %arg3[%c96, %c0_40] : memref<288x32xbf16, #tpu.memory_space<vmem>>, vector<32x32xbf16>
    %cst_41 = arith.constant dense<0.000000e+00> : vector<16x32xf32>
    %51 = tpu.matmul %49, %50, %cst_41 {dimension_numbers = #tpu.dot_dimension_numbers<[1], [0], [0], [1], [0, 0, 1, 1], [], []>} : vector<16x32xbf16>, vector<32x32xbf16>, vector<16x32xf32> -> vector<16x32xf32>
    %52 = arith.addf %43, %51 : vector<16x32xf32>
    %c5_42 = arith.constant 5 : index
    %c0_43 = arith.constant 0 : index
    %53 = vector.load %arg8[%c5_42, %c0_43] : memref<26x32xbf16, #tpu.memory_space<vmem>>, vector<16x32xbf16>
    %c128 = arith.constant 128 : index
    %c0_44 = arith.constant 0 : index
    %54 = vector.load %arg3[%c128, %c0_44] : memref<288x32xbf16, #tpu.memory_space<vmem>>, vector<32x32xbf16>
    %cst_45 = arith.constant dense<0.000000e+00> : vector<16x32xf32>
    %55 = tpu.matmul %53, %54, %cst_45 {dimension_numbers = #tpu.dot_dimension_numbers<[1], [0], [0], [1], [0, 0, 1, 1], [], []>} : vector<16x32xbf16>, vector<32x32xbf16>, vector<16x32xf32> -> vector<16x32xf32>
    %56 = arith.addf %52, %55 : vector<16x32xf32>
    %c6 = arith.constant 6 : index
    %c0_46 = arith.constant 0 : index
    %57 = vector.load %arg8[%c6, %c0_46] : memref<26x32xbf16, #tpu.memory_space<vmem>>, vector<16x32xbf16>
    %c5_47 = arith.constant 5 : index
    %c0_48 = arith.constant 0 : index
    %c0_49 = arith.constant 0 : index
    %58 = vector.load %arg6[%c5_47, %c0_48, %c0_49] : memref<9x16x1xf32, #tpu.memory_space<vmem>>, vector<1x16x1xf32>
    %59 = vector.shape_cast %58 : vector<1x16x1xf32> to vector<16x1xf32>
    %60 = arith.truncf %59 : vector<16x1xf32> to vector<16x1xbf16>
    %61 = vector.broadcast %60 : vector<16x1xbf16> to vector<16x32xbf16>
    %62 = arith.mulf %57, %61 : vector<16x32xbf16>
    %c160 = arith.constant 160 : index
    %c0_50 = arith.constant 0 : index
    %63 = vector.load %arg3[%c160, %c0_50] : memref<288x32xbf16, #tpu.memory_space<vmem>>, vector<32x32xbf16>
    %cst_51 = arith.constant dense<0.000000e+00> : vector<16x32xf32>
    %64 = tpu.matmul %62, %63, %cst_51 {dimension_numbers = #tpu.dot_dimension_numbers<[1], [0], [0], [1], [0, 0, 1, 1], [], []>} : vector<16x32xbf16>, vector<32x32xbf16>, vector<16x32xf32> -> vector<16x32xf32>
    %65 = arith.addf %56, %64 : vector<16x32xf32>
    %c8 = arith.constant 8 : index
    %c0_52 = arith.constant 0 : index
    %66 = vector.load %arg8[%c8, %c0_52] : memref<26x32xbf16, #tpu.memory_space<vmem>>, vector<16x32xbf16>
    %c6_53 = arith.constant 6 : index
    %c0_54 = arith.constant 0 : index
    %c0_55 = arith.constant 0 : index
    %67 = vector.load %arg6[%c6_53, %c0_54, %c0_55] : memref<9x16x1xf32, #tpu.memory_space<vmem>>, vector<1x16x1xf32>
    %68 = vector.shape_cast %67 : vector<1x16x1xf32> to vector<16x1xf32>
    %69 = arith.truncf %68 : vector<16x1xf32> to vector<16x1xbf16>
    %70 = vector.broadcast %69 : vector<16x1xbf16> to vector<16x32xbf16>
    %71 = arith.mulf %66, %70 : vector<16x32xbf16>
    %c192 = arith.constant 192 : index
    %c0_56 = arith.constant 0 : index
    %72 = vector.load %arg3[%c192, %c0_56] : memref<288x32xbf16, #tpu.memory_space<vmem>>, vector<32x32xbf16>
    %cst_57 = arith.constant dense<0.000000e+00> : vector<16x32xf32>
    %73 = tpu.matmul %71, %72, %cst_57 {dimension_numbers = #tpu.dot_dimension_numbers<[1], [0], [0], [1], [0, 0, 1, 1], [], []>} : vector<16x32xbf16>, vector<32x32xbf16>, vector<16x32xf32> -> vector<16x32xf32>
    %74 = arith.addf %65, %73 : vector<16x32xf32>
    %c9 = arith.constant 9 : index
    %c0_58 = arith.constant 0 : index
    %75 = vector.load %arg8[%c9, %c0_58] : memref<26x32xbf16, #tpu.memory_space<vmem>>, vector<16x32xbf16>
    %c7 = arith.constant 7 : index
    %c0_59 = arith.constant 0 : index
    %c0_60 = arith.constant 0 : index
    %76 = vector.load %arg6[%c7, %c0_59, %c0_60] : memref<9x16x1xf32, #tpu.memory_space<vmem>>, vector<1x16x1xf32>
    %77 = vector.shape_cast %76 : vector<1x16x1xf32> to vector<16x1xf32>
    %78 = arith.truncf %77 : vector<16x1xf32> to vector<16x1xbf16>
    %79 = vector.broadcast %78 : vector<16x1xbf16> to vector<16x32xbf16>
    %80 = arith.mulf %75, %79 : vector<16x32xbf16>
    %c224 = arith.constant 224 : index
    %c0_61 = arith.constant 0 : index
    %81 = vector.load %arg3[%c224, %c0_61] : memref<288x32xbf16, #tpu.memory_space<vmem>>, vector<32x32xbf16>
    %cst_62 = arith.constant dense<0.000000e+00> : vector<16x32xf32>
    %82 = tpu.matmul %80, %81, %cst_62 {dimension_numbers = #tpu.dot_dimension_numbers<[1], [0], [0], [1], [0, 0, 1, 1], [], []>} : vector<16x32xbf16>, vector<32x32xbf16>, vector<16x32xf32> -> vector<16x32xf32>
    %83 = arith.addf %74, %82 : vector<16x32xf32>
    %c10 = arith.constant 10 : index
    %c0_63 = arith.constant 0 : index
    %84 = vector.load %arg8[%c10, %c0_63] : memref<26x32xbf16, #tpu.memory_space<vmem>>, vector<16x32xbf16>
    %c8_64 = arith.constant 8 : index
    %c0_65 = arith.constant 0 : index
    %c0_66 = arith.constant 0 : index
    %85 = vector.load %arg6[%c8_64, %c0_65, %c0_66] : memref<9x16x1xf32, #tpu.memory_space<vmem>>, vector<1x16x1xf32>
    %86 = vector.shape_cast %85 : vector<1x16x1xf32> to vector<16x1xf32>
    %87 = arith.truncf %86 : vector<16x1xf32> to vector<16x1xbf16>
    %88 = vector.broadcast %87 : vector<16x1xbf16> to vector<16x32xbf16>
    %89 = arith.mulf %84, %88 : vector<16x32xbf16>
    %c256 = arith.constant 256 : index
    %c0_67 = arith.constant 0 : index
    %90 = vector.load %arg3[%c256, %c0_67] : memref<288x32xbf16, #tpu.memory_space<vmem>>, vector<32x32xbf16>
    %cst_68 = arith.constant dense<0.000000e+00> : vector<16x32xf32>
    %91 = tpu.matmul %89, %90, %cst_68 {dimension_numbers = #tpu.dot_dimension_numbers<[1], [0], [0], [1], [0, 0, 1, 1], [], []>} : vector<16x32xbf16>, vector<32x32xbf16>, vector<16x32xf32> -> vector<16x32xf32>
    %92 = arith.addf %83, %91 : vector<16x32xf32>
    %cst_69 = arith.constant 0.000000e+00 : f32
    %93 = vector.broadcast %cst_69 : f32 to vector<16x32xf32>
    %94 = arith.maximumf %92, %93 : vector<16x32xf32>
    %95 = arith.truncf %94 : vector<16x32xf32> to vector<16x32xbf16>
    %c0_70 = arith.constant 0 : index
    %c0_71 = arith.constant 0 : index
    %c0_72 = arith.constant 0 : index
    %96 = vector.load %arg7[%c0_70, %c0_71, %c0_72] : memref<1x16x32xbf16, #tpu.memory_space<vmem>>, vector<1x16x32xbf16>
    %97 = vector.shape_cast %96 : vector<1x16x32xbf16> to vector<16x32xbf16>
    %98 = vector.shape_cast %95 : vector<16x32xbf16> to vector<1x16x32xbf16>
    tpu.vector_store %arg7[%c0_70, %c0_71, %c0_72], %98 {strides = array<i32>} : memref<1x16x32xbf16, #tpu.memory_space<vmem>>, vector<1x16x32xbf16>,
    return
  }
  func.func @transform_0(%arg0: i32) -> (i32, i32, i32) {
    %c0_i32 = arith.constant 0 : i32
    %c0_i32_0 = arith.constant 0 : i32
    %c0_i32_1 = arith.constant 0 : i32
    return %arg0, %c0_i32, %c0_i32_0 : i32, i32, i32
  }
  func.func @transform_1(%arg0: i32) -> (i32, i32) {
    %c0_i32 = arith.constant 0 : i32
    %c0_i32_0 = arith.constant 0 : i32
    %c0_i32_1 = arith.constant 0 : i32
    return %c0_i32, %c0_i32_0 : i32, i32
  }
  func.func @transform_2(%arg0: i32) -> (i32, i32) {
    %c0_i32 = arith.constant 0 : i32
    %c0_i32_0 = arith.constant 0 : i32
    %c0_i32_1 = arith.constant 0 : i32
    return %c0_i32, %c0_i32_0 : i32, i32
  }
  func.func @transform_3(%arg0: i32) -> (i32, i32) {
    %c0_i32 = arith.constant 0 : i32
    %c0_i32_0 = arith.constant 0 : i32
    %c0_i32_1 = arith.constant 0 : i32
    return %c0_i32, %c0_i32_0 : i32, i32
  }
  func.func @transform_4(%arg0: i32) -> (i32, i32) {
    %c0_i32 = arith.constant 0 : i32
    %c0_i32_0 = arith.constant 0 : i32
    %c0_i32_1 = arith.constant 0 : i32
    return %c0_i32, %c0_i32_0 : i32, i32
  }
  func.func @transform_5(%arg0: i32) -> (i32, i32, i32) {
    %c0_i32 = arith.constant 0 : i32
    %c0_i32_0 = arith.constant 0 : i32
    %c0_i32_1 = arith.constant 0 : i32
    %c0_i32_2 = arith.constant 0 : i32
    return %c0_i32, %c0_i32_0, %c0_i32_1 : i32, i32, i32
  }
  func.func @transform_6(%arg0: i32) -> (i32, i32, i32) {
    %c0_i32 = arith.constant 0 : i32
    %c0_i32_0 = arith.constant 0 : i32
    %c0_i32_1 = arith.constant 0 : i32
    return %arg0, %c0_i32, %c0_i32_0 : i32, i32, i32
  }
}

module attributes {stable_mosaic.version = 11 : i64} {
  func.func @kernel(%arg0: i32, %arg1: memref<1x4x288xbf16, #tpu.memory_space<vmem>>, %arg2: memref<288x128xbf16, #tpu.memory_space<vmem>>, %arg3: memref<1152x128xbf16, #tpu.memory_space<vmem>>, %arg4: memref<32x128xbf16, #tpu.memory_space<vmem>>, %arg5: memref<1x128xf32, #tpu.memory_space<vmem>>, %arg6: memref<9x4x1xf32, #tpu.memory_space<vmem>>, %arg7: memref<1x4x128xbf16, #tpu.memory_space<vmem>>, %arg8: memref<10x128xbf16, #tpu.memory_space<vmem>>) attributes {dimension_semantics = [#tpu.dimension_semantics<parallel>], iteration_bounds = array<i64: 2>, scalar_prefetch = 0 : i64, scratch_operands = 1 : i64, tpu.core_type = #tpu.core_type<tc>, window_params = [{transform_indices = @transform_0, window_bounds = array<i64: 1, 4, 288>}, {pipeline_mode = #tpu.pipeline_mode<synchronous>, transform_indices = @transform_1, window_bounds = array<i64: 288, 128>}, {pipeline_mode = #tpu.pipeline_mode<synchronous>, transform_indices = @transform_2, window_bounds = array<i64: 1152, 128>}, {pipeline_mode = #tpu.pipeline_mode<synchronous>, transform_indices = @transform_3, window_bounds = array<i64: 32, 128>}, {pipeline_mode = #tpu.pipeline_mode<synchronous>, transform_indices = @transform_4, window_bounds = array<i64: 1, 128>}, {pipeline_mode = #tpu.pipeline_mode<synchronous>, transform_indices = @transform_5, window_bounds = array<i64: 9, 4, 1>}, {transform_indices = @transform_6, window_bounds = array<i64: 1, 4, 128>}]} {
    %c0 = arith.constant 0 : index
    %c0_0 = arith.constant 0 : index
    %c0_1 = arith.constant 0 : index
    %0 = vector.load %arg1[%c0, %c0_0, %c0_1] : memref<1x4x288xbf16, #tpu.memory_space<vmem>>, vector<1x4x288xbf16>
    %1 = vector.shape_cast %0 : vector<1x4x288xbf16> to vector<4x288xbf16>
    %c0_2 = arith.constant 0 : index
    %c0_3 = arith.constant 0 : index
    %2 = vector.load %arg2[%c0_2, %c0_3] : memref<288x128xbf16, #tpu.memory_space<vmem>>, vector<288x128xbf16>
    %cst = arith.constant dense<0.000000e+00> : vector<4x128xf32>
    %3 = tpu.matmul %1, %2, %cst {dimension_numbers = #tpu.dot_dimension_numbers<[1], [0], [0], [1], [0, 0, 1, 1], [], []>} : vector<4x288xbf16>, vector<288x128xbf16>, vector<4x128xf32> -> vector<4x128xf32>
    %cst_4 = arith.constant 0.000000e+00 : f32
    %4 = vector.broadcast %cst_4 : f32 to vector<4x128xf32>
    %5 = arith.maximumf %3, %4 : vector<4x128xf32>
    %c0_5 = arith.constant 0 : index
    %c0_6 = arith.constant 0 : index
    %c128 = arith.constant 128 : index
    %6 = vector.load %arg1[%c0_5, %c0_6, %c128] : memref<1x4x288xbf16, #tpu.memory_space<vmem>>, vector<1x4x32xbf16>
    %7 = vector.shape_cast %6 : vector<1x4x32xbf16> to vector<4x32xbf16>
    %c0_7 = arith.constant 0 : index
    %c0_8 = arith.constant 0 : index
    %8 = vector.load %arg4[%c0_7, %c0_8] : memref<32x128xbf16, #tpu.memory_space<vmem>>, vector<32x128xbf16>
    %cst_9 = arith.constant dense<0.000000e+00> : vector<4x128xf32>
    %9 = tpu.matmul %7, %8, %cst_9 {dimension_numbers = #tpu.dot_dimension_numbers<[1], [0], [0], [1], [0, 0, 1, 1], [], []>} : vector<4x32xbf16>, vector<32x128xbf16>, vector<4x128xf32> -> vector<4x128xf32>
    %c0_10 = arith.constant 0 : index
    %c0_11 = arith.constant 0 : index
    %10 = vector.load %arg5[%c0_10, %c0_11] : memref<1x128xf32, #tpu.memory_space<vmem>>, vector<1x128xf32>
    %11 = vector.broadcast %10 : vector<1x128xf32> to vector<4x128xf32>
    %12 = arith.addf %9, %11 : vector<4x128xf32>
    %cst_12 = arith.constant 0.000000e+00 : bf16
    %13 = vector.broadcast %cst_12 : bf16 to vector<10x128xbf16>
    %c0_13 = arith.constant 0 : index
    %c0_14 = arith.constant 0 : index
    %14 = vector.load %arg8[%c0_13, %c0_14] : memref<10x128xbf16, #tpu.memory_space<vmem>>, vector<10x128xbf16>
    tpu.vector_store %arg8[%c0_13, %c0_14], %13 {strides = array<i32>} : memref<10x128xbf16, #tpu.memory_space<vmem>>, vector<10x128xbf16>,
    %15 = arith.truncf %5 : vector<4x128xf32> to vector<4x128xbf16>
    %c3 = arith.constant 3 : index
    %c0_15 = arith.constant 0 : index
    %16 = vector.load %arg8[%c3, %c0_15] : memref<10x128xbf16, #tpu.memory_space<vmem>>, vector<4x128xbf16>
    tpu.vector_store %arg8[%c3, %c0_15], %15 {strides = array<i32>} : memref<10x128xbf16, #tpu.memory_space<vmem>>, vector<4x128xbf16>,
    %c0_16 = arith.constant 0 : index
    %c0_17 = arith.constant 0 : index
    %17 = vector.load %arg8[%c0_16, %c0_17] : memref<10x128xbf16, #tpu.memory_space<vmem>>, vector<4x128xbf16>
    %c0_18 = arith.constant 0 : index
    %c0_19 = arith.constant 0 : index
    %c0_20 = arith.constant 0 : index
    %18 = vector.load %arg6[%c0_18, %c0_19, %c0_20] : memref<9x4x1xf32, #tpu.memory_space<vmem>>, vector<1x4x1xf32>
    %19 = vector.shape_cast %18 : vector<1x4x1xf32> to vector<4x1xf32>
    %20 = arith.truncf %19 : vector<4x1xf32> to vector<4x1xbf16>
    %21 = vector.broadcast %20 : vector<4x1xbf16> to vector<4x128xbf16>
    %22 = arith.mulf %17, %21 : vector<4x128xbf16>
    %c0_21 = arith.constant 0 : index
    %c0_22 = arith.constant 0 : index
    %23 = vector.load %arg3[%c0_21, %c0_22] : memref<1152x128xbf16, #tpu.memory_space<vmem>>, vector<128x128xbf16>
    %cst_23 = arith.constant dense<0.000000e+00> : vector<4x128xf32>
    %24 = tpu.matmul %22, %23, %cst_23 {dimension_numbers = #tpu.dot_dimension_numbers<[1], [0], [0], [1], [0, 0, 1, 1], [], []>} : vector<4x128xbf16>, vector<128x128xbf16>, vector<4x128xf32> -> vector<4x128xf32>
    %25 = arith.addf %12, %24 : vector<4x128xf32>
    %c1 = arith.constant 1 : index
    %c0_24 = arith.constant 0 : index
    %26 = vector.load %arg8[%c1, %c0_24] : memref<10x128xbf16, #tpu.memory_space<vmem>>, vector<4x128xbf16>
    %c1_25 = arith.constant 1 : index
    %c0_26 = arith.constant 0 : index
    %c0_27 = arith.constant 0 : index
    %27 = vector.load %arg6[%c1_25, %c0_26, %c0_27] : memref<9x4x1xf32, #tpu.memory_space<vmem>>, vector<1x4x1xf32>
    %28 = vector.shape_cast %27 : vector<1x4x1xf32> to vector<4x1xf32>
    %29 = arith.truncf %28 : vector<4x1xf32> to vector<4x1xbf16>
    %30 = vector.broadcast %29 : vector<4x1xbf16> to vector<4x128xbf16>
    %31 = arith.mulf %26, %30 : vector<4x128xbf16>
    %c128_28 = arith.constant 128 : index
    %c0_29 = arith.constant 0 : index
    %32 = vector.load %arg3[%c128_28, %c0_29] : memref<1152x128xbf16, #tpu.memory_space<vmem>>, vector<128x128xbf16>
    %cst_30 = arith.constant dense<0.000000e+00> : vector<4x128xf32>
    %33 = tpu.matmul %31, %32, %cst_30 {dimension_numbers = #tpu.dot_dimension_numbers<[1], [0], [0], [1], [0, 0, 1, 1], [], []>} : vector<4x128xbf16>, vector<128x128xbf16>, vector<4x128xf32> -> vector<4x128xf32>
    %34 = arith.addf %25, %33 : vector<4x128xf32>
    %c2 = arith.constant 2 : index
    %c0_31 = arith.constant 0 : index
    %35 = vector.load %arg8[%c2, %c0_31] : memref<10x128xbf16, #tpu.memory_space<vmem>>, vector<4x128xbf16>
    %c2_32 = arith.constant 2 : index
    %c0_33 = arith.constant 0 : index
    %c0_34 = arith.constant 0 : index
    %36 = vector.load %arg6[%c2_32, %c0_33, %c0_34] : memref<9x4x1xf32, #tpu.memory_space<vmem>>, vector<1x4x1xf32>
    %37 = vector.shape_cast %36 : vector<1x4x1xf32> to vector<4x1xf32>
    %38 = arith.truncf %37 : vector<4x1xf32> to vector<4x1xbf16>
    %39 = vector.broadcast %38 : vector<4x1xbf16> to vector<4x128xbf16>
    %40 = arith.mulf %35, %39 : vector<4x128xbf16>
    %c256 = arith.constant 256 : index
    %c0_35 = arith.constant 0 : index
    %41 = vector.load %arg3[%c256, %c0_35] : memref<1152x128xbf16, #tpu.memory_space<vmem>>, vector<128x128xbf16>
    %cst_36 = arith.constant dense<0.000000e+00> : vector<4x128xf32>
    %42 = tpu.matmul %40, %41, %cst_36 {dimension_numbers = #tpu.dot_dimension_numbers<[1], [0], [0], [1], [0, 0, 1, 1], [], []>} : vector<4x128xbf16>, vector<128x128xbf16>, vector<4x128xf32> -> vector<4x128xf32>
    %43 = arith.addf %34, %42 : vector<4x128xf32>
    %c2_37 = arith.constant 2 : index
    %c0_38 = arith.constant 0 : index
    %44 = vector.load %arg8[%c2_37, %c0_38] : memref<10x128xbf16, #tpu.memory_space<vmem>>, vector<4x128xbf16>
    %c3_39 = arith.constant 3 : index
    %c0_40 = arith.constant 0 : index
    %c0_41 = arith.constant 0 : index
    %45 = vector.load %arg6[%c3_39, %c0_40, %c0_41] : memref<9x4x1xf32, #tpu.memory_space<vmem>>, vector<1x4x1xf32>
    %46 = vector.shape_cast %45 : vector<1x4x1xf32> to vector<4x1xf32>
    %47 = arith.truncf %46 : vector<4x1xf32> to vector<4x1xbf16>
    %48 = vector.broadcast %47 : vector<4x1xbf16> to vector<4x128xbf16>
    %49 = arith.mulf %44, %48 : vector<4x128xbf16>
    %c384 = arith.constant 384 : index
    %c0_42 = arith.constant 0 : index
    %50 = vector.load %arg3[%c384, %c0_42] : memref<1152x128xbf16, #tpu.memory_space<vmem>>, vector<128x128xbf16>
    %cst_43 = arith.constant dense<0.000000e+00> : vector<4x128xf32>
    %51 = tpu.matmul %49, %50, %cst_43 {dimension_numbers = #tpu.dot_dimension_numbers<[1], [0], [0], [1], [0, 0, 1, 1], [], []>} : vector<4x128xbf16>, vector<128x128xbf16>, vector<4x128xf32> -> vector<4x128xf32>
    %52 = arith.addf %43, %51 : vector<4x128xf32>
    %c3_44 = arith.constant 3 : index
    %c0_45 = arith.constant 0 : index
    %53 = vector.load %arg8[%c3_44, %c0_45] : memref<10x128xbf16, #tpu.memory_space<vmem>>, vector<4x128xbf16>
    %c512 = arith.constant 512 : index
    %c0_46 = arith.constant 0 : index
    %54 = vector.load %arg3[%c512, %c0_46] : memref<1152x128xbf16, #tpu.memory_space<vmem>>, vector<128x128xbf16>
    %cst_47 = arith.constant dense<0.000000e+00> : vector<4x128xf32>
    %55 = tpu.matmul %53, %54, %cst_47 {dimension_numbers = #tpu.dot_dimension_numbers<[1], [0], [0], [1], [0, 0, 1, 1], [], []>} : vector<4x128xbf16>, vector<128x128xbf16>, vector<4x128xf32> -> vector<4x128xf32>
    %56 = arith.addf %52, %55 : vector<4x128xf32>
    %c4 = arith.constant 4 : index
    %c0_48 = arith.constant 0 : index
    %57 = vector.load %arg8[%c4, %c0_48] : memref<10x128xbf16, #tpu.memory_space<vmem>>, vector<4x128xbf16>
    %c5 = arith.constant 5 : index
    %c0_49 = arith.constant 0 : index
    %c0_50 = arith.constant 0 : index
    %58 = vector.load %arg6[%c5, %c0_49, %c0_50] : memref<9x4x1xf32, #tpu.memory_space<vmem>>, vector<1x4x1xf32>
    %59 = vector.shape_cast %58 : vector<1x4x1xf32> to vector<4x1xf32>
    %60 = arith.truncf %59 : vector<4x1xf32> to vector<4x1xbf16>
    %61 = vector.broadcast %60 : vector<4x1xbf16> to vector<4x128xbf16>
    %62 = arith.mulf %57, %61 : vector<4x128xbf16>
    %c640 = arith.constant 640 : index
    %c0_51 = arith.constant 0 : index
    %63 = vector.load %arg3[%c640, %c0_51] : memref<1152x128xbf16, #tpu.memory_space<vmem>>, vector<128x128xbf16>
    %cst_52 = arith.constant dense<0.000000e+00> : vector<4x128xf32>
    %64 = tpu.matmul %62, %63, %cst_52 {dimension_numbers = #tpu.dot_dimension_numbers<[1], [0], [0], [1], [0, 0, 1, 1], [], []>} : vector<4x128xbf16>, vector<128x128xbf16>, vector<4x128xf32> -> vector<4x128xf32>
    %65 = arith.addf %56, %64 : vector<4x128xf32>
    %c4_53 = arith.constant 4 : index
    %c0_54 = arith.constant 0 : index
    %66 = vector.load %arg8[%c4_53, %c0_54] : memref<10x128xbf16, #tpu.memory_space<vmem>>, vector<4x128xbf16>
    %c6 = arith.constant 6 : index
    %c0_55 = arith.constant 0 : index
    %c0_56 = arith.constant 0 : index
    %67 = vector.load %arg6[%c6, %c0_55, %c0_56] : memref<9x4x1xf32, #tpu.memory_space<vmem>>, vector<1x4x1xf32>
    %68 = vector.shape_cast %67 : vector<1x4x1xf32> to vector<4x1xf32>
    %69 = arith.truncf %68 : vector<4x1xf32> to vector<4x1xbf16>
    %70 = vector.broadcast %69 : vector<4x1xbf16> to vector<4x128xbf16>
    %71 = arith.mulf %66, %70 : vector<4x128xbf16>
    %c768 = arith.constant 768 : index
    %c0_57 = arith.constant 0 : index
    %72 = vector.load %arg3[%c768, %c0_57] : memref<1152x128xbf16, #tpu.memory_space<vmem>>, vector<128x128xbf16>
    %cst_58 = arith.constant dense<0.000000e+00> : vector<4x128xf32>
    %73 = tpu.matmul %71, %72, %cst_58 {dimension_numbers = #tpu.dot_dimension_numbers<[1], [0], [0], [1], [0, 0, 1, 1], [], []>} : vector<4x128xbf16>, vector<128x128xbf16>, vector<4x128xf32> -> vector<4x128xf32>
    %74 = arith.addf %65, %73 : vector<4x128xf32>
    %c5_59 = arith.constant 5 : index
    %c0_60 = arith.constant 0 : index
    %75 = vector.load %arg8[%c5_59, %c0_60] : memref<10x128xbf16, #tpu.memory_space<vmem>>, vector<4x128xbf16>
    %c7 = arith.constant 7 : index
    %c0_61 = arith.constant 0 : index
    %c0_62 = arith.constant 0 : index
    %76 = vector.load %arg6[%c7, %c0_61, %c0_62] : memref<9x4x1xf32, #tpu.memory_space<vmem>>, vector<1x4x1xf32>
    %77 = vector.shape_cast %76 : vector<1x4x1xf32> to vector<4x1xf32>
    %78 = arith.truncf %77 : vector<4x1xf32> to vector<4x1xbf16>
    %79 = vector.broadcast %78 : vector<4x1xbf16> to vector<4x128xbf16>
    %80 = arith.mulf %75, %79 : vector<4x128xbf16>
    %c896 = arith.constant 896 : index
    %c0_63 = arith.constant 0 : index
    %81 = vector.load %arg3[%c896, %c0_63] : memref<1152x128xbf16, #tpu.memory_space<vmem>>, vector<128x128xbf16>
    %cst_64 = arith.constant dense<0.000000e+00> : vector<4x128xf32>
    %82 = tpu.matmul %80, %81, %cst_64 {dimension_numbers = #tpu.dot_dimension_numbers<[1], [0], [0], [1], [0, 0, 1, 1], [], []>} : vector<4x128xbf16>, vector<128x128xbf16>, vector<4x128xf32> -> vector<4x128xf32>
    %83 = arith.addf %74, %82 : vector<4x128xf32>
    %c6_65 = arith.constant 6 : index
    %c0_66 = arith.constant 0 : index
    %84 = vector.load %arg8[%c6_65, %c0_66] : memref<10x128xbf16, #tpu.memory_space<vmem>>, vector<4x128xbf16>
    %c8 = arith.constant 8 : index
    %c0_67 = arith.constant 0 : index
    %c0_68 = arith.constant 0 : index
    %85 = vector.load %arg6[%c8, %c0_67, %c0_68] : memref<9x4x1xf32, #tpu.memory_space<vmem>>, vector<1x4x1xf32>
    %86 = vector.shape_cast %85 : vector<1x4x1xf32> to vector<4x1xf32>
    %87 = arith.truncf %86 : vector<4x1xf32> to vector<4x1xbf16>
    %88 = vector.broadcast %87 : vector<4x1xbf16> to vector<4x128xbf16>
    %89 = arith.mulf %84, %88 : vector<4x128xbf16>
    %c1024 = arith.constant 1024 : index
    %c0_69 = arith.constant 0 : index
    %90 = vector.load %arg3[%c1024, %c0_69] : memref<1152x128xbf16, #tpu.memory_space<vmem>>, vector<128x128xbf16>
    %cst_70 = arith.constant dense<0.000000e+00> : vector<4x128xf32>
    %91 = tpu.matmul %89, %90, %cst_70 {dimension_numbers = #tpu.dot_dimension_numbers<[1], [0], [0], [1], [0, 0, 1, 1], [], []>} : vector<4x128xbf16>, vector<128x128xbf16>, vector<4x128xf32> -> vector<4x128xf32>
    %92 = arith.addf %83, %91 : vector<4x128xf32>
    %cst_71 = arith.constant 0.000000e+00 : f32
    %93 = vector.broadcast %cst_71 : f32 to vector<4x128xf32>
    %94 = arith.maximumf %92, %93 : vector<4x128xf32>
    %95 = arith.truncf %94 : vector<4x128xf32> to vector<4x128xbf16>
    %c0_72 = arith.constant 0 : index
    %c0_73 = arith.constant 0 : index
    %c0_74 = arith.constant 0 : index
    %96 = vector.load %arg7[%c0_72, %c0_73, %c0_74] : memref<1x4x128xbf16, #tpu.memory_space<vmem>>, vector<1x4x128xbf16>
    %97 = vector.shape_cast %96 : vector<1x4x128xbf16> to vector<4x128xbf16>
    %98 = vector.shape_cast %95 : vector<4x128xbf16> to vector<1x4x128xbf16>
    tpu.vector_store %arg7[%c0_72, %c0_73, %c0_74], %98 {strides = array<i32>} : memref<1x4x128xbf16, #tpu.memory_space<vmem>>, vector<1x4x128xbf16>,
    return
  }
  func.func @transform_0(%arg0: i32) -> (i32, i32, i32) {
    %c0_i32 = arith.constant 0 : i32
    %c0_i32_0 = arith.constant 0 : i32
    %c0_i32_1 = arith.constant 0 : i32
    return %arg0, %c0_i32, %c0_i32_0 : i32, i32, i32
  }
  func.func @transform_1(%arg0: i32) -> (i32, i32) {
    %c0_i32 = arith.constant 0 : i32
    %c0_i32_0 = arith.constant 0 : i32
    %c0_i32_1 = arith.constant 0 : i32
    return %c0_i32, %c0_i32_0 : i32, i32
  }
  func.func @transform_2(%arg0: i32) -> (i32, i32) {
    %c0_i32 = arith.constant 0 : i32
    %c0_i32_0 = arith.constant 0 : i32
    %c0_i32_1 = arith.constant 0 : i32
    return %c0_i32, %c0_i32_0 : i32, i32
  }
  func.func @transform_3(%arg0: i32) -> (i32, i32) {
    %c0_i32 = arith.constant 0 : i32
    %c0_i32_0 = arith.constant 0 : i32
    %c0_i32_1 = arith.constant 0 : i32
    return %c0_i32, %c0_i32_0 : i32, i32
  }
  func.func @transform_4(%arg0: i32) -> (i32, i32) {
    %c0_i32 = arith.constant 0 : i32
    %c0_i32_0 = arith.constant 0 : i32
    %c0_i32_1 = arith.constant 0 : i32
    return %c0_i32, %c0_i32_0 : i32, i32
  }
  func.func @transform_5(%arg0: i32) -> (i32, i32, i32) {
    %c0_i32 = arith.constant 0 : i32
    %c0_i32_0 = arith.constant 0 : i32
    %c0_i32_1 = arith.constant 0 : i32
    %c0_i32_2 = arith.constant 0 : i32
    return %c0_i32, %c0_i32_0, %c0_i32_1 : i32, i32, i32
  }
  func.func @transform_6(%arg0: i32) -> (i32, i32, i32) {
    %c0_i32 = arith.constant 0 : i32
    %c0_i32_0 = arith.constant 0 : i32
    %c0_i32_1 = arith.constant 0 : i32
    return %arg0, %c0_i32, %c0_i32_0 : i32, i32, i32
  }
}

module attributes {stable_mosaic.version = 11 : i64} {
  func.func @kernel(%arg0: i32, %arg1: memref<1x1x1152xbf16, #tpu.memory_space<vmem>>, %arg2: memref<1152x256xbf16, #tpu.memory_space<vmem>>, %arg3: memref<2304x256xbf16, #tpu.memory_space<vmem>>, %arg4: memref<128x256xbf16, #tpu.memory_space<vmem>>, %arg5: memref<1x256xf32, #tpu.memory_space<vmem>>, %arg6: memref<9x1x1xf32, #tpu.memory_space<vmem>>, %arg7: memref<1x1x256xbf16, #tpu.memory_space<vmem>>, %arg8: memref<5x256xbf16, #tpu.memory_space<vmem>>) attributes {dimension_semantics = [#tpu.dimension_semantics<parallel>], iteration_bounds = array<i64: 2>, scalar_prefetch = 0 : i64, scratch_operands = 1 : i64, tpu.core_type = #tpu.core_type<tc>, window_params = [{transform_indices = @transform_0, window_bounds = array<i64: 1, 1, 1152>}, {pipeline_mode = #tpu.pipeline_mode<synchronous>, transform_indices = @transform_1, window_bounds = array<i64: 1152, 256>}, {pipeline_mode = #tpu.pipeline_mode<synchronous>, transform_indices = @transform_2, window_bounds = array<i64: 2304, 256>}, {pipeline_mode = #tpu.pipeline_mode<synchronous>, transform_indices = @transform_3, window_bounds = array<i64: 128, 256>}, {pipeline_mode = #tpu.pipeline_mode<synchronous>, transform_indices = @transform_4, window_bounds = array<i64: 1, 256>}, {pipeline_mode = #tpu.pipeline_mode<synchronous>, transform_indices = @transform_5, window_bounds = array<i64: 9, 1, 1>}, {transform_indices = @transform_6, window_bounds = array<i64: 1, 1, 256>}]} {
    %c0 = arith.constant 0 : index
    %c0_0 = arith.constant 0 : index
    %c0_1 = arith.constant 0 : index
    %0 = vector.load %arg1[%c0, %c0_0, %c0_1] : memref<1x1x1152xbf16, #tpu.memory_space<vmem>>, vector<1x1x1152xbf16>
    %1 = vector.shape_cast %0 : vector<1x1x1152xbf16> to vector<1x1152xbf16>
    %c0_2 = arith.constant 0 : index
    %c0_3 = arith.constant 0 : index
    %2 = vector.load %arg2[%c0_2, %c0_3] : memref<1152x256xbf16, #tpu.memory_space<vmem>>, vector<1152x256xbf16>
    %cst = arith.constant dense<0.000000e+00> : vector<1x256xf32>
    %3 = tpu.matmul %1, %2, %cst {dimension_numbers = #tpu.dot_dimension_numbers<[1], [0], [0], [1], [0, 0, 1, 1], [], []>} : vector<1x1152xbf16>, vector<1152x256xbf16>, vector<1x256xf32> -> vector<1x256xf32>
    %cst_4 = arith.constant 0.000000e+00 : f32
    %4 = vector.broadcast %cst_4 : f32 to vector<1x256xf32>
    %5 = arith.maximumf %3, %4 : vector<1x256xf32>
    %c0_5 = arith.constant 0 : index
    %c0_6 = arith.constant 0 : index
    %c512 = arith.constant 512 : index
    %6 = vector.load %arg1[%c0_5, %c0_6, %c512] : memref<1x1x1152xbf16, #tpu.memory_space<vmem>>, vector<1x1x128xbf16>
    %7 = vector.shape_cast %6 : vector<1x1x128xbf16> to vector<1x128xbf16>
    %c0_7 = arith.constant 0 : index
    %c0_8 = arith.constant 0 : index
    %8 = vector.load %arg4[%c0_7, %c0_8] : memref<128x256xbf16, #tpu.memory_space<vmem>>, vector<128x256xbf16>
    %cst_9 = arith.constant dense<0.000000e+00> : vector<1x256xf32>
    %9 = tpu.matmul %7, %8, %cst_9 {dimension_numbers = #tpu.dot_dimension_numbers<[1], [0], [0], [1], [0, 0, 1, 1], [], []>} : vector<1x128xbf16>, vector<128x256xbf16>, vector<1x256xf32> -> vector<1x256xf32>
    %c0_10 = arith.constant 0 : index
    %c0_11 = arith.constant 0 : index
    %10 = vector.load %arg5[%c0_10, %c0_11] : memref<1x256xf32, #tpu.memory_space<vmem>>, vector<1x256xf32>
    %11 = arith.addf %9, %10 : vector<1x256xf32>
    %cst_12 = arith.constant 0.000000e+00 : bf16
    %12 = vector.broadcast %cst_12 : bf16 to vector<5x256xbf16>
    %c0_13 = arith.constant 0 : index
    %c0_14 = arith.constant 0 : index
    %13 = vector.load %arg8[%c0_13, %c0_14] : memref<5x256xbf16, #tpu.memory_space<vmem>>, vector<5x256xbf16>
    tpu.vector_store %arg8[%c0_13, %c0_14], %12 {strides = array<i32>} : memref<5x256xbf16, #tpu.memory_space<vmem>>, vector<5x256xbf16>,
    %14 = arith.truncf %5 : vector<1x256xf32> to vector<1x256xbf16>
    %c2 = arith.constant 2 : index
    %c0_15 = arith.constant 0 : index
    %15 = vector.load %arg8[%c2, %c0_15] : memref<5x256xbf16, #tpu.memory_space<vmem>>, vector<1x256xbf16>
    tpu.vector_store %arg8[%c2, %c0_15], %14 {strides = array<i32>} : memref<5x256xbf16, #tpu.memory_space<vmem>>, vector<1x256xbf16>,
    %c0_16 = arith.constant 0 : index
    %c0_17 = arith.constant 0 : index
    %16 = vector.load %arg8[%c0_16, %c0_17] : memref<5x256xbf16, #tpu.memory_space<vmem>>, vector<1x256xbf16>
    %c0_18 = arith.constant 0 : index
    %c0_19 = arith.constant 0 : index
    %c0_20 = arith.constant 0 : index
    %17 = vector.load %arg6[%c0_18, %c0_19, %c0_20] : memref<9x1x1xf32, #tpu.memory_space<vmem>>, vector<1x1x1xf32>
    %18 = vector.shape_cast %17 : vector<1x1x1xf32> to vector<1x1xf32>
    %19 = arith.truncf %18 : vector<1x1xf32> to vector<1x1xbf16>
    %20 = vector.broadcast %19 : vector<1x1xbf16> to vector<1x256xbf16>
    %21 = arith.mulf %16, %20 : vector<1x256xbf16>
    %c0_21 = arith.constant 0 : index
    %c0_22 = arith.constant 0 : index
    %22 = vector.load %arg3[%c0_21, %c0_22] : memref<2304x256xbf16, #tpu.memory_space<vmem>>, vector<256x256xbf16>
    %cst_23 = arith.constant dense<0.000000e+00> : vector<1x256xf32>
    %23 = tpu.matmul %21, %22, %cst_23 {dimension_numbers = #tpu.dot_dimension_numbers<[1], [0], [0], [1], [0, 0, 1, 1], [], []>} : vector<1x256xbf16>, vector<256x256xbf16>, vector<1x256xf32> -> vector<1x256xf32>
    %24 = arith.addf %11, %23 : vector<1x256xf32>
    %c1 = arith.constant 1 : index
    %c0_24 = arith.constant 0 : index
    %25 = vector.load %arg8[%c1, %c0_24] : memref<5x256xbf16, #tpu.memory_space<vmem>>, vector<1x256xbf16>
    %c1_25 = arith.constant 1 : index
    %c0_26 = arith.constant 0 : index
    %c0_27 = arith.constant 0 : index
    %26 = vector.load %arg6[%c1_25, %c0_26, %c0_27] : memref<9x1x1xf32, #tpu.memory_space<vmem>>, vector<1x1x1xf32>
    %27 = vector.shape_cast %26 : vector<1x1x1xf32> to vector<1x1xf32>
    %28 = arith.truncf %27 : vector<1x1xf32> to vector<1x1xbf16>
    %29 = vector.broadcast %28 : vector<1x1xbf16> to vector<1x256xbf16>
    %30 = arith.mulf %25, %29 : vector<1x256xbf16>
    %c256 = arith.constant 256 : index
    %c0_28 = arith.constant 0 : index
    %31 = vector.load %arg3[%c256, %c0_28] : memref<2304x256xbf16, #tpu.memory_space<vmem>>, vector<256x256xbf16>
    %cst_29 = arith.constant dense<0.000000e+00> : vector<1x256xf32>
    %32 = tpu.matmul %30, %31, %cst_29 {dimension_numbers = #tpu.dot_dimension_numbers<[1], [0], [0], [1], [0, 0, 1, 1], [], []>} : vector<1x256xbf16>, vector<256x256xbf16>, vector<1x256xf32> -> vector<1x256xf32>
    %33 = arith.addf %24, %32 : vector<1x256xf32>
    %c2_30 = arith.constant 2 : index
    %c0_31 = arith.constant 0 : index
    %34 = vector.load %arg8[%c2_30, %c0_31] : memref<5x256xbf16, #tpu.memory_space<vmem>>, vector<1x256xbf16>
    %c2_32 = arith.constant 2 : index
    %c0_33 = arith.constant 0 : index
    %c0_34 = arith.constant 0 : index
    %35 = vector.load %arg6[%c2_32, %c0_33, %c0_34] : memref<9x1x1xf32, #tpu.memory_space<vmem>>, vector<1x1x1xf32>
    %36 = vector.shape_cast %35 : vector<1x1x1xf32> to vector<1x1xf32>
    %37 = arith.truncf %36 : vector<1x1xf32> to vector<1x1xbf16>
    %38 = vector.broadcast %37 : vector<1x1xbf16> to vector<1x256xbf16>
    %39 = arith.mulf %34, %38 : vector<1x256xbf16>
    %c512_35 = arith.constant 512 : index
    %c0_36 = arith.constant 0 : index
    %40 = vector.load %arg3[%c512_35, %c0_36] : memref<2304x256xbf16, #tpu.memory_space<vmem>>, vector<256x256xbf16>
    %cst_37 = arith.constant dense<0.000000e+00> : vector<1x256xf32>
    %41 = tpu.matmul %39, %40, %cst_37 {dimension_numbers = #tpu.dot_dimension_numbers<[1], [0], [0], [1], [0, 0, 1, 1], [], []>} : vector<1x256xbf16>, vector<256x256xbf16>, vector<1x256xf32> -> vector<1x256xf32>
    %42 = arith.addf %33, %41 : vector<1x256xf32>
    %c1_38 = arith.constant 1 : index
    %c0_39 = arith.constant 0 : index
    %43 = vector.load %arg8[%c1_38, %c0_39] : memref<5x256xbf16, #tpu.memory_space<vmem>>, vector<1x256xbf16>
    %c3 = arith.constant 3 : index
    %c0_40 = arith.constant 0 : index
    %c0_41 = arith.constant 0 : index
    %44 = vector.load %arg6[%c3, %c0_40, %c0_41] : memref<9x1x1xf32, #tpu.memory_space<vmem>>, vector<1x1x1xf32>
    %45 = vector.shape_cast %44 : vector<1x1x1xf32> to vector<1x1xf32>
    %46 = arith.truncf %45 : vector<1x1xf32> to vector<1x1xbf16>
    %47 = vector.broadcast %46 : vector<1x1xbf16> to vector<1x256xbf16>
    %48 = arith.mulf %43, %47 : vector<1x256xbf16>
    %c768 = arith.constant 768 : index
    %c0_42 = arith.constant 0 : index
    %49 = vector.load %arg3[%c768, %c0_42] : memref<2304x256xbf16, #tpu.memory_space<vmem>>, vector<256x256xbf16>
    %cst_43 = arith.constant dense<0.000000e+00> : vector<1x256xf32>
    %50 = tpu.matmul %48, %49, %cst_43 {dimension_numbers = #tpu.dot_dimension_numbers<[1], [0], [0], [1], [0, 0, 1, 1], [], []>} : vector<1x256xbf16>, vector<256x256xbf16>, vector<1x256xf32> -> vector<1x256xf32>
    %51 = arith.addf %42, %50 : vector<1x256xf32>
    %c2_44 = arith.constant 2 : index
    %c0_45 = arith.constant 0 : index
    %52 = vector.load %arg8[%c2_44, %c0_45] : memref<5x256xbf16, #tpu.memory_space<vmem>>, vector<1x256xbf16>
    %c1024 = arith.constant 1024 : index
    %c0_46 = arith.constant 0 : index
    %53 = vector.load %arg3[%c1024, %c0_46] : memref<2304x256xbf16, #tpu.memory_space<vmem>>, vector<256x256xbf16>
    %cst_47 = arith.constant dense<0.000000e+00> : vector<1x256xf32>
    %54 = tpu.matmul %52, %53, %cst_47 {dimension_numbers = #tpu.dot_dimension_numbers<[1], [0], [0], [1], [0, 0, 1, 1], [], []>} : vector<1x256xbf16>, vector<256x256xbf16>, vector<1x256xf32> -> vector<1x256xf32>
    %55 = arith.addf %51, %54 : vector<1x256xf32>
    %c3_48 = arith.constant 3 : index
    %c0_49 = arith.constant 0 : index
    %56 = vector.load %arg8[%c3_48, %c0_49] : memref<5x256xbf16, #tpu.memory_space<vmem>>, vector<1x256xbf16>
    %c5 = arith.constant 5 : index
    %c0_50 = arith.constant 0 : index
    %c0_51 = arith.constant 0 : index
    %57 = vector.load %arg6[%c5, %c0_50, %c0_51] : memref<9x1x1xf32, #tpu.memory_space<vmem>>, vector<1x1x1xf32>
    %58 = vector.shape_cast %57 : vector<1x1x1xf32> to vector<1x1xf32>
    %59 = arith.truncf %58 : vector<1x1xf32> to vector<1x1xbf16>
    %60 = vector.broadcast %59 : vector<1x1xbf16> to vector<1x256xbf16>
    %61 = arith.mulf %56, %60 : vector<1x256xbf16>
    %c1280 = arith.constant 1280 : index
    %c0_52 = arith.constant 0 : index
    %62 = vector.load %arg3[%c1280, %c0_52] : memref<2304x256xbf16, #tpu.memory_space<vmem>>, vector<256x256xbf16>
    %cst_53 = arith.constant dense<0.000000e+00> : vector<1x256xf32>
    %63 = tpu.matmul %61, %62, %cst_53 {dimension_numbers = #tpu.dot_dimension_numbers<[1], [0], [0], [1], [0, 0, 1, 1], [], []>} : vector<1x256xbf16>, vector<256x256xbf16>, vector<1x256xf32> -> vector<1x256xf32>
    %64 = arith.addf %55, %63 : vector<1x256xf32>
    %c2_54 = arith.constant 2 : index
    %c0_55 = arith.constant 0 : index
    %65 = vector.load %arg8[%c2_54, %c0_55] : memref<5x256xbf16, #tpu.memory_space<vmem>>, vector<1x256xbf16>
    %c6 = arith.constant 6 : index
    %c0_56 = arith.constant 0 : index
    %c0_57 = arith.constant 0 : index
    %66 = vector.load %arg6[%c6, %c0_56, %c0_57] : memref<9x1x1xf32, #tpu.memory_space<vmem>>, vector<1x1x1xf32>
    %67 = vector.shape_cast %66 : vector<1x1x1xf32> to vector<1x1xf32>
    %68 = arith.truncf %67 : vector<1x1xf32> to vector<1x1xbf16>
    %69 = vector.broadcast %68 : vector<1x1xbf16> to vector<1x256xbf16>
    %70 = arith.mulf %65, %69 : vector<1x256xbf16>
    %c1536 = arith.constant 1536 : index
    %c0_58 = arith.constant 0 : index
    %71 = vector.load %arg3[%c1536, %c0_58] : memref<2304x256xbf16, #tpu.memory_space<vmem>>, vector<256x256xbf16>
    %cst_59 = arith.constant dense<0.000000e+00> : vector<1x256xf32>
    %72 = tpu.matmul %70, %71, %cst_59 {dimension_numbers = #tpu.dot_dimension_numbers<[1], [0], [0], [1], [0, 0, 1, 1], [], []>} : vector<1x256xbf16>, vector<256x256xbf16>, vector<1x256xf32> -> vector<1x256xf32>
    %73 = arith.addf %64, %72 : vector<1x256xf32>
    %c3_60 = arith.constant 3 : index
    %c0_61 = arith.constant 0 : index
    %74 = vector.load %arg8[%c3_60, %c0_61] : memref<5x256xbf16, #tpu.memory_space<vmem>>, vector<1x256xbf16>
    %c7 = arith.constant 7 : index
    %c0_62 = arith.constant 0 : index
    %c0_63 = arith.constant 0 : index
    %75 = vector.load %arg6[%c7, %c0_62, %c0_63] : memref<9x1x1xf32, #tpu.memory_space<vmem>>, vector<1x1x1xf32>
    %76 = vector.shape_cast %75 : vector<1x1x1xf32> to vector<1x1xf32>
    %77 = arith.truncf %76 : vector<1x1xf32> to vector<1x1xbf16>
    %78 = vector.broadcast %77 : vector<1x1xbf16> to vector<1x256xbf16>
    %79 = arith.mulf %74, %78 : vector<1x256xbf16>
    %c1792 = arith.constant 1792 : index
    %c0_64 = arith.constant 0 : index
    %80 = vector.load %arg3[%c1792, %c0_64] : memref<2304x256xbf16, #tpu.memory_space<vmem>>, vector<256x256xbf16>
    %cst_65 = arith.constant dense<0.000000e+00> : vector<1x256xf32>
    %81 = tpu.matmul %79, %80, %cst_65 {dimension_numbers = #tpu.dot_dimension_numbers<[1], [0], [0], [1], [0, 0, 1, 1], [], []>} : vector<1x256xbf16>, vector<256x256xbf16>, vector<1x256xf32> -> vector<1x256xf32>
    %82 = arith.addf %73, %81 : vector<1x256xf32>
    %c4 = arith.constant 4 : index
    %c0_66 = arith.constant 0 : index
    %83 = vector.load %arg8[%c4, %c0_66] : memref<5x256xbf16, #tpu.memory_space<vmem>>, vector<1x256xbf16>
    %c8 = arith.constant 8 : index
    %c0_67 = arith.constant 0 : index
    %c0_68 = arith.constant 0 : index
    %84 = vector.load %arg6[%c8, %c0_67, %c0_68] : memref<9x1x1xf32, #tpu.memory_space<vmem>>, vector<1x1x1xf32>
    %85 = vector.shape_cast %84 : vector<1x1x1xf32> to vector<1x1xf32>
    %86 = arith.truncf %85 : vector<1x1xf32> to vector<1x1xbf16>
    %87 = vector.broadcast %86 : vector<1x1xbf16> to vector<1x256xbf16>
    %88 = arith.mulf %83, %87 : vector<1x256xbf16>
    %c2048 = arith.constant 2048 : index
    %c0_69 = arith.constant 0 : index
    %89 = vector.load %arg3[%c2048, %c0_69] : memref<2304x256xbf16, #tpu.memory_space<vmem>>, vector<256x256xbf16>
    %cst_70 = arith.constant dense<0.000000e+00> : vector<1x256xf32>
    %90 = tpu.matmul %88, %89, %cst_70 {dimension_numbers = #tpu.dot_dimension_numbers<[1], [0], [0], [1], [0, 0, 1, 1], [], []>} : vector<1x256xbf16>, vector<256x256xbf16>, vector<1x256xf32> -> vector<1x256xf32>
    %91 = arith.addf %82, %90 : vector<1x256xf32>
    %cst_71 = arith.constant 0.000000e+00 : f32
    %92 = vector.broadcast %cst_71 : f32 to vector<1x256xf32>
    %93 = arith.maximumf %91, %92 : vector<1x256xf32>
    %cst_72 = arith.constant 0.999994993 : f32
    %94 = vector.broadcast %cst_72 : f32 to vector<1x256xf32>
    %95 = arith.mulf %93, %94 : vector<1x256xf32>
    %96 = arith.truncf %95 : vector<1x256xf32> to vector<1x256xbf16>
    %c0_73 = arith.constant 0 : index
    %c0_74 = arith.constant 0 : index
    %c0_75 = arith.constant 0 : index
    %97 = vector.load %arg7[%c0_73, %c0_74, %c0_75] : memref<1x1x256xbf16, #tpu.memory_space<vmem>>, vector<1x1x256xbf16>
    %98 = vector.shape_cast %97 : vector<1x1x256xbf16> to vector<1x256xbf16>
    %99 = vector.shape_cast %96 : vector<1x256xbf16> to vector<1x1x256xbf16>
    tpu.vector_store %arg7[%c0_73, %c0_74, %c0_75], %99 {strides = array<i32>} : memref<1x1x256xbf16, #tpu.memory_space<vmem>>, vector<1x1x256xbf16>,
    return
  }
  func.func @transform_0(%arg0: i32) -> (i32, i32, i32) {
    %c0_i32 = arith.constant 0 : i32
    %c0_i32_0 = arith.constant 0 : i32
    %c0_i32_1 = arith.constant 0 : i32
    return %arg0, %c0_i32, %c0_i32_0 : i32, i32, i32
  }
  func.func @transform_1(%arg0: i32) -> (i32, i32) {
    %c0_i32 = arith.constant 0 : i32
    %c0_i32_0 = arith.constant 0 : i32
    %c0_i32_1 = arith.constant 0 : i32
    return %c0_i32, %c0_i32_0 : i32, i32
  }
  func.func @transform_2(%arg0: i32) -> (i32, i32) {
    %c0_i32 = arith.constant 0 : i32
    %c0_i32_0 = arith.constant 0 : i32
    %c0_i32_1 = arith.constant 0 : i32
    return %c0_i32, %c0_i32_0 : i32, i32
  }
  func.func @transform_3(%arg0: i32) -> (i32, i32) {
    %c0_i32 = arith.constant 0 : i32
    %c0_i32_0 = arith.constant 0 : i32
    %c0_i32_1 = arith.constant 0 : i32
    return %c0_i32, %c0_i32_0 : i32, i32
  }
  func.func @transform_4(%arg0: i32) -> (i32, i32) {
    %c0_i32 = arith.constant 0 : i32
    %c0_i32_0 = arith.constant 0 : i32
    %c0_i32_1 = arith.constant 0 : i32
    return %c0_i32, %c0_i32_0 : i32, i32
  }
  func.func @transform_5(%arg0: i32) -> (i32, i32, i32) {
    %c0_i32 = arith.constant 0 : i32
    %c0_i32_0 = arith.constant 0 : i32
    %c0_i32_1 = arith.constant 0 : i32
    %c0_i32_2 = arith.constant 0 : i32
    return %c0_i32, %c0_i32_0, %c0_i32_1 : i32, i32, i32
  }
  func.func @transform_6(%arg0: i32) -> (i32, i32, i32) {
    %c0_i32 = arith.constant 0 : i32
    %c0_i32_0 = arith.constant 0 : i32
    %c0_i32_1 = arith.constant 0 : i32
    return %arg0, %c0_i32, %c0_i32_0 : i32, i32, i32
  }
}

module attributes {stable_mosaic.version = 11 : i64} {
  func.func @_fc_kernel(%arg0: i32, %arg1: memref<2x256xbf16, #tpu.memory_space<vmem>>, %arg2: memref<256x10xbf16, #tpu.memory_space<vmem>>, %arg3: memref<1x10xf32, #tpu.memory_space<vmem>>, %arg4: memref<2x10xf32, #tpu.memory_space<vmem>>) attributes {dimension_semantics = [#tpu.dimension_semantics<arbitrary>], iteration_bounds = array<i64: 1>, scalar_prefetch = 0 : i64, scratch_operands = 0 : i64, tpu.core_type = #tpu.core_type<tc>, window_params = [{pipeline_mode = #tpu.pipeline_mode<synchronous>, transform_indices = @transform_0, window_bounds = array<i64: 2, 256>}, {pipeline_mode = #tpu.pipeline_mode<synchronous>, transform_indices = @transform_1, window_bounds = array<i64: 256, 10>}, {pipeline_mode = #tpu.pipeline_mode<synchronous>, transform_indices = @transform_2, window_bounds = array<i64: 1, 10>}, {pipeline_mode = #tpu.pipeline_mode<synchronous>, transform_indices = @transform_3, window_bounds = array<i64: 2, 10>}]} {
    %c0 = arith.constant 0 : index
    %c0_0 = arith.constant 0 : index
    %0 = vector.load %arg1[%c0, %c0_0] : memref<2x256xbf16, #tpu.memory_space<vmem>>, vector<2x256xbf16>
    %c0_1 = arith.constant 0 : index
    %c0_2 = arith.constant 0 : index
    %1 = vector.load %arg2[%c0_1, %c0_2] : memref<256x10xbf16, #tpu.memory_space<vmem>>, vector<256x10xbf16>
    %cst = arith.constant dense<0.000000e+00> : vector<2x10xf32>
    %2 = tpu.matmul %0, %1, %cst {dimension_numbers = #tpu.dot_dimension_numbers<[1], [0], [0], [1], [0, 0, 1, 1], [], []>} : vector<2x256xbf16>, vector<256x10xbf16>, vector<2x10xf32> -> vector<2x10xf32>
    %c0_3 = arith.constant 0 : index
    %c0_4 = arith.constant 0 : index
    %3 = vector.load %arg3[%c0_3, %c0_4] : memref<1x10xf32, #tpu.memory_space<vmem>>, vector<1x10xf32>
    %4 = vector.broadcast %3 : vector<1x10xf32> to vector<2x10xf32>
    %5 = arith.addf %2, %4 : vector<2x10xf32>
    %c0_5 = arith.constant 0 : index
    %c0_6 = arith.constant 0 : index
    %6 = vector.load %arg4[%c0_5, %c0_6] : memref<2x10xf32, #tpu.memory_space<vmem>>, vector<2x10xf32>
    tpu.vector_store %arg4[%c0_5, %c0_6], %5 {strides = array<i32>} : memref<2x10xf32, #tpu.memory_space<vmem>>, vector<2x10xf32>,
    return
  }
  func.func @transform_0(%arg0: i32) -> (i32, i32) {
    %c0_i32 = arith.constant 0 : i32
    %c0_i32_0 = arith.constant 0 : i32
    %c0_i32_1 = arith.constant 0 : i32
    return %c0_i32, %c0_i32_0 : i32, i32
  }
  func.func @transform_1(%arg0: i32) -> (i32, i32) {
    %c0_i32 = arith.constant 0 : i32
    %c0_i32_0 = arith.constant 0 : i32
    %c0_i32_1 = arith.constant 0 : i32
    return %c0_i32, %c0_i32_0 : i32, i32
  }
  func.func @transform_2(%arg0: i32) -> (i32, i32) {
    %c0_i32 = arith.constant 0 : i32
    %c0_i32_0 = arith.constant 0 : i32
    %c0_i32_1 = arith.constant 0 : i32
    return %c0_i32, %c0_i32_0 : i32, i32
  }
  func.func @transform_3(%arg0: i32) -> (i32, i32) {
    %c0_i32 = arith.constant 0 : i32
    %c0_i32_0 = arith.constant 0 : i32
    %c0_i32_1 = arith.constant 0 : i32
    return %c0_i32, %c0_i32_0 : i32, i32
  }
}

</mosaic_0001>

<bundles_post_ra>
// kernel: ensemble_forward.6
= control target key start
LH: loop header
LB: loop body
LE: loop exit
PB: predicated region body
PF: predicated region fallthrough
CT: control target
= control target key end

     0   :  { %s1427_s15 = smov 0   ;;  %s1856_s0 = inlined_call_operand.vmem [shape: bf16[2,256,147], index: 0, kind: input, shape index: {}]   ;;  %s1857_s1 = inlined_call_operand.vmem [shape: bf16[147,8], index: 1, kind: input, shape index: {}]   ;;  %s1858_s2 = inlined_call_operand.vmem [shape: f32[1,8], index: 2, kind: input, shape index: {}]   ;;  %s1859_s3 = inlined_call_operand.vmem [shape: f32[2,64,1], index: 3, kind: input, shape index: {}]   ;;  %s1860_s4 = inlined_call_operand.vmem [shape: bf16[2,64,8], index: 4, kind: output, shape index: {}]  }
   0x1 LB: > { %s1126_s16 = sadd.s32 4294967295, %s1398_s15   ;;  %p1130_p0 = scmp.ge.s32.totalorder %s1398_s15, 1  ;;  %s1398_s15 = sphi %s1427_s15, %s14_s15  }
   0x2   : > { %p162_p1 = scmp.lt.s32.totalorder %s1398_s15, 3 }
   0x4   : > { %p163_p2 = pnand %p1130_p0, %p162_p1 }
   0x5   : > { %p188_p3 = scmp.lt.s32.totalorder (!%p163_p2), %s1126_s16, 1 }
   0x6   : > { %166 = sbr.rel (%p163_p2) target bundleno = 323 (0x143), region = 36 }
   0xb   : > { %v1366_v0 = vld [vmem:[%s1857_s1 + $0x38] sm:$0xff]  ;;  %v249_v1 = vld [vmem:[%s1857_s1 + $0x48] sm:$0x3]  ;;  %vm504_vm0 = vcmask 1040384   ;;  %vm505_vm1 = vcmask 1041408   ;;  %v1365_v3 = vld [vmem:[%s1857_s1 + $0x30] sm:$0xff] }
   0xc   : > { %v435_v2 = vunpack.c.l.b16 %v249_v1  ;;  %511 = vmatpush.bf16.msra.mxu0 %v1366_v0  ;;  %1368 = vmatpush.bf16.msra.mxu2 %v1366_v0  ;;  %v1400_v4 = vmov 65535   ;;  %s1862_s16 = smov (!%p188_p3, %s1126_s16), 1  ;;  %v1364_v9 = vld [vmem:[%s1857_s1 + $0x28] sm:$0xff]  ;;  %v1367_v10 = vld [vmem:[%s1857_s1 + $0x40] sm:$0xff]  ;;  %vm455_vm2 = vcmask 154624   ;;  %v1362_v18 = vld [vmem:[%s1857_s1 + $0x18] sm:$0xff] }
   0xd   : > { %v506_v5 = vsel %vm504_vm0, 4294967295, %v1400_v4  ;;  %s1325_s23 = sshll.u32 %s1862_s16, 8  ;;  %v1363_v14 = vld [vmem:[%s1857_s1 + $0x20] sm:$0xff]  ;;  %v1361_v19 = vld [vmem:[%s1857_s1 + $0x10] sm:$0xff]  ;;  %v1401_v21 = vmov 0   ;;  %v1360_v22 = vld [vmem:[%s1857_s1 + $0x8] sm:$0xff] }
   0xe   : > { %v445_v6 = vpack.c.b16 %v435_v2, %v435_v2  ;;  %v507_v7 = vsel %vm505_vm1, %v506_v5, 0  ;;  %s1453_s28 = scalar_lea.vmem %s1856_s0, %s1325_s23  ;;  %v1476_v20 = vld [vmem:[%s1859_s3 + $0x40] sm:$0xff]  ;;  %1388 = vset.pattern.permute.xlu0 %v1401_v21  ;;  %1389 = vset.pattern.permute.xlu1 %v1401_v21  ;;  %v1497_v36 = vld [vmem:[%s1859_s3 + $0x48] sm:$0xff]  ;;  %v1504_v37 = vld [vmem:[%s1859_s3 + $0x50] sm:$0xff]  ;;  %vm721_vm3 = vcmask 64512   ;;  %vm1062_vm4 = vcmask 60416  }
   0xf   : > { %v1327_v11 = vld [vmem:[%s1453_s28 + $0x4] sm:$0xf]  ;;  %v1139_v12 = vld [vmem:[%s1453_s28 + $0x8] sm:$0xf0]  ;;  %v1345_v15 = vld [vmem:[%s1453_s28 + $0x94] sm:$0xf]  ;;  %813 = vperm.xlu0 %1388, %v1476_v20   ;;  %1390 = vset.pattern.permute.xlu2 %v1401_v21 }
  0x10   : > { %v509_v8 = vand.u32 %v507_v7, %v445_v6  ;;  %512 = vmatpush.bf16.msra.mxu0 %v1365_v3  ;;  %1369 = vmatpush.bf16.msra.mxu2 %v1365_v3  ;;  %v1142_v13 = vor.u32 %v1327_v11, %v1139_v12  ;;  %v1211_v16 = vld [vmem:[%s1453_s28 + $0x98] sm:$0xf0]  ;;  %v1329_v23 = vld [vmem:[%s1453_s28 + $0x14] sm:$0xf]  ;;  %v1359_v25 = vld [vmem:[%s1857_s1] sm:$0xff] }
  0x11   : > { %v1214_v17 = vor.u32 %v1345_v15, %v1211_v16  ;;  %v1147_v24 = vld [vmem:[%s1453_s28 + $0x18] sm:$0xf0]  ;;  %v1137_v27 = vld [vmem:[%s1453_s28] sm:$0xf]  ;;  %v1328_v28 = vld [vmem:[%s1453_s28 + $0x4] sm:$0xf0]  ;;  %823 = vperm.xlu1 %1389, %v1504_v37  }
  0x12   : > { %606 = vmatpush.bf16.msra.mxu1 %v509_v8  ;;  %1376 = vmatpush.bf16.msra.mxu3 %v509_v8  ;;  %v1150_v26 = vor.u32 %v1329_v23, %v1147_v24  ;;  %v1201_v29 = vld [vmem:[%s1453_s28 + $0x80] sm:$0xf]  ;;  %v1344_v30 = vld [vmem:[%s1453_s28 + $0x84] sm:$0xf0]  ;;  %v1347_v31 = vld [vmem:[%s1453_s28 + $0xa4] sm:$0xf]  ;;  %v1138_v34 = vor.u32 %v1328_v28, %v1137_v27 }
  0x13   : > { %v1219_v32 = vld [vmem:[%s1453_s28 + $0xa8] sm:$0xf0]  ;;  %v1202_v35 = vor.u32 %v1344_v30, %v1201_v29  ;;  %v1510_v38 = vld [vmem:[%s1859_s3 + $0x70] sm:$0xff]  ;;  %v1331_v39 = vld [vmem:[%s1453_s28 + $0x24] sm:$0xf] }
  0x14   : > { %513 = vmatpush.bf16.msra.mxu0 %v1364_v9  ;;  %1370 = vmatpush.bf16.msra.mxu2 %v1364_v9  ;;  %v1222_v33 = vor.u32 %v1347_v31, %v1219_v32  ;;  %v1155_v40 = vld [vmem:[%s1453_s28 + $0x28] sm:$0xf0]  ;;  %v1518_v41 = vld [vmem:[%s1859_s3 + $0x58] sm:$0xff]  ;;  %v1145_v43 = vld [vmem:[%s1453_s28 + $0x10] sm:$0xf] }
  0x15   : > { %v1158_v42 = vor.u32 %v1331_v39, %v1155_v40  ;;  %v1330_v44 = vld [vmem:[%s1453_s28 + $0x14] sm:$0xf0]  ;;  %v1209_v45 = vld [vmem:[%s1453_s28 + $0x90] sm:$0xf]  ;;  %v1349_v47 = vld [vmem:[%s1453_s28 + $0xb4] sm:$0xf] }
  0x16   : > { %607 = vmatpush.bf16.msra.mxu1 %v1367_v10  ;;  %1377 = vmatpush.bf16.msra.mxu3 %v1367_v10  ;;  %v1346_v46 = vld [vmem:[%s1453_s28 + $0x94] sm:$0xf0]  ;;  %v1227_v48 = vld [vmem:[%s1453_s28 + $0xb8] sm:$0xf0]  ;;  %v1146_v50 = vor.u32 %v1330_v44, %v1145_v43  ;;  %v1531_v52 = vld [vmem:[%s1859_s3 + $0x8] sm:$0xff] }
  0x17   : > { %818 = vperm.xlu0 %1388, %v1497_v36   ;;  %v1230_v49 = vor.u32 %v1349_v47, %v1227_v48  ;;  %v1210_v51 = vor.u32 %v1346_v46, %v1209_v45  ;;  %v1538_v53 = vld [vmem:[%s1859_s3 + $0x60] sm:$0xff]  ;;  %v1543_v54 = vld [vmem:[%s1859_s3 + $0x78] sm:$0xff]  ;;  %v1333_v56 = vld [vmem:[%s1453_s28 + $0x34] sm:$0xf] }
  0x18   : > { %514 = vmatpush.bf16.msra.mxu0 %v1363_v14  ;;  %1371 = vmatpush.bf16.msra.mxu2 %v1363_v14  ;;  %v1550_v55 = vld [vmem:[%s1859_s3 + $0x20] sm:$0xff]  ;;  %v1163_v57 = vld [vmem:[%s1453_s28 + $0x38] sm:$0xf0]  ;;  %v756_v58 = vld [vmem:[%s1859_s3 + $0x10] sm:$0xff] }
  0x19   : > { %1299 = vmatmul.msk.bf16.vlgmr.msra.gmra.mxu1 %vm455_vm2, %v1142_v13  ;;  %1308 = vmatmul.msk.bf16.vlgmr.msra.gmra.mxu3 %vm455_vm2, %v1214_v17  ;;  %v1320_v59 = vld [vmem:[%s1859_s3 + $0x68] sm:$0xff]  ;;  %v1166_v60 = vor.u32 %v1333_v56, %v1163_v57  ;;  %v1153_v61 = vld [vmem:[%s1453_s28 + $0x20] sm:$0xf]  ;;  %v1351_v1 = vld [vmem:[%s1453_s28 + $0xc4] sm:$0xf]  ;;  %v773_v24 = vmul.f32 %v1504_v37, %v756_v58 }
  0x1a   : > { %828 = vperm.xlu1 %1389, %v1518_v41   ;;  %833 = vperm.xlu2 %1390, %v1538_v53   ;;  %v1332_v62 = vld [vmem:[%s1453_s28 + $0x24] sm:$0xf0]  ;;  %v1217_v63 = vld [vmem:[%s1453_s28 + $0xa0] sm:$0xf]  ;;  %v1235_v2 = vld [vmem:[%s1453_s28 + $0xc8] sm:$0xf0] }
  0x1b   : > { %v1348_v0 = vld [vmem:[%s1453_s28 + $0xa4] sm:$0xf0]  ;;  %v1238_v3 = vor.u32 %v1351_v1, %v1235_v2  ;;  %v1154_v4 = vor.u32 %v1332_v62, %v1153_v61  ;;  %v754_v6 = vld [vmem:[%s1859_s3] sm:$0xff]  ;;  %v1171_v10 = vld [vmem:[%s1453_s28 + $0x48] sm:$0xf0] }
  0x1c   : > { %515 = vmatpush.bf16.msra.mxu0 %v1362_v18  ;;  %1372 = vmatpush.bf16.msra.mxu2 %v1362_v18  ;;  %v1218_v5 = vor.u32 %v1348_v0, %v1217_v63  ;;  %v759_v7 = vld [vmem:[%s1859_s3 + $0x28] sm:$0xff]  ;;  %v771_v8 = vmul.f32 %v1476_v20, %v754_v6  ;;  %v1335_v9 = vld [vmem:[%s1453_s28 + $0x44] sm:$0xf]  ;;  %v757_v11 = vld [vmem:[%s1859_s3 + $0x18] sm:$0xff] }
  0x1d   : > { %v1174_v12 = vor.u32 %v1335_v9, %v1171_v10  ;;  %v1161_v13 = vld [vmem:[%s1453_s28 + $0x30] sm:$0xf]  ;;  %v1334_v14 = vld [vmem:[%s1453_s28 + $0x34] sm:$0xf0]  ;;  %v1353_v17 = vld [vmem:[%s1453_s28 + $0xd4] sm:$0xf]  ;;  %v776_v40 = vmul.f32 %v1320_v59, %v759_v7 }
  0x1e   : > { %v1225_v15 = vld [vmem:[%s1453_s28 + $0xb0] sm:$0xf]  ;;  %v1350_v16 = vld [vmem:[%s1453_s28 + $0xb4] sm:$0xf0]  ;;  %v1243_v18 = vld [vmem:[%s1453_s28 + $0xd8] sm:$0xf0]  ;;  %v1162_v20 = vor.u32 %v1334_v14, %v1161_v13 }
  0x1f   : > { %843 = vperm.xlu0 %1388, %v1510_v38   ;;  %v1226_v21 = vor.u32 %v1350_v16, %v1225_v15  ;;  %v761_v23 = vld [vmem:[%s1859_s3 + $0x38] sm:$0xff]  ;;  %v1169_v28 = vld [vmem:[%s1453_s28 + $0x40] sm:$0xf]  ;;  %v1336_v29 = vld [vmem:[%s1453_s28 + $0x44] sm:$0xf0] }
  0x20   : > { %516 = vmatpush.bf16.msra.mxu0 %v1361_v19  ;;  %1373 = vmatpush.bf16.msra.mxu2 %v1361_v19  ;;  %v1246_v19 = vor.u32 %v1353_v17, %v1243_v18  ;;  %v1233_v30 = vld [vmem:[%s1453_s28 + $0xc0] sm:$0xf]  ;;  %v1352_v31 = vld [vmem:[%s1453_s28 + $0xc4] sm:$0xf0]  ;;  %v1355_v32 = vld [vmem:[%s1453_s28 + $0xe4] sm:$0xf] }
  0x21   : > { %v1234_v39 = vor.u32 %v1352_v31, %v1233_v30  ;;  %v760_v37 = vld [vmem:[%s1859_s3 + $0x30] sm:$0xff]  ;;  %v1339_v43 = vld [vmem:[%s1453_s28 + $0x64] sm:$0xf]  ;;  %v1187_v44 = vld [vmem:[%s1453_s28 + $0x68] sm:$0xf0] }
  0x22   : > { %848 = vperm.xlu1 %1389, %v1543_v54   ;;  %838 = vperm.xlu2 %1390, %v1320_v59   ;;  %v1190_v45 = vor.u32 %v1339_v43, %v1187_v44  ;;  %v1177_v46 = vld [vmem:[%s1453_s28 + $0x50] sm:$0xf]  ;;  %v1338_v47 = vld [vmem:[%s1453_s28 + $0x54] sm:$0xf0]  ;;  %v1195_v57 = vld [vmem:[%s1453_s28 + $0x78] sm:$0xf0] }
  0x23   : > { %v1241_v48 = vld [vmem:[%s1453_s28 + $0xd0] sm:$0xf]  ;;  %v1185_v59 = vld [vmem:[%s1453_s28 + $0x60] sm:$0xf]  ;;  %v1356_v62 = vld [vmem:[%s1453_s28 + $0xe4] sm:$0xf0] }
  0x24   : > { %517 = vmatpush.bf16.msra.mxu0 %v1360_v22  ;;  %1374 = vmatpush.bf16.msra.mxu2 %v1360_v22  ;;  %v774_v22 = vmul.f32 %v1518_v41, %v757_v11  ;;  %v777_v41 = vmul.f32 %v1510_v38, %v760_v37  ;;  %v775_v38 = vmul.f32 %v1538_v53, %v1550_v55  ;;  %v1249_v61 = vld [vmem:[%s1453_s28 + $0xe0] sm:$0xf]  ;;  %v1343_v1 = vld [vmem:[%s1453_s28 + $0x84] sm:$0xf] }
  0x25   : > { %v778_v53 = vmul.f32 %v1543_v54, %v761_v23  ;;  %v1250_v0 = vor.u32 %v1356_v62, %v1249_v61  ;;  %v1203_v54 = vld [vmem:[%s1453_s28 + $0x88] sm:$0xf0] }
  0x26   : > { %v1206_v2 = vor.u32 %v1343_v1, %v1203_v54 }
  0x27   : > { %891 = vperm.xlu0 %1388, %v1531_v52  }
  0x28   : > { %518 = vmatpush.bf16.msra.mxu0 %v1359_v25  ;;  %1375 = vmatpush.bf16.msra.mxu2 %v1359_v25  ;;  %v1337_v25 = vld [vmem:[%s1453_s28 + $0x54] sm:$0xf] }
  0x29   : > { %1300 = vmatmul.msk.bf16.gmra.mxu1 %vm455_vm2, %v1150_v26  ;;  %1309 = vmatmul.msk.bf16.gmra.mxu3 %vm455_vm2, %v1222_v33  ;;  %v1179_v26 = vld [vmem:[%s1453_s28 + $0x58] sm:$0xf0]  ;;  %v1251_v33 = vld [vmem:[%s1453_s28 + $0xe8] sm:$0xf0] }
  0x2a   : > { %896 = vperm.xlu1 %1389, %v756_v58   ;;  %886 = vperm.xlu2 %1390, %v754_v6   ;;  %v1182_v27 = vor.u32 %v1337_v25, %v1179_v26  ;;  %v1257_v6 = vld [vmem:[%s1453_s28 + $0xf0] sm:$0xf] }
  0x2b   : > { %519 = vmatmul.bf16.vlgmr.msra.gmra.mxu0 %v1138_v34  ;;  %559 = vmatmul.bf16.vlgmr.msra.gmra.mxu2 %v1202_v35  ;;  %v1254_v34 = vor.u32 %v1355_v32, %v1251_v33  ;;  %v1170_v35 = vor.u32 %v1336_v29, %v1169_v28 }
  0x2f   : > { %906 = vperm.xlu0 %1388, %v1550_v55   ;;  %v1341_v55 = vld [vmem:[%s1453_s28 + $0x74] sm:$0xf] }
  0x30   : > { %v1198_v58 = vor.u32 %v1341_v55, %v1195_v57 }
  0x32   : > { %911 = vperm.xlu1 %1389, %v759_v7   ;;  %901 = vperm.xlu2 %1390, %v757_v11   ;;  %v1358_v7 = vld [vmem:[%s1453_s28 + $0xf4] sm:$0xf0] }
  0x33   : > { %v1258_v9 = vor.u32 %v1358_v7, %v1257_v6 }
  0x37   : > { %921 = vperm.xlu0 %1388, %v761_v23  }
  0x39   : > { %1301 = vmatmul.msk.bf16.gmra.mxu1 %vm455_vm2, %v1158_v42  ;;  %1310 = vmatmul.msk.bf16.gmra.mxu3 %vm455_vm2, %v1230_v49  ;;  %v772_v42 = vmul.f32 %v1497_v36, %v1531_v52  ;;  %v1354_v49 = vld [vmem:[%s1453_s28 + $0xd4] sm:$0xf0]  ;;  %v1178_v36 = vor.u32 %v1338_v47, %v1177_v46 }
  0x3a   : > { %1000 = vperm.xlu1 %1389, %v771_v8   ;;  %916 = vperm.xlu2 %1390, %v760_v37   ;;  %v1242_v56 = vor.u32 %v1354_v49, %v1241_v48 }
  0x3b   : > { %524 = vmatmul.bf16.gmra.mxu0 %v1146_v50  ;;  %564 = vmatmul.bf16.gmra.mxu2 %v1210_v51  ;;  %v1357_v50 = vld [vmem:[%s1453_s28 + $0xf4] sm:$0xf]  ;;  %v1259_v51 = vld [vmem:[%s1453_s28 + $0xf8] sm:$0xf0] }
  0x3c   : > { %v1262_v52 = vor.u32 %v1357_v50, %v1259_v51 }
  0x3f   : > { %1010 = vperm.xlu0 %1388, %v773_v24  }
  0x42   : > { %1015 = vperm.xlu1 %1389, %v774_v22   ;;  %1005 = vperm.xlu2 %1390, %v772_v42  }
  0x47   : > { %1025 = vperm.xlu0 %1388, %v776_v40  }
  0x49   : > { %1302 = vmatmul.msk.bf16.gmra.mxu1 %vm455_vm2, %v1166_v60  ;;  %1311 = vmatmul.msk.bf16.gmra.mxu3 %vm455_vm2, %v1238_v3  ;;  %v1340_v60 = vld [vmem:[%s1453_s28 + $0x64] sm:$0xf0]  ;;  %v1193_v3 = vld [vmem:[%s1453_s28 + $0x70] sm:$0xf] }
  0x4a   : > { %1030 = vperm.xlu1 %1389, %v777_v41   ;;  %1020 = vperm.xlu2 %1390, %v775_v38   ;;  %v1186_v63 = vor.u32 %v1340_v60, %v1185_v59 }
  0x4b   : > { %529 = vmatmul.bf16.gmra.mxu0 %v1154_v4  ;;  %569 = vmatmul.bf16.gmra.mxu2 %v1218_v5  ;;  %v1342_v4 = vld [vmem:[%s1453_s28 + $0x74] sm:$0xf0]  ;;  %s1326_s28 = sshll.u32 %s1862_s16, 5 }
  0x4c   : > { %v1194_v8 = vor.u32 %v1342_v4, %v1193_v3  ;;  %s1767_s16 = scalar_lea.vmem %s1860_s4, %s1326_s28 }
  0x52   : > { %1035 = vperm.xlu2 %1390, %v778_v53  }
  0x59   : > { %1303 = vmatmul.msk.bf16.gmra.mxu1 %vm455_vm2, %v1174_v12  ;;  %1312 = vmatmul.msk.bf16.gmra.mxu3 %vm455_vm2, %v1246_v19  ;;  %v1640_v12 = vld [vmem:[%s1858_s2] ss:$0 sm:$0xff] }
  0x5b   : > { %534 = vmatmul.bf16.gmra.mxu0 %v1162_v20  ;;  %574 = vmatmul.bf16.gmra.mxu2 %v1226_v21 }
  0x69   : > { %1304 = vmatmul.msk.bf16.gmra.mxu1 %vm455_vm2, %v1182_v27  ;;  %1313 = vmatmul.msk.bf16.gmra.mxu3 %vm455_vm2, %v1254_v34 }
  0x6b   : > { %539 = vmatmul.bf16.gmra.mxu0 %v1170_v35  ;;  %579 = vmatmul.bf16.gmra.mxu2 %v1234_v39 }
  0x79   : > { %1305 = vmatmul.msk.bf16.gmra.mxu1 %vm455_vm2, %v1190_v45  ;;  %1314 = vmatmul.msk.bf16.gmra.mxu3 %vm455_vm2, %v1262_v52 }
  0x7b   : > { %544 = vmatmul.bf16.gmra.mxu0 %v1178_v36  ;;  %584 = vmatmul.bf16.gmra.mxu2 %v1242_v56 }
  0x89   : > { %1306 = vmatmul.msk.bf16.gmra.mxu1 %vm455_vm2, %v1198_v58 }
  0x8b   : > { %549 = vmatmul.bf16.gmra.mxu0 %v1186_v63  ;;  %589 = vmatmul.bf16.gmra.mxu2 %v1250_v0 }
  0x96   : > { %v609_v5 = vpop.f32.mrf.mxu1 }
  0x99   : > { %1307 = vmatmul.msk.bf16.gmra.mxu1 %vm455_vm2, %v1206_v2 }
  0x9b   : > { %554 = vmatmul.bf16.gmra.mxu0 %v1194_v8  ;;  %594 = vmatmul.bf16.gmra.mxu2 %v1258_v9  ;;  %v1668_v9 = vpop.permute.xlu1 %823 }
  0x9c   : > { %v654_v13 = vpop.f32.mrf.mxu3 }
  0x9e   : > { %v611_v10 = vpop.f32.mrf.mxu1 }
  0xa4   : > { %v656_v22 = vpop.f32.mrf.mxu3 }
  0xa6   : > { %v614_v11 = vpop.f32.mrf.mxu1 }
  0xa8   : > { %v520_v14 = vpop.f32.mrf.mxu0 }
  0xa9   : > { %v521_v15 = vadd.f32 %v1640_v12, %v520_v14 }
  0xab   : > { %v610_v16 = vadd.f32 %v609_v5, %v521_v15 }
  0xac   : > { %v659_v30 = vpop.f32.mrf.mxu3 }
  0xad   : > { %v689_v17 = vmax.f32 %v610_v16, 0.0 }
  0xae   : > { %v616_v18 = vpop.f32.mrf.mxu1  ;;  %v1644_v19 = vpop.f32.mrf.mxu2 }
  0xaf   : > { %722 = vst.msk [vmem:[#allocation2] sm:$0xff] %vm721_vm3, %v689_v17 }
  0xb0   : > { %v522_v20 = vpop.f32.mrf.mxu0 }
  0xb1   : > { %v523_v21 = vadd.f32 %v1640_v12, %v522_v20 }
  0xb3   : > { %v612_v23 = vadd.f32 %v611_v10, %v523_v21  ;;  %v1672_v21 = vpop.permute.xlu0 %813 }
  0xb4   : > { %v661_v44 = vpop.f32.mrf.mxu3 }
  0xb5   : > { %v690_v24 = vmax.f32 %v612_v23, 0.0 }
  0xb6   : > { %v619_v25 = vpop.f32.mrf.mxu1  ;;  %v1648_v26 = vpop.f32.mrf.mxu2 }
  0xb7   : > { %723 = vst.msk [vmem:[#allocation2 + $0x8] sm:$0xff] %vm721_vm3, %v690_v24 }
  0xb8   : > { %v525_v27 = vpop.f32.mrf.mxu0 }
  0xb9   : > { %v526_v28 = vadd.f32 %v1640_v12, %v525_v27 }
  0xbb   : > { %v615_v29 = vadd.f32 %v614_v11, %v526_v28  ;;  %v1680_v28 = vpop.permute.xlu1 %828 }
  0xbc   : > { %v664_v56 = vpop.f32.mrf.mxu3 }
  0xbd   : > { %v691_v31 = vmax.f32 %v615_v29, 0.0 }
  0xbe   : > { %v621_v32 = vpop.f32.mrf.mxu1  ;;  %v565_v33 = vpop.f32.mrf.mxu2 }
  0xbf   : > { %724 = vst.msk [vmem:[#allocation2 + $0x10] sm:$0xff] %vm721_vm3, %v691_v31  ;;  %v566_v34 = vadd.f32 %v1640_v12, %v565_v33 }
  0xc0   : > { %v527_v35 = vpop.f32.mrf.mxu0 }
  0xc1   : > { %v528_v39 = vadd.f32 %v1640_v12, %v527_v35  ;;  %v655_v37 = vadd.f32 %v654_v13, %v566_v34 }
  0xc3   : > { %v617_v40 = vadd.f32 %v616_v18, %v528_v39  ;;  %v707_v41 = vmax.f32 %v655_v37, 0.0  ;;  %v1684_v39 = vpop.permute.xlu0 %818 }
  0xc4   : > { %v666_v2 = vpop.f32.mrf.mxu3 }
  0xc5   : > { %v692_v42 = vmax.f32 %v617_v40, 0.0  ;;  %740 = vst.msk [vmem:[#allocation2 + $0x90] sm:$0xff] %vm721_vm3, %v707_v41 }
  0xc6   : > { %v624_v43 = vpop.f32.mrf.mxu1  ;;  %v567_v45 = vpop.f32.mrf.mxu2 }
  0xc7   : > { %725 = vst.msk [vmem:[#allocation2 + $0x18] sm:$0xff] %vm721_vm3, %v692_v42  ;;  %v568_v46 = vadd.f32 %v1640_v12, %v567_v45  ;;  %v1690_v45 = vpop.permute.xlu1 %848 }
  0xc8   : > { %v530_v47 = vpop.f32.mrf.mxu0 }
  0xc9   : > { %v531_v38 = vadd.f32 %v1640_v12, %v530_v47  ;;  %v657_v48 = vadd.f32 %v656_v22, %v568_v46 }
  0xcb   : > { %v620_v49 = vadd.f32 %v619_v25, %v531_v38  ;;  %v708_v50 = vmax.f32 %v657_v48, 0.0  ;;  %v1677_v25 = vpop.permute.xlu2 %833 }
  0xcc   : > { %v669_v16 = vpop.f32.mrf.mxu3 }
  0xcd   : > { %v693_v51 = vmax.f32 %v620_v49, 0.0  ;;  %741 = vst.msk [vmem:[#allocation2 + $0x98] sm:$0xff] %vm721_vm3, %v708_v50 }
  0xce   : > { %v626_v36 = vpop.f32.mrf.mxu1  ;;  %v570_v52 = vpop.f32.mrf.mxu2 }
  0xcf   : > { %726 = vst.msk [vmem:[#allocation2 + $0x20] sm:$0xff] %vm721_vm3, %v693_v51  ;;  %v571_v53 = vadd.f32 %v1640_v12, %v570_v52  ;;  %v1696_v52 = vpop.permute.xlu0 %843 }
  0xd0   : > { %v532_v55 = vpop.f32.mrf.mxu0 }
  0xd1   : > { %v533_v57 = vadd.f32 %v1640_v12, %v532_v55  ;;  %v660_v58 = vadd.f32 %v659_v30, %v571_v53 }
  0xd3   : > { %v622_v59 = vadd.f32 %v621_v32, %v533_v57  ;;  %v709_v60 = vmax.f32 %v660_v58, 0.0 }
  0xd4   : > { %v671_v34 = vpop.f32.mrf.mxu3 }
  0xd5   : > { %v694_v61 = vmax.f32 %v622_v59, 0.0  ;;  %742 = vst.msk [vmem:[#allocation2 + $0xa0] sm:$0xff] %vm721_vm3, %v709_v60  ;;  %v1700_v60 = vpop.permute.xlu1 %896 }
  0xd6   : > { %v629_v62 = vpop.f32.mrf.mxu1  ;;  %v572_v63 = vpop.f32.mrf.mxu2 }
  0xd7   : > { %727 = vst.msk [vmem:[#allocation2 + $0x28] sm:$0xff] %vm721_vm3, %v694_v61  ;;  %v573_v0 = vadd.f32 %v1640_v12, %v572_v63 }
  0xd8   : > { %v535_v1 = vpop.f32.mrf.mxu0 }
  0xd9   : > { %v536_v54 = vadd.f32 %v1640_v12, %v535_v1  ;;  %v662_v3 = vadd.f32 %v661_v44, %v573_v0 }
  0xdb   : > { %v625_v4 = vadd.f32 %v624_v43, %v536_v54  ;;  %v710_v5 = vmax.f32 %v662_v3, 0.0  ;;  %v1688_v43 = vpop.permute.xlu2 %838  ;;  %v1706_v3 = vpop.permute.xlu0 %891 }
  0xdc   : > { %v674_v49 = vpop.f32.mrf.mxu3 }
  0xdd   : > { %v695_v6 = vmax.f32 %v625_v4, 0.0  ;;  %743 = vst.msk [vmem:[#allocation2 + $0xa8] sm:$0xff] %vm721_vm3, %v710_v5 }
  0xde   : > { %v631_v7 = vpop.f32.mrf.mxu1  ;;  %v575_v8 = vpop.f32.mrf.mxu2 }
  0xdf   : > { %728 = vst.msk [vmem:[#allocation2 + $0x30] sm:$0xff] %vm721_vm3, %v695_v6  ;;  %v576_v10 = vadd.f32 %v1640_v12, %v575_v8 }
  0xe0   : > { %v537_v11 = vpop.f32.mrf.mxu0 }
  0xe1   : > { %v538_v13 = vadd.f32 %v1640_v12, %v537_v11  ;;  %v665_v14 = vadd.f32 %v664_v56, %v576_v10  ;;  %v1712_v10 = vpop.permute.xlu1 %911 }
  0xe3   : > { %v627_v15 = vadd.f32 %v626_v36, %v538_v13  ;;  %v711_v17 = vmax.f32 %v665_v14, 0.0  ;;  %v1698_v57 = vpop.permute.xlu2 %886 }
  0xe4   : > { %v676_v1 = vpop.f32.mrf.mxu3 }
  0xe5   : > { %v696_v18 = vmax.f32 %v627_v15, 0.0  ;;  %744 = vst.msk [vmem:[#allocation2 + $0xb0] sm:$0xff] %vm721_vm3, %v711_v17 }
  0xe6   : > { %v634_v20 = vpop.f32.mrf.mxu1  ;;  %v577_v22 = vpop.f32.mrf.mxu2 }
  0xe7   : > { %729 = vst.msk [vmem:[#allocation2 + $0x38] sm:$0xff] %vm721_vm3, %v696_v18  ;;  %v578_v23 = vadd.f32 %v1640_v12, %v577_v22 }
  0xe8   : > { %v540_v24 = vpop.f32.mrf.mxu0 }
  0xe9   : > { %v541_v27 = vadd.f32 %v1640_v12, %v540_v24  ;;  %v667_v29 = vadd.f32 %v666_v2, %v578_v23  ;;  %v782_v23 = vld [vmem:[#allocation2 + $0x18] sm:$0xff]  ;;  %v1718_v24 = vpop.permute.xlu0 %906 }
  0xeb   : > { %v630_v30 = vadd.f32 %v629_v62, %v541_v27  ;;  %v712_v31 = vmax.f32 %v667_v29, 0.0 }
  0xec   : > { %v679_v17 = vpop.f32.mrf.mxu3 }
  0xed   : > { %v697_v32 = vmax.f32 %v630_v30, 0.0  ;;  %745 = vst.msk [vmem:[#allocation2 + $0xb8] sm:$0xff] %vm721_vm3, %v712_v31 }
  0xee   : > { %v636_v33 = vpop.f32.mrf.mxu1  ;;  %v580_v35 = vpop.f32.mrf.mxu2 }
  0xef   : > { %730 = vst.msk [vmem:[#allocation2 + $0x40] sm:$0xff] %vm721_vm3, %v697_v32  ;;  %v581_v37 = vadd.f32 %v1640_v12, %v580_v35  ;;  %v1727_v35 = vpop.permute.xlu1 %1000 }
  0xf0   : > { %v542_v40 = vpop.f32.mrf.mxu0 }
  0xf1   : > { %v543_v41 = vadd.f32 %v1640_v12, %v542_v40  ;;  %v670_v42 = vadd.f32 %v669_v16, %v581_v37 }
  0xf3   : > { %v632_v44 = vadd.f32 %v631_v7, %v543_v41  ;;  %v713_v46 = vmax.f32 %v670_v42, 0.0  ;;  %v902_v7 = vpop.permute.xlu2 %901 }
  0xf5   : > { %v698_v47 = vmax.f32 %v632_v44, 0.0  ;;  %746 = vst.msk [vmem:[#allocation2 + $0xc0] sm:$0xff] %vm721_vm3, %v713_v46  ;;  %v870_v44 = vld [vmem:[#allocation2 + $0x98] sm:$0xff] }
  0xf6   : > { %v639_v38 = vpop.f32.mrf.mxu1  ;;  %v582_v48 = vpop.f32.mrf.mxu2 }
  0xf7   : > { %731 = vst.msk [vmem:[#allocation2 + $0x48] sm:$0xff] %vm721_vm3, %v698_v47  ;;  %v583_v50 = vadd.f32 %v1640_v12, %v582_v48 }
  0xf8   : > { %v545_v51 = vpop.f32.mrf.mxu0 }
  0xf9   : > { %v546_v36 = vadd.f32 %v1640_v12, %v545_v51  ;;  %v672_v56 = vadd.f32 %v671_v34, %v583_v50  ;;  %v1725_v34 = vld [vmem:[#allocation2 + $0x90] sm:$0xff]  ;;  %v783_v51 = vld [vmem:[#allocation2 + $0x20] sm:$0xff] }
  0xfa   : > { %v927_v47 = vmul.f32 %v902_v7, %v1725_v34 }
  0xfb   : > { %v635_v53 = vadd.f32 %v634_v20, %v546_v36  ;;  %v714_v55 = vmax.f32 %v672_v56, 0.0  ;;  %v1721_v30 = vpop.permute.xlu2 %916 }
  0xfd   : > { %v699_v58 = vmax.f32 %v635_v53, 0.0  ;;  %747 = vst.msk [vmem:[#allocation2 + $0xc8] sm:$0xff] %vm721_vm3, %v714_v55 }
  0xfe   : > { %v641_v59 = vpop.f32.mrf.mxu1  ;;  %v585_v61 = vpop.f32.mrf.mxu2 }
  0xff   : > { %732 = vst.msk [vmem:[#allocation2 + $0x50] sm:$0xff] %vm721_vm3, %v699_v58  ;;  %v586_v62 = vadd.f32 %v1640_v12, %v585_v61  ;;  %v681_v58 = vpop.f32.mrf.mxu3 }
 0x100   : > { %v547_v63 = vpop.f32.mrf.mxu0 }
 0x101   : > { %v548_v0 = vadd.f32 %v1640_v12, %v547_v63  ;;  %v675_v54 = vadd.f32 %v674_v49, %v586_v62  ;;  %v561_v49 = vadd.f32 %v1640_v12, %v1644_v19 }
 0x103   : > { %v637_v2 = vadd.f32 %v636_v33, %v548_v0  ;;  %v715_v4 = vmax.f32 %v675_v54, 0.0 }
 0x105   : > { %v700_v5 = vmax.f32 %v637_v2, 0.0  ;;  %748 = vst.msk [vmem:[#allocation2 + $0xd0] sm:$0xff] %vm721_vm3, %v715_v4 }
 0x106   : > { %v1708_v6 = vpop.f32.mrf.mxu1  ;;  %v587_v8 = vpop.f32.mrf.mxu2 }
 0x107   : > { %733 = vst.msk [vmem:[#allocation2 + $0x58] sm:$0xff] %vm721_vm3, %v700_v5  ;;  %v588_v11 = vadd.f32 %v1640_v12, %v587_v8  ;;  %v1748_v8 = vpop.permute.xlu2 %1005 }
 0x108   : > { %v550_v13 = vpop.f32.mrf.mxu0 }
 0x109   : > { %v551_v14 = vadd.f32 %v1640_v12, %v550_v13  ;;  %v677_v15 = vadd.f32 %v676_v1, %v588_v11  ;;  %v1741_v1 = vpop.permute.xlu0 %921 }
 0x10b   : > { %v640_v16 = vadd.f32 %v639_v38, %v551_v14  ;;  %v716_v18 = vmax.f32 %v677_v15, 0.0 }
 0x10c   : > { %v1734_v36 = vld [vmem:[#allocation2 + $0xd0] sm:$0xff] }
 0x10d   : > { %v701_v20 = vmax.f32 %v640_v16, 0.0  ;;  %749 = vst.msk [vmem:[#allocation2 + $0xd8] sm:$0xff] %vm721_vm3, %v716_v18  ;;  %v1750_v11 = vld [vmem:[#allocation2 + $0xcf] sm:$0xff]  ;;  %v984_v16 = vmul.f32 %v1734_v36, %v902_v7  ;;  %v563_v7 = vadd.f32 %v1640_v12, %v1648_v26 }
 0x10e   : > { %v1716_v22 = vpop.f32.mrf.mxu1  ;;  %v790_v27 = vld [vmem:[#allocation2 + $0x58] sm:$0xff]  ;;  %v590_v33 = vpop.f32.mrf.mxu2 }
 0x10f   : > { %v806_v29 = vld [vmem:[#allocation2 + $0x57] sm:$0xff]  ;;  %v798_v31 = vmax.f32 %v782_v23, %v790_v27  ;;  %734 = vst.msk [vmem:[#allocation2 + $0x60] sm:$0xff] %vm721_vm3, %v701_v20  ;;  %v591_v37 = vadd.f32 %v1640_v12, %v590_v33  ;;  %v928_v20 = vmul.f32 %v1718_v24, %v870_v44  ;;  %v871_v23 = vld [vmem:[#allocation2 + $0xa0] sm:$0xff]  ;;  %v1016_v27 = vpop.permute.xlu1 %1015 }
 0x110   : > { %v854_v32 = vmul.f32 %v1680_v28, %v806_v29  ;;  %v552_v40 = vpop.f32.mrf.mxu0 }
 0x111   : > { %v553_v42 = vadd.f32 %v1640_v12, %v552_v40  ;;  %v680_v46 = vadd.f32 %v679_v17, %v591_v37  ;;  %v784_v40 = vld [vmem:[#allocation2 + $0x28] sm:$0xff] }
 0x112   : > { %v862_v41 = vmax.f32 %v798_v31, %v854_v32  ;;  %v1041_v31 = vmul.f32 %v1016_v27, %v1750_v11  ;;  %v872_v27 = vld [vmem:[#allocation2 + $0xa8] sm:$0xff] }
 0x113   : > { %v642_v48 = vadd.f32 %v641_v59, %v553_v42  ;;  %v717_v50 = vmax.f32 %v680_v46, 0.0  ;;  %v789_v42 = vld [vmem:[#allocation2 + $0x50] sm:$0xff] }
 0x114   : > { %v878_v38 = vmax.f32 %v862_v41, %v870_v44  ;;  %v1736_v53 = vld [vmem:[#allocation2 + $0xd7] sm:$0xff]  ;;  %v805_v46 = vld [vmem:[#allocation2 + $0x4f] sm:$0xff] }
 0x115   : > { %v702_v55 = vmax.f32 %v642_v48, 0.0  ;;  %v1738_v62 = vld [vmem:[#allocation2 + $0xd8] sm:$0xff]  ;;  %750 = vst.msk [vmem:[#allocation2 + $0xe0] sm:$0xff] %vm721_vm3, %v717_v50  ;;  %v967_v54 = vmul.f32 %v1736_v53, %v1680_v28 }
 0x116   : > { %v935_v56 = vmax.f32 %v878_v38, %v927_v47  ;;  %v649_v61 = vpop.f32.mrf.mxu1  ;;  %v791_v63 = vld [vmem:[#allocation2 + $0x60] sm:$0xff]  ;;  %v592_v5 = vpop.f32.mrf.mxu2 }
 0x117   : > { %v807_v0 = vld [vmem:[#allocation2 + $0x5f] sm:$0xff]  ;;  %v650_v59 = vadd.f32 %v649_v61, %v561_v49  ;;  %v799_v2 = vmax.f32 %v783_v51, %v791_v63  ;;  %735 = vst.msk [vmem:[#allocation2 + $0x68] sm:$0xff] %vm721_vm3, %v702_v55  ;;  %v593_v14 = vadd.f32 %v1640_v12, %v592_v5  ;;  %v781_v55 = vld [vmem:[#allocation2 + $0x10] sm:$0xff] }
 0x118   : > { %v951_v19 = vmax.f32 %v935_v56, %v1738_v62  ;;  %v855_v4 = vmul.f32 %v1677_v25, %v807_v0  ;;  %v555_v15 = vpop.f32.mrf.mxu0 }
 0x119   : > { %v705_v13 = vmax.f32 %v650_v59, 0.0  ;;  %v556_v28 = vadd.f32 %v1640_v12, %v555_v15  ;;  %v682_v29 = vadd.f32 %v681_v58, %v593_v14  ;;  %v684_v59 = vpop.f32.mrf.mxu3  ;;  %v788_v14 = vld [vmem:[#allocation2 + $0x48] sm:$0xff] }
 0x11a   : > { %v975_v17 = vmax.f32 %v951_v19, %v967_v54  ;;  %v863_v18 = vmax.f32 %v799_v2, %v855_v4  ;;  %v797_v54 = vmax.f32 %v781_v55, %v789_v42  ;;  %v1778_v2 = vpop.permute.xlu0 %1010  ;;  %v804_v15 = vld [vmem:[#allocation2 + $0x47] sm:$0xff] }
 0x11b   : > { %738 = vst.msk [vmem:[#allocation2 + $0x80] sm:$0xff] %vm721_vm3, %v705_v13  ;;  %v645_v37 = vadd.f32 %v1708_v6, %v556_v28  ;;  %v718_v41 = vmax.f32 %v682_v29, 0.0  ;;  %v1021_v29 = vpop.permute.xlu2 %1020  ;;  %v852_v42 = vmul.f32 %v1684_v39, %v804_v15 }
 0x11c   : > { %v992_v32 = vmax.f32 %v975_v17, %v984_v16  ;;  %v879_v33 = vmax.f32 %v863_v18, %v871_v23  ;;  %v1762_v38 = vld [vmem:[#allocation2 + $0xdf] sm:$0xff]  ;;  %v985_v16 = vmul.f32 %v1738_v62, %v1718_v24 }
 0x11d   : > { %v703_v48 = vmax.f32 %v645_v37, 0.0  ;;  %v1769_v6 = vld [vmem:[#allocation2 + $0xe0] sm:$0xff]  ;;  %v968_v26 = vmul.f32 %v1762_v38, %v1677_v25  ;;  %751 = vst.msk [vmem:[#allocation2 + $0xe8] sm:$0xff] %vm721_vm3, %v718_v41  ;;  %v853_v25 = vmul.f32 %v1668_v9, %v805_v46 }
 0x11e   : > { %v1049_v44 = vmax.f32 %v992_v32, %v1041_v31  ;;  %v936_v47 = vmax.f32 %v879_v33, %v928_v20  ;;  %v651_v49 = vpop.f32.mrf.mxu1  ;;  %v792_v50 = vld [vmem:[#allocation2 + $0x68] sm:$0xff]  ;;  %v595_v19 = vpop.f32.mrf.mxu2  ;;  %v929_v20 = vmul.f32 %v1712_v10, %v871_v23  ;;  %v787_v33 = vld [vmem:[#allocation2 + $0x40] sm:$0xff]  ;;  %v785_v23 = vld [vmem:[#allocation2 + $0x30] sm:$0xff] }
 0x11f   : > { %v808_v51 = vld [vmem:[#allocation2 + $0x67] sm:$0xff]  ;;  %v652_v56 = vadd.f32 %v651_v49, %v563_v7  ;;  %v800_v63 = vmax.f32 %v784_v40, %v792_v50  ;;  %736 = vst.msk [vmem:[#allocation2 + $0x70] sm:$0xff] %vm721_vm3, %v703_v48  ;;  %v596_v5 = vadd.f32 %v1640_v12, %v595_v19  ;;  %v803_v37 = vld [vmem:[#allocation2 + $0x3f] sm:$0xff]  ;;  %v1042_v7 = vmul.f32 %v1021_v29, %v1736_v53 }
 0x120   : > { %v1057_v58 = vpack.c.bf16 %v1049_v44, %v1049_v44  ;;  %v952_v61 = vmax.f32 %v936_v47, %v1769_v6  ;;  %v856_v0 = vmul.f32 %v1688_v43, %v808_v51  ;;  %v557_v13 = vpop.f32.mrf.mxu0  ;;  %v780_v32 = vld [vmem:[#allocation2 + $0x8] sm:$0xff]  ;;  %v779_v44 = vld [vmem:[#allocation2] sm:$0xff]  ;;  %v861_v47 = vmax.f32 %v797_v54, %v853_v25 }
 0x121   : > { %v706_v4 = vmax.f32 %v652_v56, 0.0  ;;  %v558_v28 = vadd.f32 %v1640_v12, %v557_v13  ;;  %v685_v31 = vadd.f32 %v684_v59, %v596_v5  ;;  %v796_v41 = vmax.f32 %v780_v32, %v788_v14  ;;  %v1806_v5 = vld [vmem:[#allocation2 + $0xc0] sm:$0xff] }
 0x122   : > { %1066 = vst.msk [vmem:[%s1767_s16 + $0xc] sm:$0xf] %vm1062_vm4, %v1057_v58  ;;  %v976_v17 = vmax.f32 %v952_v61, %v968_v26  ;;  %v864_v18 = vmax.f32 %v800_v63, %v856_v0  ;;  %v795_v51 = vmax.f32 %v779_v44, %v787_v33  ;;  %v851_v56 = vmul.f32 %v1672_v21, %v803_v37  ;;  %v1799_v63 = vld [vmem:[#allocation2 + $0x80] sm:$0xff] }
 0x123   : > { %739 = vst.msk [vmem:[#allocation2 + $0x88] sm:$0xff] %vm721_vm3, %v706_v4  ;;  %v647_v62 = vadd.f32 %v1716_v22, %v558_v28  ;;  %v719_v46 = vmax.f32 %v685_v31, 0.0  ;;  %v930_v25 = vmul.f32 %v1721_v30, %v872_v27  ;;  %v860_v4 = vmax.f32 %v796_v41, %v852_v42  ;;  %v873_v28 = vld [vmem:[#allocation2 + $0xb0] sm:$0xff]  ;;  %v957_v29 = vld [vmem:[#allocation2 + $0xc7] sm:$0xff]  ;;  %v786_v41 = vld [vmem:[#allocation2 + $0x38] sm:$0xff] }
 0x124   : > { %v993_v40 = vmax.f32 %v976_v17, %v985_v16  ;;  %v880_v24 = vmax.f32 %v864_v18, %v872_v27  ;;  %v1791_v26 = vld [vmem:[#allocation2 + $0xe7] sm:$0xff]  ;;  %v986_v13 = vmul.f32 %v1769_v6, %v1712_v10  ;;  %v877_v17 = vmax.f32 %v861_v47, %v1725_v34  ;;  %v686_v18 = vpop.f32.mrf.mxu3  ;;  %v1026_v27 = vpop.permute.xlu0 %1025  ;;  %v956_v42 = vld [vmem:[#allocation2 + $0xbf] sm:$0xff] }
 0x125   : > { %v704_v50 = vmax.f32 %v647_v62, 0.0  ;;  %v1794_v53 = vld [vmem:[#allocation2 + $0xe8] sm:$0xff]  ;;  %v969_v22 = vmul.f32 %v1791_v26, %v1688_v43  ;;  %752 = vst.msk [vmem:[#allocation2 + $0xf0] sm:$0xff] %vm721_vm3, %v719_v46  ;;  %v1043_v10 = vmul.f32 %v1026_v27, %v1762_v38  ;;  %v859_v6 = vmax.f32 %v795_v51, %v851_v56 }
 0x126   : > { %v1050_v48 = vmax.f32 %v993_v40, %v1042_v7  ;;  %v937_v49 = vmax.f32 %v880_v24, %v929_v20  ;;  %v793_v55 = vld [vmem:[#allocation2 + $0x70] sm:$0xff]  ;;  %v597_v54 = vpop.f32.mrf.mxu2  ;;  %v941_v20 = vld [vmem:[#allocation2 + $0xc8] sm:$0xff]  ;;  %v982_v34 = vmul.f32 %v1806_v5, %v1706_v3  ;;  %v965_v44 = vmul.f32 %v957_v29, %v1684_v39 }
 0x127   : > { %v809_v58 = vld [vmem:[#allocation2 + $0x6f] sm:$0xff]  ;;  %v801_v59 = vmax.f32 %v785_v23, %v793_v55  ;;  %737 = vst.msk [vmem:[#allocation2 + $0x78] sm:$0xff] %vm721_vm3, %v704_v50  ;;  %v598_v43 = vadd.f32 %v1640_v12, %v597_v54  ;;  %v925_v12 = vmul.f32 %v1706_v3, %v1799_v63  ;;  %v983_v46 = vmul.f32 %v941_v20, %v1700_v60  ;;  %v874_v54 = vld [vmem:[#allocation2 + $0xb8] sm:$0xff] }
 0x128   : > { %v1058_v61 = vpack.c.bf16 %v1050_v48, %v1050_v48  ;;  %v953_v0 = vmax.f32 %v937_v49, %v1794_v53  ;;  %v857_v19 = vmul.f32 %v1696_v52, %v809_v58  ;;  %v966_v38 = vmul.f32 %v1750_v11, %v1668_v9 }
 0x129   : > { %v687_v33 = vadd.f32 %v686_v18, %v598_v43  ;;  %v875_v49 = vmax.f32 %v859_v6, %v1799_v63  ;;  %v1039_v63 = vmul.f32 %v1748_v8, %v956_v42  ;;  %v981_v18 = vmul.f32 %v1698_v57, %v874_v54 }
 0x12a   : > { %1067 = vst.msk [vmem:[%s1767_s16 + $0x10] sm:$0xf] %vm1062_vm4, %v1058_v61  ;;  %v977_v14 = vmax.f32 %v953_v0, %v969_v22  ;;  %v865_v15 = vmax.f32 %v801_v59, %v857_v19  ;;  %v868_v16 = vld [vmem:[#allocation2 + $0x88] sm:$0xff]  ;;  %v987_v59 = vmul.f32 %v1794_v53, %v1721_v30 }
 0x12b   : > { %v876_v31 = vmax.f32 %v860_v4, %v868_v16  ;;  %v926_v32 = vmul.f32 %v1700_v60, %v868_v16  ;;  %v720_v62 = vmax.f32 %v687_v33, 0.0 }
 0x12c   : > { %v994_v37 = vmax.f32 %v977_v14, %v986_v13  ;;  %v881_v7 = vmax.f32 %v865_v15, %v873_v28  ;;  %v962_v48 = vld [vmem:[#allocation2 + $0xef] sm:$0xff]  ;;  %v931_v14 = vmul.f32 %v1741_v1, %v873_v28  ;;  %v964_v15 = vmul.f32 %v956_v42, %v1672_v21 }
 0x12d   : > { %v933_v40 = vmax.f32 %v876_v31, %v925_v12  ;;  %v934_v24 = vmax.f32 %v877_v17, %v926_v32  ;;  %v946_v51 = vld [vmem:[#allocation2 + $0xf0] sm:$0xff]  ;;  %753 = vst.msk [vmem:[#allocation2 + $0xf8] sm:$0xff] %vm721_vm3, %v720_v62  ;;  %v970_v39 = vmul.f32 %v962_v48, %v1696_v52 }
 0x12e   : > { %v1051_v23 = vmax.f32 %v994_v37, %v1043_v10  ;;  %v938_v47 = vmax.f32 %v881_v7, %v930_v25  ;;  %v794_v56 = vld [vmem:[#allocation2 + $0x78] sm:$0xff]  ;;  %v1031_v25 = vpop.permute.xlu1 %1030  ;;  %v988_v6 = vmul.f32 %v946_v51, %v1741_v1 }
 0x12f   : > { %v949_v50 = vmax.f32 %v933_v40, %v941_v20  ;;  %v950_v3 = vmax.f32 %v934_v24, %v1734_v36  ;;  %v810_v22 = vld [vmem:[#allocation2 + $0x77] sm:$0xff]  ;;  %v802_v58 = vmax.f32 %v786_v41, %v794_v56  ;;  %v924_v11 = vmul.f32 %v1698_v57, %v794_v56 }
 0x130   : > { %v1059_v60 = vpack.c.bf16 %v1051_v23, %v1051_v23  ;;  %v954_v55 = vmax.f32 %v938_v47, %v946_v51  ;;  %v858_v9 = vmul.f32 %v1690_v45, %v810_v22  ;;  %v1040_v36 = vmul.f32 %v1778_v2, %v957_v29  ;;  %v997_v20 = vld [vmem:[#allocation2 + $0xb7] sm:$0xff] }
 0x131   : > { %v973_v61 = vmax.f32 %v949_v50, %v965_v44  ;;  %v974_v0 = vmax.f32 %v950_v3, %v966_v38  ;;  %v932_v13 = vmax.f32 %v875_v49, %v924_v11  ;;  %v1044_v8 = vmul.f32 %v1031_v25, %v1791_v26 }
 0x132   : > { %1068 = vst.msk [vmem:[%s1767_s16 + $0x14] sm:$0xf] %vm1062_vm4, %v1059_v60  ;;  %v978_v19 = vmax.f32 %v954_v55, %v970_v39  ;;  %v866_v43 = vmax.f32 %v802_v58, %v858_v9  ;;  %v1038_v33 = vmul.f32 %v1727_v35, %v997_v20 }
 0x133   : > { %v990_v52 = vmax.f32 %v973_v61, %v982_v34  ;;  %v991_v4 = vmax.f32 %v974_v0, %v983_v46  ;;  %v948_v30 = vmax.f32 %v932_v13, %v1806_v5  ;;  %v1036_v34 = vpop.permute.xlu2 %1035 }
 0x134   : > { %v995_v16 = vmax.f32 %v978_v19, %v987_v59  ;;  %v882_v53 = vmax.f32 %v866_v43, %v874_v54  ;;  %v963_v27 = vld [vmem:[#allocation2 + $0xf7] sm:$0xff]  ;;  %v1045_v40 = vmul.f32 %v1036_v34, %v962_v48 }
 0x135   : > { %v1047_v2 = vmax.f32 %v990_v52, %v1039_v63  ;;  %v1048_v17 = vmax.f32 %v991_v4, %v1040_v36  ;;  %v972_v31 = vmax.f32 %v948_v30, %v964_v15  ;;  %v947_v26 = vld [vmem:[#allocation2 + $0xf8] sm:$0xff]  ;;  %v971_v57 = vmul.f32 %v963_v27, %v1690_v45 }
 0x136   : > { %v1052_v29 = vmax.f32 %v995_v16, %v1044_v8  ;;  %v939_v21 = vmax.f32 %v882_v53, %v931_v14 }
 0x137   : > { %v1055_v12 = vpack.c.bf16 %v1047_v2, %v1047_v2  ;;  %v1056_v28 = vpack.c.bf16 %v1048_v17, %v1048_v17  ;;  %v989_v5 = vmax.f32 %v972_v31, %v981_v18 }
 0x138   : > { %v1060_v32 = vpack.c.bf16 %v1052_v29, %v1052_v29  ;;  %v955_v10 = vmax.f32 %v939_v21, %v947_v26 }
 0x139   : > { %1064 = vst.msk [vmem:[%s1767_s16 + $0x4] sm:$0xf] %vm1062_vm4, %v1055_v12  ;;  %v1046_v37 = vmax.f32 %v989_v5, %v1038_v33 }
 0x13a   : > { %1065 = vst.msk [vmem:[%s1767_s16 + $0x8] sm:$0xf] %vm1062_vm4, %v1056_v28  ;;  %v979_v7 = vmax.f32 %v955_v10, %v971_v57 }
 0x13b   : > { %1069 = vst.msk [vmem:[%s1767_s16 + $0x18] sm:$0xf] %vm1062_vm4, %v1060_v32  ;;  %v1054_v24 = vpack.c.bf16 %v1046_v37, %v1046_v37 }
 0x13c   : > { %v996_v62 = vmax.f32 %v979_v7, %v988_v6 }
 0x13d   : > { %1063 = vst.msk [vmem:[%s1767_s16] sm:$0xf] %vm1062_vm4, %v1054_v24 }
 0x13e   : > { %v1053_v35 = vmax.f32 %v996_v62, %v1045_v40 }
 0x140   : > { %v1061_v41 = vpack.c.bf16 %v1053_v35, %v1053_v35 }
 0x142   : > { %1070 = vst.msk [vmem:[%s1767_s16 + $0x1c] sm:$0xf] %vm1062_vm4, %v1061_v41 }
 0x143 PF: > { %s14_s15 = sadd.s32 1, %s1398_s15  }
 0x144   : > { %p11_p4 = scmp.ge.s32.totalorder %s14_s15, 4  }
 0x146   :  { %13 = sbr.rel (!%p11_p4) target bundleno = 1 (0x1), region = 67 }

// kernel: ensemble_forward.7
= control target key start
LH: loop header
LB: loop body
LE: loop exit
PB: predicated region body
PF: predicated region fallthrough
CT: control target
= control target key end

     0   :  { %s2917_s15 = smov 0   ;;  %s4121_s0 = inlined_call_operand.vmem [shape: bf16[2,64,72], index: 0, kind: input, shape index: {}]   ;;  %s4122_s1 = inlined_call_operand.vmem [shape: bf16[72,8], index: 1, kind: input, shape index: {}]   ;;  %s4123_s2 = inlined_call_operand.vmem [shape: bf16[72,8], index: 2, kind: input, shape index: {}]   ;;  %s4124_s3 = inlined_call_operand.vmem [shape: f32[9,64,1], index: 3, kind: input, shape index: {}]   ;;  %s4125_s4 = inlined_call_operand.vmem [shape: bf16[2,64,8], index: 4, kind: output, shape index: {}]  }
   0x1 LB: > { %s2621_s16 = sadd.s32 4294967295, %s2886_s15   ;;  %p2625_p0 = scmp.ge.s32.totalorder %s2886_s15, 1  ;;  %s2886_s15 = sphi %s2917_s15, %s14_s15  }
   0x2   : > { %p162_p1 = scmp.lt.s32.totalorder %s2886_s15, 3 }
   0x4   : > { %p163_p2 = pnand %p2625_p0, %p162_p1 }
   0x5   : > { %p188_p3 = scmp.lt.s32.totalorder (!%p163_p2), %s2621_s16, 1  ;;  %s2890_s20 = smov (!%p163_p2), 32  }
   0x6   : > { %166 = sbr.rel (%p163_p2) target bundleno = 774 (0x306), region = 36 }
   0xb   : > { %v459_v0 = vld [vmem:[%s4124_s3 + $0x20] sm:$0xff]  ;;  %v457_v1 = vld [vmem:[%s4124_s3 + $0x10] sm:$0xff]  ;;  %v2888_v3 = vmov 0   ;;  %vm276_vm0 = vcmask 1043456   ;;  %v460_v10 = vld [vmem:[%s4124_s3 + $0x28] sm:$0xff]  ;;  %s4131_s16 = smov (!%p188_p3, %s2621_s16), 1 }
   0xc   : > { %v455_v2 = vld [vmem:[%s4124_s3] sm:$0xff]  ;;  %2879 = vset.pattern.permute.xlu2 %v2888_v3  ;;  %2878 = vset.pattern.permute.xlu1 %v2888_v3  ;;  %v467_v4 = vpack.c.bf16 %v459_v0, %v459_v0  ;;  %v465_v5 = vpack.c.bf16 %v457_v1, %v457_v1  ;;  %v458_v11 = vld [vmem:[%s4124_s3 + $0x18] sm:$0xff]  ;;  %v456_v12 = vld [vmem:[%s4124_s3 + $0x8] sm:$0xff]  ;;  %v468_v15 = vpack.c.bf16 %v460_v10, %v460_v10  ;;  %s2776_s19 = sshll.u32 %s4131_s16, 5  ;;  %vm263_vm1 = vcmask 588800  }
   0xd   : > { %v463_v6 = vpack.c.bf16 %v455_v2, %v455_v2  ;;  %v215_v7 = vld [vmem:[%s4122_s1 + $0x20] sm:$0xf]  ;;  %2877 = vset.pattern.permute.xlu0 %v2888_v3  ;;  %v2785_v14 = vld [vmem:[%s4122_s1 + $0x18] sm:$0xff]  ;;  %v466_v16 = vpack.c.bf16 %v458_v11, %v458_v11  ;;  %v464_v17 = vpack.c.bf16 %v456_v12, %v456_v12  ;;  %v2784_v18 = vld [vmem:[%s4122_s1 + $0x10] sm:$0xff]  ;;  %s2983_s24 = scalar_lea.vmem %s4121_s0, %s2776_s19  ;;  %vm325_vm2 = vcmask 60416   ;;  %s197_s23 = scalar_lea.vmem %s4125_s4, %s2776_s19 }
   0xe   : > { %v253_v8 = vunpack.c.l.b16 %v215_v7  ;;  %509 = vperm.xlu2 %2879, %v467_v4   ;;  %491 = vperm.xlu1 %2878, %v465_v5   ;;  %v2671_v19 = vld [vmem:[%s4124_s3 + $0x48] sm:$0xff]  ;;  %v462_v20 = vld [vmem:[%s4124_s3 + $0x38] sm:$0xff]  ;;  %v461_v21 = vld [vmem:[%s4124_s3 + $0x30] sm:$0xff]  ;;  %326 = vst.msk [vmem:[#allocation2] sm:$0xf] %vm325_vm2, %v2888_v3  ;;  %vm780_vm8 = vcmask 1040384  }
   0xf   : > { %473 = vperm.xlu0 %2877, %v463_v6   ;;  %v2783_v22 = vld [vmem:[%s4122_s1 + $0x8] sm:$0xff]  ;;  %v676_v23 = vpack.c.bf16 %v2671_v19, %v2671_v19  ;;  %v470_v24 = vpack.c.bf16 %v462_v20, %v462_v20  ;;  %v469_v25 = vpack.c.bf16 %v461_v21, %v461_v21  ;;  %v2782_v26 = vld [vmem:[%s4122_s1] sm:$0xff]  ;;  %v2672_v29 = vld [vmem:[%s4124_s3 + $0x50] sm:$0xff]  ;;  %327 = vst.msk [vmem:[#allocation2 + $0x4] sm:$0xf] %vm325_vm2, %v2888_v3  ;;  %vm1048_vm9 = vcmask 1041408  }
  0x10   : > { %v258_v9 = vpack.c.b16 %v253_v8, %v253_v8  ;;  %v2674_v27 = vld [vmem:[%s4124_s3 + $0x60] sm:$0xff]  ;;  %v677_v33 = vpack.c.bf16 %v2672_v29, %v2672_v29  ;;  %v2677_v34 = vld [vmem:[%s4124_s3 + $0x78] sm:$0xff]  ;;  %v2675_v36 = vld [vmem:[%s4124_s3 + $0x68] sm:$0xff]  ;;  %328 = vst.msk [vmem:[#allocation2 + $0x8] sm:$0xf] %vm325_vm2, %v2888_v3  ;;  %vm572_vm10 = vcmask 64512  }
  0x11   : > { %v2670_v28 = vld [vmem:[%s4124_s3 + $0x40] sm:$0xff]  ;;  %v679_v31 = vpack.c.bf16 %v2674_v27, %v2674_v27  ;;  %v2673_v35 = vld [vmem:[%s4124_s3 + $0x58] sm:$0xff]  ;;  %v682_v37 = vpack.c.bf16 %v2677_v34, %v2677_v34  ;;  %v680_v39 = vpack.c.bf16 %v2675_v36, %v2675_v36  ;;  %v2676_v41 = vld [vmem:[%s4124_s3 + $0x70] sm:$0xff]  ;;  %329 = vst.msk [vmem:[#allocation2 + $0xc] sm:$0xf] %vm325_vm2, %v2888_v3  ;;  %vm336_vm11 = vcmask 57344  }
  0x12   : > { %v278_v13 = vsel %vm276_vm0, %v258_v9, 0  ;;  %v2778_v30 = vld [vmem:[%s2983_s24] sm:$0xff]  ;;  %v675_v32 = vpack.c.bf16 %v2670_v28, %v2670_v28  ;;  %v678_v38 = vpack.c.bf16 %v2673_v35, %v2673_v35  ;;  %v2683_v42 = vld [vmem:[%s4124_s3 + $0x88] sm:$0xff]  ;;  %v681_v45 = vpack.c.bf16 %v2676_v41, %v2676_v41  ;;  %v2685_v47 = vld [vmem:[%s4124_s3 + $0x98] sm:$0xff]  ;;  %330 = vst.msk [vmem:[#allocation2 + $0x10] sm:$0xf] %vm325_vm2, %v2888_v3 }
  0x13   : > { %283 = vmatpush.bf16.msra.mxu0 %v278_v13  ;;  %v2682_v40 = vld [vmem:[%s4124_s3 + $0x80] sm:$0xff]  ;;  %v2779_v43 = vld [vmem:[%s2983_s24 + $0x8] sm:$0xff]  ;;  %v952_v46 = vpack.c.bf16 %v2683_v42, %v2683_v42  ;;  %v2684_v48 = vld [vmem:[%s4124_s3 + $0x90] sm:$0xff]  ;;  %v954_v50 = vpack.c.bf16 %v2685_v47, %v2685_v47  ;;  %331 = vst.msk [vmem:[#allocation2 + $0x14] sm:$0xf] %vm325_vm2, %v2888_v3  ;;  %vm1093_vm14 = vcmask 1046528  }
  0x14   : > { %v951_v44 = vpack.c.bf16 %v2682_v40, %v2682_v40  ;;  %v2686_v49 = vld [vmem:[%s4124_s3 + $0xa0] sm:$0xff]  ;;  %v953_v51 = vpack.c.bf16 %v2684_v48, %v2684_v48  ;;  %v2688_v53 = vld [vmem:[%s4124_s3 + $0xb0] sm:$0xff]  ;;  %v2687_v54 = vld [vmem:[%s4124_s3 + $0xa8] sm:$0xff]  ;;  %332 = vst.msk [vmem:[#allocation2 + $0x18] sm:$0xf] %vm325_vm2, %v2888_v3 }
  0x15   : > { %v955_v52 = vpack.c.bf16 %v2686_v49, %v2686_v49  ;;  %v2689_v55 = vld [vmem:[%s4124_s3 + $0xb8] sm:$0xff]  ;;  %v2780_v56 = vld [vmem:[%s2983_s24 + $0x10] sm:$0xff]  ;;  %v957_v57 = vpack.c.bf16 %v2688_v53, %v2688_v53  ;;  %v956_v58 = vpack.c.bf16 %v2687_v54, %v2687_v54  ;;  %v2695_v61 = vld [vmem:[%s4124_s3 + $0xc8] sm:$0xff]  ;;  %333 = vst.msk [vmem:[#allocation2 + $0x1c] sm:$0xf] %vm325_vm2, %v2888_v3 }
  0x16   : > { %518 = vperm.xlu2 %2879, %v468_v15   ;;  %500 = vperm.xlu1 %2878, %v466_v16   ;;  %v958_v59 = vpack.c.bf16 %v2689_v55, %v2689_v55  ;;  %v2696_v60 = vld [vmem:[%s4124_s3 + $0xd0] sm:$0xff]  ;;  %v2694_v62 = vld [vmem:[%s4124_s3 + $0xc0] sm:$0xff]  ;;  %v1198_v0 = vpack.c.bf16 %v2695_v61, %v2695_v61  ;;  %v2699_v2 = vld [vmem:[%s4124_s3 + $0xe8] sm:$0xff]  ;;  %334 = vst.msk [vmem:[#allocation2 + $0x20] sm:$0xf] %vm325_vm2, %v2888_v3 }
  0x17   : > { %284 = vmatpush.bf16.msra.mxu0 %v2785_v14  ;;  %482 = vperm.xlu0 %2877, %v464_v17   ;;  %v1199_v63 = vpack.c.bf16 %v2696_v60, %v2696_v60  ;;  %v1197_v1 = vpack.c.bf16 %v2694_v62, %v2694_v62  ;;  %v2698_v4 = vld [vmem:[%s4124_s3 + $0xe0] sm:$0xff]  ;;  %v2697_v5 = vld [vmem:[%s4124_s3 + $0xd8] sm:$0xff]  ;;  %v1202_v7 = vpack.c.bf16 %v2699_v2, %v2699_v2  ;;  %v2728_v10 = vld [vmem:[%s4124_s3 + $0x150] sm:$0xff]  ;;  %vm430_vm3 = vsmask.f32 7938 }
  0x18   : > { %v2781_v6 = vld [vmem:[%s2983_s24 + $0x18] sm:$0xff]  ;;  %v1201_v8 = vpack.c.bf16 %v2698_v4, %v2698_v4  ;;  %v1200_v9 = vpack.c.bf16 %v2697_v5, %v2697_v5  ;;  %v2700_v12 = vld [vmem:[%s4124_s3 + $0xf0] sm:$0xff]  ;;  %v1548_v13 = vpack.c.bf16 %v2728_v10, %v2728_v10  ;;  %v2751_v16 = vld [vmem:[%s4124_s3 + $0x1c8] sm:$0xff]  ;;  %335 = vst.msk [vmem:[#allocation2 + $0x24] sm:$0xf] %vm325_vm2, %v2888_v3 }
  0x19   : > { %v2701_v11 = vld [vmem:[%s4124_s3 + $0xf8] sm:$0xff]  ;;  %v1203_v15 = vpack.c.bf16 %v2700_v12, %v2700_v12  ;;  %v2727_v17 = vld [vmem:[%s4124_s3 + $0x148] sm:$0xff]  ;;  %v2003_v19 = vpack.c.bf16 %v2751_v16, %v2751_v16  ;;  %v2730_v36 = vld [vmem:[%s4124_s3 + $0x160] sm:$0xff]  ;;  %vm346_vm5 = vsmask.f32 256 }
  0x1a   : > { %v1204_v14 = vpack.c.bf16 %v2701_v11, %v2701_v11  ;;  %v1547_v20 = vpack.c.bf16 %v2727_v17, %v2727_v17  ;;  %v2753_v29 = vld [vmem:[%s4124_s3 + $0x1d8] sm:$0xff]  ;;  %v1550_v40 = vpack.c.bf16 %v2730_v36, %v2730_v36  ;;  %v2738_v47 = vld [vmem:[%s4124_s3 + $0x180] sm:$0xff]  ;;  %v2731_v55 = vld [vmem:[%s4124_s3 + $0x168] sm:$0xff]  ;;  %vm347_vm6 = vsmask.f32 4368 }
  0x1b   : > { %285 = vmatpush.bf16.msra.mxu0 %v2784_v18  ;;  %v2726_v18 = vld [vmem:[%s4124_s3 + $0x140] sm:$0xff]  ;;  %v1551_v60 = vpack.c.bf16 %v2731_v55, %v2731_v55  ;;  %v2733_v61 = vld [vmem:[%s4124_s3 + $0x178] sm:$0xff]  ;;  %v2732_v10 = vld [vmem:[%s4124_s3 + $0x170] sm:$0xff]  ;;  %337 = vst.msk [vmem:[#allocation2 + $0x28] sm:$0x1] %vm336_vm11, %v2888_v3 }
  0x1c   : > { %v1546_v21 = vpack.c.bf16 %v2726_v18, %v2726_v18  ;;  %v2766_v54 = vld [vmem:[%s4124_s3 + $0x220] sm:$0xff]  ;;  %v1553_v4 = vpack.c.bf16 %v2733_v61, %v2733_v61  ;;  %v2741_v11 = vld [vmem:[%s4124_s3 + $0x198] sm:$0xff]  ;;  %v1552_v18 = vpack.c.bf16 %v2732_v10, %v2732_v10  ;;  %vm431_vm4 = vmand %vm325_vm2, %vm430_vm3  ;;  %vm820_vm12 = vsmask.f32 7424 }
  0x1d   : > { %v819_v12 = vld [vmem:[%s4123_s2 + $0x4] sm:$0xf]  ;;  %vm3267_vm7 = vmor %vm346_vm5, %vm347_vm6 }
  0x1e   : > { %694 = vperm.xlu2 %2879, %v676_v23   ;;  %536 = vperm.xlu1 %2878, %v470_v24   ;;  %v2750_v24 = vld [vmem:[%s4124_s3 + $0x1c0] sm:$0xff]  ;;  %vm3526_vm13 = vmand %vm336_vm11, %vm346_vm5 }
  0x1f   : > { %286 = vmatpush.bf16.msra.mxu0 %v2783_v22  ;;  %527 = vperm.xlu0 %2877, %v469_v25   ;;  %v2764_v22 = vld [vmem:[%s4124_s3 + $0x210] sm:$0xff]  ;;  %v2729_v25 = vld [vmem:[%s4124_s3 + $0x158] sm:$0xff]  ;;  %v2002_v27 = vpack.c.bf16 %v2750_v24, %v2750_v24 }
  0x20   : > { %v1549_v28 = vpack.c.bf16 %v2729_v25, %v2729_v25  ;;  %v2768_v24 = vld [vmem:[%s4124_s3 + $0x230] sm:$0xff] }
  0x23   : > { %287 = vmatpush.bf16.msra.mxu0 %v2782_v26  ;;  %v2278_v26 = vpack.c.bf16 %v2764_v22, %v2764_v22  ;;  %v2769_v22 = vld [vmem:[%s4124_s3 + $0x238] sm:$0xff] }
  0x26   : > { %2662 = vmatmul.msk.bf16.vlgmr.msra.gmra.mxu0 %vm263_vm1, %v2778_v30  ;;  %721 = vperm.xlu2 %2879, %v679_v31   ;;  %v2763_v31 = vld [vmem:[%s4124_s3 + $0x208] sm:$0xff] }
  0x27   : > { %685 = vperm.xlu1 %2878, %v675_v32   ;;  %703 = vperm.xlu0 %2877, %v677_v33   ;;  %v2762_v32 = vld [vmem:[%s4124_s3 + $0x200] sm:$0xff]  ;;  %v2005_v33 = vpack.c.bf16 %v2753_v29, %v2753_v29  ;;  %v2277_v34 = vpack.c.bf16 %v2763_v31, %v2763_v31  ;;  %v2283_v31 = vpack.c.bf16 %v2769_v22, %v2769_v22 }
  0x28   : > { %v2276_v35 = vpack.c.bf16 %v2762_v32, %v2762_v32  ;;  %v2282_v32 = vpack.c.bf16 %v2768_v24, %v2768_v24 }
  0x2e   : > { %748 = vperm.xlu2 %2879, %v682_v37  }
  0x2f   : > { %712 = vperm.xlu1 %2878, %v678_v38   ;;  %730 = vperm.xlu0 %2877, %v680_v39   ;;  %v2752_v38 = vld [vmem:[%s4124_s3 + $0x1d0] sm:$0xff]  ;;  %v2765_v39 = vld [vmem:[%s4124_s3 + $0x218] sm:$0xff] }
  0x30   : > { %v2004_v41 = vpack.c.bf16 %v2752_v38, %v2752_v38  ;;  %v2279_v42 = vpack.c.bf16 %v2765_v39, %v2765_v39 }
  0x36   : > { %2663 = vmatmul.msk.bf16.gmra.mxu0 %vm263_vm1, %v2779_v43  ;;  %961 = vperm.xlu2 %2879, %v951_v44   ;;  %v2767_v43 = vld [vmem:[%s4124_s3 + $0x228] sm:$0xff] }
  0x37   : > { %739 = vperm.xlu1 %2878, %v681_v45   ;;  %970 = vperm.xlu0 %2877, %v952_v46   ;;  %v2739_v46 = vld [vmem:[%s4124_s3 + $0x188] sm:$0xff]  ;;  %v2281_v49 = vpack.c.bf16 %v2767_v43, %v2767_v43 }
  0x3e   : > { %988 = vperm.xlu2 %2879, %v954_v50   ;;  %v1799_v50 = vpack.c.bf16 %v2739_v46, %v2739_v46 }
  0x3f   : > { %979 = vperm.xlu1 %2878, %v953_v51   ;;  %997 = vperm.xlu0 %2877, %v955_v52   ;;  %v1798_v51 = vpack.c.bf16 %v2738_v47, %v2738_v47  ;;  %v2740_v52 = vld [vmem:[%s4124_s3 + $0x190] sm:$0xff] }
  0x46   : > { %2664 = vmatmul.msk.bf16.gmra.mxu0 %vm263_vm1, %v2780_v56  ;;  %1015 = vperm.xlu2 %2879, %v957_v57  }
  0x47   : > { %1006 = vperm.xlu1 %2878, %v956_v58   ;;  %1024 = vperm.xlu0 %2877, %v958_v59   ;;  %v1800_v58 = vpack.c.bf16 %v2740_v52, %v2740_v52  ;;  %v2280_v59 = vpack.c.bf16 %v2766_v54, %v2766_v54 }
  0x4e   : > { %1225 = vperm.xlu2 %2879, %v1199_v63   ;;  %v2755_v63 = vld [vmem:[%s4124_s3 + $0x1e8] sm:$0xff] }
  0x4f   : > { %1216 = vperm.xlu1 %2878, %v1198_v0   ;;  %1207 = vperm.xlu0 %2877, %v1197_v1   ;;  %v2754_v0 = vld [vmem:[%s4124_s3 + $0x1e0] sm:$0xff]  ;;  %v2007_v5 = vpack.c.bf16 %v2755_v63, %v2755_v63 }
  0x56   : > { %2665 = vmatmul.msk.bf16.gmra.mxu0 %vm263_vm1, %v2781_v6  ;;  %1252 = vperm.xlu2 %2879, %v1202_v7   ;;  %v2006_v6 = vpack.c.bf16 %v2754_v0, %v2754_v0  ;;  %v2756_v7 = vld [vmem:[%s4124_s3 + $0x1f0] sm:$0xff] }
  0x57   : > { %1243 = vperm.xlu1 %2878, %v1201_v8   ;;  %1234 = vperm.xlu0 %2877, %v1200_v9   ;;  %v571_v8 = vld [vmem:[%s4123_s2] sm:$0xf]  ;;  %v2008_v17 = vpack.c.bf16 %v2756_v7, %v2756_v7 }
  0x58   : > { %v586_v16 = vsel %vm276_vm0, %v571_v8, 0 }
  0x59   : > { %595 = vmatpush.bf16.msra.mxu1 %v586_v16  ;;  %2863 = vmatpush.bf16.msra.mxu3 %v586_v16 }
  0x5e   : > { %1574 = vperm.xlu2 %2879, %v1548_v13  }
  0x5f   : > { %1270 = vperm.xlu1 %2878, %v1204_v14   ;;  %1261 = vperm.xlu0 %2877, %v1203_v15   ;;  %v870_v15 = vsel %vm276_vm0, %v819_v12, 0  ;;  %v2744_v12 = vld [vmem:[%s4124_s3 + $0x1b0] sm:$0xff] }
  0x60   : > { %879 = vmatpush.bf16.msrb.mxu0 %v870_v15  ;;  %2864 = vmatpush.bf16.msra.mxu2 %v870_v15 }
  0x66   : > { %2021 = vperm.xlu2 %2879, %v2003_v19   ;;  %v1801_v19 = vpack.c.bf16 %v2741_v11, %v2741_v11  ;;  %v2745_v11 = vld [vmem:[%s4124_s3 + $0x1b8] sm:$0xff] }
  0x67   : > { %1565 = vperm.xlu1 %2878, %v1547_v20   ;;  %1556 = vperm.xlu0 %2877, %v1546_v21   ;;  %v2743_v20 = vld [vmem:[%s4124_s3 + $0x1a8] sm:$0xff] }
  0x68   : > { %v3077_v23 = vpop.permute.xlu2 %509 }
  0x6e   : > { %2304 = vperm.xlu2 %2879, %v2278_v26  }
  0x6f   : > { %2012 = vperm.xlu1 %2878, %v2002_v27   ;;  %1583 = vperm.xlu0 %2877, %v1549_v28   ;;  %v1803_v28 = vpack.c.bf16 %v2743_v20, %v2743_v20 }
  0x70   : > { %v3092_v30 = vpop.permute.xlu2 %518 }
  0x76   : > { %2039 = vperm.xlu2 %2879, %v2005_v33   ;;  %v2889_v33 = vmov 839922192  }
  0x77   : > { %2295 = vperm.xlu1 %2878, %v2277_v34   ;;  %2286 = vperm.xlu0 %2877, %v2276_v35   ;;  %v477_v34 = vunpack.c.l.s4 %v2889_v33 }
  0x78   : > { %v3119_v37 = vpop.permute.xlu2 %694 }
  0x79   : > { %v3210_v39 = vunpack.c.0.s8 %v477_v34 }
  0x7b   : > { %v515_v61 = vperm.slane %v3077_v23, %v3210_v39 }
  0x7d   : > { %v3253_v15 = vunpack.c.l.bf16 %v515_v61 }
  0x7e   : > { %1592 = vperm.xlu2 %2879, %v1550_v40  }
  0x7f   : > { %2030 = vperm.xlu1 %2878, %v2004_v41   ;;  %2313 = vperm.xlu0 %2877, %v2279_v42   ;;  %v2742_v41 = vld [vmem:[%s4124_s3 + $0x1a0] sm:$0xff]  ;;  %v2757_v42 = vld [vmem:[%s4124_s3 + $0x1f8] sm:$0xff] }
  0x80   : > { %v3130_v44 = vpop.permute.xlu2 %721  ;;  %v3132_v45 = vpop.permute.xlu1 %491 }
  0x81   : > { %v3140_v48 = vpop.permute.xlu0 %473  ;;  %v727_v8 = vperm.slane %v3130_v44, %v3210_v39  ;;  %v497_v23 = vperm.slane %v3132_v45, %v3210_v39 }
  0x82   : > { %v479_v44 = vperm.slane %v3140_v48, %v3210_v39 }
  0x83   : > { %v3273_v33 = vunpack.c.l.bf16 %v497_v23 }
  0x86   : > { %2331 = vperm.xlu2 %2879, %v2281_v49   ;;  %v1298_v49 = vld [vmem:[%s4123_s2 + $0xc] sm:$0xf] }
  0x87   : > { %1817 = vperm.xlu1 %2878, %v1799_v50   ;;  %1808 = vperm.xlu0 %2877, %v1798_v51   ;;  %v700_v50 = vperm.slane %v3119_v37, %v3210_v39  ;;  %v432_v51 = vld [vmem:[#allocation2 + $0x4] sm:$0xf]  ;;  %v1312_v54 = vsel %vm276_vm0, %v1298_v49, 0 }
  0x88   : > { %v3145_v53 = vpop.permute.xlu2 %748  ;;  %v3153_v56 = vpop.permute.xlu1 %500  ;;  %1321 = vmatpush.bf16.msrb.mxu1 %v1312_v54 }
  0x89   : > { %v3155_v57 = vpop.permute.xlu0 %482  ;;  %v3235_v37 = vunpack.c.l.bf16 %v700_v50 }
  0x8a   : > { %v488_v20 = vperm.slane %v3155_v57, %v3210_v39  ;;  %v551_v57 = vunpack.c.l.bf16 %v479_v44 }
  0x8e   : > { %1826 = vperm.xlu2 %2879, %v1800_v58  }
  0x8f   : > { %2322 = vperm.xlu1 %2878, %v2280_v59   ;;  %1601 = vperm.xlu0 %2877, %v1551_v60   ;;  %v1802_v59 = vpack.c.bf16 %v2742_v41, %v2742_v41  ;;  %v2009_v60 = vpack.c.bf16 %v2757_v42, %v2757_v42 }
  0x90   : > { %v3160_v62 = vpop.permute.xlu2 %961  ;;  %v3168_v1 = vpop.permute.xlu1 %536 }
  0x91   : > { %v3170_v2 = vpop.permute.xlu0 %527 }
  0x96   : > { %1619 = vperm.xlu2 %2879, %v1553_v4   ;;  %v524_v4 = vperm.slane %v3092_v30, %v3210_v39 }
  0x97   : > { %2057 = vperm.xlu1 %2878, %v2007_v5   ;;  %2048 = vperm.xlu0 %2877, %v2006_v6   ;;  %v3237_v5 = vld [vmem:[#allocation2] sm:$0xe] }
  0x98   : > { %v3178_v9 = vpop.permute.xlu2 %988  ;;  %v1031_v22 = vunpack.c.l.bf16 %v3237_v5 }
  0x99   : > { %v3189_v13 = vpop.permute.xlu1 %685  ;;  %v3191_v14 = vpop.permute.xlu0 %703 }
  0x9a   : > { %v691_v30 = vperm.slane %v3189_v13, %v3210_v39 }
  0x9c   : > { %v764_v34 = vunpack.c.l.bf16 %v691_v30 }
  0x9e   : > { %2066 = vperm.xlu2 %2879, %v2008_v17  }
  0x9f   : > { %1610 = vperm.xlu1 %2878, %v1552_v18   ;;  %1835 = vperm.xlu0 %2877, %v1801_v19   ;;  %v3259_v18 = vunpack.c.l.bf16 %v524_v4  ;;  %v782_v19 = vrot.slane %v3235_v37, 7 }
  0xa0   : > { %v3198_v21 = vpop.permute.xlu2 %1015 }
  0xa1   : > { %v3206_v25 = vpop.permute.xlu1 %712  ;;  %v3208_v26 = vpop.permute.xlu0 %730  ;;  %v1021_v42 = vperm.slane %v3198_v21, %v3210_v39 }
  0xa2   : > { %v718_v21 = vperm.slane %v3206_v25, %v3210_v39  ;;  %v967_v25 = vperm.slane %v3160_v62, %v3210_v39  ;;  %v736_v3 = vperm.slane %v3208_v26, %v3210_v39 }
  0xa3   : > { %v289_v27 = vpop.f32.mrf.mxu0 }
  0xa4   : > { %v309_v29 = vmax.f32 %v289_v27, 0.0 }
  0xa6   : > { %v338_v35 = vpack.c.bf16 %v309_v29, %v309_v29  ;;  %1853 = vperm.xlu2 %2879, %v1803_v28   ;;  %v1805_v29 = vpack.c.bf16 %v2745_v11, %v2745_v11 }
  0xa7   : > { %2349 = vperm.xlu1 %2878, %v2283_v31   ;;  %2340 = vperm.xlu0 %2877, %v2282_v32   ;;  %v1804_v31 = vpack.c.bf16 %v2744_v12, %v2744_v12  ;;  %v3271_v32 = vunpack.c.l.bf16 %v727_v8 }
  0xa8   : > { %v350_v36 = vshrl.u32 %v338_v35, 16  ;;  %v353_v38 = vshll.u32 %v338_v35, 16  ;;  %v3212_v40 = vpop.permute.xlu2 %1225  ;;  %v754_v35 = vperm.slane %v3145_v53, %v3210_v39 }
  0xa9   : > { %v3220_v46 = vpop.permute.xlu1 %739  ;;  %v3222_v47 = vpop.permute.xlu0 %970 }
  0xaa   : > { %v352_v43 = vrot.slane %v350_v36, 7 }
  0xab   : > { %v291_v52 = vpop.f32.mrf.mxu0 }
  0xac   : > { %v355_v55 = vor.u32 %v353_v38, %v352_v43  ;;  %v310_v58 = vmax.f32 %v291_v52, 0.0  ;;  %v356_v16 = vrot.slane %v352_v43, 4  ;;  %v552_v52 = vunpack.c.l.bf16 %v488_v20 }
  0xae   : > { %v433_v63 = vsel %vm431_vm4, %v355_v55, %v432_v51  ;;  %v339_v0 = vpack.c.bf16 %v310_v58, %v310_v58  ;;  %v506_v51 = vperm.slane %v3153_v56, %v3210_v39  ;;  %v781_v58 = vrot.slane %v764_v34, 7 }
  0xaf   : > { %434 = vst [vmem:[#allocation2 + $0x4] sm:$0xf] %v433_v63  ;;  %1844 = vperm.xlu1 %2878, %v1802_v59   ;;  %2075 = vperm.xlu0 %2877, %v2009_v60   ;;  %v709_v59 = vperm.slane %v3191_v14, %v3210_v39 }
  0xb0   : > { %v358_v6 = vshrl.u32 %v339_v0, 16  ;;  %v361_v7 = vshll.u32 %v339_v0, 16  ;;  %v3245_v10 = vpop.permute.xlu2 %1252  ;;  %v783_v20 = vsel %vm780_vm8, %v781_v58, %v782_v19 }
  0xb1   : > { %v3257_v17 = vpop.permute.xlu1 %979  ;;  %v998_v13 = vpop.permute.xlu0 %997  ;;  %v766_v44 = vunpack.c.l.bf16 %v709_v59 }
  0xb2   : > { %v360_v45 = vrot.slane %v358_v6, 7  ;;  %v1003_v50 = vperm.slane %v998_v13, %v3210_v39 }
  0xb3   : > { %v294_v48 = vpop.f32.mrf.mxu0 }
  0xb4   : > { %v363_v27 = vor.u32 %v361_v7, %v360_v45  ;;  %v311_v28 = vmax.f32 %v294_v48, 0.0  ;;  %v365_v61 = vrot.slane %v360_v45, 4  ;;  %v1038_v7 = vunpack.c.l.bf16 %v1021_v42 }
  0xb5   : > { %v3294_v8 = vunpack.c.l.bf16 %v1003_v50  ;;  %v3305_v48 = vunpack.c.l.bf16 %v718_v21  ;;  %v784_v42 = vrot.slane %v766_v44, 7 }
  0xb6   : > { %v2807_v36 = vld [vmem:[#allocation2] sm:$0xff]   ;;  %v364_v38 = vsel %vm3267_vm7, %v356_v16, %v363_v27  ;;  %v340_v41 = vpack.c.bf16 %v311_v28, %v311_v28 }
  0xb7   : > { %v2808_v43 = vunpack.c.l.bf16 %v2807_v36  ;;  %v3281_v49 = vunpack.c.h.bf16 %v2807_v36  ;;  %435 = vst.msk [vmem:[#allocation2 + $0x8] sm:$0xf] %vm325_vm2, %v364_v38  ;;  %1871 = vperm.xlu1 %2878, %v1805_v29   ;;  %1862 = vperm.xlu0 %2877, %v1804_v31   ;;  %v1060_v29 = vrot.slane %v1038_v7, 6  ;;  %v1056_v62 = vrot.slane %v3294_v8, 6 }
  0xb8   : > { %v367_v54 = vshrl.u32 %v340_v41, 16  ;;  %v370_v55 = vshll.u32 %v340_v41, 16  ;;  %v3291_v60 = vpop.permute.xlu2 %1574  ;;  %v785_v53 = vsel %vm780_vm8, %v782_v19, %v784_v42 }
  0xb9   : > { %v1007_v0 = vpop.permute.xlu1 %1006  ;;  %v1025_v4 = vpop.permute.xlu0 %1024  ;;  %v559_v56 = vmul.f32 %v2808_v43, %v551_v57  ;;  %v560_v6 = vmul.f32 %v3281_v49, %v552_v52  ;;  %v805_v38 = vmul.f32 %v2808_v43, %v781_v58  ;;  %v806_v41 = vmul.f32 %v3281_v49, %v783_v20 }
  0xba   : > { %v369_v63 = vrot.slane %v367_v54, 7  ;;  %v1012_v23 = vperm.slane %v1007_v0, %v3210_v39  ;;  %v1030_v14 = vperm.slane %v1025_v4, %v3210_v39  ;;  %v786_v43 = vrot.slane %v3305_v48, 7  ;;  %v1536_v48 = vld [vmem:[#allocation2 + $0x4] sm:$0xe] }
  0xbb   : > { %v296_v30 = vpop.f32.mrf.mxu0  ;;  %v567_v13 = vpack.c.bf16 %v560_v6, %v559_v56  ;;  %v788_v0 = vrot.slane %v3271_v32, 7  ;;  %v3334_v4 = vunpack.c.l.bf16 %v754_v35 }
  0xbc   : > { %v372_v11 = vor.u32 %v370_v55, %v369_v63  ;;  %v312_v12 = vmax.f32 %v296_v30, 0.0  ;;  %v1037_v16 = vunpack.c.l.bf16 %v1012_v23  ;;  %v3300_v45 = vunpack.c.l.bf16 %v1030_v14 }
  0xbd   : > { %2666 = vmatmul.msk.bf16.vlgmr.msra.gmra.mxu1 %vm572_vm10, %v567_v13  ;;  %v374_v58 = vrot.slane %v369_v63, 4  ;;  %v554_v63 = vunpack.c.l.bf16 %v506_v51  ;;  %v814_v30 = vpack.c.bf16 %v806_v41, %v805_v38  ;;  %v787_v44 = vsel %vm780_vm8, %v784_v42, %v786_v43 }
  0xbe   : > { %v373_v27 = vsel %vm3267_vm7, %v365_v61, %v372_v11  ;;  %v341_v28 = vpack.c.bf16 %v312_v12, %v312_v12  ;;  %v1058_v31 = vrot.slane %v1037_v16, 6  ;;  %v1062_v34 = vrot.slane %v3300_v45, 6 }
  0xbf   : > { %436 = vst.msk [vmem:[#allocation2 + $0xc] sm:$0xf] %vm325_vm2, %v373_v27  ;;  %v3340_v11 = vunpack.c.l.bf16 %v967_v25  ;;  %v542_v12 = vperm.slane %v3168_v1, %v3210_v39  ;;  %v745_v1 = vperm.slane %v3220_v46, %v3210_v39  ;;  %v824_v26 = vshll.u32 %v814_v30, 16 }
  0xc0   : > { %v376_v57 = vshrl.u32 %v341_v28, 16  ;;  %v379_v36 = vshll.u32 %v341_v28, 16  ;;  %v3317_v50 = vsel %vm1048_vm9, %v1056_v62, %v1058_v31  ;;  %v3320_v52 = vsel %vm1048_vm9, %v1058_v31, %v1060_v29  ;;  %v3327_v55 = vpop.permute.xlu2 %2021 }
  0xc1   : > { %v3325_v54 = vsel %vm1048_vm9, %v1060_v29, %v1062_v34  ;;  %v1217_v21 = vpop.permute.xlu1 %1216  ;;  %v1208_v61 = vpop.permute.xlu0 %1207  ;;  %v994_v38 = vperm.slane %v3178_v9, %v3210_v39  ;;  %v533_v9 = vperm.slane %v3170_v2, %v3210_v39 }
  0xc2   : > { %v378_v59 = vrot.slane %v376_v57, 7  ;;  %v1222_v56 = vperm.slane %v1217_v21, %v3210_v39  ;;  %v1213_v6 = vperm.slane %v1208_v61, %v3210_v39 }
  0xc3   : > { %v299_v7 = vpop.f32.mrf.mxu0 }
  0xc4   : > { %v381_v23 = vor.u32 %v379_v36, %v378_v59  ;;  %v313_v14 = vmax.f32 %v299_v7, 0.0  ;;  %v1278_v35 = vunpack.c.l.bf16 %v1213_v6  ;;  %v1279_v13 = vunpack.c.l.bf16 %v1222_v56 }
  0xc5   : > { %v383_v41 = vrot.slane %v378_v59, 4  ;;  %v794_v56 = vrot.slane %v3334_v4, 7  ;;  %v769_v6 = vunpack.c.l.bf16 %v736_v3  ;;  %v826_v3 = vrot.slane %v824_v26, 1 }
  0xc6   : > { %v382_v51 = vsel %vm3267_vm7, %v374_v58, %v381_v23  ;;  %v2853_v25 = vld [vmem:[#allocation2 + $0x8] sm:$0xff]   ;;  %v342_v16 = vpack.c.bf16 %v313_v14, %v313_v14  ;;  %v1286_v20 = vmul.f32 %v3281_v49, %v1278_v35  ;;  %v3379_v14 = vunpack.c.l.bf16 %v542_v12 }
  0xc7   : > { %437 = vst.msk [vmem:[#allocation2 + $0x10] sm:$0xf] %vm325_vm2, %v382_v51  ;;  %v3357_v37 = vunpack.c.l.bf16 %v2853_v25  ;;  %v3359_v19 = vunpack.c.h.bf16 %v2853_v25  ;;  %v976_v35 = vperm.slane %v3222_v47, %v3210_v39  ;;  %v1049_v51 = vrot.slane %v3340_v11, 6 }
  0xc8   : > { %v385_v27 = vshrl.u32 %v342_v16, 16  ;;  %v388_v28 = vshll.u32 %v342_v16, 16  ;;  %v3364_v57 = vpop.permute.xlu2 %2304  ;;  %v3390_v25 = vunpack.c.l.bf16 %v994_v38  ;;  %v790_v16 = vrot.slane %v769_v6, 7 }
  0xc9   : > { %v807_v29 = vmul.f32 %v3357_v37, %v785_v53  ;;  %v1287_v31 = vmul.f32 %v3357_v37, %v1279_v13  ;;  %v561_v46 = vmul.f32 %v3357_v37, %v3273_v33  ;;  %v562_v36 = vmul.f32 %v3359_v19, %v554_v63  ;;  %v3373_v58 = vpop.permute.xlu1 %1243  ;;  %v3375_v21 = vpop.permute.xlu0 %1234 }
  0xca   : > { %v3371_v42 = vrot.slane %v385_v27, 7  ;;  %v808_v61 = vmul.f32 %v3359_v19, %v787_v44  ;;  %v770_v53 = vunpack.c.l.bf16 %v745_v1  ;;  %v985_v1 = vperm.slane %v3257_v17, %v3210_v39 }
  0xcb   : > { %v1294_v7 = vpack.c.bf16 %v1287_v31, %v1286_v20  ;;  %v301_v23 = vpop.f32.mrf.mxu0  ;;  %v568_v33 = vpack.c.bf16 %v562_v36, %v561_v46  ;;  %v822_v47 = vshrl.u32 %v814_v30, 16  ;;  %v1231_v20 = vperm.slane %v3212_v40, %v3210_v39 }
  0xcc   : > { %v390_v59 = vor.u32 %v388_v28, %v3371_v42  ;;  %v314_v63 = vmax.f32 %v301_v23, 0.0  ;;  %v3387_v44 = vpack.c.bf16 %v808_v61, %v807_v29  ;;  %v792_v26 = vrot.slane %v770_v53, 7 }
  0xcd   : > { %2667 = vmatmul.msk.bf16.vlgmr.msra.gmra.mxu3 %vm572_vm10, %v568_v33  ;;  %2702 = vmatmul.msk.bf16.vlgmr.msrb.gmra.mxu1 %vm572_vm10, %v1294_v7  ;;  %v3401_v29 = vunpack.c.l.bf16 %v976_v35  ;;  %v827_v46 = vor.u32 %v826_v3, %v822_v47  ;;  %v3411_v30 = vmul.f32 %v1049_v51, %v1031_v22  ;;  %v3413_v36 = vunpack.c.l.bf16 %v533_v9 }
  0xce   : > { %v391_v12 = vsel %vm3267_vm7, %v383_v41, %v390_v59  ;;  %v343_v2 = vpack.c.bf16 %v314_v63, %v314_v63  ;;  %v829_v13 = vshll.u32 %v3387_v44, 16  ;;  %v392_v40 = vrot.slane %v3371_v42, 4 }
  0xcf   : > { %438 = vst.msk [vmem:[#allocation2 + $0x14] sm:$0xf] %vm325_vm2, %v391_v12  ;;  %v1054_v6 = vrot.slane %v3390_v25, 6  ;;  %v3421_v7 = vunpack.c.l.bf16 %v985_v1  ;;  %v1240_v5 = vperm.slane %v3375_v21, %v3210_v39  ;;  %v789_v42 = vsel %vm780_vm8, %v786_v43, %v788_v0 }
  0xd0   : > { %v394_v27 = vshrl.u32 %v343_v2, 16  ;;  %v397_v28 = vshll.u32 %v343_v2, 16  ;;  %v3403_v31 = vpop.permute.xlu2 %2039  ;;  %v3405_v17 = vrot.slane %v829_v13, 1  ;;  %v1580_v33 = vperm.slane %v3291_v60, %v3210_v39 }
  0xd1   : > { %v3416_v41 = vpop.permute.xlu1 %1270  ;;  %v3418_v61 = vpop.permute.xlu0 %1261  ;;  %v791_v21 = vsel %vm780_vm8, %v788_v0, %v790_v16  ;;  %v1280_v63 = vunpack.c.l.bf16 %v1231_v20  ;;  %v3439_v53 = vsel %vm780_vm8, %v790_v16, %v792_v26  ;;  %v1050_v35 = vrot.slane %v3401_v29, 6 }
  0xd2   : > { %v396_v38 = vrot.slane %v394_v27, 7  ;;  %v832_v22 = vsel %vm820_vm12, %v827_v46, %v3405_v17  ;;  %v3445_v43 = vsel %vm780_vm8, %v792_v26, %v794_v56  ;;  %v1258_v60 = vperm.slane %v3245_v10, %v3210_v39 }
  0xd3   : > { %v304_v23 = vpop.f32.mrf.mxu0  ;;  %2678 = vmatmul.msk.bf16.vlgmr.msrb.gmra.mxu0 %vm572_vm10, %v832_v22  ;;  %v1052_v12 = vrot.slane %v3421_v7, 6  ;;  %v1281_v1 = vunpack.c.l.bf16 %v1240_v5  ;;  %v3457_v47 = vunpack.c.l.bf16 %v1580_v33  ;;  %v1626_v27 = vunpack.c.l.bf16 %v1536_v48 }
  0xd4   : > { %v399_v9 = vor.u32 %v397_v28, %v396_v38  ;;  %v315_v59 = vmax.f32 %v304_v23, 0.0  ;;  %v401_v22 = vrot.slane %v396_v38, 4 }
  0xd5   : > { %v1654_v38 = vrot.slane %v3457_v47, 6  ;;  %v1053_v10 = vsel %vm1048_vm9, %v1050_v35, %v1052_v12  ;;  %v1055_v24 = vsel %vm1048_vm9, %v1052_v12, %v1054_v6 }
  0xd6   : > { %v2854_v3 = vld [vmem:[#allocation2 + $0x10] sm:$0xff]   ;;  %v400_v32 = vsel %vm3267_vm7, %v392_v40, %v399_v9  ;;  %v344_v0 = vpack.c.bf16 %v315_v59, %v315_v59  ;;  %v1288_v40 = vmul.f32 %v3359_v19, %v1280_v63 }
  0xd7   : > { %v3452_v2 = vunpack.c.h.bf16 %v2854_v3  ;;  %v3454_v16 = vunpack.c.l.bf16 %v2854_v3  ;;  %439 = vst.msk [vmem:[#allocation2 + $0x18] sm:$0xf] %vm325_vm2, %v400_v32 }
  0xd8   : > { %v403_v13 = vshrl.u32 %v344_v0, 16  ;;  %v406_v20 = vshll.u32 %v344_v0, 16 }
  0xd9   : > { %v1289_v28 = vmul.f32 %v3454_v16, %v1281_v1  ;;  %v563_v26 = vmul.f32 %v3454_v16, %v3253_v15  ;;  %v564_v46 = vmul.f32 %v3452_v2, %v3259_v18  ;;  %v1566_v5 = vpop.permute.xlu1 %1565  ;;  %v1557_v9 = vpop.permute.xlu0 %1556  ;;  %v809_v33 = vmul.f32 %v3454_v16, %v789_v42 }
  0xda   : > { %v3465_v23 = vrot.slane %v403_v13, 7  ;;  %v810_v59 = vmul.f32 %v3452_v2, %v791_v21  ;;  %v1571_v48 = vperm.slane %v1566_v5, %v3210_v39  ;;  %v1562_v3 = vperm.slane %v1557_v9, %v3210_v39  ;;  %v1593_v42 = vpop.permute.xlu2 %1592  ;;  %v1087_v21 = vld [vmem:[%s4123_s2 + $0x8] sm:$0xf] }
  0xdb   : > { %v306_v32 = vpop.f32.mrf.mxu0  ;;  %v569_v15 = vpack.c.bf16 %v564_v46, %v563_v26  ;;  %v1295_v0 = vpack.c.bf16 %v1289_v28, %v1288_v40  ;;  %v1057_v18 = vsel %vm1048_vm9, %v1054_v6, %v1056_v62  ;;  %v1116_v8 = vsel %vm276_vm0, %v1087_v21, 0  ;;  %v1899_v40 = vld [vmem:[%s4123_s2 + $0x18] sm:$0xf] }
  0xdc   : > { %v408_v63 = vor.u32 %v406_v20, %v3465_v23  ;;  %v316_v1 = vmax.f32 %v306_v32, 0.0  ;;  %v1636_v13 = vunpack.c.l.bf16 %v1571_v48  ;;  %v1635_v5 = vunpack.c.l.bf16 %v1562_v3  ;;  %1125 = vmatpush.bf16.msrb.mxu3 %v1116_v8  ;;  %v1392_v8 = vld [vmem:[%s4123_s2 + $0x10] sm:$0xf] }
  0xdd   : > { %2668 = vmatmul.msk.bf16.gmra.mxu3 %vm572_vm10, %v569_v15  ;;  %v3482_v28 = vpack.c.bf16 %v810_v59, %v809_v33  ;;  %v1249_v62 = vperm.slane %v3373_v58, %v3210_v39  ;;  %v833_v46 = vshrl.u32 %v3387_v44, 16  ;;  %v1598_v9 = vperm.slane %v1593_v42, %v3210_v39  ;;  %2703 = vmatmul.msk.bf16.gmra.mxu1 %vm572_vm10, %v1295_v0 }
  0xde   : > { %v409_v20 = vsel %vm3267_vm7, %v401_v22, %v408_v63  ;;  %v345_v26 = vpack.c.bf16 %v316_v1, %v316_v1  ;;  %v1652_v33 = vrot.slane %v1636_v13, 6  ;;  %v1651_v59 = vrot.slane %v1635_v5, 6 }
  0xdf   : > { %440 = vst.msk [vmem:[#allocation2 + $0x1c] sm:$0xf] %vm325_vm2, %v409_v20  ;;  %v837_v58 = vshll.u32 %v3482_v28, 16  ;;  %v835_v3 = vor.u32 %v833_v46, %v3405_v17  ;;  %v1913_v44 = vsel %vm276_vm0, %v1899_v40, 0  ;;  %v410_v0 = vrot.slane %v3465_v23, 4 }
  0xe0   : > { %v412_v48 = vshrl.u32 %v345_v26, 16  ;;  %v415_v22 = vshll.u32 %v345_v26, 16  ;;  %v1655_v32 = vsel %vm1048_vm9, %v1652_v33, %v1654_v38  ;;  %v1653_v15 = vsel %vm1048_vm9, %v1651_v59, %v1652_v33  ;;  %1922 = vmatpush.bf16.msra.mxu0 %v1913_v44  ;;  %v444_v26 = vld [vmem:[#allocation2 + $0x24] sm:$0x1] }
  0xe1   : > { %v3503_v63 = vmul.f32 %v1651_v59, %v1626_v27  ;;  %v3505_v42 = vrot.slane %v837_v58, 1  ;;  %v3508_v21 = vpop.permute.xlu1 %2012  ;;  %v1584_v13 = vpop.permute.xlu0 %1583  ;;  %v3511_v17 = vmul.f32 %v3359_v19, %v1655_v32  ;;  %v3514_v5 = vmul.f32 %v3357_v37, %v1653_v15  ;;  %v2145_v27 = vld [vmem:[%s4123_s2 + $0x1c] sm:$0xf] }
  0xe2   : > { %v414_v1 = vrot.slane %v412_v48, 7  ;;  %v3522_v20 = vunpack.c.l.bf16 %v1598_v9  ;;  %v1589_v46 = vperm.slane %v1584_v13, %v3210_v39  ;;  %v3534_v33 = vmul.f32 %v3454_v16, %v1057_v18 }
  0xe3   : > { %v840_v40 = vsel %vm820_vm12, %v835_v3, %v3505_v42  ;;  %v1684_v9 = vpack.c.bf16 %v3514_v5, %v3503_v63  ;;  %v3541_v48 = vmul.f32 %v3452_v2, %v3317_v50  ;;  %v2310_v44 = vperm.slane %v3364_v57, %v3210_v39 }
  0xe4   : > { %v417_v59 = vor.u32 %v415_v22, %v414_v1  ;;  %v419_v58 = vrot.slane %v414_v1, 4  ;;  %2679 = vmatmul.msk.bf16.vlgmr.msra.gmra.mxu2 %vm572_vm10, %v840_v40  ;;  %v1638_v32 = vunpack.c.l.bf16 %v1589_v46  ;;  %v2195_v3 = vsel %vm276_vm0, %v2145_v27, 0 }
  0xe5   : > { %v1465_v18 = vsel %vm276_vm0, %v1392_v8, 0  ;;  %v1051_v22 = vsel %vm1048_vm9, %v1049_v51, %v1050_v35  ;;  %v1283_v15 = vunpack.c.l.bf16 %v1258_v60  ;;  %2204 = vmatpush.bf16.msra.mxu1 %v2195_v3  ;;  %v1658_v13 = vrot.slane %v3522_v20, 6 }
  0xe6   : > { %v418_v50 = vsel %vm3267_vm7, %v410_v0, %v417_v59  ;;  %v445_v57 = vsel %vm3526_vm13, %v419_v58, %v444_v26  ;;  %v2852_v1 = vld [vmem:[#allocation2 + $0x18] sm:$0xff]   ;;  %1474 = vmatpush.bf16.msrb.mxu2 %v1465_v18  ;;  %v1656_v11 = vrot.slane %v1638_v32, 6  ;;  %v1282_v60 = vunpack.c.l.bf16 %v1249_v62 }
  0xe7   : > { %441 = vst.msk [vmem:[#allocation2 + $0x20] sm:$0xf] %vm325_vm2, %v418_v50  ;;  %v3561_v27 = vunpack.c.l.bf16 %v2852_v1  ;;  %v3563_v51 = vunpack.c.h.bf16 %v2852_v1  ;;  %v1084_v0 = vpack.c.bf16 %v3541_v48, %v3534_v33  ;;  %v2027_v8 = vperm.slane %v3327_v55, %v3210_v39 }
  0xe8   : > { %446 = vst [vmem:[#allocation2 + $0x24] sm:$0x1] %v445_v57  ;;  %v3579_v23 = vunpack.c.l.bf16 %v2310_v44  ;;  %v1657_v29 = vsel %vm1048_vm9, %v1654_v38, %v1656_v11  ;;  %v3587_v25 = vsel %vm1048_vm9, %v1656_v11, %v1658_v13  ;;  %v1290_v6 = vmul.f32 %v3452_v2, %v1282_v60  ;;  %v2266_v38 = vld [vmem:[#allocation2 + $0x8] sm:$0xe] }
  0xe9   : > { %v3591_v7 = vmul.f32 %v3454_v16, %v1657_v29  ;;  %v2296_v35 = vpop.permute.xlu1 %2295  ;;  %v2287_v12 = vpop.permute.xlu0 %2286  ;;  %v565_v55 = vmul.f32 %v3561_v27, %v3413_v36  ;;  %v1075_v62 = vmul.f32 %v3357_v37, %v1053_v10  ;;  %v566_v46 = vmul.f32 %v3563_v51, %v3379_v14 }
  0xea   : > { %v2301_v47 = vperm.slane %v2296_v35, %v3210_v39  ;;  %v2292_v26 = vperm.slane %v2287_v12, %v3210_v39  ;;  %v1291_v40 = vmul.f32 %v3561_v27, %v1283_v15  ;;  %v2018_v59 = vperm.slane %v3508_v21, %v3210_v39 }
  0xeb   : > { %v811_v58 = vmul.f32 %v3561_v27, %v3439_v53  ;;  %v812_v36 = vmul.f32 %v3563_v51, %v3445_v43  ;;  %v1076_v44 = vmul.f32 %v3359_v19, %v1055_v24  ;;  %v570_v18 = vpack.c.bf16 %v566_v46, %v565_v55 }
  0xec   : > { %v2358_v32 = vunpack.c.l.bf16 %v2301_v47  ;;  %v2357_v3 = vunpack.c.l.bf16 %v2292_v26  ;;  %v1296_v50 = vpack.c.bf16 %v1291_v40, %v1290_v6  ;;  %v1074_v57 = vmul.f32 %v3281_v49, %v1051_v22  ;;  %v3640_v26 = vpop.permute.xlu2 %2331 }
  0xed   : > { %v3609_v14 = vunpack.c.l.bf16 %v2027_v8  ;;  %v2356_v15 = vunpack.c.l.bf16 %v2266_v38  ;;  %v3611_v1 = vpack.c.bf16 %v812_v36, %v811_v58  ;;  %v2376_v21 = vrot.slane %v3579_v23, 6  ;;  %2669 = vmatmul.msk.bf16.gmra.mxu3 %vm572_vm10, %v570_v18 }
  0xee   : > { %v2374_v11 = vrot.slane %v2358_v32, 6  ;;  %v2373_v53 = vrot.slane %v2357_v3, 6  ;;  %2704 = vmatmul.msk.bf16.gmra.mxu1 %vm572_vm10, %v1296_v50  ;;  %v1685_v43 = vpack.c.bf16 %v3591_v7, %v3511_v17  ;;  %v2045_v10 = vperm.slane %v3403_v31, %v3210_v39  ;;  %v3626_v6 = vld [vmem:[#allocation2 + $0x20] sm:$0x1] }
  0xef   : > { %v2091_v49 = vunpack.c.l.bf16 %v2018_v59  ;;  %v845_v22 = vshll.u32 %v3611_v1, 16  ;;  %v1083_v24 = vpack.c.bf16 %v1076_v44, %v1075_v62  ;;  %v841_v29 = vshrl.u32 %v3482_v28, 16  ;;  %v3638_v38 = vld [vmem:[#allocation2 + $0x20] sm:$0xff]  }
  0xf0   : > { %v2377_v60 = vsel %vm1048_vm9, %v2374_v11, %v2376_v21  ;;  %v2375_v8 = vsel %vm1048_vm9, %v2373_v53, %v2374_v11  ;;  %v3623_v23 = vmul.f32 %v2373_v53, %v2356_v15  ;;  %v1276_v35 = vperm.slane %v3416_v41, %v3210_v39 }
  0xf1   : > { %v1267_v31 = vperm.slane %v3418_v61, %v3210_v39  ;;  %v3633_v12 = vmul.f32 %v3454_v16, %v2377_v60  ;;  %v3636_v55 = vmul.f32 %v3359_v19, %v2375_v8  ;;  %v2031_v62 = vpop.permute.xlu1 %2030  ;;  %v2314_v47 = vpop.permute.xlu0 %2313  ;;  %v843_v41 = vor.u32 %v841_v29, %v3505_v42 }
  0xf2   : > { %v2036_v28 = vperm.slane %v2031_v62, %v3210_v39  ;;  %v2319_v46 = vperm.slane %v2314_v47, %v3210_v39  ;;  %v3645_v40 = vrot.slane %v845_v22, 1  ;;  %v3647_v61 = vunpack.c.l.bf16 %v2045_v10 }
  0xf3   : > { %v2107_v59 = vrot.slane %v2091_v49, 7  ;;  %v2406_v58 = vpack.c.bf16 %v3636_v55, %v3623_v23  ;;  %v763_v36 = vunpack.c.l.bf16 %v3626_v6  ;;  %v1277_v18 = vunpack.c.l.bf16 %v3638_v38 }
  0xf4   : > { %v2093_v44 = vunpack.c.l.bf16 %v2036_v28  ;;  %v3652_v32 = vunpack.c.l.bf16 %v2319_v46  ;;  %v848_v3 = vsel %vm820_vm12, %v843_v41, %v3645_v40  ;;  %v2108_v42 = vrot.slane %v3609_v14, 7  ;;  %v3692_v41 = vpop.permute.xlu2 %1826 }
  0xf5   : > { %2680 = vmatmul.msk.bf16.gmra.mxu2 %vm572_vm10, %v848_v3  ;;  %v1082_v50 = vpack.c.bf16 %v1074_v57, %v3411_v30  ;;  %v813_v15 = vmul.f32 %v794_v56, %v763_v36  ;;  %v1285_v11 = vunpack.c.l.bf16 %v1276_v35  ;;  %v1095_v49 = vrot.slane %v1083_v24, 1 }
  0xf6   : > { %v2110_v53 = vrot.slane %v2093_v44, 7  ;;  %v2378_v10 = vrot.slane %v3652_v32, 6  ;;  %v1284_v22 = vunpack.c.l.bf16 %v1267_v31  ;;  %v3666_v8 = vrot.slane %v1084_v0, 1 }
  0xf7   : > { %v818_v60 = vpack.c.bf16 %v813_v15, %v813_v15  ;;  %v3670_v14 = vmul.f32 %v3452_v2, %v3587_v25  ;;  %v2112_v30 = vrot.slane %v3647_v61, 7  ;;  %v2109_v4 = vsel %vm780_vm8, %v2107_v59, %v2108_v42 }
  0xf8   : > { %v2379_v56 = vsel %vm1048_vm9, %v2376_v21, %v2378_v10  ;;  %v1293_v57 = vmul.f32 %v1285_v11, %v1277_v18  ;;  %v2131_v24 = vmul.f32 %v3357_v37, %v2107_v59  ;;  %v1094_v0 = vrot.slane %v1082_v50, 1 }
  0xf9   : > { %v2400_v29 = vmul.f32 %v3452_v2, %v2379_v56  ;;  %v1818_v33 = vpop.permute.xlu1 %1817  ;;  %v1809_v48 = vpop.permute.xlu0 %1808  ;;  %v1292_v6 = vmul.f32 %v3563_v51, %v1284_v22  ;;  %v2111_v25 = vsel %vm780_vm8, %v2108_v42, %v2110_v53  ;;  %v2113_v35 = vsel %vm780_vm8, %v2110_v53, %v2112_v30 }
  0xfa   : > { %v1823_v31 = vperm.slane %v1818_v33, %v3210_v39  ;;  %v1814_v21 = vperm.slane %v1809_v48, %v3210_v39  ;;  %v2132_v62 = vmul.f32 %v3359_v19, %v2109_v4  ;;  %v853_v28 = vshll.u32 %v818_v60, 16  ;;  %v3727_v33 = vld [vmem:[#allocation2 + $0x4] sm:$0xff] }
  0xfb   : > { %v2407_v47 = vpack.c.bf16 %v2400_v29, %v3633_v12  ;;  %v3690_v46 = vsel %vm1093_vm14, %v1095_v49, %v3666_v8  ;;  %v1096_v3 = vsel %vm1093_vm14, %v1094_v0, %v1095_v49  ;;  %v1297_v18 = vpack.c.bf16 %v1293_v57, %v1292_v6 }
  0xfc   : > { %v1880_v59 = vunpack.c.l.bf16 %v1823_v31  ;;  %v1879_v44 = vunpack.c.l.bf16 %v1814_v21  ;;  %v2337_v42 = vperm.slane %v3640_v26, %v3210_v39  ;;  %v2133_v50 = vmul.f32 %v3454_v16, %v2111_v25  ;;  %v1620_v31 = vpop.permute.xlu2 %1619 }
  0xfd   : > { %v2134_v15 = vmul.f32 %v3452_v2, %v2113_v35  ;;  %v1079_v12 = vmul.f32 %v3561_v27, %v3320_v52  ;;  %2690 = vmatmul.msk.bf16.vlgmr.msrb.gmra.mxu3 %vm572_vm10, %v1096_v3  ;;  %v2140_v49 = vpack.c.bf16 %v2132_v62, %v2131_v24  ;;  %v849_v22 = vshrl.u32 %v3611_v1, 16  ;;  %v3764_v3 = vld [vmem:[#allocation2 + $0xc] sm:$0xff] }
  0xfe   : > { %v1888_v11 = vmul.f32 %v3359_v19, %v1880_v59  ;;  %v1887_v53 = vmul.f32 %v3357_v37, %v1879_v44  ;;  %2705 = vmatmul.msk.bf16.gmra.mxu1 %vm572_vm10, %v1297_v18  ;;  %v855_v60 = vrot.slane %v853_v28, 1  ;;  %v1080_v26 = vmul.f32 %v3563_v51, %v3325_v54 }
  0xff   : > { %v3711_v4 = vrot.slane %v1685_v43, 1  ;;  %v1081_v37 = vmul.f32 %v1062_v34, %v763_v36  ;;  %v3715_v19 = vunpack.c.l.bf16 %v2337_v42  ;;  %v3717_v56 = vpack.c.bf16 %v2134_v15, %v2133_v50 }
 0x100   : > { %v1895_v52 = vpack.c.bf16 %v1888_v11, %v1887_v53  ;;  %v851_v1 = vor.u32 %v849_v22, %v3645_v40  ;;  %v1085_v29 = vpack.c.bf16 %v1080_v26, %v1079_v12  ;;  %v1695_v54 = vrot.slane %v1684_v9, 1 }
 0x101   : > { %v2323_v57 = vpop.permute.xlu1 %2322  ;;  %v1602_v24 = vpop.permute.xlu0 %1601  ;;  %v1086_v45 = vpack.c.bf16 %v1081_v37, %v1081_v37  ;;  %v2149_v34 = vshll.u32 %v2140_v49, 16  ;;  %v2418_v43 = vrot.slane %v2407_v47, 1  ;;  %v2417_v5 = vrot.slane %v2406_v58, 1 }
 0x102   : > { %v2328_v17 = vperm.slane %v2323_v57, %v3210_v39  ;;  %v1607_v7 = vperm.slane %v1602_v24, %v3210_v39  ;;  %2746 = vmatmul.msk.bf16.vlgmr.msra.gmra.mxu0 %vm572_vm10, %v1895_v52  ;;  %v856_v36 = vsel %vm820_vm12, %v851_v1, %v855_v60  ;;  %v1099_v48 = vrot.slane %v1085_v29, 1 }
 0x103   : > { %v1101_v6 = vrot.slane %v1086_v45, 1  ;;  %v3733_v63 = vsel %vm1093_vm14, %v1695_v54, %v3711_v4  ;;  %v2154_v9 = vshll.u32 %v3717_v56, 16  ;;  %v2382_v35 = vrot.slane %v3715_v19, 6 }
 0x104   : > { %v2361_v40 = vunpack.c.l.bf16 %v2328_v17  ;;  %v3729_v0 = vunpack.c.l.bf16 %v1607_v7  ;;  %v3742_v25 = vsel %vm1093_vm14, %v3666_v8, %v1099_v48  ;;  %v2151_v28 = vrot.slane %v2149_v34, 1  ;;  %v1689_v17 = vld [vmem:[%s4123_s2 + $0x14] sm:$0xf]  ;;  %v2411_v7 = vld [vmem:[%s4123_s2 + $0x20] sm:$0xf] }
 0x105   : > { %2681 = vmatmul.msk.bf16.gmra.mxu2 %vm572_vm10, %v856_v36  ;;  %v3747_v47 = vsel %vm1093_vm14, %v1099_v48, %v1101_v6  ;;  %v1419_v23 = vshll.u32 %v3727_v33, 16  ;;  %v3751_v55 = vsel %vm1093_vm14, %v2417_v5, %v2418_v43  ;;  %v2147_v58 = vshrl.u32 %v2140_v49, 16  ;;  %v2067_v36 = vpop.permute.xlu2 %2066 }
 0x106   : > { %v2380_v21 = vrot.slane %v2361_v40, 6  ;;  %v1660_v62 = vrot.slane %v3729_v0, 6  ;;  %v3768_v15 = vrot.slane %v2154_v9, 1  ;;  %v1417_v60 = vshrl.u32 %v3727_v33, 16 }
 0x107   : > { %v2152_v53 = vor.u32 %v2151_v28, %v2147_v58  ;;  %v1424_v26 = vshll.u32 %v3764_v3, 16  ;;  %v1421_v37 = vrot.slane %v1419_v23, 1  ;;  %v1832_v1 = vperm.slane %v3692_v41, %v3210_v39 }
 0x108   : > { %v2381_v8 = vsel %vm1048_vm9, %v2378_v10, %v2380_v21  ;;  %v2383_v59 = vsel %vm1048_vm9, %v2380_v21, %v2382_v35  ;;  %v1661_v44 = vsel %vm1048_vm9, %v1658_v13, %v1660_v62  ;;  %v1717_v41 = vsel %vm276_vm0, %v1689_v17, 0  ;;  %v2862_v17 = vld [vmem:[#allocation2 + $0x20] sm:$0xff]  }
 0x109   : > { %v2401_v18 = vmul.f32 %v3561_v27, %v2381_v8  ;;  %v2402_v42 = vmul.f32 %v3563_v51, %v2383_v59  ;;  %v2058_v50 = vpop.permute.xlu1 %2057  ;;  %v2049_v32 = vpop.permute.xlu0 %2048  ;;  %v1680_v10 = vmul.f32 %v3561_v27, %v1661_v44  ;;  %v2157_v52 = vsel %vm820_vm12, %v2152_v53, %v3768_v15  ;;  %1726 = vmatpush.bf16.msra.mxu3 %v1717_v41  ;;  %v3826_v59 = vld [vmem:[#allocation2 + $0x20] sm:$0xf] }
 0x10a   : > { %v2063_v12 = vperm.slane %v2058_v50, %v3210_v39  ;;  %v2054_v11 = vperm.slane %v2049_v32, %v3210_v39  ;;  %v2439_v45 = vsel %vm276_vm0, %v2411_v7, 0  ;;  %v3814_v40 = vrot.slane %v1424_v26, 1 }
 0x10b   : > { %v1686_v20 = vpack.c.bf16 %v1680_v10, %v3670_v14  ;;  %v2408_v13 = vpack.c.bf16 %v2402_v42, %v2401_v18  ;;  %v1625_v14 = vperm.slane %v1620_v31, %v3210_v39  ;;  %2448 = vmatpush.bf16.msra.mxu2 %v2439_v45  ;;  %v1422_v9 = vor.u32 %v1421_v37, %v1417_v60 }
 0x10c   : > { %v3774_v49 = vunpack.c.l.bf16 %v2063_v12  ;;  %v2095_v22 = vunpack.c.l.bf16 %v2054_v11  ;;  %v1881_v31 = vunpack.c.l.bf16 %v1832_v1  ;;  %v1633_v10 = vunpack.c.l.bf16 %v3826_v59 }
 0x10d   : > { %v3780_v57 = vrot.slane %v1686_v20, 1  ;;  %v3782_v24 = vrot.slane %v2408_v13, 1  ;;  %2691 = vmatmul.msk.bf16.gmra.mxu3 %vm572_vm10, %v3690_v46  ;;  %v3818_v21 = vunpack.c.l.bf16 %v1625_v14  ;;  %v1427_v8 = vsel %vm820_vm12, %v1422_v9, %v3814_v40  ;;  %v3840_v20 = vld [vmem:[#allocation2 + $0x14] sm:$0xff]  ;;  %v1854_v1 = vpop.permute.xlu2 %1853 }
 0x10e   : > { %v2116_v29 = vrot.slane %v3774_v49, 7  ;;  %v2114_v54 = vrot.slane %v2095_v22, 7  ;;  %2758 = vmatmul.msk.bf16.vlgmr.msra.gmra.mxu1 %vm572_vm10, %v2157_v52  ;;  %v1889_v18 = vmul.f32 %v3454_v16, %v1881_v31  ;;  %v3843_v22 = vld [vmem:[#allocation2 + $0x28] sm:$0x1]  ;;  %v2072_v37 = vperm.slane %v2067_v36, %v3210_v39 }
 0x10f   : > { %v3802_v34 = vsel %vm1093_vm14, %v3711_v4, %v3780_v57  ;;  %v3806_v46 = vsel %vm1093_vm14, %v2418_v43, %v3782_v24  ;;  %v1664_v42 = vrot.slane %v3818_v21, 6  ;;  %v1432_v45 = vshll.u32 %v3840_v20, 16 }
 0x110   : > { %v2115_v33 = vsel %vm780_vm8, %v2112_v30, %v2114_v54  ;;  %v2117_v48 = vsel %vm780_vm8, %v2114_v54, %v2116_v29  ;;  %v2849_v9 = vunpack.c.h.bf16 %v2862_v17 }
 0x111   : > { %v2135_v4 = vmul.f32 %v3561_v27, %v2115_v33  ;;  %v2136_v6 = vmul.f32 %v3563_v51, %v2117_v48  ;;  %v1611_v5 = vpop.permute.xlu1 %1610  ;;  %v1836_v43 = vpop.permute.xlu0 %1835 }
 0x112   : > { %v1616_v61 = vperm.slane %v1611_v5, %v3210_v39  ;;  %v1841_v30 = vperm.slane %v1836_v43, %v3210_v39  ;;  %v2097_v5 = vunpack.c.l.bf16 %v2072_v37  ;;  %v2848_v43 = vunpack.c.l.bf16 %v2862_v17 }
 0x113   : > { %v3822_v28 = vpack.c.bf16 %v2136_v6, %v2135_v4  ;;  %v1859_v4 = vperm.slane %v1854_v1, %v3210_v39 }
 0x114   : > { %v1641_v23 = vunpack.c.l.bf16 %v1616_v61  ;;  %v1882_v58 = vunpack.c.l.bf16 %v1841_v30 }
 0x115   : > { %2722 = vmatmul.msk.bf16.vlgmr.msrb.gmra.mxu2 %vm572_vm10, %v1427_v8  ;;  %v2162_v44 = vshll.u32 %v3822_v28, 16 }
 0x116   : > { %v1662_v50 = vrot.slane %v1641_v23, 6  ;;  %v1890_v32 = vmul.f32 %v3452_v2, %v1882_v58  ;;  %v2158_v2 = vshrl.u32 %v3717_v56, 16  ;;  %v2090_v56 = vunpack.c.l.bf16 %v3843_v22 }
 0x117   : > { %v3846_v26 = vrot.slane %v2162_v44, 1  ;;  %v1434_v23 = vrot.slane %v1432_v45, 1  ;;  %v2166_v45 = vshrl.u32 %v3822_v28, 16 }
 0x118   : > { %v1663_v12 = vsel %vm1048_vm9, %v1660_v62, %v1662_v50  ;;  %v1665_v11 = vsel %vm1048_vm9, %v1662_v50, %v1664_v42  ;;  %v1896_v53 = vpack.c.bf16 %v1890_v32, %v1889_v18  ;;  %v2160_v14 = vor.u32 %v2158_v2, %v3768_v15 }
 0x119   : > { %v1681_v16 = vmul.f32 %v3563_v51, %v1663_v12  ;;  %v2350_v13 = vpop.permute.xlu1 %2349  ;;  %v2341_v60 = vpop.permute.xlu0 %2340  ;;  %v1682_v0 = vmul.f32 %v1665_v11, %v1633_v10  ;;  %v1428_v15 = vshrl.u32 %v3764_v3, 16  ;;  %v1884_v50 = vunpack.c.l.bf16 %v1859_v4 }
 0x11a   : > { %v2355_v62 = vperm.slane %v2350_v13, %v3210_v39  ;;  %v2346_v52 = vperm.slane %v2341_v60, %v3210_v39  ;;  %2747 = vmatmul.msk.bf16.gmra.mxu0 %vm572_vm10, %v1896_v53  ;;  %v2165_v33 = vsel %vm820_vm12, %v2160_v14, %v3846_v26  ;;  %v2118_v11 = vrot.slane %v2097_v5, 7 }
 0x11b   : > { %v1687_v54 = vpack.c.bf16 %v1682_v0, %v1681_v16  ;;  %v1430_v18 = vor.u32 %v1428_v15, %v3814_v40  ;;  %v1892_v2 = vmul.f32 %v3563_v51, %v1884_v50  ;;  %v2168_v4 = vor.u32 %v2166_v45, %v3846_v26 }
 0x11c   : > { %v2364_v7 = vunpack.c.l.bf16 %v2355_v62  ;;  %v2363_v41 = vunpack.c.l.bf16 %v2346_v52  ;;  %v2119_v40 = vsel %vm780_vm8, %v2116_v29, %v2118_v11  ;;  %v1436_v5 = vshrl.u32 %v3840_v20, 16 }
 0x11d   : > { %v3859_v48 = vrot.slane %v1687_v54, 1  ;;  %2692 = vmatmul.msk.bf16.gmra.mxu3 %vm572_vm10, %v3742_v25  ;;  %v1435_v13 = vsel %vm820_vm12, %v1430_v18, %v1434_v23  ;;  %v2789_v54 = vld [vmem:[#allocation2 + $0x1c] sm:$0xff]  ;;  %v2137_v17 = vmul.f32 %v2848_v43, %v2119_v40 }
 0x11e   : > { %v2386_v6 = vrot.slane %v2364_v7, 6  ;;  %v2384_v36 = vrot.slane %v2363_v41, 6  ;;  %2759 = vmatmul.msk.bf16.gmra.mxu1 %vm572_vm10, %v2165_v33  ;;  %v1444_v22 = vshrl.u32 %v2789_v54, 16 }
 0x11f   : > { %v3869_v31 = vsel %vm1093_vm14, %v3780_v57, %v3859_v48 }
 0x120   : > { %v2405_v61 = vmul.f32 %v2386_v6, %v2090_v56  ;;  %v2385_v30 = vsel %vm1048_vm9, %v2382_v35, %v2384_v36  ;;  %v2387_v25 = vsel %vm1048_vm9, %v2384_v36, %v2386_v6 }
 0x121   : > { %v2403_v58 = vmul.f32 %v2848_v43, %v2385_v30  ;;  %v2404_v3 = vmul.f32 %v2849_v9, %v2387_v25  ;;  %v1845_v8 = vpop.permute.xlu1 %1844  ;;  %v2076_v44 = vpop.permute.xlu0 %2075  ;;  %v1438_v30 = vor.u32 %v1436_v5, %v1434_v23 }
 0x122   : > { %v2410_v32 = vpack.c.bf16 %v2405_v61, %v2405_v61  ;;  %v1850_v57 = vperm.slane %v1845_v8, %v3210_v39  ;;  %v2081_v12 = vperm.slane %v2076_v44, %v3210_v39 }
 0x123   : > { %v2409_v53 = vpack.c.bf16 %v2404_v3, %v2403_v58 }
 0x124   : > { %v2424_v19 = vrot.slane %v2410_v32, 1  ;;  %v1883_v16 = vunpack.c.l.bf16 %v1850_v57  ;;  %v2098_v35 = vunpack.c.l.bf16 %v2081_v12 }
 0x125   : > { %2723 = vmatmul.msk.bf16.gmra.mxu2 %vm572_vm10, %v1435_v13  ;;  %v2422_v60 = vrot.slane %v2409_v53, 1 }
 0x126   : > { %v1891_v0 = vmul.f32 %v3561_v27, %v1883_v16  ;;  %v2120_v62 = vrot.slane %v2098_v35, 7 }
 0x127   : > { %v3889_v52 = vsel %vm1093_vm14, %v3782_v24, %v2422_v60  ;;  %v3892_v37 = vsel %vm1093_vm14, %v2422_v60, %v2424_v19  ;;  %v1440_v24 = vshll.u32 %v2789_v54, 16 }
 0x128   : > { %v2121_v1 = vsel %vm780_vm8, %v2118_v11, %v2120_v62  ;;  %v1897_v14 = vpack.c.bf16 %v1892_v2, %v1891_v0  ;;  %v2139_v28 = vmul.f32 %v2120_v62, %v2090_v56 }
 0x129   : > { %v2138_v51 = vmul.f32 %v2849_v9, %v2121_v1  ;;  %v1872_v7 = vpop.permute.xlu1 %1871  ;;  %v1863_v49 = vpop.permute.xlu0 %1862  ;;  %v1442_v43 = vrot.slane %v1440_v24, 1  ;;  %v1391_v9 = vld [vmem:[#allocation2 + $0x24] sm:$0x1] }
 0x12a   : > { %2748 = vmatmul.msk.bf16.gmra.mxu0 %vm572_vm10, %v1897_v14  ;;  %v1877_v27 = vperm.slane %v1872_v7, %v3210_v39  ;;  %v1868_v41 = vperm.slane %v1863_v49, %v3210_v39  ;;  %v1878_v39 = vunpack.c.h.bf16 %v3638_v38  ;;  %v2144_v20 = vpack.c.bf16 %v2139_v28, %v2139_v28 }
 0x12b   : > { %v2143_v29 = vpack.c.bf16 %v2138_v51, %v2137_v17  ;;  %v1443_v58 = vsel %vm820_vm12, %v1438_v30, %v1442_v43 }
 0x12c   : > { %v1886_v36 = vunpack.c.l.bf16 %v1877_v27  ;;  %v1885_v15 = vunpack.c.l.bf16 %v1868_v41  ;;  %v2178_v38 = vshll.u32 %v2144_v20, 16 }
 0x12d   : > { %v2170_v33 = vshll.u32 %v2143_v29, 16  ;;  %2693 = vmatmul.msk.bf16.gmra.mxu3 %vm572_vm10, %v3747_v47  ;;  %v1410_v47 = vunpack.c.l.b16 %v1391_v9  ;;  %v2174_v44 = vshrl.u32 %v2143_v29, 16 }
 0x12e   : > { %v1894_v25 = vmul.f32 %v1886_v36, %v1878_v39  ;;  %v1893_v26 = vmul.f32 %v1885_v15, %v1633_v10  ;;  %v2180_v59 = vrot.slane %v2178_v38, 1  ;;  %v1446_v10 = vor.u32 %v1444_v22, %v1442_v43  ;;  %v201_v38 = vld [vmem:[%s2983_s24 + $0x8] sm:$0xf] }
 0x12f   : > { %v2172_v6 = vrot.slane %v2170_v33, 1  ;;  %v1415_v8 = vpack.c.b16 %v1410_v47, %v1410_v47 }
 0x130   : > { %v1898_v3 = vpack.c.bf16 %v1894_v25, %v1893_v26 }
 0x131   : > { %v2173_v61 = vsel %vm820_vm12, %v2168_v4, %v2172_v6  ;;  %v1448_v56 = vshll.u32 %v1415_v8, 16  ;;  %v2176_v18 = vor.u32 %v2174_v44, %v2172_v6 }
 0x132   : > { %2760 = vmatmul.msk.bf16.gmra.mxu1 %vm572_vm10, %v2173_v61 }
 0x133   : > { %v1450_v50 = vrot.slane %v1448_v56, 1  ;;  %v2181_v32 = vsel %vm820_vm12, %v2176_v18, %v2180_v59  ;;  %v319_v18 = vunpack.c.l.bf16 %v201_v38 }
 0x135   : > { %2724 = vmatmul.msk.bf16.gmra.mxu2 %vm572_vm10, %v1443_v58  ;;  %v1451_v12 = vsel %vm820_vm12, %v1446_v10, %v1450_v50 }
 0x13a   : > { %2749 = vmatmul.msk.bf16.gmra.mxu0 %vm572_vm10, %v1898_v3  ;;  %v597_v23 = vpop.f32.mrf.mxu1  ;;  %v199_v3 = vld [vmem:[%s2983_s24] sm:$0xff]  }
 0x13b   : > { %625 = vrot.lane.b32.xlu2 %v597_v23, %s2890_s20  ;;  %v317_v44 = vunpack.c.l.bf16 %v199_v3 }
 0x13d   : > { %2734 = vmatmul.msk.bf16.vlgmr.msra.gmra.mxu3 %vm572_vm10, %v3733_v63 }
 0x142   : > { %2761 = vmatmul.msk.bf16.gmra.mxu1 %vm572_vm10, %v2181_v32  ;;  %v599_v57 = vpop.f32.mrf.mxu1 }
 0x143   : > { %627 = vrot.lane.b32.xlu0 %v599_v57, %s2890_s20 }
 0x145   : > { %2725 = vmatmul.msk.bf16.gmra.mxu2 %vm572_vm10, %v1451_v12 }
 0x14a   : > { %v1323_v11 = vpop.f32.mrf.mxu1 }
 0x14b   : > { %1351 = vrot.lane.b32.xlu2 %v1323_v11, %s2890_s20 }
 0x14d   : > { %2735 = vmatmul.msk.bf16.gmra.mxu3 %vm572_vm10, %v3802_v34  ;;  %v1634_v34 = vunpack.c.l.bf16 %v1391_v9 }
 0x150   : > { %v602_v63 = vpop.f32.mrf.mxu3  ;;  %v881_v53 = vpop.f32.mrf.mxu0 }
 0x151   : > { %629 = vrot.lane.b32.xlu1 %v602_v63, %s2890_s20  ;;  %909 = vrot.lane.b32.xlu0 %v881_v53, %s2890_s20  ;;  %v318_v63 = vunpack.c.h.bf16 %v199_v3 }
 0x152   : > { %v1325_v19 = vpop.f32.mrf.mxu1 }
 0x155   : > { %2770 = vmatmul.msk.bf16.vlgmr.msra.gmra.mxu2 %vm572_vm10, %v3751_v55  ;;  %v1683_v55 = vmul.f32 %v1664_v42, %v1634_v34 }
 0x157   : > { %v1688_v0 = vpack.c.bf16 %v1683_v55, %v1683_v55 }
 0x158   : > { %v604_v16 = vpop.f32.mrf.mxu3  ;;  %v883_v35 = vpop.f32.mrf.mxu0 }
 0x159   : > { %631 = vrot.lane.b32.xlu2 %v604_v16, %s2890_s20  ;;  %1353 = vrot.lane.b32.xlu0 %v1325_v19, %s2890_s20  ;;  %v1702_v1 = vrot.slane %v1688_v0, 1 }
 0x15a   : > { %911 = vrot.lane.b32.xlu1 %v883_v35, %s2890_s20  ;;  %v1328_v13 = vpop.f32.mrf.mxu1 }
 0x15b   : > { %v1703_v14 = vsel %vm1093_vm14, %v3859_v48, %v1702_v1 }
 0x15d   : > { %2736 = vmatmul.msk.bf16.gmra.mxu3 %vm572_vm10, %v3869_v31 }
 0x160   : > { %v607_v60 = vpop.f32.mrf.mxu3 }
 0x161   : > { %633 = vrot.lane.b32.xlu0 %v607_v60, %s2890_s20 }
 0x162   : > { %1355 = vrot.lane.b32.xlu1 %v1328_v13, %s2890_s20  ;;  %v1330_v2 = vpop.f32.mrf.mxu1 }
 0x163   : > { %1357 = vrot.lane.b32.xlu2 %v1330_v2, %s2890_s20 }
 0x165   : > { %2771 = vmatmul.msk.bf16.gmra.mxu2 %vm572_vm10, %v3806_v46 }
 0x167   : > { %v886_v40 = vpop.f32.mrf.mxu2 }
 0x168   : > { %v609_v62 = vpop.f32.mrf.mxu3 }
 0x16b   : > { %v1333_v31 = vpop.f32.mrf.mxu1  ;;  %913 = vrot.lane.b32.xlu2 %v886_v40, %s2890_s20 }
 0x16c   : > { %1359 = vrot.lane.b32.xlu0 %v1333_v31, %s2890_s20 }
 0x16d   : > { %2737 = vmatmul.msk.bf16.gmra.mxu3 %vm572_vm10, %v1703_v14 }
 0x16f   : > { %v888_v21 = vpop.f32.mrf.mxu2 }
 0x170   : > { %v612_v42 = vpop.f32.mrf.mxu3 }
 0x173   : > { %v1335_v27 = vpop.f32.mrf.mxu1 }
 0x174   : > { %915 = vrot.lane.b32.xlu0 %v888_v21, %s2890_s20 }
 0x175   : > { %2772 = vmatmul.msk.bf16.gmra.mxu2 %vm572_vm10, %v3889_v52 }
 0x178   : > { %v891_v46 = vpop.f32.mrf.mxu2  ;;  %v614_v54 = vpop.f32.mrf.mxu3 }
 0x17b   : > { %v1338_v45 = vpop.f32.mrf.mxu1 }
 0x17f   : > { %v1924_v17 = vpop.f32.mrf.mxu0 }
 0x180   : > { %v893_v51 = vpop.f32.mrf.mxu2  ;;  %1952 = vrot.lane.b32.xlu1 %v1924_v17, %s2890_s20  ;;  %v1127_v7 = vpop.f32.mrf.mxu3 }
 0x183   : > { %v1340_v36 = vpop.f32.mrf.mxu1 }
 0x185   : > { %2773 = vmatmul.msk.bf16.gmra.mxu2 %vm572_vm10, %v3892_v37 }
 0x187   : > { %v1926_v48 = vpop.f32.mrf.mxu0 }
 0x188   : > { %v896_v49 = vpop.f32.mrf.mxu2  ;;  %635 = vrot.lane.b32.xlu1 %v609_v62, %s2890_s20  ;;  %1954 = vrot.lane.b32.xlu2 %v1926_v48, %s2890_s20  ;;  %v1129_v29 = vpop.f32.mrf.mxu3 }
 0x18b   : > { %v2206_v61 = vpop.f32.mrf.mxu1 }
 0x190   : > { %v898_v41 = vpop.f32.mrf.mxu2  ;;  %1361 = vrot.lane.b32.xlu1 %v1335_v27, %s2890_s20  ;;  %637 = vrot.lane.b32.xlu2 %v612_v42, %s2890_s20  ;;  %v1132_v52 = vpop.f32.mrf.mxu3  ;;  %v202_v42 = vld [vmem:[%s2983_s24 + $0xc] sm:$0xff]  }
 0x193   : > { %v2208_v25 = vpop.f32.mrf.mxu1 }
 0x195   : > { %v626_v15 = vpop.permute.xlu2 %625 }
 0x196   : > { %v649_v50 = vadd.f32 %v626_v15, %v317_v44 }
 0x197   : > { %v1929_v24 = vpop.f32.mrf.mxu0 }
 0x198   : > { %v1476_v33 = vpop.f32.mrf.mxu2  ;;  %917 = vrot.lane.b32.xlu1 %v891_v46, %s2890_s20  ;;  %1956 = vrot.lane.b32.xlu0 %v1929_v24, %s2890_s20  ;;  %v1134_v37 = vpop.f32.mrf.mxu3 }
 0x199   : > { %1363 = vrot.lane.b32.xlu2 %v1338_v45, %s2890_s20 }
 0x19b   : > { %v2211_v59 = vpop.f32.mrf.mxu1 }
 0x19f   : > { %v1931_v4 = vpop.f32.mrf.mxu0 }
 0x1a0   : > { %v1478_v6 = vpop.f32.mrf.mxu2  ;;  %639 = vrot.lane.b32.xlu0 %v614_v54, %s2890_s20  ;;  %1958 = vrot.lane.b32.xlu1 %v1931_v4, %s2890_s20  ;;  %v1137_v9 = vpop.f32.mrf.mxu3  ;;  %v320_v54 = vunpack.c.l.bf16 %v202_v42 }
 0x1a1   : > { %919 = vrot.lane.b32.xlu2 %v893_v51, %s2890_s20 }
 0x1a3   : > { %v2213_v13 = vpop.f32.mrf.mxu1 }
 0x1a5   : > { %v3966_v39 = vpop.permute.xlu2 %1351 }
 0x1a7   : > { %v1934_v5 = vpop.f32.mrf.mxu0 }
 0x1a8   : > { %v3961_v43 = vpop.f32.mrf.mxu2  ;;  %1155 = vrot.lane.b32.xlu1 %v1127_v7, %s2890_s20  ;;  %1365 = vrot.lane.b32.xlu0 %v1340_v36, %s2890_s20  ;;  %v1139_v47 = vpop.f32.mrf.mxu3 }
 0x1a9   : > { %1960 = vrot.lane.b32.xlu2 %v1934_v5, %s2890_s20 }
 0x1af   : > { %v1936_v30 = vpop.f32.mrf.mxu0  ;;  %v2216_v62 = vpop.f32.mrf.mxu1 }
 0x1b0   : > { %v1483_v28 = vpop.f32.mrf.mxu2  ;;  %921 = vrot.lane.b32.xlu0 %v896_v49, %s2890_s20  ;;  %923 = vrot.lane.b32.xlu1 %v898_v41, %s2890_s20  ;;  %v1142_v23 = vpop.f32.mrf.mxu3 }
 0x1b1   : > { %1157 = vrot.lane.b32.xlu2 %v1129_v29, %s2890_s20 }
 0x1b3   : > { %v632_v26 = vpop.permute.xlu2 %631 }
 0x1b4   : > { %v652_v7 = vadd.f32 %v632_v26, %v320_v54 }
 0x1b5   : > { %v628_v8 = vpop.permute.xlu0 %627 }
 0x1b6   : > { %v650_v34 = vadd.f32 %v628_v8, %v318_v63 }
 0x1b7   : > { %v1939_v58 = vpop.f32.mrf.mxu0  ;;  %v2218_v21 = vpop.f32.mrf.mxu1 }
 0x1b8   : > { %v1486_v20 = vpop.f32.mrf.mxu2  ;;  %1962 = vrot.lane.b32.xlu0 %v1936_v30, %s2890_s20  ;;  %1964 = vrot.lane.b32.xlu1 %v1939_v58, %s2890_s20  ;;  %v1144_v19 = vpop.f32.mrf.mxu3  ;;  %v321_v58 = vunpack.c.h.bf16 %v202_v42 }
 0x1bd   : > { %v3975_v22 = vpop.permute.xlu2 %1357 }
 0x1bf   : > { %v1941_v56 = vpop.f32.mrf.mxu0  ;;  %v2221_v49 = vpop.f32.mrf.mxu1 }
 0x1c0   : > { %v3977_v10 = vpop.f32.mrf.mxu2  ;;  %1966 = vrot.lane.b32.xlu2 %v1941_v56, %s2890_s20  ;;  %2234 = vrot.lane.b32.xlu0 %v2206_v61, %s2890_s20  ;;  %v1728_v0 = vpop.f32.mrf.mxu3 }
 0x1c1   : > { %2236 = vrot.lane.b32.xlu1 %v2208_v25, %s2890_s20 }
 0x1c3   : > { %v630_v32 = vpop.permute.xlu1 %629  ;;  %v910_v57 = vpop.permute.xlu0 %909 }
 0x1c4   : > { %v651_v12 = vadd.f32 %v630_v32, %v319_v18  ;;  %v3982_v11 = vadd.f32 %v910_v57, %v649_v50 }
 0x1c5   : > { %v914_v53 = vpop.permute.xlu2 %913 }
 0x1c6   : > { %v3984_v16 = vadd.f32 %v914_v53, %v651_v12  ;;  %v205_v53 = vld [vmem:[%s2983_s24 + $0x18] sm:$0xff]  }
 0x1c8   : > { %v1491_v35 = vpop.f32.mrf.mxu2  ;;  %2238 = vrot.lane.b32.xlu2 %v2211_v59, %s2890_s20  ;;  %1159 = vrot.lane.b32.xlu0 %v1132_v52, %s2890_s20  ;;  %v1730_v14 = vpop.f32.mrf.mxu3 }
 0x1c9   : > { %1504 = vrot.lane.b32.xlu1 %v1476_v33, %s2890_s20  ;;  %v2223_v33 = vpop.f32.mrf.mxu1 }
 0x1cb   : > { %v3989_v55 = vpop.permute.xlu0 %1353 }
 0x1cc   : > { %v912_v60 = vpop.permute.xlu1 %911 }
 0x1cd   : > { %v3991_v2 = vadd.f32 %v912_v60, %v650_v34 }
 0x1d0   : > { %v1493_v40 = vpop.f32.mrf.mxu2  ;;  %2240 = vrot.lane.b32.xlu0 %v2213_v13, %s2890_s20  ;;  %1506 = vrot.lane.b32.xlu2 %v1478_v6, %s2890_s20  ;;  %v1733_v48 = vpop.f32.mrf.mxu3  ;;  %v204_v6 = vld [vmem:[%s2983_s24 + $0x14] sm:$0xf]  ;;  %v323_v13 = vunpack.c.l.bf16 %v205_v53  ;;  %s2891_s24 = smov 96  }
 0x1d1   : > { %1161 = vrot.lane.b32.xlu1 %v1134_v37, %s2890_s20  ;;  %v322_v15 = vunpack.c.l.bf16 %v204_v6 }
 0x1d3   : > { %v634_v1 = vpop.permute.xlu0 %633 }
 0x1d4   : > { %v4013_v41 = vpop.permute.xlu1 %1355 }
 0x1d8   : > { %1165 = vrot.lane.b32.xlu0 %v1139_v47, %s2890_s20  ;;  %1163 = vrot.lane.b32.xlu2 %v1137_v9, %s2890_s20  ;;  %v2450_v31 = vpop.f32.mrf.mxu2  ;;  %v1735_v45 = vpop.f32.mrf.mxu3 }
 0x1d9   : > { %2242 = vrot.lane.b32.xlu1 %v2216_v62, %s2890_s20 }
 0x1de   : > { %v4000_v46 = vpop.permute.xlu0 %1359 }
 0x1e0   : > { %1508 = vrot.lane.b32.xlu2 %v3961_v43, %s2890_s20  ;;  %1510 = vrot.lane.b32.xlu0 %v1483_v28, %s2890_s20  ;;  %v2452_v51 = vpop.f32.mrf.mxu2  ;;  %v1738_v5 = vpop.f32.mrf.mxu3 }
 0x1e1   : > { %1167 = vrot.lane.b32.xlu1 %v1142_v23, %s2890_s20 }
 0x1e2   : > { %v4006_v17 = vpop.permute.xlu2 %1954 }
 0x1e6   : > { %v916_v29 = vpop.permute.xlu0 %915 }
 0x1e7   : > { %v4008_v27 = vadd.f32 %v916_v29, %v652_v7 }
 0x1e8   : > { %2244 = vrot.lane.b32.xlu2 %v2218_v21, %s2890_s20  ;;  %2246 = vrot.lane.b32.xlu0 %v2221_v49, %s2890_s20  ;;  %v2455_v24 = vpop.f32.mrf.mxu2  ;;  %v1740_v25 = vpop.f32.mrf.mxu3 }
 0x1e9   : > { %1512 = vrot.lane.b32.xlu1 %v1486_v20, %s2890_s20  ;;  %v653_v20 = vadd.f32 %v634_v1, %v321_v58 }
 0x1ea   : > { %v638_v52 = vpop.permute.xlu2 %637 }
 0x1f0   : > { %1169 = vrot.lane.b32.xlu2 %v1144_v19, %s2890_s20  ;;  %1516 = vrot.lane.b32.xlu0 %v1491_v35, %s2890_s20  ;;  %v2457_v36 = vpop.f32.mrf.mxu2  ;;  %v1743_v18 = vpop.f32.mrf.mxu3  ;;  %v324_v35 = vunpack.c.h.bf16 %v205_v53 }
 0x1f1   : > { %2248 = vrot.lane.b32.xlu1 %v2223_v33, %s2890_s20 }
 0x1f2   : > { %v4018_v37 = vpop.permute.xlu1 %1952 }
 0x1f3   : > { %v4020_v4 = vpop.permute.xlu2 %1363 }
 0x1f8   : > { %1514 = vrot.lane.b32.xlu2 %v3977_v10, %s2890_s20  ;;  %1758 = vrot.lane.b32.xlu0 %v1730_v14, %s2890_s20  ;;  %v2460_v28 = vpop.f32.mrf.mxu2  ;;  %v1745_v57 = vpop.f32.mrf.mxu3 }
 0x1f9   : > { %1518 = vrot.lane.b32.xlu1 %v1493_v40, %s2890_s20 }
 0x1fa   : > { %v636_v43 = vpop.permute.xlu1 %635 }
 0x1fb   : > { %v654_v9 = vadd.f32 %v636_v43, %v322_v15  ;;  %v920_v61 = vpop.permute.xlu2 %919 }
 0x1fd   : > { %v4027_v30 = vadd.f32 %v920_v61, %v654_v9 }
 0x200   : > { %1756 = vrot.lane.b32.xlu2 %v1728_v0, %s2890_s20  ;;  %2480 = vrot.lane.b32.xlu0 %v2452_v51, %s2890_s20  ;;  %v2462_v38 = vpop.f32.mrf.mxu2 }
 0x201   : > { %1760 = vrot.lane.b32.xlu1 %v1733_v48, %s2890_s20 }
 0x202   : > { %v4032_v47 = vpop.permute.xlu1 %1361 }
 0x203   : > { %v4034_v26 = vpop.permute.xlu2 %1960 }
 0x208   : > { %2478 = vrot.lane.b32.xlu2 %v2450_v31, %s2890_s20  ;;  %1764 = vrot.lane.b32.xlu0 %v1738_v5, %s2890_s20  ;;  %v2465_v32 = vpop.f32.mrf.mxu2 }
 0x209   : > { %2482 = vrot.lane.b32.xlu1 %v2455_v24, %s2890_s20 }
 0x20a   : > { %v918_v3 = vpop.permute.xlu1 %917  ;;  %v4039_v8 = vpop.permute.xlu0 %1956 }
 0x20b   : > { %v937_v23 = vadd.f32 %v918_v3, %v653_v20  ;;  %v1158_v44 = vpop.permute.xlu2 %1157 }
 0x20c   : > { %v1180_v56 = vadd.f32 %v1158_v44, %v3991_v2 }
 0x20e   : > { %v1376_v59 = vadd.f32 %v3989_v55, %v1180_v56  ;;  %v655_v55 = vadd.f32 %v638_v52, %v323_v13 }
 0x210   : > { %1762 = vrot.lane.b32.xlu2 %v1735_v45, %s2890_s20  ;;  %2486 = vrot.lane.b32.xlu0 %v2460_v28, %s2890_s20  ;;  %v2467_v34 = vpop.f32.mrf.mxu2 }
 0x211   : > { %1766 = vrot.lane.b32.xlu1 %v1740_v25, %s2890_s20 }
 0x212   : > { %v640_v10 = vpop.permute.xlu0 %639  ;;  %v4046_v50 = vpop.permute.xlu1 %1958 }
 0x213   : > { %v656_v60 = vadd.f32 %v640_v10, %v324_v35 }
 0x218   : > { %2484 = vrot.lane.b32.xlu2 %v2457_v36, %s2890_s20  ;;  %1770 = vrot.lane.b32.xlu0 %v1745_v57, %s2890_s20 }
 0x219   : > { %2488 = vrot.lane.b32.xlu1 %v2462_v38, %s2890_s20 }
 0x21a   : > { %v1156_v12 = vpop.permute.xlu1 %1155  ;;  %v4051_v63 = vpop.permute.xlu2 %1966 }
 0x21b   : > { %v1366_v19 = vpop.permute.xlu0 %1365  ;;  %v1179_v61 = vadd.f32 %v1156_v12, %v3982_v11 }
 0x21d   : > { %v1375_v58 = vadd.f32 %v3966_v39, %v1179_v61 }
 0x220   : > { %1768 = vrot.lane.b32.xlu2 %v1743_v18, %s2890_s20  ;;  %2492 = vrot.lane.b32.xlu0 %v2467_v34, %s2890_s20 }
 0x222   : > { %v4056_v2 = vpop.permute.xlu2 %2238  ;;  %v924_v40 = vpop.permute.xlu1 %923 }
 0x223   : > { %v922_v0 = vpop.permute.xlu0 %921  ;;  %v940_v62 = vadd.f32 %v924_v40, %v656_v60 }
 0x224   : > { %v939_v1 = vadd.f32 %v922_v0, %v655_v55 }
 0x228   : > { %2490 = vrot.lane.b32.xlu2 %v2465_v32, %s2890_s20 }
 0x22a   : > { %v4059_v31 = vpop.permute.xlu1 %1964  ;;  %v1507_v14 = vpop.permute.xlu2 %1506 }
 0x22b   : > { %v4061_v21 = vpop.permute.xlu0 %1962  ;;  %v1529_v42 = vadd.f32 %v1507_v14, %v1376_v59 }
 0x232   : > { %v1164_v54 = vpop.permute.xlu2 %1163 }
 0x233   : > { %v2235_v51 = vpop.permute.xlu0 %2234  ;;  %v2237_v7 = vpop.permute.xlu1 %2236  ;;  %v1183_v48 = vadd.f32 %v1164_v54, %v937_v23 }
 0x23a   : > { %v1509_v49 = vpop.permute.xlu2 %1508 }
 0x23b   : > { %v1160_v29 = vpop.permute.xlu0 %1159  ;;  %v1505_v52 = vpop.permute.xlu1 %1504 }
 0x23c   : > { %v1528_v20 = vadd.f32 %v1505_v52, %v1375_v58  ;;  %v1181_v35 = vadd.f32 %v1160_v29, %v3984_v16 }
 0x23e   : > { %v1377_v40 = vadd.f32 %v4013_v41, %v1181_v35  ;;  %v1379_v41 = vadd.f32 %v4000_v46, %v1183_v48 }
 0x242   : > { %v4063_v24 = vpop.permute.xlu2 %2244 }
 0x243   : > { %v2241_v45 = vpop.permute.xlu0 %2240  ;;  %v1162_v33 = vpop.permute.xlu1 %1161 }
 0x244   : > { %v1182_v10 = vadd.f32 %v1162_v33, %v4008_v27 }
 0x246   : > { %v1378_v12 = vadd.f32 %v3975_v22, %v1182_v10  ;;  %v1530_v22 = vadd.f32 %v1509_v49, %v1377_v40 }
 0x24a   : > { %v1170_v6 = vpop.permute.xlu2 %1169 }
 0x24b   : > { %v1166_v36 = vpop.permute.xlu0 %1165  ;;  %v4065_v15 = vpop.permute.xlu1 %2242  ;;  %v1186_v5 = vadd.f32 %v1170_v6, %v940_v62 }
 0x24d   : > { %v4067_v43 = vadd.f32 %v1366_v19, %v1186_v5 }
 0x252   : > { %v4069_v9 = vpop.permute.xlu2 %1514 }
 0x253   : > { %v1168_v28 = vpop.permute.xlu1 %1167  ;;  %v1511_v25 = vpop.permute.xlu0 %1510 }
 0x254   : > { %v1531_v39 = vadd.f32 %v1511_v25, %v1378_v12 }
 0x25a   : > { %v1757_v3 = vpop.permute.xlu2 %1756 }
 0x25b   : > { %v2247_v38 = vpop.permute.xlu0 %2246  ;;  %v1513_v23 = vpop.permute.xlu1 %1512  ;;  %v1780_v44 = vadd.f32 %v1757_v3, %v1528_v20 }
 0x25d   : > { %v1976_v56 = vadd.f32 %v4018_v37, %v1780_v44 }
 0x25f   : > { %v2258_v18 = vadd.f32 %v2235_v51, %v1976_v56  ;;  %v1185_v51 = vadd.f32 %v1168_v28, %v939_v1 }
 0x262   : > { %v2479_v59 = vpop.permute.xlu2 %2478 }
 0x263   : > { %v4075_v32 = vpop.permute.xlu1 %2248  ;;  %v1517_v57 = vpop.permute.xlu0 %1516  ;;  %v2502_v53 = vadd.f32 %v2479_v59, %v2258_v18 }
 0x265   : > { %v2510_v11 = vmax.f32 %v2502_v53, 0.0 }
 0x267   : > { %v2518_v19 = vpack.c.bf16 %v2510_v11, %v2510_v11 }
 0x269   : > { %2534 = vrot.lane.b32.xlu1 %v2518_v19, %s2891_s24 }
 0x26a   : > { %v1763_v13 = vpop.permute.xlu2 %1762 }
 0x26b   : > { %v1759_v37 = vpop.permute.xlu0 %1758  ;;  %v1519_v34 = vpop.permute.xlu1 %1518  ;;  %v1783_v60 = vadd.f32 %v1763_v13, %v1531_v39 }
 0x26c   : > { %v1781_v55 = vadd.f32 %v1759_v37, %v1529_v42 }
 0x26d   : > { %v1979_v27 = vadd.f32 %v4046_v50, %v1783_v60  ;;  %v1381_v50 = vadd.f32 %v4020_v4, %v1185_v51 }
 0x26e   : > { %v1977_v0 = vadd.f32 %v4006_v17, %v1781_v55 }
 0x26f   : > { %v2261_v62 = vadd.f32 %v2241_v45, %v1979_v27  ;;  %v1534_v45 = vadd.f32 %v1517_v57, %v1381_v50 }
 0x270   : > { %v2259_v14 = vadd.f32 %v2237_v7, %v1977_v0  ;;  %v1532_v7 = vadd.f32 %v1513_v23, %v1379_v41 }
 0x272   : > { %v2485_v54 = vpop.permute.xlu2 %2484 }
 0x273   : > { %v1761_v52 = vpop.permute.xlu1 %1760  ;;  %v2481_v33 = vpop.permute.xlu0 %2480  ;;  %v2505_v6 = vadd.f32 %v2485_v54, %v2261_v62 }
 0x274   : > { %v1782_v16 = vadd.f32 %v1761_v52, %v1530_v22  ;;  %v2503_v29 = vadd.f32 %v2481_v33, %v2259_v14 }
 0x275   : > { %v2513_v5 = vmax.f32 %v2505_v6, 0.0 }
 0x276   : > { %v1978_v61 = vadd.f32 %v4039_v8, %v1782_v16  ;;  %v2511_v42 = vmax.f32 %v2503_v29, 0.0  ;;  %v1184_v8 = vadd.f32 %v1166_v36, %v4027_v30 }
 0x277   : > { %v2521_v25 = vpack.c.bf16 %v2513_v5, %v2513_v5 }
 0x278   : > { %v2519_v17 = vpack.c.bf16 %v2511_v42, %v2511_v42  ;;  %v2260_v1 = vadd.f32 %v4056_v2, %v1978_v61  ;;  %v1380_v56 = vadd.f32 %v4032_v47, %v1184_v8 }
 0x279   : > { %2540 = vrot.lane.b32.xlu1 %v2521_v25, %s2891_s24 }
 0x27a   : > { %2536 = vrot.lane.b32.xlu2 %v2519_v17, %s2891_s24  ;;  %v1769_v49 = vpop.permute.xlu2 %1768  ;;  %v1533_v59 = vadd.f32 %v4069_v9, %v1380_v56  ;;  %v1535_v9 = vadd.f32 %v1519_v34, %v4067_v43 }
 0x27b   : > { %v1765_v28 = vpop.permute.xlu0 %1764  ;;  %v2483_v58 = vpop.permute.xlu1 %2482  ;;  %v1786_v20 = vadd.f32 %v1769_v49, %v1534_v45 }
 0x27c   : > { %v1784_v3 = vadd.f32 %v1765_v28, %v1532_v7  ;;  %v2504_v4 = vadd.f32 %v2483_v58, %v2260_v1 }
 0x27d   : > { %v1982_v44 = vadd.f32 %v4059_v31, %v1786_v20 }
 0x27e   : > { %v1980_v46 = vadd.f32 %v4034_v26, %v1784_v3  ;;  %v2512_v48 = vmax.f32 %v2504_v4, 0.0 }
 0x27f   : > { %v2264_v18 = vadd.f32 %v2247_v38, %v1982_v44 }
 0x280   : > { %v2520_v23 = vpack.c.bf16 %v2512_v48, %v2512_v48  ;;  %v2262_v2 = vadd.f32 %v4065_v15, %v1980_v46 }
 0x282   : > { %2538 = vrot.lane.b32.xlu0 %v2520_v23, %s2891_s24  ;;  %v2491_v10 = vpop.permute.xlu2 %2490 }
 0x283   : > { %v1767_v57 = vpop.permute.xlu1 %1766  ;;  %v2487_v30 = vpop.permute.xlu0 %2486  ;;  %v2508_v36 = vadd.f32 %v2491_v10, %v2264_v18 }
 0x284   : > { %v1785_v53 = vadd.f32 %v1767_v57, %v1533_v59  ;;  %v2506_v11 = vadd.f32 %v2487_v30, %v2262_v2 }
 0x285   : > { %v2516_v31 = vmax.f32 %v2508_v36, 0.0 }
 0x286   : > { %v1981_v26 = vadd.f32 %v4061_v21, %v1785_v53  ;;  %v2514_v12 = vmax.f32 %v2506_v11, 0.0 }
 0x287   : > { %v2524_v19 = vpack.c.bf16 %v2516_v31, %v2516_v31 }
 0x288   : > { %v2522_v47 = vpack.c.bf16 %v2514_v12, %v2514_v12  ;;  %v2263_v38 = vadd.f32 %v4063_v24, %v1981_v26 }
 0x289   : > { %2546 = vrot.lane.b32.xlu1 %v2524_v19, %s2891_s24 }
 0x28a   : > { %2542 = vrot.lane.b32.xlu2 %v2522_v47, %s2891_s24 }
 0x28b   : > { %v1771_v15 = vpop.permute.xlu0 %1770  ;;  %v2489_v39 = vpop.permute.xlu1 %2488 }
 0x28c   : > { %v1787_v35 = vadd.f32 %v1771_v15, %v1535_v9  ;;  %v2507_v13 = vadd.f32 %v2489_v39, %v2263_v38 }
 0x28e   : > { %v1983_v37 = vadd.f32 %v4051_v63, %v1787_v35  ;;  %v2515_v60 = vmax.f32 %v2507_v13, 0.0 }
 0x290   : > { %v2523_v21 = vpack.c.bf16 %v2515_v60, %v2515_v60  ;;  %v2265_v55 = vadd.f32 %v4075_v32, %v1983_v37 }
 0x292   : > { %2544 = vrot.lane.b32.xlu0 %v2523_v21, %s2891_s24 }
 0x293   : > { %v2493_v24 = vpop.permute.xlu0 %2492 }
 0x294   : > { %v2509_v27 = vadd.f32 %v2493_v24, %v2265_v55 }
 0x296   : > { %v2517_v40 = vmax.f32 %v2509_v27, 0.0 }
 0x298   : > { %v2525_v0 = vpack.c.bf16 %v2517_v40, %v2517_v40 }
 0x29a   : > { %2548 = vrot.lane.b32.xlu2 %v2525_v0, %s2891_s24 }
 0x2d4   : > { %v2537_v43 = vpop.permute.xlu2 %2536 }
 0x2d5   : > { %2559 = vst.msk [vmem:[%s197_s23 + $0x4] sm:$0xf] %vm325_vm2, %v2537_v43 }
 0x2db   : > { %v2535_v63 = vpop.permute.xlu1 %2534 }
 0x2dc   : > { %2558 = vst.msk [vmem:[%s197_s23] sm:$0xf] %vm325_vm2, %v2535_v63 }
 0x2e4   : > { %v2543_v34 = vpop.permute.xlu2 %2542 }
 0x2e5   : > { %2562 = vst.msk [vmem:[%s197_s23 + $0x10] sm:$0xf] %vm325_vm2, %v2543_v34 }
 0x2eb   : > { %v2541_v32 = vpop.permute.xlu1 %2540 }
 0x2ec   : > { %2561 = vst.msk [vmem:[%s197_s23 + $0xc] sm:$0xf] %vm325_vm2, %v2541_v32 }
 0x2f4   : > { %v2549_v62 = vpop.permute.xlu2 %2548  ;;  %v2539_v22 = vpop.permute.xlu0 %2538 }
 0x2f5   : > { %2565 = vst.msk [vmem:[%s197_s23 + $0x1c] sm:$0xf] %vm325_vm2, %v2549_v62 }
 0x2f6   : > { %2560 = vst.msk [vmem:[%s197_s23 + $0x8] sm:$0xf] %vm325_vm2, %v2539_v22 }
 0x2fb   : > { %v2547_v14 = vpop.permute.xlu1 %2546 }
 0x2fc   : > { %2564 = vst.msk [vmem:[%s197_s23 + $0x18] sm:$0xf] %vm325_vm2, %v2547_v14 }
 0x304   : > { %v2545_v54 = vpop.permute.xlu0 %2544 }
 0x305   : > { %2563 = vst.msk [vmem:[%s197_s23 + $0x14] sm:$0xf] %vm325_vm2, %v2545_v54 }
 0x306 PF: > { %s14_s15 = sadd.s32 1, %s2886_s15  }
 0x307   : > { %p11_p4 = scmp.ge.s32.totalorder %s14_s15, 4  }
 0x309   :  { %13 = sbr.rel (!%p11_p4) target bundleno = 1 (0x1), region = 73 }

// kernel: ensemble_forward.8
= control target key start
LH: loop header
LB: loop body
LE: loop exit
PB: predicated region body
PF: predicated region fallthrough
CT: control target
= control target key end

     0   :  { %s1387_s21 = smov 0   ;;  %s1653_s0 = inlined_call_operand.vmem [shape: bf16[2,16,72], index: 0, kind: input, shape index: {}]   ;;  %s1654_s1 = inlined_call_operand.vmem [shape: bf16[72,32], index: 1, kind: input, shape index: {}]   ;;  %s1655_s2 = inlined_call_operand.vmem [shape: bf16[288,32], index: 2, kind: input, shape index: {}]   ;;  %s1656_s3 = inlined_call_operand.vmem [shape: bf16[8,32], index: 3, kind: input, shape index: {}]   ;;  %s1657_s4 = inlined_call_operand.vmem [shape: f32[1,32], index: 4, kind: input, shape index: {}]   ;;  %s1658_s5 = inlined_call_operand.vmem [shape: f32[9,16,1], index: 5, kind: input, shape index: {}]   ;;  %s1659_s6 = inlined_call_operand.vmem [shape: bf16[2,16,32], index: 6, kind: output, shape index: {}]  }
   0x1 LB: > { %s1160_s22 = sadd.s32 4294967295, %s1347_s21   ;;  %p1164_p0 = scmp.ge.s32.totalorder %s1347_s21, 1  ;;  %s1347_s21 = sphi %s1387_s21, %s16_s21  }
   0x2   : > { %p212_p1 = scmp.lt.s32.totalorder %s1347_s21, 3 }
   0x4   : > { %p213_p2 = pnand %p1164_p0, %p212_p1 }
   0x5   : > { %p242_p3 = scmp.lt.s32.totalorder (!%p213_p2), %s1160_s22, 1  ;;  %s1350_s7 = smov (!%p213_p2), 96  }
   0x6   : > { %216 = sbr.rel (%p213_p2) target bundleno = 382 (0x17e), region = 44 }
   0xb   : > { %v263_v0 = vld [vmem:[%s1654_s1 + $0x20] sm:$0xf]  ;;  %vm352_vm0 = vcmask 253952   ;;  %v1200_v1 = vld [vmem:[%s1658_s5 + $0x10] sm:$0xff]  ;;  %v1349_v3 = vmov 0   ;;  %vm300_vm1 = vcmask 1043456  }
   0xc   : > { %v286_v2 = vunpack.c.l.b16 %v263_v0  ;;  %1337 = vset.pattern.permute.xlu0 %v1349_v3  ;;  %353 = vst.msk [vmem:[#allocation2 + $0xc] sm:$0x1] %vm352_vm0, %v1349_v3  ;;  %v466_v4 = vpack.c.bf16 %v1200_v1, %v1200_v1  ;;  %1338 = vset.pattern.permute.xlu1 %v1349_v3  ;;  %v395_v5 = vld [vmem:[%s1658_s5] sm:$0xff]  ;;  %v1201_v8 = vld [vmem:[%s1658_s5 + $0x18] sm:$0xff]  ;;  %v1222_v9 = vld [vmem:[%s1658_s5 + $0x30] sm:$0xff]  ;;  %s1661_s22 = smov (!%p242_p3, %s1160_s22), 1 }
   0xd   : > { %v397_v6 = vpack.c.bf16 %v395_v5, %v395_v5  ;;  %1339 = vset.pattern.permute.xlu2 %v1349_v3  ;;  %v396_v11 = vld [vmem:[%s1658_s5 + $0x8] sm:$0xff]  ;;  %v640_v12 = vpack.c.bf16 %v1222_v9, %v1222_v9  ;;  %v1298_v13 = vld [vmem:[%s1654_s1 + $0x18] sm:$0xff]  ;;  %v467_v14 = vpack.c.bf16 %v1201_v8, %v1201_v8  ;;  %s1292_s13 = sshll.u32 %s1661_s22, 3  ;;  %v1297_v16 = vld [vmem:[%s1654_s1 + $0x10] sm:$0xff]  ;;  %vm296_vm2 = vcmask 588800  }
   0xe   : > { %v291_v7 = vpack.c.b16 %v286_v2, %v286_v2  ;;  %470 = vperm.xlu0 %1337, %v466_v4   ;;  %v398_v15 = vpack.c.bf16 %v396_v11, %v396_v11  ;;  %v1223_v17 = vld [vmem:[%s1658_s5 + $0x38] sm:$0xff]  ;;  %s246_s20 = scalar_lea.vmem %s1653_s0, %s1292_s13  ;;  %v1211_v19 = vld [vmem:[%s1658_s5 + $0x20] sm:$0xff]  ;;  %v1296_v20 = vld [vmem:[%s1654_s1 + $0x8] sm:$0xff]  ;;  %vm348_vm3 = vcmask 257024   ;;  %vm327_vm4 = vcmask 64512   ;;  %s251_s27 = scalar_lea.vmem %s1659_s6, %s1292_s13 }
   0xf   : > { %401 = vperm.xlu1 %1338, %v397_v6   ;;  %644 = vperm.xlu2 %1339, %v640_v12   ;;  %v641_v18 = vpack.c.bf16 %v1223_v17, %v1223_v17  ;;  %v1294_v21 = vld [vmem:[%s246_s20] sm:$0xff]  ;;  %v557_v22 = vpack.c.bf16 %v1211_v19, %v1211_v19  ;;  %v1212_v23 = vld [vmem:[%s1658_s5 + $0x28] sm:$0xff]  ;;  %v1268_v26 = vld [vmem:[%s1658_s5 + $0x70] sm:$0xff]  ;;  %349 = vst.msk [vmem:[#allocation2] sm:$0xf] %vm348_vm3, %v1349_v3  ;;  %vm381_vm5 = vcmask 257026  }
  0x10   : > { %v302_v10 = vsel %vm300_vm1, %v291_v7, 0  ;;  %v1295_v24 = vld [vmem:[%s1654_s1] sm:$0xff]  ;;  %v558_v25 = vpack.c.bf16 %v1212_v23, %v1212_v23  ;;  %v1269_v27 = vld [vmem:[%s1658_s5 + $0x78] sm:$0xff]  ;;  %v934_v28 = vpack.c.bf16 %v1268_v26, %v1268_v26  ;;  %v1246_v30 = vld [vmem:[%s1658_s5 + $0x50] sm:$0xff]  ;;  %350 = vst.msk [vmem:[#allocation2 + $0x4] sm:$0xf] %vm348_vm3, %v1349_v3 }
  0x11   : > { %307 = vmatpush.bf16.msra.mxu0 %v302_v10  ;;  %v935_v29 = vpack.c.bf16 %v1269_v27, %v1269_v27  ;;  %v784_v31 = vpack.c.bf16 %v1246_v30, %v1246_v30  ;;  %v1247_v32 = vld [vmem:[%s1658_s5 + $0x58] sm:$0xff]  ;;  %v1279_v33 = vld [vmem:[%s1658_s5 + $0x80] sm:$0xff]  ;;  %v1280_v36 = vld [vmem:[%s1658_s5 + $0x88] sm:$0xff]  ;;  %351 = vst.msk [vmem:[#allocation2 + $0x8] sm:$0xf] %vm348_vm3, %v1349_v3  ;;  %vm388_vm10 = vcmask 256000  }
  0x12   : > { %v785_v34 = vpack.c.bf16 %v1247_v32, %v1247_v32  ;;  %v1023_v35 = vpack.c.bf16 %v1279_v33, %v1279_v33  ;;  %v1024_v37 = vpack.c.bf16 %v1280_v36, %v1280_v36  ;;  %v1257_v38 = vld [vmem:[%s1658_s5 + $0x60] sm:$0xff]  ;;  %v1258_v39 = vld [vmem:[%s1658_s5 + $0x68] sm:$0xff]  ;;  %v1311_v53 = vld [vmem:[%s1655_s2 + $0x58] sm:$0xff]  ;;  %vm382_vm6 = vsmask.f32 7946 }
  0x13   : > { %v867_v40 = vpack.c.bf16 %v1257_v38, %v1257_v38  ;;  %v868_v41 = vpack.c.bf16 %v1258_v39, %v1258_v39  ;;  %v320_v45 = vld [vmem:[%s1656_s3] sm:$0xf]  ;;  %v1300_v49 = vld [vmem:[%s1655_s2 + $0x8] sm:$0xff]  ;;  %v1303_v56 = vld [vmem:[%s1655_s2 + $0x18] sm:$0xff]  ;;  %v1351_v9 = vmov 839922192  }
  0x14   : > { %v332_v46 = vsel %vm300_vm1, %v320_v45, 0  ;;  %450 = vmatpush.bf16.msra.mxu2 %v1300_v49  ;;  %v1299_v51 = vld [vmem:[%s1655_s2] sm:$0xff]  ;;  %v1305_v52 = vld [vmem:[%s1655_s2 + $0x28] sm:$0xff]  ;;  %543 = vmatpush.bf16.msra.mxu3 %v1303_v56  ;;  %v1310_v60 = vld [vmem:[%s1655_s2 + $0x50] sm:$0xff]  ;;  %v405_v10 = vunpack.c.l.s4 %v1351_v9  ;;  %vm356_vm8 = vsmask.f32 2304 }
  0x15   : > { %308 = vmatpush.bf16.msra.mxu0 %v1298_v13  ;;  %341 = vmatpush.bf16.msra.mxu1 %v332_v46  ;;  %v1304_v59 = vld [vmem:[%s1655_s2 + $0x20] sm:$0xff]  ;;  %v1302_v0 = vld [vmem:[%s1655_s2 + $0x10] sm:$0xff]  ;;  %vm383_vm7 = vmand %vm381_vm5, %vm382_vm6  ;;  %vm357_vm9 = vsmask.f32 6416  ;;  %vm493_vm13 = vcmask 1040384   ;;  %vm582_vm14 = vcmask 1041408  }
  0x16   : > { %479 = vperm.xlu0 %1337, %v467_v14   ;;  %v384_v4 = vld [vmem:[#allocation2] sm:$0xc]  ;;  %v1307_v8 = vld [vmem:[%s1655_s2 + $0x38] sm:$0xff]  ;;  %vm358_vm11 = vmor %vm356_vm8, %vm357_vm9  ;;  %vm683_vm15 = vcmask 1045504   ;;  %vm440_vm0 = vcmask 261120  }
  0x17   : > { %410 = vperm.xlu1 %1338, %v398_v15   ;;  %653 = vperm.xlu2 %1339, %v641_v18   ;;  %v1308_v27 = vld [vmem:[%s1655_s2 + $0x40] sm:$0xff]  ;;  %vm389_vm12 = vmand %vm388_vm10, %vm356_vm8  ;;  %vm731_vm5 = vsmask.f32 5376 }
  0x18   : > { %451 = vmatpush.bf16.msra.mxu2 %v1299_v51  ;;  %544 = vmatpush.bf16.msra.mxu3 %v1302_v0 }
  0x19   : > { %309 = vmatpush.bf16.msra.mxu0 %v1297_v16  ;;  %625 = vmatpush.bf16.msrb.mxu1 %v1305_v52  ;;  %v1522_v16 = vunpack.c.0.s8 %v405_v10 }
  0x1c   : > { %708 = vmatpush.bf16.msrb.mxu2 %v1307_v8 }
  0x1d   : > { %310 = vmatpush.bf16.msra.mxu0 %v1296_v20  ;;  %626 = vmatpush.bf16.msrb.mxu1 %v1304_v59  ;;  %v1309_v20 = vld [vmem:[%s1655_s2 + $0x48] sm:$0xff] }
  0x1e   : > { %325 = vrot.lane.b32.xlu0 %v1294_v21, %s1350_s7  ;;  %770 = vmatpush.bf16.msrb.mxu3 %v1309_v20 }
  0x1f   : > { %561 = vperm.xlu1 %1338, %v557_v22   ;;  %570 = vperm.xlu2 %1339, %v558_v25   ;;  %v1313_v22 = vld [vmem:[%s1655_s2 + $0x68] sm:$0xff] }
  0x21   : > { %311 = vmatpush.bf16.msra.mxu0 %v1295_v24 }
  0x22   : > { %771 = vmatpush.bf16.msrb.mxu3 %v1308_v27 }
  0x24   : > { %1189 = vmatmul.msk.bf16.vlgmr.msra.gmra.mxu0 %vm296_vm2, %v1294_v21  ;;  %v1306_v21 = vld [vmem:[%s1655_s2 + $0x30] sm:$0xff]  ;;  %vm828_vm2 = vcmask 1044480  }
  0x25   : > { %853 = vmatpush.bf16.msrb.mxu0 %v1311_v53  ;;  %709 = vmatpush.bf16.msrb.mxu2 %v1306_v21  ;;  %v1315_v21 = vld [vmem:[%s1655_s2 + $0x78] sm:$0xff] }
  0x26   : > { %938 = vperm.xlu0 %1337, %v934_v28  }
  0x27   : > { %947 = vperm.xlu1 %1338, %v935_v29   ;;  %788 = vperm.xlu2 %1339, %v784_v31   ;;  %v390_v29 = vld [vmem:[#allocation2 + $0x8] sm:$0x7] }
  0x29   : > { %854 = vmatpush.bf16.msrb.mxu0 %v1310_v60 }
  0x2e   : > { %797 = vperm.xlu0 %1337, %v785_v34  }
  0x2f   : > { %1027 = vperm.xlu1 %1338, %v1023_v35   ;;  %1036 = vperm.xlu2 %1339, %v1024_v37   ;;  %v1312_v35 = vld [vmem:[%s1655_s2 + $0x60] sm:$0xff] }
  0x36   : > { %871 = vperm.xlu0 %1337, %v867_v40  }
  0x37   : > { %880 = vperm.xlu1 %1338, %v868_v41  }
  0x69   : > { %v1481_v44 = vpop.permute.xlu2 %644 }
  0x6a   : > { %v650_v31 = vperm.slane %v1481_v44, %v1522_v16 }
  0x6c   : > { %v1556_v46 = vunpack.c.l.bf16 %v650_v31 }
  0x71   : > { %v1492_v50 = vpop.permute.xlu2 %653 }
  0x72   : > { %v659_v36 = vperm.slane %v1492_v50, %v1522_v16 }
  0x79   : > { %v571_v63 = vpop.permute.xlu2 %570 }
  0x7a   : > { %v576_v24 = vperm.slane %v571_v63, %v1522_v16 }
  0x7c   : > { %v579_v39 = vunpack.c.l.bf16 %v576_v24 }
  0x7e   : > { %v584_v52 = vrot.slane %v579_v39, 6 }
  0x80   : > { %v1473_v42 = vpop.permute.xlu0 %470 }
  0x81   : > { %v1487_v48 = vpop.permute.xlu1 %401  ;;  %v789_v19 = vpop.permute.xlu2 %788  ;;  %v476_v37 = vperm.slane %v1473_v42, %v1522_v16  ;;  %v1560_v42 = vunpack.c.l.bf16 %v659_v36 }
  0x82   : > { %v794_v30 = vperm.slane %v789_v19, %v1522_v16  ;;  %v407_v49 = vperm.slane %v1487_v48, %v1522_v16  ;;  %v666_v48 = vrot.slane %v1556_v46, 4 }
  0x83   : > { %v489_v50 = vunpack.c.l.bf16 %v476_v37 }
  0x84   : > { %v806_v45 = vunpack.c.l.bf16 %v794_v30 }
  0x88   : > { %v1479_v43 = vpop.permute.xlu0 %479 }
  0x89   : > { %v1506_v57 = vpop.permute.xlu1 %410  ;;  %v485_v38 = vperm.slane %v1479_v43, %v1522_v16 }
  0x8a   : > { %v416_v51 = vperm.slane %v1506_v57, %v1522_v16 }
  0x8b   : > { %v490_v43 = vunpack.c.l.bf16 %v485_v38  ;;  %v1314_v38 = vld [vmem:[%s1655_s2 + $0x70] sm:$0xff] }
  0x90   : > { %v326_v47 = vpop.permute.xlu0 %325 }
  0x91   : > { %1190 = vmatmul.msk.bf16.vlgmr.msra.gmra.mxu1 %vm327_vm4, %v326_v47  ;;  %v562_v13 = vpop.permute.xlu1 %561  ;;  %vm509_vm4 = vsmask.f32 7424 }
  0x92   : > { %918 = vmatpush.bf16.msra.mxu1 %v1313_v22  ;;  %v567_v32 = vperm.slane %v562_v13, %v1522_v16 }
  0x94   : > { %v578_v47 = vunpack.c.l.bf16 %v567_v32 }
  0x96   : > { %919 = vmatpush.bf16.msra.mxu1 %v1312_v35  ;;  %v583_v59 = vrot.slane %v578_v47, 6 }
  0x98   : > { %v1517_v1 = vpop.permute.xlu0 %938 }
  0x99   : > { %v948_v41 = vpop.permute.xlu1 %947 }
  0x9a   : > { %v953_v60 = vperm.slane %v948_v41, %v1522_v16 }
  0x9c   : > { %v1576_v10 = vunpack.c.l.bf16 %v953_v60 }
  0xa0   : > { %v798_v25 = vpop.permute.xlu0 %797 }
  0xa1   : > { %v313_v54 = vpop.f32.mrf.mxu0  ;;  %v803_v28 = vperm.slane %v798_v25, %v1522_v16 }
  0xa2   : > { %v318_v55 = vmax.f32 %v313_v54, 0.0  ;;  %v944_v54 = vperm.slane %v1517_v1, %v1522_v16  ;;  %v420_v1 = vunpack.c.l.bf16 %v416_v51 }
  0xa3   : > { %v1554_v44 = vunpack.c.l.bf16 %v803_v28 }
  0xa4   : > { %v354_v58 = vpack.c.bf16 %v318_v55, %v318_v55  ;;  %v1573_v8 = vunpack.c.l.bf16 %v944_v54 }
  0xa5   : > { %v812_v55 = vrot.slane %v1554_v44, 2 }
  0xa6   : > { %v360_v61 = vshrl.u32 %v354_v58, 16  ;;  %v363_v62 = vshll.u32 %v354_v58, 16  ;;  %v811_v58 = vrot.slane %v806_v45, 2  ;;  %v961_v30 = vrot.slane %v1573_v8, 7 }
  0xa8   : > { %v362_v2 = vrot.slane %v360_v61, 5  ;;  %v365_v3 = vrot.slane %v363_v62, 6  ;;  %v667_v62 = vrot.slane %v1560_v42, 4  ;;  %v813_v9 = vsel %vm683_vm15, %v811_v58, %v812_v55 }
  0xa9   : > { %v315_v5 = vpop.f32.mrf.mxu0 }
  0xaa   : > { %v366_v6 = vor.u32 %v365_v3, %v362_v2  ;;  %v319_v7 = vmax.f32 %v315_v5, 0.0  ;;  %v419_v2 = vunpack.c.l.bf16 %v407_v49  ;;  %v585_v3 = vsel %vm582_vm14, %v583_v59, %v584_v52 }
  0xab   : > { %v668_v22 = vsel %vm300_vm1, %v666_v48, %v667_v62  ;;  %vm600_vm1 = vcmask 1046528  }
  0xac   : > { %v385_v11 = vsel %vm383_vm7, %v366_v6, %v384_v4  ;;  %v355_v12 = vpack.c.bf16 %v319_v7, %v319_v7  ;;  %v367_v23 = vrot.slane %v366_v6, 4  ;;  %v494_v6 = vrot.slane %v489_v50, 7 }
  0xad   : > { %386 = vst [vmem:[#allocation2] sm:$0xc] %v385_v11  ;;  %v495_v7 = vrot.slane %v490_v43, 7 }
  0xae   : > { %v369_v14 = vshrl.u32 %v355_v12, 16  ;;  %v372_v15 = vshll.u32 %v355_v12, 16 }
  0xaf   : > { %v496_v25 = vsel %vm493_vm13, %v494_v6, %v495_v7 }
  0xb0   : > { %v371_v17 = vrot.slane %v369_v14, 5  ;;  %v374_v18 = vrot.slane %v372_v15, 6  ;;  %v1582_v15 = vpop.permute.xlu1 %1027 }
  0xb2   : > { %v375_v26 = vor.u32 %v374_v18, %v371_v17 }
  0xb4   : > { %v376_v33 = vsel %vm358_vm11, %v367_v23, %v375_v26  ;;  %v377_v34 = vrot.slane %v375_v26, 4  ;;  %v553_v53 = vld [vmem:[#allocation2] sm:$0xe] }
  0xb5   : > { %387 = vst.msk [vmem:[#allocation2 + $0x4] sm:$0xf] %vm348_vm3, %v376_v33  ;;  %v780_v56 = vld [vmem:[#allocation2] sm:$0x8]  ;;  %v577_v0 = vunpack.c.l.bf16 %v553_v53 }
  0xb6   : > { %v391_v40 = vsel %vm389_vm12, %v377_v34, %v390_v29  ;;  %v804_v4 = vunpack.c.l.bf16 %v780_v56  ;;  %v635_v20 = vld [vmem:[#allocation2] sm:$0xc]  ;;  %v962_v34 = vrot.slane %v1576_v10, 7 }
  0xb7   : > { %392 = vst [vmem:[#allocation2 + $0x8] sm:$0x7] %v391_v40  ;;  %v589_v18 = vmul.f32 %v583_v59, %v577_v0  ;;  %v660_v33 = vunpack.c.l.bf16 %v635_v20  ;;  %v1235_v20 = vld [vmem:[#allocation2] sm:$0xc] }
  0xb8   : > { %v817_v23 = vmul.f32 %v811_v58, %v804_v4  ;;  %v881_v60 = vpop.permute.xlu1 %880 }
  0xb9   : > { %v672_v50 = vmul.f32 %v666_v48, %v660_v33 }
  0xbc   : > { %v1323_v61 = vld [vmem:[#allocation2] sm:$0xff]  }
  0xbd   : > { %v1570_v57 = vunpack.c.h.bf16 %v1323_v61  ;;  %v1320_v63 = vunpack.c.l.bf16 %v1323_v61 }
  0xbe   : > { %v462_v5 = vld [vmem:[#allocation2 + $0x8] sm:$0x1] }
  0xbf   : > { %v818_v11 = vmul.f32 %v1570_v57, %v813_v9  ;;  %v421_v12 = vmul.f32 %v1320_v63, %v419_v2  ;;  %v422_v13 = vmul.f32 %v1570_v57, %v420_v1  ;;  %v1580_v14 = vld [vmem:[#allocation2 + $0x8] sm:$0x7]  ;;  %v488_v17 = vunpack.c.l.bf16 %v462_v5  ;;  %v872_v2 = vpop.permute.xlu0 %871 }
  0xc0   : > { %v590_v19 = vmul.f32 %v1570_v57, %v585_v3  ;;  %v805_v28 = vunpack.c.l.bf16 %v1580_v14  ;;  %v636_v29 = vld [vmem:[#allocation2 + $0x8] sm:$0x3]  ;;  %v500_v32 = vmul.f32 %v1320_v63, %v494_v6  ;;  %v501_v37 = vmul.f32 %v1570_v57, %v496_v25  ;;  %v930_v6 = vld [vmem:[#allocation2 + $0xc] sm:$0x1] }
  0xc1   : > { %v423_v24 = vpack.c.bf16 %v422_v13, %v421_v12  ;;  %v591_v26 = vmul.f32 %v584_v52, %v488_v17  ;;  %v820_v31 = vpack.c.bf16 %v818_v11, %v817_v23  ;;  %v502_v39 = vmul.f32 %v495_v7, %v488_v17  ;;  %v1598_v41 = vld [vmem:[#allocation2 + $0x4] sm:$0xff]  }
  0xc2   : > { %v592_v27 = vpack.c.bf16 %v590_v19, %v589_v18  ;;  %v819_v36 = vmul.f32 %v812_v55, %v805_v28  ;;  %v661_v40 = vunpack.c.l.bf16 %v636_v29  ;;  %v503_v47 = vpack.c.bf16 %v501_v37, %v500_v32  ;;  %v863_v1 = vld [vmem:[#allocation2 + $0x8] sm:$0xf]  ;;  %v1301_v11 = vld [vmem:[#allocation2] sm:$0xf0] }
  0xc3   : > { %1199 = vmatmul.msk.bf16.vlgmr.msra.gmra.mxu2 %vm440_vm0, %v423_v24  ;;  %v593_v35 = vpack.c.bf16 %v591_v26, %v591_v26  ;;  %v829_v49 = vrot.slane %v820_v31, 3  ;;  %v504_v42 = vpack.c.bf16 %v502_v39, %v502_v39  ;;  %v673_v54 = vmul.f32 %v1570_v57, %v668_v22  ;;  %v1317_v5 = vld [vmem:[%s1655_s2 + $0x88] sm:$0xff]  ;;  %v1316_v24 = vld [vmem:[%s1655_s2 + $0x80] sm:$0xff]  ;;  %v1037_v26 = vpop.permute.xlu2 %1036 }
  0xc4   : > { %1009 = vmatpush.bf16.msra.mxu2 %v1315_v21  ;;  %v601_v44 = vrot.slane %v592_v27, 1  ;;  %v821_v46 = vpack.c.bf16 %v819_v36, %v819_v36  ;;  %v674_v43 = vmul.f32 %v667_v62, %v661_v40  ;;  %v513_v53 = vshll.u32 %v503_v47, 16 }
  0xc5   : > { %v602_v45 = vrot.slane %v593_v35, 1  ;;  %v954_v55 = vunpack.c.l.bf16 %v1598_v41  ;;  %v955_v56 = vunpack.c.h.bf16 %v1598_v41  ;;  %v518_v58 = vshll.u32 %v504_v42, 16 }
  0xc6   : > { %v830_v52 = vrot.slane %v821_v46, 3  ;;  %v728_v59 = vunpack.c.l.b16 %v1580_v14  ;;  %v511_v61 = vshrl.u32 %v503_v47, 16  ;;  %v515_v62 = vrot.slane %v513_v53, 1 }
  0xc7   : > { %v603_v51 = vsel %vm600_vm1, %v601_v44, %v602_v45  ;;  %v676_v63 = vpack.c.bf16 %v674_v43, %v674_v43  ;;  %v520_v0 = vrot.slane %v518_v58, 1  ;;  %v675_v4 = vpack.c.bf16 %v673_v54, %v672_v50 }
  0xc8   : > { %1010 = vmatpush.bf16.msra.mxu2 %v1314_v38  ;;  %1221 = vmatmul.msk.bf16.vlgmr.msrb.gmra.mxu1 %vm440_vm0, %v603_v51  ;;  %v831_v48 = vsel %vm828_vm2, %v829_v49, %v830_v52  ;;  %v516_v3 = vor.u32 %v515_v62, %v511_v61  ;;  %v963_v7 = vsel %vm493_vm13, %v961_v30, %v962_v34  ;;  %v887_v19 = vunpack.c.l.bf16 %v863_v1 }
  0xc9   : > { %1256 = vmatmul.msk.bf16.vlgmr.msrb.gmra.mxu0 %vm440_vm0, %v831_v48  ;;  %v967_v8 = vmul.f32 %v961_v30, %v954_v55  ;;  %v886_v9 = vperm.slane %v881_v60, %v1522_v16  ;;  %v968_v12 = vmul.f32 %v963_v7, %v955_v56  ;;  %v685_v14 = vrot.slane %v676_v63, 2 }
  0xca   : > { %v521_v13 = vsel %vm509_vm4, %v516_v3, %v520_v0  ;;  %v730_v17 = vpack.c.b16 %v728_v59, %v728_v59  ;;  %v877_v18 = vperm.slane %v872_v2, %v1522_v16  ;;  %v956_v21 = vunpack.c.l.bf16 %v930_v6 }
  0xcb   : > { %1210 = vmatmul.msk.bf16.vlgmr.msra.gmra.mxu3 %vm440_vm0, %v521_v13  ;;  %v684_v22 = vrot.slane %v675_v4, 2  ;;  %v1236_v23 = vor.u32 %v1301_v11, %v1235_v20  ;;  %v889_v25 = vunpack.c.l.bf16 %v886_v9  ;;  %v970_v27 = vpack.c.bf16 %v968_v12, %v967_v8 }
  0xcc   : > { %1089 = vmatpush.bf16.msra.mxu3 %v1317_v5  ;;  %v741_v29 = vshrl.u32 %v730_v17, 16  ;;  %v744_v30 = vshll.u32 %v730_v17, 16  ;;  %v888_v31 = vunpack.c.l.bf16 %v877_v18  ;;  %v969_v33 = vmul.f32 %v962_v34, %v956_v21 }
  0xcd   : > { %v686_v28 = vsel %vm683_vm15, %v684_v22, %v685_v14  ;;  %v891_v32 = vmul.f32 %v889_v25, %v887_v19  ;;  %v733_v35 = vshrl.u32 %v1236_v23, 16  ;;  %v736_v36 = vshll.u32 %v1236_v23, 16 }
  0xce   : > { %v1033_v37 = vperm.slane %v1582_v15, %v1522_v16  ;;  %v890_v38 = vmul.f32 %v1570_v57, %v888_v31  ;;  %v1042_v39 = vperm.slane %v1037_v26, %v1522_v16  ;;  %v743_v40 = vrot.slane %v741_v29, 2  ;;  %v1019_v57 = vld [vmem:[#allocation2 + $0x4] sm:$0xe] }
  0xcf   : > { %v746_v44 = vrot.slane %v744_v30, 3  ;;  %v979_v45 = vshll.u32 %v970_v27, 16  ;;  %v971_v47 = vpack.c.bf16 %v969_v33, %v969_v33  ;;  %v735_v49 = vrot.slane %v733_v35, 2 }
  0xd0   : > { %1090 = vmatpush.bf16.msra.mxu3 %v1316_v24  ;;  %v892_v46 = vpack.c.bf16 %v891_v32, %v890_v38  ;;  %v738_v42 = vrot.slane %v736_v36, 3  ;;  %v1044_v50 = vunpack.c.l.bf16 %v1033_v37  ;;  %v1045_v10 = vunpack.c.l.bf16 %v1042_v39 }
  0xd1   : > { %v747_v34 = vor.u32 %v746_v44, %v743_v40  ;;  %v981_v43 = vrot.slane %v979_v45, 1  ;;  %v984_v51 = vshll.u32 %v971_v47, 16  ;;  %v977_v52 = vshrl.u32 %v970_v27, 16 }
  0xd2   : > { %v739_v15 = vor.u32 %v738_v42, %v735_v49  ;;  %v1048_v53 = vrot.slane %v1044_v50, 6  ;;  %v1049_v16 = vrot.slane %v1045_v10, 6  ;;  %v1043_v59 = vunpack.c.l.bf16 %v1019_v57 }
  0xd3   : > { %1232 = vmatmul.msk.bf16.vlgmr.msrb.gmra.mxu2 %vm440_vm0, %v686_v28  ;;  %v982_v55 = vor.u32 %v981_v43, %v977_v52  ;;  %v986_v58 = vrot.slane %v984_v51, 1 }
  0xd4   : > { %v748_v54 = vsel %vm731_vm5, %v739_v15, %v747_v34  ;;  %v1050_v60 = vsel %vm582_vm14, %v1048_v53, %v1049_v16  ;;  %v1056_v61 = vmul.f32 %v1049_v16, %v956_v21  ;;  %v1054_v63 = vmul.f32 %v1048_v53, %v1043_v59 }
  0xd5   : > { %v1055_v48 = vmul.f32 %v1050_v60, %v955_v56  ;;  %v987_v62 = vsel %vm509_vm4, %v982_v55, %v986_v58  ;;  %v1340_v56 = vld [vmem:[%s1657_s4] ss:$0 sm:$0xff] }
  0xd6   : > { %v1058_v2 = vpack.c.bf16 %v1056_v61, %v1056_v61 }
  0xd7   : > { %v1057_v0 = vpack.c.bf16 %v1055_v48, %v1054_v63 }
  0xd8   : > { %1267 = vmatmul.msk.bf16.vlgmr.msra.gmra.mxu1 %vm440_vm0, %v892_v46  ;;  %v1066_v3 = vrot.slane %v1058_v2, 1 }
  0xd9   : > { %v1065_v1 = vrot.slane %v1057_v0, 1 }
  0xdb   : > { %1245 = vmatmul.msk.bf16.vlgmr.msrb.gmra.mxu3 %vm440_vm0, %v748_v54  ;;  %v1067_v4 = vsel %vm600_vm1, %v1065_v1, %v1066_v3 }
  0xe3   : > { %1278 = vmatmul.msk.bf16.vlgmr.msra.gmra.mxu2 %vm440_vm0, %v987_v62 }
  0xeb   : > { %1289 = vmatmul.msk.bf16.vlgmr.msra.gmra.mxu3 %vm440_vm0, %v1067_v4 }
 0x10e   : > { %v343_v5 = vpop.f32.mrf.mxu1 }
 0x10f   : > { %v344_v12 = vadd.f32 %v1340_v56, %v343_v5 }
 0x116   : > { %v345_v7 = vpop.f32.mrf.mxu1 }
 0x117   : > { %v346_v21 = vadd.f32 %v1340_v56, %v345_v7 }
 0x145   : > { %v628_v9 = vpop.f32.mrf.mxu1 }
 0x146   : > { %v453_v6 = vpop.f32.mrf.mxu2  ;;  %v856_v27 = vpop.f32.mrf.mxu0 }
 0x147   : > { %v458_v14 = vadd.f32 %v453_v6, %v344_v12 }
 0x14d   : > { %v630_v18 = vpop.f32.mrf.mxu1 }
 0x14e   : > { %v455_v8 = vpop.f32.mrf.mxu2  ;;  %v546_v41 = vpop.f32.mrf.mxu3 }
 0x14f   : > { %v551_v17 = vadd.f32 %v546_v41, %v458_v14  ;;  %v459_v23 = vadd.f32 %v455_v8, %v346_v21  ;;  %v858_v38 = vpop.f32.mrf.mxu0 }
 0x151   : > { %v633_v22 = vadd.f32 %v628_v9, %v551_v17 }
 0x155   : > { %v921_v31 = vpop.f32.mrf.mxu1 }
 0x156   : > { %v711_v11 = vpop.f32.mrf.mxu2  ;;  %v548_v13 = vpop.f32.mrf.mxu3 }
 0x157   : > { %v716_v24 = vadd.f32 %v711_v11, %v633_v22  ;;  %v552_v25 = vadd.f32 %v548_v13, %v459_v23 }
 0x159   : > { %v634_v30 = vadd.f32 %v630_v18, %v552_v25 }
 0x15d   : > { %v923_v46 = vpop.f32.mrf.mxu1 }
 0x15e   : > { %v773_v19 = vpop.f32.mrf.mxu3  ;;  %v713_v20 = vpop.f32.mrf.mxu2 }
 0x15f   : > { %v778_v26 = vadd.f32 %v773_v19, %v716_v24  ;;  %v717_v33 = vadd.f32 %v713_v20, %v634_v30 }
 0x161   : > { %v861_v29 = vadd.f32 %v856_v27, %v778_v26 }
 0x163   : > { %v926_v36 = vadd.f32 %v921_v31, %v861_v29 }
 0x166   : > { %v775_v28 = vpop.f32.mrf.mxu3  ;;  %v1012_v32 = vpop.f32.mrf.mxu2 }
 0x167   : > { %v779_v35 = vadd.f32 %v775_v28, %v717_v33  ;;  %v1017_v37 = vadd.f32 %v1012_v32, %v926_v36 }
 0x169   : > { %v862_v40 = vadd.f32 %v858_v38, %v779_v35 }
 0x16b   : > { %v927_v42 = vadd.f32 %v923_v46, %v862_v40 }
 0x16e   : > { %v1092_v39 = vpop.f32.mrf.mxu3  ;;  %v1014_v47 = vpop.f32.mrf.mxu2 }
 0x16f   : > { %v1097_v44 = vadd.f32 %v1092_v39, %v1017_v37  ;;  %v1018_v50 = vadd.f32 %v1014_v47, %v927_v42 }
 0x171   : > { %v1099_v45 = vmax.f32 %v1097_v44, 0.0 }
 0x173   : > { %v1101_v49 = vpack.c.bf16 %v1099_v45, %v1099_v45 }
 0x175   : > { %1103 = vst.msk [vmem:[%s251_s27] sm:$0xf] %vm348_vm3, %v1101_v49 }
 0x176   : > { %v1094_v10 = vpop.f32.mrf.mxu3 }
 0x177   : > { %v1098_v34 = vadd.f32 %v1094_v10, %v1018_v50 }
 0x179   : > { %v1100_v43 = vmax.f32 %v1098_v34, 0.0 }
 0x17b   : > { %v1102_v51 = vpack.c.bf16 %v1100_v43, %v1100_v43 }
 0x17d   : > { %1104 = vst.msk [vmem:[%s251_s27 + $0x4] sm:$0xf] %vm348_vm3, %v1102_v51 }
 0x17e PF: > { %s16_s21 = sadd.s32 1, %s1347_s21  }
 0x17f   : > { %p13_p4 = scmp.ge.s32.totalorder %s16_s21, 4  }
 0x181   :  { %15 = sbr.rel (!%p13_p4) target bundleno = 1 (0x1), region = 81 }

// kernel: ensemble_forward.11
= control target key start
LH: loop header
LB: loop body
LE: loop exit
PB: predicated region body
PF: predicated region fallthrough
CT: control target
= control target key end

     0   :  { %s384_s0 = inlined_call_operand.vmem [shape: bf16[2,256], index: 0, kind: input, shape index: {}]   ;;  %s385_s1 = inlined_call_operand.vmem [shape: bf16[256,10], index: 1, kind: input, shape index: {}]   ;;  %s386_s2 = inlined_call_operand.vmem [shape: f32[1,10], index: 2, kind: input, shape index: {}]   ;;  %s387_s3 = inlined_call_operand.hbm [shape: f32[2,10], index: 3, kind: output, shape index: {}]  }
   0x1   :  { %v269_v0 = vld [vmem:[%s385_s1 + $0x38] sm:$0xff]  ;;  %v268_v2 = vld [vmem:[%s385_s1 + $0x30] sm:$0xff]  ;;  %v15_v4 = vld [vmem:[%s384_s0] sm:$0x3] }
   0x2   :  { %v277_v1 = vld [vmem:[%s385_s1 + $0x78] sm:$0xff]  ;;  %154 = vmatpush.bf16.msra.mxu0 %v269_v0  ;;  %v276_v3 = vld [vmem:[%s385_s1 + $0x70] sm:$0xff]  ;;  %v267_v5 = vld [vmem:[%s385_s1 + $0x28] sm:$0xff]  ;;  %53 = vst [vmem:[#allocation1] ss:$9 sm:$0xff] %v15_v4 }
   0x3   :  { %167 = vmatpush.bf16.msra.mxu1 %v277_v1  ;;  %v275_v6 = vld [vmem:[%s385_s1 + $0x68] sm:$0xff] }
   0x6   :  { %155 = vmatpush.bf16.msra.mxu0 %v268_v2 }
   0x7   :  { %168 = vmatpush.bf16.msra.mxu1 %v276_v3 }
   0x8   :  { %8 = vsyncpa [#allocation3], 0  ;;  %v266_v7 = vld [vmem:[%s385_s1 + $0x20] sm:$0xff]  ;;  %v265_v9 = vld [vmem:[%s385_s1 + $0x18] sm:$0xff]  ;;  %s306_s20 = smov [#allocation2]   ;;  %s189_s24 = sshll.u32 %s387_s3, 4  ;;  %s190_s24 = int_to_ptr.hbm [resolvable:$true] %s189_s24 }
   0x9   :  { %v274_v8 = vld [vmem:[%s385_s1 + $0x60] sm:$0xff]  ;;  %v273_v10 = vld [vmem:[%s385_s1 + $0x58] sm:$0xff]  ;;  %v264_v11 = vld [vmem:[%s385_s1 + $0x10] sm:$0xff]  ;;  %s187_s21 = sshll.u32 %s306_s20, 4  ;;  %vm180_vm0 = vcmask 74752   ;;  %s188_s21 = int_to_ptr.vmem [resolvable:$true] %s187_s21 }
   0xa   :  { %156 = vmatpush.bf16.msra.mxu0 %v267_v5  ;;  %v272_v12 = vld [vmem:[%s385_s1 + $0x50] sm:$0xff]  ;;  %v263_v13 = vld [vmem:[%s385_s1 + $0x8] sm:$0xff]  ;;  %v262_v15 = vld [vmem:[%s385_s1] sm:$0xff] }
   0xb   :  { %169 = vmatpush.bf16.msra.mxu1 %v275_v6  ;;  %v271_v14 = vld [vmem:[%s385_s1 + $0x48] sm:$0xff]  ;;  %v270_v16 = vld [vmem:[%s385_s1 + $0x40] sm:$0xff] }
   0xc   :  { %v54_v17 = vld [vmem:[#allocation1] sm:$0xff]  ;;  %v55_v18 = vld [vmem:[#allocation1 + $0x9] sm:$0xff] }
   0xd   :  { %v279_v19 = vld [vmem:[%s386_s2] ss:$0 sm:$0xff] }
   0xe   :  { %157 = vmatpush.bf16.msra.mxu0 %v266_v7 }
   0xf   :  { %170 = vmatpush.bf16.msra.mxu1 %v274_v8 }
  0x12   :  { %158 = vmatpush.bf16.msra.mxu0 %v265_v9 }
  0x13   :  { %171 = vmatpush.bf16.msra.mxu1 %v273_v10 }
  0x16   :  { %159 = vmatpush.bf16.msra.mxu0 %v264_v11 }
  0x17   :  { %172 = vmatpush.bf16.msra.mxu1 %v272_v12 }
  0x1a   :  { %160 = vmatpush.bf16.msra.mxu0 %v263_v13 }
  0x1b   :  { %173 = vmatpush.bf16.msra.mxu1 %v271_v14 }
  0x1e   :  { %161 = vmatpush.bf16.msra.mxu0 %v262_v15 }
  0x1f   :  { %174 = vmatpush.bf16.msra.mxu1 %v270_v16 }
  0x21   :  { %162 = vmatmul.bf16.vlgmr.msra.gmra.mxu0 %v54_v17 }
  0x22   :  { %175 = vmatmul.bf16.vlgmr.msra.gmra.mxu1 %v55_v18 }
  0x9e   :  { %v163_v20 = vpop.f32.mrf.mxu0 }
  0x9f   :  { %v176_v21 = vpop.f32.mrf.mxu1  ;;  %v164_v22 = vadd.f32 %v279_v19, %v163_v20 }
  0xa1   :  { %v177_v23 = vadd.f32 %v176_v21, %v164_v22 }
  0xa3   :  { %181 = vst.msk [vmem:[#allocation2] sm:$0x3] %vm180_vm0, %v177_v23 }
  0xa4   :  { %192 = dma.vmem_to_hbm [thread:$0]  %s188_s21, 32, %s190_s24, [#allocation3]  }
  0xa6   :  { %v165_v24 = vpop.f32.mrf.mxu0 }
  0xa7   :  { %v178_v25 = vpop.f32.mrf.mxu1 }
  0xa8   :  { %304 = dma.done.wait [#allocation3], 32  }
  0xa9   :  { %305 = vsyncadd [#allocation3], 4294967264 }
  0xaa   :  { %197 = vsyncpa [#allocation3], 1 }

// kernel: ensemble_forward.9
= control target key start
LH: loop header
LB: loop body
LE: loop exit
PB: predicated region body
PF: predicated region fallthrough
CT: control target
= control target key end

     0   :  { %s1998_s21 = smov 0   ;;  %s2348_s0 = inlined_call_operand.vmem [shape: bf16[2,4,288], index: 0, kind: input, shape index: {}]   ;;  %s2349_s1 = inlined_call_operand.vmem [shape: bf16[288,128], index: 1, kind: input, shape index: {}]   ;;  %s2350_s2 = inlined_call_operand.vmem [shape: bf16[1152,128], index: 2, kind: input, shape index: {}]   ;;  %s2351_s3 = inlined_call_operand.vmem [shape: bf16[32,128], index: 3, kind: input, shape index: {}]   ;;  %s2352_s4 = inlined_call_operand.vmem [shape: f32[1,128], index: 4, kind: input, shape index: {}]   ;;  %s2353_s5 = inlined_call_operand.vmem [shape: f32[9,4,1], index: 5, kind: input, shape index: {}]   ;;  %s2354_s6 = inlined_call_operand.vmem [shape: bf16[2,4,128], index: 6, kind: output, shape index: {}]  }
   0x1 LB: > { %s1460_s22 = sadd.s32 4294967295, %s1959_s21   ;;  %p1464_p0 = scmp.ge.s32.totalorder %s1959_s21, 1  ;;  %s1959_s21 = sphi %s1998_s21, %s16_s21  }
   0x2   : > { %p212_p1 = scmp.lt.s32.totalorder %s1959_s21, 3 }
   0x4   : > { %p213_p2 = pnand %p1464_p0, %p212_p1 }
   0x5   : > { %p241_p3 = scmp.lt.s32.totalorder (!%p213_p2), %s1460_s22, 1 }
   0x6   : > { %216 = sbr.rel (%p213_p2) target bundleno = 373 (0x175), region = 44 }
   0xb   : > { %v1853_v0 = vld [vmem:[%s2349_s1 + $0x38] sm:$0xff]  ;;  %v1852_v2 = vld [vmem:[%s2349_s1 + $0x30] sm:$0xff]  ;;  %v1863_v4 = vld [vmem:[%s2349_s1 + $0x88] sm:$0xff]  ;;  %s2356_s22 = smov (!%p241_p3, %s1460_s22), 1  ;;  %v1961_v5 = vmov 0   ;;  %vm403_vm0 = vcmask 261120  }
   0xc   : > { %v1861_v1 = vld [vmem:[%s2349_s1 + $0x78] sm:$0xff]  ;;  %406 = vmatpush.bf16.msra.mxu0 %v1853_v0  ;;  %v1860_v3 = vld [vmem:[%s2349_s1 + $0x70] sm:$0xff]  ;;  %483 = vst [vmem:[#allocation2] sm:$0xf] %v1961_v5  ;;  %1949 = vset.pattern.permute.xlu0 %v1961_v5  ;;  %v1862_v6 = vld [vmem:[%s2349_s1 + $0x80] sm:$0xff]  ;;  %s1938_s11 = smul.u32 6, %s2356_s22 }
   0xd   : > { %419 = vmatpush.bf16.msra.mxu1 %v1861_v1  ;;  %484 = vst [vmem:[#allocation2 + $0x4] sm:$0x1] %v1961_v5  ;;  %1950 = vset.pattern.permute.xlu1 %v1961_v5  ;;  %v1851_v7 = vld [vmem:[%s2349_s1 + $0x28] sm:$0xff]  ;;  %v502_v9 = vld [vmem:[%s2353_s5] sm:$0xf]  ;;  %v1873_v18 = vld [vmem:[%s2350_s2 + $0x38] sm:$0xff] }
   0xe   : > { %438 = vmatpush.bf16.msra.mxu3 %v1863_v4  ;;  %1951 = vset.pattern.permute.xlu2 %v1961_v5  ;;  %v1859_v8 = vld [vmem:[%s2349_s1 + $0x68] sm:$0xff]  ;;  %s2036_s18 = scalar_lea.vmem %s2348_s0, %s1938_s11  ;;  %v503_v12 = vpack.c.bf16 %v502_v9, %v502_v9  ;;  %v1712_v14 = vld [vmem:[%s2353_s5 + $0x14] sm:$0xf]  ;;  %v1850_v15 = vld [vmem:[%s2349_s1 + $0x20] sm:$0xff]  ;;  %vm495_vm1 = vcmask 1043457   ;;  %s1466_s12 = sshll.u32 %s2356_s22, 1 }
   0xf   : > { %v1614_v10 = vld [vmem:[%s2353_s5 + $0x8] sm:$0xf]  ;;  %v251_v11 = vld [vmem:[%s2036_s18] sm:$0x3f]  ;;  %v995_v17 = vpack.c.bf16 %v1712_v14, %v1712_v14  ;;  %v1647_v20 = vld [vmem:[%s2353_s5 + $0xc] sm:$0xf]  ;;  %581 = vmatpush.bf16.msra.mxu2 %v1873_v18  ;;  %s249_s14 = scalar_lea.vmem %s2354_s6, %s1466_s12 }
  0x10   : > { %407 = vmatpush.bf16.msra.mxu0 %v1852_v2  ;;  %v704_v13 = vpack.c.bf16 %v1614_v10, %v1614_v10  ;;  %289 = vst [vmem:[#allocation1] ss:$4 sm:$0xff] %v251_v11  ;;  %v1858_v16 = vld [vmem:[%s2349_s1 + $0x60] sm:$0xff]  ;;  %506 = vperm.xlu0 %1949, %v503_v12   ;;  %v1865_v21 = vld [vmem:[%s2351_s3 + $0x8] sm:$0xff]  ;;  %v1872_v22 = vld [vmem:[%s2350_s2 + $0x30] sm:$0xff]  ;;  %v804_v25 = vpack.c.bf16 %v1647_v20, %v1647_v20 }
  0x11   : > { %420 = vmatpush.bf16.msra.mxu1 %v1860_v3  ;;  %v1581_v19 = vld [vmem:[%s2353_s5 + $0x4] sm:$0xf]  ;;  %998 = vperm.xlu2 %1951, %v995_v17   ;;  %v1811_v23 = vld [vmem:[%s2353_s5 + $0x20] sm:$0xf]  ;;  %v1849_v26 = vld [vmem:[%s2349_s1 + $0x18] sm:$0xff] }
  0x12   : > { %439 = vmatpush.bf16.msra.mxu3 %v1862_v6  ;;  %707 = vperm.xlu1 %1950, %v704_v13   ;;  %v598_v24 = vpack.c.bf16 %v1581_v19, %v1581_v19  ;;  %v1857_v27 = vld [vmem:[%s2349_s1 + $0x58] sm:$0xff]  ;;  %v1305_v29 = vpack.c.bf16 %v1811_v23, %v1811_v23  ;;  %v1871_v30 = vld [vmem:[%s2350_s2 + $0x28] sm:$0xff]  ;;  %v1864_v31 = vld [vmem:[%s2351_s3] sm:$0xff]  ;;  %vm496_vm2 = vsmask.f32 3334 }
  0x13   : > { %582 = vmatpush.bf16.msra.mxu2 %v1872_v22  ;;  %v1848_v32 = vld [vmem:[%s2349_s1 + $0x10] sm:$0xff]  ;;  %v1881_v33 = vld [vmem:[%s2350_s2 + $0x78] sm:$0xff]  ;;  %v1870_v37 = vld [vmem:[%s2350_s2 + $0x20] sm:$0xff] }
  0x14   : > { %408 = vmatpush.bf16.msra.mxu0 %v1851_v7  ;;  %v1856_v34 = vld [vmem:[%s2349_s1 + $0x50] sm:$0xff]  ;;  %v1778_v35 = vld [vmem:[%s2353_s5 + $0x1c] sm:$0xf]  ;;  %v1745_v36 = vld [vmem:[%s2353_s5 + $0x18] sm:$0xf] }
  0x15   : > { %421 = vmatpush.bf16.msra.mxu1 %v1859_v8  ;;  %v1196_v38 = vpack.c.bf16 %v1778_v35, %v1778_v35  ;;  %v1095_v39 = vpack.c.bf16 %v1745_v36, %v1745_v36  ;;  %v1847_v40 = vld [vmem:[%s2349_s1 + $0x8] sm:$0xff]  ;;  %v1869_v42 = vld [vmem:[%s2350_s2 + $0x18] sm:$0xff]  ;;  %v1846_v43 = vld [vmem:[%s2349_s1] sm:$0xff] }
  0x16   : > { %476 = vmatpush.bf16.msrb.mxu3 %v1865_v21  ;;  %v1855_v41 = vld [vmem:[%s2349_s1 + $0x48] sm:$0xff]  ;;  %v1854_v44 = vld [vmem:[%s2349_s1 + $0x40] sm:$0xff]  ;;  %v1889_v45 = vld [vmem:[%s2350_s2 + $0xb8] sm:$0xff] }
  0x17   : > { %v292_v28 = vld.sshfl [vmem:[#allocation1 + $0x10] sm:$0xff pattern:$0x73625140]  ;;  %583 = vmatpush.bf16.msra.mxu2 %v1871_v30  ;;  %v1897_v46 = vld [vmem:[%s2350_s2 + $0xf8] sm:$0xff]  ;;  %v1887_v53 = vld [vmem:[%s2350_s2 + $0xa8] sm:$0xff] }
  0x18   : > { %409 = vmatpush.bf16.msra.mxu0 %v1850_v15  ;;  %1539 = vmatmul.msk.bf16.vlgmr.msra.gmra.mxu3 %vm403_vm0, %v292_v28  ;;  %v1868_v47 = vld [vmem:[%s2350_s2 + $0x10] sm:$0xff]  ;;  %v290_v48 = vld.sshfl [vmem:[#allocation1] sm:$0xff pattern:$0x73625140]  ;;  %v1895_v54 = vld [vmem:[%s2350_s2 + $0xe8] sm:$0xff] }
  0x19   : > { %422 = vmatpush.bf16.msra.mxu1 %v1858_v16  ;;  %601 = vperm.xlu0 %1949, %v598_v24   ;;  %v291_v49 = vld.sshfl [vmem:[#allocation1 + $0x8] sm:$0xff pattern:$0x73625140]  ;;  %v1888_v50 = vld [vmem:[%s2350_s2 + $0xb0] sm:$0xff]  ;;  %v1886_v57 = vld [vmem:[%s2350_s2 + $0xa0] sm:$0xff] }
  0x1a   : > { %807 = vperm.xlu1 %1950, %v804_v25   ;;  %1308 = vperm.xlu2 %1951, %v1305_v29   ;;  %v1896_v51 = vld [vmem:[%s2350_s2 + $0xf0] sm:$0xff]  ;;  %v1867_v55 = vld [vmem:[%s2350_s2 + $0x8] sm:$0xff]  ;;  %v1894_v58 = vld [vmem:[%s2350_s2 + $0xe0] sm:$0xff] }
  0x1b   : > { %477 = vmatpush.bf16.msrb.mxu3 %v1864_v31  ;;  %584 = vmatpush.bf16.msra.mxu2 %v1870_v37  ;;  %v1880_v52 = vld [vmem:[%s2350_s2 + $0x70] sm:$0xff]  ;;  %v1879_v56 = vld [vmem:[%s2350_s2 + $0x68] sm:$0xff]  ;;  %v1866_v59 = vld [vmem:[%s2350_s2] sm:$0xff] }
  0x1c   : > { %410 = vmatpush.bf16.msra.mxu0 %v1849_v26  ;;  %v1905_v60 = vld [vmem:[%s2350_s2 + $0x138] sm:$0xff]  ;;  %v1878_v61 = vld [vmem:[%s2350_s2 + $0x60] sm:$0xff]  ;;  %v1904_v0 = vld [vmem:[%s2350_s2 + $0x130] sm:$0xff] }
  0x1d   : > { %423 = vmatpush.bf16.msra.mxu1 %v1857_v27  ;;  %v1885_v62 = vld [vmem:[%s2350_s2 + $0x98] sm:$0xff]  ;;  %v1884_v2 = vld [vmem:[%s2350_s2 + $0x90] sm:$0xff]  ;;  %v1903_v4 = vld [vmem:[%s2350_s2 + $0x128] sm:$0xff] }
  0x1e   : > { %v1893_v63 = vld [vmem:[%s2350_s2 + $0xd8] sm:$0xff]  ;;  %v1892_v3 = vld [vmem:[%s2350_s2 + $0xd0] sm:$0xff]  ;;  %v1883_v6 = vld [vmem:[%s2350_s2 + $0x88] sm:$0xff] }
  0x1f   : > { %687 = vmatpush.bf16.msra.mxu3 %v1881_v33  ;;  %585 = vmatpush.bf16.msra.mxu2 %v1869_v42  ;;  %v1877_v1 = vld [vmem:[%s2350_s2 + $0x58] sm:$0xff]  ;;  %v1876_v5 = vld [vmem:[%s2350_s2 + $0x50] sm:$0xff]  ;;  %v1891_v7 = vld [vmem:[%s2350_s2 + $0xc8] sm:$0xff] }
  0x20   : > { %411 = vmatpush.bf16.msra.mxu0 %v1848_v32  ;;  %v1902_v8 = vld [vmem:[%s2350_s2 + $0x120] sm:$0xff]  ;;  %v1875_v9 = vld [vmem:[%s2350_s2 + $0x48] sm:$0xff]  ;;  %v1921_v12 = vld [vmem:[%s2350_s2 + $0x1b8] sm:$0xff] }
  0x21   : > { %424 = vmatpush.bf16.msra.mxu1 %v1856_v34  ;;  %1199 = vperm.xlu0 %1949, %v1196_v38   ;;  %v1882_v10 = vld [vmem:[%s2350_s2 + $0x80] sm:$0xff]  ;;  %v1929_v13 = vld [vmem:[%s2350_s2 + $0x1f8] sm:$0xff]  ;;  %v1920_v18 = vld [vmem:[%s2350_s2 + $0x1b0] sm:$0xff] }
  0x22   : > { %1098 = vperm.xlu1 %1950, %v1095_v39   ;;  %v1890_v11 = vld [vmem:[%s2350_s2 + $0xc0] sm:$0xff]  ;;  %v1901_v15 = vld [vmem:[%s2350_s2 + $0x118] sm:$0xff]  ;;  %v1928_v19 = vld [vmem:[%s2350_s2 + $0x1f0] sm:$0xff] }
  0x23   : > { %586 = vmatpush.bf16.msra.mxu2 %v1868_v47  ;;  %688 = vmatpush.bf16.msra.mxu3 %v1880_v52  ;;  %v446_v14 = vld [vmem:[%s2036_s18 + $0x2] sm:$0x3]  ;;  %v1913_v17 = vld [vmem:[%s2350_s2 + $0x178] sm:$0xff]  ;;  %v1900_v21 = vld [vmem:[%s2350_s2 + $0x110] sm:$0xff] }
  0x24   : > { %412 = vmatpush.bf16.msra.mxu0 %v1847_v40  ;;  %v1874_v16 = vld [vmem:[%s2350_s2 + $0x40] sm:$0xff]  ;;  %v1912_v22 = vld [vmem:[%s2350_s2 + $0x170] sm:$0xff]  ;;  %v1919_v23 = vld [vmem:[%s2350_s2 + $0x1a8] sm:$0xff] }
  0x25   : > { %425 = vmatpush.bf16.msra.mxu1 %v1855_v41  ;;  %v1927_v24 = vld [vmem:[%s2350_s2 + $0x1e8] sm:$0xff]  ;;  %v1918_v27 = vld [vmem:[%s2350_s2 + $0x1a0] sm:$0xff]  ;;  %v1917_v36 = vld [vmem:[%s2350_s2 + $0x198] sm:$0xff] }
  0x26   : > { %v1899_v25 = vld [vmem:[%s2350_s2 + $0x108] sm:$0xff]  ;;  %v1926_v28 = vld [vmem:[%s2350_s2 + $0x1e0] sm:$0xff]  ;;  %v1925_v37 = vld [vmem:[%s2350_s2 + $0x1d8] sm:$0xff] }
  0x27   : > { %587 = vmatpush.bf16.msra.mxu2 %v1867_v55  ;;  %689 = vmatpush.bf16.msra.mxu3 %v1879_v56  ;;  %v1911_v26 = vld [vmem:[%s2350_s2 + $0x168] sm:$0xff]  ;;  %v1898_v31 = vld [vmem:[%s2350_s2 + $0x100] sm:$0xff]  ;;  %v1909_v40 = vld [vmem:[%s2350_s2 + $0x158] sm:$0xff] }
  0x28   : > { %413 = vmatpush.bf16.msra.mxu0 %v1846_v43  ;;  %1548 = vmatmul.msk.bf16.vlgmr.msrb.gmra.mxu3 %vm403_vm0, %v446_v14  ;;  %v1910_v35 = vld [vmem:[%s2350_s2 + $0x160] sm:$0xff]  ;;  %v1916_v41 = vld [vmem:[%s2350_s2 + $0x190] sm:$0xff]  ;;  %v1923_v52 = vld [vmem:[%s2350_s2 + $0x1c8] sm:$0xff] }
  0x29   : > { %426 = vmatpush.bf16.msra.mxu1 %v1854_v44  ;;  %v1924_v42 = vld [vmem:[%s2350_s2 + $0x1d0] sm:$0xff]  ;;  %vm497_vm3 = vmand %vm495_vm1, %vm496_vm2 }
  0x2b   : > { %414 = vmatmul.bf16.vlgmr.msra.gmra.mxu0 %v290_v48  ;;  %588 = vmatpush.bf16.msra.mxu2 %v1866_v59  ;;  %v1907_v59 = vld [vmem:[%s2350_s2 + $0x148] sm:$0xff] }
  0x2c   : > { %788 = vmatpush.bf16.msrb.mxu0 %v1889_v45  ;;  %427 = vmatmul.bf16.vlgmr.msra.gmra.mxu1 %v291_v49 }
  0x2d   : > { %887 = vmatpush.bf16.msrb.mxu1 %v1897_v46  ;;  %690 = vmatpush.bf16.msra.mxu3 %v1878_v61  ;;  %v1962_v46 = vmov 839922192   ;;  %v1922_v61 = vld [vmem:[%s2350_s2 + $0x1c0] sm:$0xff] }
  0x2e   : > { %v510_v47 = vunpack.c.l.s4 %v1962_v46 }
  0x2f   : > { %978 = vmatpush.bf16.msrb.mxu2 %v1905_v60  ;;  %v1914_v60 = vld [vmem:[%s2350_s2 + $0x180] sm:$0xff] }
  0x30   : > { %789 = vmatpush.bf16.msrb.mxu0 %v1888_v50  ;;  %v1908_v50 = vld [vmem:[%s2350_s2 + $0x150] sm:$0xff] }
  0x31   : > { %888 = vmatpush.bf16.msrb.mxu1 %v1896_v51  ;;  %691 = vmatpush.bf16.msra.mxu3 %v1877_v1  ;;  %v1915_v51 = vld [vmem:[%s2350_s2 + $0x188] sm:$0xff] }
  0x33   : > { %979 = vmatpush.bf16.msrb.mxu2 %v1904_v0 }
  0x34   : > { %790 = vmatpush.bf16.msrb.mxu0 %v1887_v53 }
  0x35   : > { %889 = vmatpush.bf16.msrb.mxu1 %v1895_v54  ;;  %692 = vmatpush.bf16.msra.mxu3 %v1876_v5 }
  0x37   : > { %980 = vmatpush.bf16.msrb.mxu2 %v1903_v4 }
  0x38   : > { %791 = vmatpush.bf16.msrb.mxu0 %v1886_v57  ;;  %v498_v57 = vld [vmem:[#allocation2] sm:$0xe] }
  0x39   : > { %890 = vmatpush.bf16.msrb.mxu1 %v1894_v58  ;;  %693 = vmatpush.bf16.msra.mxu3 %v1875_v9  ;;  %v2284_v58 = vunpack.c.0.s8 %v510_v47 }
  0x3b   : > { %981 = vmatpush.bf16.msrb.mxu2 %v1902_v8 }
  0x3c   : > { %792 = vmatpush.bf16.msrb.mxu0 %v1885_v62 }
  0x3d   : > { %891 = vmatpush.bf16.msrb.mxu1 %v1893_v63  ;;  %694 = vmatpush.bf16.msra.mxu3 %v1874_v16 }
  0x3f   : > { %982 = vmatpush.bf16.msrb.mxu2 %v1901_v15 }
  0x40   : > { %793 = vmatpush.bf16.msrb.mxu0 %v1884_v2 }
  0x41   : > { %892 = vmatpush.bf16.msrb.mxu1 %v1892_v3  ;;  %1079 = vmatpush.bf16.msrb.mxu3 %v1913_v17 }
  0x43   : > { %983 = vmatpush.bf16.msrb.mxu2 %v1900_v21 }
  0x44   : > { %794 = vmatpush.bf16.msrb.mxu0 %v1883_v6 }
  0x45   : > { %893 = vmatpush.bf16.msrb.mxu1 %v1891_v7  ;;  %1080 = vmatpush.bf16.msrb.mxu3 %v1912_v22  ;;  %v1906_v7 = vld [vmem:[%s2350_s2 + $0x140] sm:$0xff] }
  0x47   : > { %984 = vmatpush.bf16.msrb.mxu2 %v1899_v25 }
  0x48   : > { %795 = vmatpush.bf16.msrb.mxu0 %v1882_v10 }
  0x49   : > { %894 = vmatpush.bf16.msrb.mxu1 %v1890_v11  ;;  %1081 = vmatpush.bf16.msrb.mxu3 %v1911_v26 }
  0x4b   : > { %985 = vmatpush.bf16.msrb.mxu2 %v1898_v31 }
  0x4c   : > { %1178 = vmatpush.bf16.msra.mxu0 %v1921_v12 }
  0x4d   : > { %1288 = vmatpush.bf16.msra.mxu1 %v1929_v13  ;;  %1082 = vmatpush.bf16.msrb.mxu3 %v1910_v35  ;;  %v1937_v35 = vld [vmem:[%s2350_s2 + $0x238] sm:$0xff] }
  0x50   : > { %1179 = vmatpush.bf16.msra.mxu0 %v1920_v18 }
  0x51   : > { %1289 = vmatpush.bf16.msra.mxu1 %v1928_v19  ;;  %1083 = vmatpush.bf16.msrb.mxu3 %v1909_v40 }
  0x54   : > { %1180 = vmatpush.bf16.msra.mxu0 %v1919_v23 }
  0x55   : > { %1290 = vmatpush.bf16.msra.mxu1 %v1927_v24  ;;  %1084 = vmatpush.bf16.msrb.mxu3 %v1908_v50 }
  0x58   : > { %1181 = vmatpush.bf16.msra.mxu0 %v1918_v27  ;;  %v2304_v27 = vld [vmem:[#allocation2 + $0x4] sm:$0x1] }
  0x59   : > { %1291 = vmatpush.bf16.msra.mxu1 %v1926_v28  ;;  %1085 = vmatpush.bf16.msrb.mxu3 %v1907_v59  ;;  %v1935_v59 = vld [vmem:[%s2350_s2 + $0x228] sm:$0xff] }
  0x5c   : > { %1182 = vmatpush.bf16.msra.mxu0 %v1917_v36 }
  0x5d   : > { %1292 = vmatpush.bf16.msra.mxu1 %v1925_v37  ;;  %1086 = vmatpush.bf16.msrb.mxu3 %v1906_v7  ;;  %v1207_v37 = vunpack.c.l.bf16 %v2304_v27 }
  0x60   : > { %1183 = vmatpush.bf16.msra.mxu0 %v1916_v41 }
  0x61   : > { %1293 = vmatpush.bf16.msra.mxu1 %v1924_v42 }
  0x64   : > { %1184 = vmatpush.bf16.msra.mxu0 %v1915_v51 }
  0x65   : > { %1294 = vmatpush.bf16.msra.mxu1 %v1923_v52 }
  0x68   : > { %1185 = vmatpush.bf16.msra.mxu0 %v1914_v60 }
  0x69   : > { %1295 = vmatpush.bf16.msra.mxu1 %v1922_v61 }
  0x82   : > { %v2252_v29 = vpop.permute.xlu0 %506 }
  0x83   : > { %v512_v9 = vperm.slane %v2252_v29, %v2284_v58 }
  0x84   : > { %v708_v39 = vpop.permute.xlu1 %707 }
  0x85   : > { %v713_v0 = vperm.slane %v708_v39, %v2284_v58  ;;  %v514_v21 = vunpack.c.l.bf16 %v512_v9 }
  0x87   : > { %v715_v4 = vunpack.c.l.bf16 %v713_v0 }
  0x89   : > { %v717_v11 = vrot.slane %v715_v4, 6 }
  0x8b   : > { %v602_v45 = vpop.permute.xlu0 %601 }
  0x8c   : > { %v808_v63 = vpop.permute.xlu1 %807  ;;  %v607_v3 = vperm.slane %v602_v45, %v2284_v58 }
  0x8d   : > { %v813_v1 = vperm.slane %v808_v63, %v2284_v58 }
  0x8e   : > { %v609_v8 = vunpack.c.l.bf16 %v607_v3  ;;  %v1934_v3 = vld [vmem:[%s2350_s2 + $0x220] sm:$0xff] }
  0x8f   : > { %v814_v5 = vunpack.c.l.bf16 %v813_v1 }
  0x90   : > { %v611_v18 = vrot.slane %v609_v8, 7 }
  0x91   : > { %v816_v12 = vrot.slane %v814_v5, 6 }
  0x93   : > { %v1200_v6 = vpop.permute.xlu0 %1199 }
  0x94   : > { %v1205_v10 = vperm.slane %v1200_v6, %v2284_v58  ;;  %v1099_v15 = vpop.permute.xlu1 %1098 }
  0x95   : > { %v1104_v28 = vperm.slane %v1099_v15, %v2284_v58 }
  0x96   : > { %v1208_v22 = vunpack.c.l.bf16 %v1205_v10 }
  0x97   : > { %v1105_v42 = vunpack.c.l.bf16 %v1104_v28 }
  0x9b   : > { %v441_v20 = vpop.f32.mrf.mxu3 }
  0xa3   : > { %v443_v30 = vpop.f32.mrf.mxu3 }
  0xa8   : > { %v415_v32 = vpop.f32.mrf.mxu0 }
  0xa9   : > { %v428_v33 = vpop.f32.mrf.mxu1 }
  0xaa   : > { %v429_v34 = vadd.f32 %v428_v33, %v415_v32  ;;  %v999_v33 = vpop.permute.xlu2 %998 }
  0xab   : > { %v1004_v36 = vperm.slane %v999_v33, %v2284_v58  ;;  %v479_v28 = vpop.f32.mrf.mxu3  ;;  %v1952_v33 = vld [vmem:[%s2352_s4] ss:$0 sm:$0xff] }
  0xac   : > { %v442_v38 = vadd.f32 %v441_v20, %v429_v34 }
  0xad   : > { %v1006_v51 = vunpack.c.l.bf16 %v1004_v36  ;;  %v480_v36 = vadd.f32 %v1952_v33, %v479_v28 }
  0xae   : > { %v445_v43 = vmax.f32 %v442_v38, 0.0  ;;  %v1210_v38 = vrot.slane %v1208_v22, 3 }
  0xb0   : > { %v485_v44 = vpack.c.bf16 %v445_v43, %v445_v43  ;;  %v417_v48 = vpop.f32.mrf.mxu0  ;;  %v1213_v52 = vmul.f32 %v1210_v38, %v1207_v37 }
  0xb1   : > { %v430_v49 = vpop.f32.mrf.mxu1 }
  0xb2   : > { %v487_v53 = vshrl.u32 %v485_v44, 16  ;;  %v490_v54 = vshll.u32 %v485_v44, 16  ;;  %v1936_v49 = vld [vmem:[%s2350_s2 + $0x230] sm:$0xff]  ;;  %v1309_v63 = vpop.permute.xlu2 %1308 }
  0xb3   : > { %v1314_v4 = vperm.slane %v1309_v63, %v2284_v58 }
  0xb4   : > { %v489_v55 = vrot.slane %v487_v53, 6  ;;  %v492_v56 = vrot.slane %v490_v54, 7  ;;  %v1107_v54 = vrot.slane %v1105_v42, 4 }
  0xb6   : > { %v493_v62 = vor.u32 %v492_v56, %v489_v55 }
  0xb8   : > { %v499_v2 = vsel %vm497_vm3, %v493_v62, %v498_v57  ;;  %v1008_v62 = vrot.slane %v1006_v51, 4 }
  0xb9   : > { %500 = vst [vmem:[#allocation2] sm:$0xe] %v499_v2 }
  0xc0   : > { %v701_v13 = vld [vmem:[#allocation2] sm:$0x6]  ;;  %v1302_v15 = vld [vmem:[#allocation2] sm:$0x8] }
  0xc1   : > { %v595_v14 = vld [vmem:[#allocation2] sm:$0x7]  ;;  %v714_v16 = vunpack.c.l.bf16 %v701_v13 }
  0xc2   : > { %v608_v17 = vunpack.c.l.bf16 %v595_v14  ;;  %v1192_v19 = vld [vmem:[#allocation2] sm:$0xc]  ;;  %v501_v20 = vld [vmem:[#allocation2] sm:$0x3] }
  0xc3   : > { %v513_v23 = vunpack.c.l.bf16 %v501_v20  ;;  %v719_v24 = vmul.f32 %v717_v11, %v714_v16  ;;  %v818_v26 = vmul.f32 %v816_v12, %v714_v16  ;;  %v1206_v29 = vunpack.c.l.bf16 %v1192_v19  ;;  %v901_v40 = vld [vmem:[#allocation2] sm:$0xe]  ;;  %v1933_v11 = vld [vmem:[%s2350_s2 + $0x218] sm:$0xff] }
  0xc4   : > { %v613_v25 = vmul.f32 %v611_v18, %v608_v17  ;;  %v992_v44 = vld [vmem:[#allocation2] sm:$0xc]  ;;  %v919_v50 = vunpack.c.l.b16 %v901_v40  ;;  %v1316_v12 = vunpack.c.l.bf16 %v1314_v4  ;;  %v1932_v17 = vld [vmem:[%s2350_s2 + $0x210] sm:$0xff]  ;;  %v1315_v18 = vunpack.c.l.bf16 %v1302_v15 }
  0xc5   : > { %v515_v30 = vmul.f32 %v514_v21, %v513_v23  ;;  %v720_v31 = vpack.c.bf16 %v719_v24, %v719_v24  ;;  %v819_v34 = vpack.c.bf16 %v818_v26, %v818_v26  ;;  %v1212_v45 = vmul.f32 %v1210_v38, %v1206_v29  ;;  %v1931_v21 = vld [vmem:[%s2350_s2 + $0x208] sm:$0xff]  ;;  %v1930_v24 = vld [vmem:[%s2350_s2 + $0x200] sm:$0xff]  ;;  %v481_v29 = vpop.f32.mrf.mxu3 }
  0xc6   : > { %v614_v32 = vpack.c.bf16 %v613_v25, %v613_v25  ;;  %v1005_v53 = vunpack.c.l.bf16 %v992_v44  ;;  %v920_v56 = vpack.c.b16 %v919_v50, %v919_v50  ;;  %v1318_v19 = vrot.slane %v1316_v12, 2 }
  0xc7   : > { %v516_v39 = vpack.c.bf16 %v515_v30, %v515_v30  ;;  %v738_v43 = vrot.slane %v720_v31, 1  ;;  %v837_v48 = vrot.slane %v819_v34, 1  ;;  %v1214_v57 = vpack.c.bf16 %v1213_v52, %v1212_v45 }
  0xc8   : > { %v634_v41 = vshll.u32 %v614_v32, 16  ;;  %v632_v46 = vshrl.u32 %v614_v32, 16  ;;  %v922_v60 = vshrl.u32 %v920_v56, 16  ;;  %v925_v61 = vshll.u32 %v920_v56, 16 }
  0xc9   : > { %589 = vmatmul.bf16.vlgmr.msra.gmra.mxu2 %v516_v39  ;;  %796 = vmatmul.bf16.vlgmr.msrb.gmra.mxu0 %v738_v43  ;;  %v1109_v0 = vmul.f32 %v1107_v54, %v1005_v53  ;;  %v1232_v1 = vshrl.u32 %v1214_v57, 16  ;;  %v1235_v2 = vshll.u32 %v1214_v57, 16  ;;  %v1010_v7 = vmul.f32 %v1008_v62, %v1005_v53 }
  0xca   : > { %v636_v47 = vrot.slane %v634_v41, 1  ;;  %1390 = vmatpush.bf16.msra.mxu2 %v1937_v35  ;;  %895 = vmatmul.bf16.vlgmr.msrb.gmra.mxu1 %v837_v48  ;;  %v924_v5 = vrot.slane %v922_v60, 1  ;;  %v927_v6 = vrot.slane %v925_v61, 2  ;;  %v1320_v22 = vmul.f32 %v1318_v19, %v1315_v18 }
  0xcb   : > { %v1110_v8 = vpack.c.bf16 %v1109_v0, %v1109_v0  ;;  %v1234_v9 = vrot.slane %v1232_v1, 2  ;;  %v1237_v10 = vrot.slane %v1235_v2, 3  ;;  %v1011_v14 = vpack.c.bf16 %v1010_v7, %v1010_v7 }
  0xcc   : > { %v637_v55 = vor.u32 %v636_v47, %v632_v46  ;;  %v928_v13 = vor.u32 %v927_v6, %v924_v5  ;;  %v1321_v23 = vmul.f32 %v1318_v19, %v1207_v37 }
  0xcd   : > { %v1128_v16 = vrot.slane %v1110_v8, 2  ;;  %v1238_v58 = vor.u32 %v1237_v10, %v1234_v9  ;;  %v1029_v20 = vrot.slane %v1011_v14, 2 }
  0xce   : > { %1391 = vmatpush.bf16.msra.mxu2 %v1936_v49  ;;  %695 = vmatmul.bf16.vlgmr.msra.gmra.mxu3 %v637_v55  ;;  %v1322_v25 = vpack.c.bf16 %v1321_v23, %v1320_v22 }
  0xd0   : > { %v1340_v26 = vrot.slane %v1322_v25, 3 }
  0xd2   : > { %1392 = vmatpush.bf16.msra.mxu2 %v1935_v59 }
  0xd6   : > { %1393 = vmatpush.bf16.msra.mxu2 %v1934_v3 }
  0xd9   : > { %986 = vmatmul.bf16.vlgmr.msrb.gmra.mxu2 %v928_v13  ;;  %1186 = vmatmul.bf16.vlgmr.msra.gmra.mxu0 %v1128_v16 }
  0xda   : > { %1394 = vmatpush.bf16.msra.mxu2 %v1933_v11  ;;  %1296 = vmatmul.bf16.vlgmr.msra.gmra.mxu1 %v1238_v58 }
  0xde   : > { %1395 = vmatpush.bf16.msra.mxu2 %v1932_v17  ;;  %1087 = vmatmul.bf16.vlgmr.msrb.gmra.mxu3 %v1029_v20 }
  0xe2   : > { %1396 = vmatpush.bf16.msra.mxu2 %v1931_v21 }
  0xe6   : > { %1397 = vmatpush.bf16.msra.mxu2 %v1930_v24 }
  0xe9   : > { %1398 = vmatmul.bf16.vlgmr.msra.gmra.mxu2 %v1340_v26 }
 0x146   : > { %v797_v30 = vpop.f32.mrf.mxu0 }
 0x147   : > { %v896_v31 = vpop.f32.mrf.mxu1 }
 0x14c   : > { %v590_v32 = vpop.f32.mrf.mxu2 }
 0x14d   : > { %v594_v38 = vadd.f32 %v590_v32, %v480_v36 }
 0x14e   : > { %v799_v27 = vpop.f32.mrf.mxu0 }
 0x14f   : > { %v898_v34 = vpop.f32.mrf.mxu1 }
 0x151   : > { %v696_v35 = vpop.f32.mrf.mxu3 }
 0x152   : > { %v700_v39 = vadd.f32 %v696_v35, %v594_v38 }
 0x154   : > { %v592_v37 = vpop.f32.mrf.mxu2  ;;  %v801_v43 = vadd.f32 %v797_v30, %v700_v39 }
 0x156   : > { %v1187_v40 = vpop.f32.mrf.mxu0  ;;  %v900_v45 = vadd.f32 %v896_v31, %v801_v43 }
 0x157   : > { %v1297_v41 = vpop.f32.mrf.mxu1 }
 0x159   : > { %v698_v42 = vpop.f32.mrf.mxu3 }
 0x15c   : > { %v987_v44 = vpop.f32.mrf.mxu2 }
 0x15d   : > { %v991_v47 = vadd.f32 %v987_v44, %v900_v45 }
 0x15e   : > { %v1189_v46 = vpop.f32.mrf.mxu0 }
 0x15f   : > { %v1299_v48 = vpop.f32.mrf.mxu1 }
 0x161   : > { %v1088_v49 = vpop.f32.mrf.mxu3 }
 0x162   : > { %v1092_v50 = vadd.f32 %v1088_v49, %v991_v47 }
 0x164   : > { %v989_v51 = vpop.f32.mrf.mxu2  ;;  %v1191_v52 = vadd.f32 %v1187_v40, %v1092_v50 }
 0x166   : > { %v1301_v54 = vadd.f32 %v1297_v41, %v1191_v52 }
 0x169   : > { %v1090_v53 = vpop.f32.mrf.mxu3 }
 0x16c   : > { %v1399_v55 = vpop.f32.mrf.mxu2 }
 0x16d   : > { %v1403_v56 = vadd.f32 %v1399_v55, %v1301_v54 }
 0x16f   : > { %v1404_v57 = vmax.f32 %v1403_v56, 0.0 }
 0x171   : > { %v1405_v59 = vpack.c.bf16 %v1404_v57, %v1404_v57 }
 0x173   : > { %1406 = vst [vmem:[%s249_s14] sm:$0x3] %v1405_v59 }
 0x174   : > { %v1401_v60 = vpop.f32.mrf.mxu2 }
 0x175 PF: > { %s16_s21 = sadd.s32 1, %s1959_s21  }
 0x176   : > { %p13_p4 = scmp.ge.s32.totalorder %s16_s21, 4  }
 0x178   :  { %15 = sbr.rel (!%p13_p4) target bundleno = 1 (0x1), region = 81 }

// kernel: ensemble_forward.10
= control target key start
LH: loop header
LB: loop body
LE: loop exit
PB: predicated region body
PF: predicated region fallthrough
CT: control target
= control target key end

     0   :  { %s6353_s21 = smov 0   ;;  %s9238_s0 = inlined_call_operand.vmem [shape: bf16[2,1,1152], index: 0, kind: input, shape index: {}]   ;;  %s9239_s1 = inlined_call_operand.vmem [shape: bf16[1152,256], index: 1, kind: input, shape index: {}]   ;;  %s9240_s2 = inlined_call_operand.vmem [shape: bf16[2304,256], index: 2, kind: input, shape index: {}]   ;;  %s9241_s3 = inlined_call_operand.vmem [shape: bf16[128,256], index: 3, kind: input, shape index: {}]   ;;  %s9242_s4 = inlined_call_operand.vmem [shape: f32[1,256], index: 4, kind: input, shape index: {}]   ;;  %s9243_s5 = inlined_call_operand.vmem [shape: f32[9,1,1], index: 5, kind: input, shape index: {}]   ;;  %s9244_s6 = inlined_call_operand.vmem [shape: bf16[2,1,256], index: 6, kind: output, shape index: {}]  }
   0x1 LB: > { %s4039_s22 = sadd.s32 4294967295, %s6314_s21   ;;  %p4043_p0 = scmp.ge.s32.totalorder %s6314_s21, 1  ;;  %s6314_s21 = sphi %s6353_s21, %s16_s21  }
   0x2   : > { %p211_p1 = scmp.lt.s32.totalorder %s6314_s21, 3 }
   0x4   : > { %p212_p2 = pnand %p4043_p0, %p211_p1 }
   0x5   : > { %p239_p3 = scmp.lt.s32.totalorder (!%p212_p2), %s4039_s22, 1 }
   0x6   : > { %215 = sbr.rel (%p212_p2) target bundleno = 635 (0x27b), region = 44 }
   0xb   : > { %v4103_v0 = vld [vmem:[%s9239_s1 + $0x70] sm:$0xf]  ;;  %v5861_v1 = vld [vmem:[%s9239_s1 + $0x74] sm:$0xf0]  ;;  %v4095_v11 = vld [vmem:[%s9239_s1 + $0x60] sm:$0xf] }
   0xc   : > { %v4167_v2 = vld [vmem:[%s9239_s1 + $0xf0] sm:$0xf]  ;;  %v4104_v3 = vor.u32 %v5861_v1, %v4103_v0  ;;  %v5877_v4 = vld [vmem:[%s9239_s1 + $0xf4] sm:$0xf0]  ;;  %v5859_v13 = vld [vmem:[%s9239_s1 + $0x64] sm:$0xf0] }
   0xd   : > { %v4231_v5 = vld [vmem:[%s9239_s1 + $0x170] sm:$0xf]  ;;  %v5893_v6 = vld [vmem:[%s9239_s1 + $0x174] sm:$0xf0]  ;;  %v4168_v7 = vor.u32 %v5877_v4, %v4167_v2  ;;  %v4159_v14 = vld [vmem:[%s9239_s1 + $0xe0] sm:$0xf]  ;;  %v4096_v16 = vor.u32 %v5859_v13, %v4095_v11 }
   0xe   : > { %v4232_v8 = vor.u32 %v5893_v6, %v4231_v5  ;;  %v4295_v9 = vld [vmem:[%s9239_s1 + $0x1f0] sm:$0xf]  ;;  %v5909_v10 = vld [vmem:[%s9239_s1 + $0x1f4] sm:$0xf0]  ;;  %1136 = vmatpush.bf16.msra.mxu0 %v4104_v3  ;;  %v5875_v15 = vld [vmem:[%s9239_s1 + $0xe4] sm:$0xf0] }
   0xf   : > { %v4296_v12 = vor.u32 %v5909_v10, %v4295_v9  ;;  %1149 = vmatpush.bf16.msra.mxu1 %v4168_v7  ;;  %v4160_v17 = vor.u32 %v5875_v15, %v4159_v14  ;;  %v4223_v18 = vld [vmem:[%s9239_s1 + $0x160] sm:$0xf]  ;;  %v5891_v19 = vld [vmem:[%s9239_s1 + $0x164] sm:$0xf0]  ;;  %v4087_v23 = vld [vmem:[%s9239_s1 + $0x50] sm:$0xf] }
  0x10   : > { %1162 = vmatpush.bf16.msra.mxu2 %v4232_v8  ;;  %v4287_v20 = vld [vmem:[%s9239_s1 + $0x1e0] sm:$0xf]  ;;  %v4224_v21 = vor.u32 %v5891_v19, %v4223_v18  ;;  %v5907_v22 = vld [vmem:[%s9239_s1 + $0x1e4] sm:$0xf0]  ;;  %v5857_v24 = vld [vmem:[%s9239_s1 + $0x54] sm:$0xf0] }
  0x11   : > { %1175 = vmatpush.bf16.msra.mxu3 %v4296_v12  ;;  %v4288_v25 = vor.u32 %v5907_v22, %v4287_v20  ;;  %v4151_v26 = vld [vmem:[%s9239_s1 + $0xd0] sm:$0xf]  ;;  %v5873_v27 = vld [vmem:[%s9239_s1 + $0xd4] sm:$0xf0]  ;;  %v4088_v29 = vor.u32 %v5857_v24, %v4087_v23  ;;  %v4079_v35 = vld [vmem:[%s9239_s1 + $0x40] sm:$0xf] }
  0x12   : > { %v4215_v28 = vld [vmem:[%s9239_s1 + $0x150] sm:$0xf]  ;;  %1137 = vmatpush.bf16.msra.mxu0 %v4096_v16  ;;  %v5889_v30 = vld [vmem:[%s9239_s1 + $0x154] sm:$0xf0]  ;;  %v4152_v33 = vor.u32 %v5873_v27, %v4151_v26  ;;  %v5855_v36 = vld [vmem:[%s9239_s1 + $0x44] sm:$0xf0] }
  0x13   : > { %v4279_v31 = vld [vmem:[%s9239_s1 + $0x1d0] sm:$0xf]  ;;  %v5905_v32 = vld [vmem:[%s9239_s1 + $0x1d4] sm:$0xf0]  ;;  %1150 = vmatpush.bf16.msra.mxu1 %v4160_v17  ;;  %v4216_v34 = vor.u32 %v5889_v30, %v4215_v28  ;;  %v4143_v37 = vld [vmem:[%s9239_s1 + $0xc0] sm:$0xf]  ;;  %v4080_v44 = vor.u32 %v5855_v36, %v4079_v35 }
  0x14   : > { %1163 = vmatpush.bf16.msra.mxu2 %v4224_v21  ;;  %v4280_v38 = vor.u32 %v5905_v32, %v4279_v31  ;;  %v5871_v39 = vld [vmem:[%s9239_s1 + $0xc4] sm:$0xf0]  ;;  %v4207_v40 = vld [vmem:[%s9239_s1 + $0x140] sm:$0xf]  ;;  %v4071_v47 = vld [vmem:[%s9239_s1 + $0x30] sm:$0xf] }
  0x15   : > { %1176 = vmatpush.bf16.msra.mxu3 %v4288_v25  ;;  %v5887_v41 = vld [vmem:[%s9239_s1 + $0x144] sm:$0xf0]  ;;  %v4271_v42 = vld [vmem:[%s9239_s1 + $0x1c0] sm:$0xf]  ;;  %v4144_v45 = vor.u32 %v5871_v39, %v4143_v37  ;;  %v5853_v48 = vld [vmem:[%s9239_s1 + $0x34] sm:$0xf0] }
  0x16   : > { %v5903_v43 = vld [vmem:[%s9239_s1 + $0x1c4] sm:$0xf0]  ;;  %1138 = vmatpush.bf16.msra.mxu0 %v4088_v29  ;;  %v4208_v46 = vor.u32 %v5887_v41, %v4207_v40  ;;  %v4135_v49 = vld [vmem:[%s9239_s1 + $0xb0] sm:$0xf]  ;;  %v5869_v51 = vld [vmem:[%s9239_s1 + $0xb4] sm:$0xf0]  ;;  %v4072_v56 = vor.u32 %v5853_v48, %v4071_v47 }
  0x17   : > { %1151 = vmatpush.bf16.msra.mxu1 %v4152_v33  ;;  %v4272_v50 = vor.u32 %v5903_v43, %v4271_v42  ;;  %v4199_v52 = vld [vmem:[%s9239_s1 + $0x130] sm:$0xf]  ;;  %v5885_v53 = vld [vmem:[%s9239_s1 + $0x134] sm:$0xf0]  ;;  %v4136_v57 = vor.u32 %v5869_v51, %v4135_v49  ;;  %v4063_v59 = vld [vmem:[%s9239_s1 + $0x20] sm:$0xf] }
  0x18   : > { %1164 = vmatpush.bf16.msra.mxu2 %v4216_v34  ;;  %v4263_v54 = vld [vmem:[%s9239_s1 + $0x1b0] sm:$0xf]  ;;  %v5901_v55 = vld [vmem:[%s9239_s1 + $0x1b4] sm:$0xf0]  ;;  %v4200_v58 = vor.u32 %v5885_v53, %v4199_v52  ;;  %v5851_v60 = vld [vmem:[%s9239_s1 + $0x24] sm:$0xf0] }
  0x19   : > { %1177 = vmatpush.bf16.msra.mxu3 %v4280_v38  ;;  %v4127_v61 = vld [vmem:[%s9239_s1 + $0xa0] sm:$0xf]  ;;  %v4264_v62 = vor.u32 %v5901_v55, %v4263_v54  ;;  %v5867_v63 = vld [vmem:[%s9239_s1 + $0xa4] sm:$0xf0]  ;;  %v4064_v4 = vor.u32 %v5851_v60, %v4063_v59  ;;  %v4055_v7 = vld [vmem:[%s9239_s1 + $0x10] sm:$0xf] }
  0x1a   : > { %1139 = vmatpush.bf16.msra.mxu0 %v4080_v44  ;;  %v4191_v0 = vld [vmem:[%s9239_s1 + $0x120] sm:$0xf]  ;;  %v5883_v1 = vld [vmem:[%s9239_s1 + $0x124] sm:$0xf0]  ;;  %v4128_v5 = vor.u32 %v5867_v63, %v4127_v61  ;;  %v5849_v8 = vld [vmem:[%s9239_s1 + $0x14] sm:$0xf0] }
  0x1b   : > { %1152 = vmatpush.bf16.msra.mxu1 %v4144_v45  ;;  %v4255_v2 = vld [vmem:[%s9239_s1 + $0x1a0] sm:$0xf]  ;;  %v5899_v3 = vld [vmem:[%s9239_s1 + $0x1a4] sm:$0xf0]  ;;  %v4192_v6 = vor.u32 %v5883_v1, %v4191_v0  ;;  %v4119_v9 = vld [vmem:[%s9239_s1 + $0x90] sm:$0xf]  ;;  %v4056_v16 = vor.u32 %v5849_v8, %v4055_v7 }
  0x1c   : > { %1165 = vmatpush.bf16.msra.mxu2 %v4208_v46  ;;  %v4256_v10 = vor.u32 %v5899_v3, %v4255_v2  ;;  %v5865_v11 = vld [vmem:[%s9239_s1 + $0x94] sm:$0xf0]  ;;  %v4183_v12 = vld [vmem:[%s9239_s1 + $0x110] sm:$0xf]  ;;  %v4047_v17 = vld [vmem:[%s9239_s1] sm:$0xf] }
  0x1d   : > { %1178 = vmatpush.bf16.msra.mxu3 %v4272_v50  ;;  %v5881_v13 = vld [vmem:[%s9239_s1 + $0x114] sm:$0xf0]  ;;  %v4247_v14 = vld [vmem:[%s9239_s1 + $0x190] sm:$0xf]  ;;  %v5847_v18 = vld [vmem:[%s9239_s1 + $0x4] sm:$0xf0]  ;;  %v4120_v19 = vor.u32 %v5865_v11, %v4119_v9 }
  0x1e   : > { %1140 = vmatpush.bf16.msra.mxu0 %v4072_v56  ;;  %v5897_v15 = vld [vmem:[%s9239_s1 + $0x194] sm:$0xf0]  ;;  %v4184_v20 = vor.u32 %v5881_v13, %v4183_v12  ;;  %v4111_v21 = vld [vmem:[%s9239_s1 + $0x80] sm:$0xf]  ;;  %v5863_v22 = vld [vmem:[%s9239_s1 + $0x84] sm:$0xf0]  ;;  %v4048_v31 = vor.u32 %v5847_v18, %v4047_v17 }
  0x1f   : > { %1153 = vmatpush.bf16.msra.mxu1 %v4136_v57  ;;  %v4175_v23 = vld [vmem:[%s9239_s1 + $0x100] sm:$0xf]  ;;  %v4248_v24 = vor.u32 %v5897_v15, %v4247_v14  ;;  %v5879_v25 = vld [vmem:[%s9239_s1 + $0x104] sm:$0xf0]  ;;  %v4359_v26 = vld [vmem:[%s9239_s1 + $0x270] sm:$0xf]  ;;  %v4112_v35 = vor.u32 %v5863_v22, %v4111_v21 }
  0x20   : > { %1166 = vmatpush.bf16.msra.mxu2 %v4200_v58  ;;  %v5925_v27 = vld [vmem:[%s9239_s1 + $0x274] sm:$0xf0]  ;;  %v4423_v28 = vld [vmem:[%s9239_s1 + $0x2f0] sm:$0xf]  ;;  %v4239_v33 = vld [vmem:[%s9239_s1 + $0x180] sm:$0xf]  ;;  %v4176_v36 = vor.u32 %v5879_v25, %v4175_v23 }
  0x21   : > { %1179 = vmatpush.bf16.msra.mxu3 %v4264_v62  ;;  %v5941_v29 = vld [vmem:[%s9239_s1 + $0x2f4] sm:$0xf0]  ;;  %v4487_v30 = vld [vmem:[%s9239_s1 + $0x370] sm:$0xf]  ;;  %v5895_v34 = vld [vmem:[%s9239_s1 + $0x184] sm:$0xf0]  ;;  %v4360_v39 = vor.u32 %v5925_v27, %v4359_v26 }
  0x22   : > { %1141 = vmatpush.bf16.msra.mxu0 %v4064_v4  ;;  %v5957_v32 = vld [vmem:[%s9239_s1 + $0x374] sm:$0xf0]  ;;  %v4551_v37 = vld [vmem:[%s9239_s1 + $0x3f0] sm:$0xf]  ;;  %v4424_v40 = vor.u32 %v5941_v29, %v4423_v28  ;;  %v4351_v41 = vld [vmem:[%s9239_s1 + $0x260] sm:$0xf]  ;;  %v4240_v43 = vor.u32 %v5895_v34, %v4239_v33 }
  0x23   : > { %1154 = vmatpush.bf16.msra.mxu1 %v4128_v5  ;;  %v5973_v38 = vld [vmem:[%s9239_s1 + $0x3f4] sm:$0xf0]  ;;  %v4488_v42 = vor.u32 %v5957_v32, %v4487_v30  ;;  %v5923_v44 = vld [vmem:[%s9239_s1 + $0x264] sm:$0xf0]  ;;  %v4415_v45 = vld [vmem:[%s9239_s1 + $0x2e0] sm:$0xf] }
  0x24   : > { %1167 = vmatpush.bf16.msra.mxu2 %v4192_v6  ;;  %v5939_v46 = vld [vmem:[%s9239_s1 + $0x2e4] sm:$0xf0]  ;;  %v4552_v47 = vor.u32 %v5973_v38, %v4551_v37  ;;  %v4479_v48 = vld [vmem:[%s9239_s1 + $0x360] sm:$0xf]  ;;  %v4352_v52 = vor.u32 %v5923_v44, %v4351_v41  ;;  %v4343_v54 = vld [vmem:[%s9239_s1 + $0x250] sm:$0xf] }
  0x25   : > { %1180 = vmatpush.bf16.msra.mxu3 %v4256_v10  ;;  %v5955_v49 = vld [vmem:[%s9239_s1 + $0x364] sm:$0xf0]  ;;  %v4543_v50 = vld [vmem:[%s9239_s1 + $0x3e0] sm:$0xf]  ;;  %v4416_v53 = vor.u32 %v5939_v46, %v4415_v45  ;;  %v5921_v56 = vld [vmem:[%s9239_s1 + $0x254] sm:$0xf0] }
  0x26   : > { %1142 = vmatpush.bf16.msra.mxu0 %v4056_v16  ;;  %v5971_v51 = vld [vmem:[%s9239_s1 + $0x3e4] sm:$0xf0]  ;;  %v4480_v55 = vor.u32 %v5955_v49, %v4479_v48  ;;  %v4407_v57 = vld [vmem:[%s9239_s1 + $0x2d0] sm:$0xf]  ;;  %v5937_v58 = vld [vmem:[%s9239_s1 + $0x2d4] sm:$0xf0]  ;;  %v4344_v0 = vor.u32 %v5921_v56, %v4343_v54 }
  0x27   : > { %1155 = vmatpush.bf16.msra.mxu1 %v4120_v19  ;;  %v4544_v59 = vor.u32 %v5971_v51, %v4543_v50  ;;  %v4471_v60 = vld [vmem:[%s9239_s1 + $0x350] sm:$0xf]  ;;  %v5953_v61 = vld [vmem:[%s9239_s1 + $0x354] sm:$0xf0]  ;;  %s9250_s22 = smov (!%p239_p3, %s4039_s22), 1  ;;  %v4408_v1 = vor.u32 %v5937_v58, %v4407_v57  ;;  %vm1501_vm0 = vcmask 1042432  }
  0x28   : > { %1168 = vmatpush.bf16.msra.mxu2 %v4184_v20  ;;  %v4535_v62 = vld [vmem:[%s9239_s1 + $0x3d0] sm:$0xf]  ;;  %v5969_v63 = vld [vmem:[%s9239_s1 + $0x3d4] sm:$0xf0]  ;;  %v4335_v2 = vld [vmem:[%s9239_s1 + $0x240] sm:$0xf]  ;;  %v4472_v3 = vor.u32 %v5953_v61, %v4471_v60 }
  0x29   : > { %1181 = vmatpush.bf16.msra.mxu3 %v4248_v24  ;;  %s6294_s25 = smul.u32 9, %s9250_s22  ;;  %v5919_v4 = vld [vmem:[%s9239_s1 + $0x244] sm:$0xf0]  ;;  %v4399_v5 = vld [vmem:[%s9239_s1 + $0x2c0] sm:$0xf]  ;;  %v4536_v7 = vor.u32 %v5969_v63, %v4535_v62  ;;  %vm1504_vm2 = vcmask 1046532  }
  0x2a   : > { %1143 = vmatpush.bf16.msra.mxu0 %v4048_v31  ;;  %v5935_v6 = vld [vmem:[%s9239_s1 + $0x2c4] sm:$0xf0]  ;;  %v4463_v8 = vld [vmem:[%s9239_s1 + $0x340] sm:$0xf]  ;;  %v4336_v13 = vor.u32 %v5919_v4, %v4335_v2  ;;  %v4327_v15 = vld [vmem:[%s9239_s1 + $0x230] sm:$0xf] }
  0x2b   : > { %1156 = vmatpush.bf16.msra.mxu1 %v4112_v35  ;;  %v5951_v9 = vld [vmem:[%s9239_s1 + $0x344] sm:$0xf0]  ;;  %s6653_s14 = scalar_lea.vmem %s9238_s0, %s6294_s25  ;;  %v4527_v10 = vld [vmem:[%s9239_s1 + $0x3c0] sm:$0xf]  ;;  %v4400_v14 = vor.u32 %v5935_v6, %v4399_v5  ;;  %v5917_v17 = vld [vmem:[%s9239_s1 + $0x234] sm:$0xf0] }
  0x2c   : > { %1169 = vmatpush.bf16.msra.mxu2 %v4176_v36  ;;  %v5967_v11 = vld [vmem:[%s9239_s1 + $0x3c4] sm:$0xf0]  ;;  %v248_v12 = vld [vmem:[%s6653_s14] sm:$0xff]  ;;  %v4464_v16 = vor.u32 %v5951_v9, %v4463_v8  ;;  %v4391_v18 = vld [vmem:[%s9239_s1 + $0x2b0] sm:$0xf]  ;;  %v4328_v24 = vor.u32 %v5917_v17, %v4327_v15  ;;  %vm1515_vm7 = vcmask 1041409  }
  0x2d   : > { %1182 = vmatpush.bf16.msra.mxu3 %v4240_v43  ;;  %395 = vst [vmem:[#allocation1] ss:$9 sm:$0xff] %v248_v12  ;;  %v5933_v19 = vld [vmem:[%s9239_s1 + $0x2b4] sm:$0xf0]  ;;  %v4528_v20 = vor.u32 %v5967_v11, %v4527_v10  ;;  %v4455_v21 = vld [vmem:[%s9239_s1 + $0x330] sm:$0xf] }
  0x2e   : > { %1188 = vmatpush.bf16.msrb.mxu0 %v4360_v39  ;;  %v5949_v22 = vld [vmem:[%s9239_s1 + $0x334] sm:$0xf0]  ;;  %v4519_v23 = vld [vmem:[%s9239_s1 + $0x3b0] sm:$0xf]  ;;  %v4392_v25 = vor.u32 %v5933_v19, %v4391_v18  ;;  %v4319_v27 = vld [vmem:[%s9239_s1 + $0x220] sm:$0xf] }
  0x2f   : > { %1201 = vmatpush.bf16.msrb.mxu1 %v4424_v40  ;;  %v5965_v26 = vld [vmem:[%s9239_s1 + $0x3b4] sm:$0xf0]  ;;  %v5915_v28 = vld [vmem:[%s9239_s1 + $0x224] sm:$0xf0]  ;;  %v4383_v29 = vld [vmem:[%s9239_s1 + $0x2a0] sm:$0xf]  ;;  %v4456_v32 = vor.u32 %v5949_v22, %v4455_v21 }
  0x30   : > { %1214 = vmatpush.bf16.msrb.mxu2 %v4488_v42  ;;  %v5931_v30 = vld [vmem:[%s9239_s1 + $0x2a4] sm:$0xf0]  ;;  %v4447_v31 = vld [vmem:[%s9239_s1 + $0x320] sm:$0xf]  ;;  %v4520_v39 = vor.u32 %v5965_v26, %v4519_v23  ;;  %v4311_v40 = vld [vmem:[%s9239_s1 + $0x210] sm:$0xf]  ;;  %v4320_v42 = vor.u32 %v5915_v28, %v4319_v27 }
  0x31   : > { %1227 = vmatpush.bf16.msrb.mxu3 %v4552_v47  ;;  %v5947_v33 = vld [vmem:[%s9239_s1 + $0x324] sm:$0xf0]  ;;  %v4511_v34 = vld [vmem:[%s9239_s1 + $0x3a0] sm:$0xf]  ;;  %v5913_v41 = vld [vmem:[%s9239_s1 + $0x214] sm:$0xf0]  ;;  %v4384_v43 = vor.u32 %v5931_v30, %v4383_v29 }
  0x32   : > { %1189 = vmatpush.bf16.msrb.mxu0 %v4352_v52  ;;  %v5963_v35 = vld [vmem:[%s9239_s1 + $0x3a4] sm:$0xf0]  ;;  %v4375_v45 = vld [vmem:[%s9239_s1 + $0x290] sm:$0xf]  ;;  %v5929_v46 = vld [vmem:[%s9239_s1 + $0x294] sm:$0xf0]  ;;  %v4448_v50 = vor.u32 %v5947_v33, %v4447_v31  ;;  %v4312_v58 = vor.u32 %v5913_v41, %v4311_v40 }
  0x33   : > { %1202 = vmatpush.bf16.msrb.mxu1 %v4416_v53  ;;  %v249_v47 = vld [vmem:[%s6653_s14 + $0x8] sm:$0x1]  ;;  %v4439_v48 = vld [vmem:[%s9239_s1 + $0x310] sm:$0xf]  ;;  %v5945_v49 = vld [vmem:[%s9239_s1 + $0x314] sm:$0xf0]  ;;  %v4512_v54 = vor.u32 %v5963_v35, %v4511_v34 }
  0x34   : > { %1215 = vmatpush.bf16.msrb.mxu2 %v4480_v55  ;;  %v6710_v36 = vld [vmem:[#allocation1 + $0x12] sm:$0xff]  ;;  %v6712_v37 = vld [vmem:[#allocation1] sm:$0xff]  ;;  %v6722_v44 = vld [vmem:[#allocation1 + $0x9] sm:$0xff]  ;;  %v4440_v2 = vor.u32 %v5945_v49, %v4439_v48  ;;  %vm1502_vm1 = vsmask.f32 2304  ;;  %vm1518_vm9 = vcmask 1045509  }
  0x35   : > { %1228 = vmatpush.bf16.msrb.mxu3 %v4544_v59  ;;  %v6714_v38 = vld [vmem:[#allocation1 + $0x1b] sm:$0xff]  ;;  %1170 = vmatmul.bf16.vlgmr.msra.gmra.mxu2 %v6710_v36  ;;  %v4503_v51 = vld [vmem:[%s9239_s1 + $0x390] sm:$0xf]  ;;  %v6749_v55 = vld [vmem:[#allocation1 + $0x24] sm:$0xff]  ;;  %v4376_v59 = vor.u32 %v5929_v46, %v4375_v45  ;;  %vm1505_vm4 = vsmask.f32 6400 }
  0x36   : > { %1190 = vmatpush.bf16.msrb.mxu0 %v4344_v0  ;;  %1183 = vmatmul.bf16.vlgmr.msra.gmra.mxu3 %v6714_v38  ;;  %v5961_v52 = vld [vmem:[%s9239_s1 + $0x394] sm:$0xf0]  ;;  %v6751_v56 = vld [vmem:[#allocation1 + $0x3f] sm:$0xff]  ;;  %v6753_v57 = vld [vmem:[#allocation1 + $0x2d] sm:$0xff]  ;;  %vm1516_vm8 = vsmask.f32 1280 }
  0x37   : > { %1203 = vmatpush.bf16.msrb.mxu1 %v4408_v1  ;;  %1144 = vmatmul.bf16.vlgmr.msra.gmra.mxu0 %v6712_v37  ;;  %v6746_v53 = vld [vmem:[#allocation1 + $0x36] sm:$0xff]  ;;  %v4303_v60 = vld [vmem:[%s9239_s1 + $0x200] sm:$0xf]  ;;  %v5911_v61 = vld [vmem:[%s9239_s1 + $0x204] sm:$0xf0]  ;;  %v6316_v1 = vmov 0   ;;  %v4504_v6 = vor.u32 %v5961_v52, %v4503_v51 }
  0x38   : > { %1216 = vmatpush.bf16.msrb.mxu2 %v4472_v3  ;;  %1157 = vmatmul.bf16.vlgmr.msra.gmra.mxu1 %v6722_v44  ;;  %405 = vst [vmem:[#allocation1] ss:$9 sm:$0xff] %v249_v47  ;;  %v4367_v62 = vld [vmem:[%s9239_s1 + $0x280] sm:$0xf]  ;;  %v5927_v63 = vld [vmem:[%s9239_s1 + $0x284] sm:$0xf0]  ;;  %v4304_v10 = vor.u32 %v5911_v61, %v4303_v60  ;;  %vm7507_vm3 = vmand %vm1501_vm0, %vm1502_vm1 }
  0x39   : > { %1229 = vmatpush.bf16.msrb.mxu3 %v4536_v7  ;;  %v4615_v0 = vld [vmem:[%s9239_s1 + $0x470] sm:$0xf]  ;;  %6305 = vset.pattern.permute.xlu0 %v6316_v1  ;;  %v5989_v3 = vld [vmem:[%s9239_s1 + $0x474] sm:$0xf0]  ;;  %v5860_v4 = vld [vmem:[%s9239_s1 + $0x74] sm:$0xf]  ;;  %v4368_v11 = vor.u32 %v5927_v63, %v4367_v62 }
  0x3a   : > { %1191 = vmatpush.bf16.msrb.mxu0 %v4336_v13  ;;  %6306 = vset.pattern.permute.xlu1 %v6316_v1  ;;  %v4105_v5 = vld [vmem:[%s9239_s1 + $0x78] sm:$0xf0]  ;;  %v4431_v7 = vld [vmem:[%s9239_s1 + $0x300] sm:$0xf]  ;;  %v5943_v8 = vld [vmem:[%s9239_s1 + $0x304] sm:$0xf0]  ;;  %v4616_v15 = vor.u32 %v5989_v3, %v4615_v0 }
  0x3b   : > { %1204 = vmatpush.bf16.msrb.mxu1 %v4400_v14  ;;  %6307 = vset.pattern.permute.xlu2 %v6316_v1  ;;  %v5876_v9 = vld [vmem:[%s9239_s1 + $0xf4] sm:$0xf]  ;;  %v4169_v12 = vld [vmem:[%s9239_s1 + $0xf8] sm:$0xf0]  ;;  %v4495_v13 = vld [vmem:[%s9239_s1 + $0x380] sm:$0xf]  ;;  %v4432_v19 = vor.u32 %v5943_v8, %v4431_v7 }
  0x3c   : > { %1217 = vmatpush.bf16.msrb.mxu2 %v4464_v16  ;;  %v5959_v14 = vld [vmem:[%s9239_s1 + $0x384] sm:$0xf0]  ;;  %v4108_v16 = vor.u32 %v5860_v4, %v4105_v5  ;;  %v5892_v17 = vld [vmem:[%s9239_s1 + $0x174] sm:$0xf]  ;;  %v4233_v18 = vld [vmem:[%s9239_s1 + $0x178] sm:$0xf0]  ;;  %v4172_v22 = vor.u32 %v5876_v9, %v4169_v12 }
  0x3d   : > { %1230 = vmatpush.bf16.msrb.mxu3 %v4528_v20  ;;  %v4607_v20 = vld [vmem:[%s9239_s1 + $0x460] sm:$0xf]  ;;  %v5987_v21 = vld [vmem:[%s9239_s1 + $0x464] sm:$0xf0]  ;;  %v4496_v23 = vor.u32 %v5959_v14, %v4495_v13  ;;  %v4236_v27 = vor.u32 %v5892_v17, %v4233_v18  ;;  %v5874_v28 = vld [vmem:[%s9239_s1 + $0xe4] sm:$0xf] }
  0x3e   : > { %1192 = vmatpush.bf16.msrb.mxu0 %v4328_v24  ;;  %v5858_v24 = vld [vmem:[%s9239_s1 + $0x64] sm:$0xf]  ;;  %v1526_v26 = vld [vmem:[%s9243_s5] sm:$0x1]  ;;  %v4161_v29 = vld [vmem:[%s9239_s1 + $0xe8] sm:$0xf0]  ;;  %v4608_v31 = vor.u32 %v5987_v21, %v4607_v20 }
  0x3f   : > { %1205 = vmatpush.bf16.msrb.mxu1 %v4392_v25  ;;  %v4097_v25 = vld [vmem:[%s9239_s1 + $0x68] sm:$0xf0]  ;;  %v1527_v30 = vpack.c.bf16 %v1526_v26, %v1526_v26  ;;  %v4599_v35 = vld [vmem:[%s9239_s1 + $0x450] sm:$0xf]  ;;  %v4164_v40 = vor.u32 %v5874_v28, %v4161_v29  ;;  %v5856_v41 = vld [vmem:[%s9239_s1 + $0x54] sm:$0xf] }
  0x40   : > { %1218 = vmatpush.bf16.msrb.mxu2 %v4456_v32  ;;  %v5890_v32 = vld [vmem:[%s9239_s1 + $0x164] sm:$0xf]  ;;  %v4225_v33 = vld [vmem:[%s9239_s1 + $0x168] sm:$0xf0]  ;;  %v4100_v34 = vor.u32 %v5858_v24, %v4097_v25  ;;  %v5872_v45 = vld [vmem:[%s9239_s1 + $0xd4] sm:$0xf] }
  0x41   : > { %1231 = vmatpush.bf16.msrb.mxu3 %v4520_v39  ;;  %v5985_v39 = vld [vmem:[%s9239_s1 + $0x454] sm:$0xf0]  ;;  %1530 = vperm.xlu0 %6305, %v1527_v30   ;;  %v4153_v46 = vld [vmem:[%s9239_s1 + $0xd8] sm:$0xf0]  ;;  %v5888_v48 = vld [vmem:[%s9239_s1 + $0x154] sm:$0xf] }
  0x42   : > { %1193 = vmatpush.bf16.msrb.mxu0 %v4320_v42  ;;  %v4089_v42 = vld [vmem:[%s9239_s1 + $0x58] sm:$0xf0]  ;;  %v4600_v47 = vor.u32 %v5985_v39, %v4599_v35  ;;  %v4591_v51 = vld [vmem:[%s9239_s1 + $0x440] sm:$0xf]  ;;  %v5983_v52 = vld [vmem:[%s9239_s1 + $0x444] sm:$0xf0] }
  0x43   : > { %1206 = vmatpush.bf16.msrb.mxu1 %v4384_v43  ;;  %v4228_v43 = vor.u32 %v5890_v32, %v4225_v33  ;;  %v4217_v49 = vld [vmem:[%s9239_s1 + $0x158] sm:$0xf0]  ;;  %v5870_v61 = vld [vmem:[%s9239_s1 + $0xc4] sm:$0xf]  ;;  %v4145_v62 = vld [vmem:[%s9239_s1 + $0xc8] sm:$0xf0]  ;;  %v4592_v63 = vor.u32 %v5983_v52, %v4591_v51 }
  0x44   : > { %1219 = vmatpush.bf16.msrb.mxu2 %v4448_v50  ;;  %v4092_v50 = vor.u32 %v5856_v41, %v4089_v42  ;;  %v4220_v60 = vor.u32 %v5888_v48, %v4217_v49  ;;  %v5886_v0 = vld [vmem:[%s9239_s1 + $0x144] sm:$0xf]  ;;  %v4209_v1 = vld [vmem:[%s9239_s1 + $0x148] sm:$0xf0]  ;;  %v4583_v4 = vld [vmem:[%s9239_s1 + $0x430] sm:$0xf]  ;;  %v4148_v7 = vor.u32 %v5870_v61, %v4145_v62 }
  0x45   : > { %1232 = vmatpush.bf16.msrb.mxu3 %v4512_v54  ;;  %v4156_v54 = vor.u32 %v5872_v45, %v4153_v46  ;;  %v5981_v5 = vld [vmem:[%s9239_s1 + $0x434] sm:$0xf0]  ;;  %v5852_v8 = vld [vmem:[%s9239_s1 + $0x34] sm:$0xf]  ;;  %v4073_v9 = vld [vmem:[%s9239_s1 + $0x38] sm:$0xf0] }
  0x46   : > { %1194 = vmatpush.bf16.msrb.mxu0 %v4312_v58  ;;  %v5854_v58 = vld [vmem:[%s9239_s1 + $0x44] sm:$0xf]  ;;  %v4137_v12 = vld [vmem:[%s9239_s1 + $0xb8] sm:$0xf0]  ;;  %v4584_v13 = vor.u32 %v5981_v5, %v4583_v4  ;;  %v5884_v14 = vld [vmem:[%s9239_s1 + $0x134] sm:$0xf] }
  0x47   : > { %1207 = vmatpush.bf16.msrb.mxu1 %v4376_v59  ;;  %v4081_v59 = vld [vmem:[%s9239_s1 + $0x48] sm:$0xf0]  ;;  %v4575_v17 = vld [vmem:[%s9239_s1 + $0x420] sm:$0xf]  ;;  %v5979_v18 = vld [vmem:[%s9239_s1 + $0x424] sm:$0xf0] }
  0x48   : > { %1220 = vmatpush.bf16.msrb.mxu2 %v4440_v2  ;;  %v4813_v2 = vld [vmem:[%s9243_s5 + $0x1] sm:$0x1]  ;;  %v4084_v3 = vor.u32 %v5854_v58, %v4081_v59  ;;  %v5850_v20 = vld [vmem:[%s9239_s1 + $0x24] sm:$0xf]  ;;  %v4065_v21 = vld [vmem:[%s9239_s1 + $0x28] sm:$0xf0]  ;;  %v4576_v25 = vor.u32 %v5979_v18, %v4575_v17 }
  0x49   : > { %1233 = vmatpush.bf16.msrb.mxu3 %v4504_v6  ;;  %v1792_v6 = vpack.c.bf16 %v4813_v2, %v4813_v2  ;;  %v4129_v24 = vld [vmem:[%s9239_s1 + $0xa8] sm:$0xf0]  ;;  %v5882_v26 = vld [vmem:[%s9239_s1 + $0x124] sm:$0xf]  ;;  %v4068_v28 = vor.u32 %v5850_v20, %v4065_v21  ;;  %v4567_v29 = vld [vmem:[%s9239_s1 + $0x410] sm:$0xf] }
  0x4a   : > { %1195 = vmatpush.bf16.msrb.mxu0 %v4304_v10  ;;  %v4212_v10 = vor.u32 %v5886_v0, %v4209_v1  ;;  %v5977_v30 = vld [vmem:[%s9239_s1 + $0x414] sm:$0xf0]  ;;  %v5848_v32 = vld [vmem:[%s9239_s1 + $0x14] sm:$0xf]  ;;  %v4057_v33 = vld [vmem:[%s9239_s1 + $0x18] sm:$0xf0] }
  0x4b   : > { %1208 = vmatpush.bf16.msrb.mxu1 %v4368_v11  ;;  %v5868_v11 = vld [vmem:[%s9239_s1 + $0xb4] sm:$0xf]  ;;  %1795 = vperm.xlu0 %6305, %v1792_v6   ;;  %v4121_v39 = vld [vmem:[%s9239_s1 + $0x98] sm:$0xf0]  ;;  %v4060_v45 = vor.u32 %v5848_v32, %v4057_v33  ;;  %v5975_v46 = vld [vmem:[%s9239_s1 + $0x404] sm:$0xf0] }
  0x4c   : > { %1221 = vmatpush.bf16.msrb.mxu2 %v4432_v19  ;;  %v4140_v19 = vor.u32 %v5868_v11, %v4137_v12  ;;  %v5864_v35 = vld [vmem:[%s9239_s1 + $0x94] sm:$0xf]  ;;  %v4185_v42 = vld [vmem:[%s9239_s1 + $0x118] sm:$0xf0]  ;;  %v4049_v48 = vld [vmem:[%s9239_s1 + $0x8] sm:$0xf0] }
  0x4d   : > { %1234 = vmatpush.bf16.msrb.mxu3 %v4496_v23  ;;  %1196 = vmatmul.bf16.vlgmr.msrb.gmra.mxu0 %v6749_v55  ;;  %v5866_v23 = vld [vmem:[%s9239_s1 + $0xa4] sm:$0xf]  ;;  %v5880_v41 = vld [vmem:[%s9239_s1 + $0x114] sm:$0xf]  ;;  %v4124_v49 = vor.u32 %v5864_v35, %v4121_v39  ;;  %v4297_v52 = vld [vmem:[%s9239_s1 + $0x1f8] sm:$0xf0] }
  0x4e   : > { %1240 = vmatpush.bf16.msra.mxu0 %v4616_v15  ;;  %1209 = vmatmul.bf16.vlgmr.msrb.gmra.mxu1 %v6753_v57  ;;  %v4201_v15 = vld [vmem:[%s9239_s1 + $0x138] sm:$0xf0]  ;;  %v5908_v51 = vld [vmem:[%s9239_s1 + $0x1f4] sm:$0xf]  ;;  %v4113_v58 = vld [vmem:[%s9239_s1 + $0x88] sm:$0xf0] }
  0x4f   : > { %1253 = vmatpush.bf16.msra.mxu1 %v4108_v16  ;;  %1222 = vmatmul.bf16.vlgmr.msrb.gmra.mxu2 %v6746_v53  ;;  %v4076_v16 = vor.u32 %v5852_v8, %v4073_v9  ;;  %v5924_v59 = vld [vmem:[%s9239_s1 + $0x274] sm:$0xf]  ;;  %v4300_v1 = vor.u32 %v5908_v51, %v4297_v52  ;;  %v5878_v2 = vld [vmem:[%s9239_s1 + $0x104] sm:$0xf]  ;;  %v4289_v9 = vld [vmem:[%s9239_s1 + $0x1e8] sm:$0xf0] }
  0x50   : > { %1266 = vmatpush.bf16.msra.mxu2 %v4172_v22  ;;  %1235 = vmatmul.bf16.vlgmr.msrb.gmra.mxu3 %v6751_v56  ;;  %v4204_v22 = vor.u32 %v5884_v14, %v4201_v15  ;;  %v5940_v62 = vld [vmem:[%s9239_s1 + $0x2f4] sm:$0xf]  ;;  %v5906_v8 = vld [vmem:[%s9239_s1 + $0x1e4] sm:$0xf]  ;;  %v4353_v12 = vld [vmem:[%s9239_s1 + $0x268] sm:$0xf0] }
  0x51   : > { %1279 = vmatpush.bf16.msra.mxu3 %v4236_v27  ;;  %v4193_v27 = vld [vmem:[%s9239_s1 + $0x128] sm:$0xf0]  ;;  %v5956_v4 = vld [vmem:[%s9239_s1 + $0x374] sm:$0xf]  ;;  %v5922_v11 = vld [vmem:[%s9239_s1 + $0x264] sm:$0xf]  ;;  %v4292_v18 = vor.u32 %v5906_v8, %v4289_v9 }
  0x52   : > { %1241 = vmatpush.bf16.msra.mxu0 %v4608_v31  ;;  %v4132_v31 = vor.u32 %v5866_v23, %v4129_v24  ;;  %v5938_v15 = vld [vmem:[%s9239_s1 + $0x2e4] sm:$0xf]  ;;  %v4481_v20 = vld [vmem:[%s9239_s1 + $0x368] sm:$0xf0]  ;;  %v4356_v21 = vor.u32 %v5922_v11, %v4353_v12  ;;  %v4281_v23 = vld [vmem:[%s9239_s1 + $0x1d8] sm:$0xf0] }
  0x53   : > { %1254 = vmatpush.bf16.msra.mxu1 %v4100_v34  ;;  %v4196_v34 = vor.u32 %v5882_v26, %v4193_v27  ;;  %v5586_v24 = vld [vmem:[%s9243_s5 + $0x7] sm:$0x1]  ;;  %v5920_v26 = vld [vmem:[%s9239_s1 + $0x254] sm:$0xf]  ;;  %v4345_v27 = vld [vmem:[%s9239_s1 + $0x258] sm:$0xf0] }
  0x54   : > { %1267 = vmatpush.bf16.msra.mxu2 %v4164_v40  ;;  %v4568_v40 = vor.u32 %v5977_v30, %v4567_v29  ;;  %v4409_v29 = vld [vmem:[%s9239_s1 + $0x2d8] sm:$0xf0]  ;;  %v3418_v30 = vpack.c.bf16 %v5586_v24, %v5586_v24  ;;  %v5952_v33 = vld [vmem:[%s9239_s1 + $0x354] sm:$0xf]  ;;  %v5902_v39 = vld [vmem:[%s9239_s1 + $0x1c4] sm:$0xf] }
  0x55   : > { %1280 = vmatpush.bf16.msra.mxu3 %v4228_v43  ;;  %v4559_v43 = vld [vmem:[%s9239_s1 + $0x400] sm:$0xf]  ;;  %v4473_v35 = vld [vmem:[%s9239_s1 + $0x358] sm:$0xf0]  ;;  %v5916_v52 = vld [vmem:[%s9239_s1 + $0x234] sm:$0xf] }
  0x56   : > { %1242 = vmatpush.bf16.msra.mxu0 %v4600_v47  ;;  %v5846_v47 = vld [vmem:[%s9239_s1 + $0x4] sm:$0xf]  ;;  %v4560_v61 = vor.u32 %v5975_v46, %v4559_v43  ;;  %3421 = vperm.xlu0 %6305, %v3418_v30   ;;  %v4449_v12 = vld [vmem:[%s9239_s1 + $0x328] sm:$0xf0]  ;;  %v4441_v24 = vld [vmem:[%s9239_s1 + $0x318] sm:$0xf0] }
  0x57   : > { %1255 = vmatpush.bf16.msra.mxu1 %v4092_v50  ;;  %v5862_v50 = vld [vmem:[%s9239_s1 + $0x84] sm:$0xf]  ;;  %v4052_v0 = vor.u32 %v5846_v47, %v4049_v48  ;;  %vm1506_vm5 = vmand %vm1504_vm2, %vm1505_vm4  ;;  %vm1519_vm10 = vsmask.f32 5376  ;;  %vm3974_vm14 = vcmask 1040384   ;;  %s4044_s10 = sshll.u32 %s9250_s22, 1 }
  0x58   : > { %1268 = vmatpush.bf16.msra.mxu2 %v4156_v54  ;;  %v4188_v54 = vor.u32 %v5880_v41, %v4185_v42  ;;  %v4116_v5 = vor.u32 %v5862_v50, %v4113_v58  ;;  %v5918_v41 = vld [vmem:[%s9239_s1 + $0x244] sm:$0xf]  ;;  %v4337_v42 = vld [vmem:[%s9239_s1 + $0x248] sm:$0xf0]  ;;  %v4265_v50 = vld [vmem:[%s9239_s1 + $0x1b8] sm:$0xf0]  ;;  %s246_s13 = scalar_lea.vmem %s9244_s6, %s4044_s10 }
  0x59   : > { %1281 = vmatpush.bf16.msra.mxu3 %v4220_v60  ;;  %v4361_v60 = vld [vmem:[%s9239_s1 + $0x278] sm:$0xf0]  ;;  %v5934_v43 = vld [vmem:[%s9239_s1 + $0x2c4] sm:$0xf]  ;;  %v4340_v48 = vor.u32 %v5918_v41, %v4337_v42  ;;  %v5932_v58 = vld [vmem:[%s9239_s1 + $0x2b4] sm:$0xf] }
  0x5a   : > { %1243 = vmatpush.bf16.msra.mxu0 %v4592_v63  ;;  %v4425_v63 = vld [vmem:[%s9239_s1 + $0x2f8] sm:$0xf0]  ;;  %v4364_v6 = vor.u32 %v5924_v59, %v4361_v60  ;;  %v5950_v47 = vld [vmem:[%s9239_s1 + $0x344] sm:$0xf]  ;;  %v4679_v41 = vld [vmem:[%s9241_s3 + $0x70] sm:$0xf] }
  0x5b   : > { %1256 = vmatpush.bf16.msra.mxu1 %v4084_v3  ;;  %v4177_v3 = vld [vmem:[%s9239_s1 + $0x108] sm:$0xf0]  ;;  %v4393_v59 = vld [vmem:[%s9239_s1 + $0x2b8] sm:$0xf0]  ;;  %v6005_v42 = vld [vmem:[%s9241_s3 + $0x74] sm:$0xf0] }
  0x5c   : > { %1269 = vmatpush.bf16.msra.mxu2 %v4148_v7  ;;  %v4489_v7 = vld [vmem:[%s9239_s1 + $0x378] sm:$0xf0]  ;;  %v4180_v14 = vor.u32 %v5878_v2, %v4177_v3  ;;  %v4257_v2 = vld [vmem:[%s9239_s1 + $0x1a8] sm:$0xf0]  ;;  %v4396_v3 = vor.u32 %v5932_v58, %v4393_v59  ;;  %vm1507_vm6 = vmor %vm1506_vm5, %vm7507_vm3  ;;  %vm3980_vm15 = vsmask.f32 256 }
  0x5d   : > { %1282 = vmatpush.bf16.msra.mxu3 %v4212_v10  ;;  %v4428_v10 = vor.u32 %v5940_v62, %v4425_v63  ;;  %v4492_v17 = vor.u32 %v5956_v4, %v4489_v7  ;;  %v5948_v62 = vld [vmem:[%s9239_s1 + $0x334] sm:$0xf]  ;;  %v5914_v4 = vld [vmem:[%s9239_s1 + $0x224] sm:$0xf]  ;;  %v4385_v7 = vld [vmem:[%s9239_s1 + $0x2a8] sm:$0xf0] }
  0x5e   : > { %1244 = vmatpush.bf16.msra.mxu0 %v4584_v13  ;;  %v7017_v13 = vld [vmem:[#allocation1] sm:$0xff]  ;;  %v4681_v58 = vld [vmem:[%s9241_s3 + $0x78] sm:$0xf0]  ;;  %vm8210_vm11 = vmand %vm1515_vm7, %vm1516_vm8 }
  0x5f   : > { %1257 = vmatpush.bf16.msra.mxu1 %v4076_v16  ;;  %v4417_v16 = vld [vmem:[%s9239_s1 + $0x2e8] sm:$0xf0]  ;;  %vm1520_vm12 = vmand %vm1518_vm9, %vm1519_vm10 }
  0x60   : > { %1270 = vmatpush.bf16.msra.mxu2 %v4140_v19  ;;  %v5954_v19 = vld [vmem:[%s9239_s1 + $0x364] sm:$0xf]  ;;  %vm1521_vm13 = vmor %vm1520_vm12, %vm8210_vm11 }
  0x61   : > { %1283 = vmatpush.bf16.msra.mxu3 %v4204_v22  ;;  %v5904_v22 = vld [vmem:[%s9239_s1 + $0x1d4] sm:$0xf]  ;;  %vm3981_vm0 = vmand %vm3974_vm14, %vm3980_vm15 }
  0x62   : > { %1245 = vmatpush.bf16.msra.mxu0 %v4576_v25  ;;  %v4420_v25 = vor.u32 %v5938_v15, %v4417_v16  ;;  %v4284_v32 = vor.u32 %v5904_v22, %v4281_v23  ;;  %v4249_v15 = vld [vmem:[%s9239_s1 + $0x198] sm:$0xf0]  ;;  %v5944_v23 = vld [vmem:[%s9239_s1 + $0x314] sm:$0xf]  ;;  %vm3982_vm1 = vmor %vm8210_vm11, %vm3981_vm0 }
  0x63   : > { %1258 = vmatpush.bf16.msra.mxu1 %v4068_v28  ;;  %v5936_v28 = vld [vmem:[%s9239_s1 + $0x2d4] sm:$0xf] }
  0x64   : > { %1271 = vmatpush.bf16.msra.mxu2 %v4132_v31  ;;  %v4484_v31 = vor.u32 %v5954_v19, %v4481_v20  ;;  %v5928_v19 = vld [vmem:[%s9239_s1 + $0x294] sm:$0xf]  ;;  %v4377_v20 = vld [vmem:[%s9239_s1 + $0x298] sm:$0xf0] }
  0x65   : > { %1284 = vmatpush.bf16.msra.mxu3 %v4196_v34  ;;  %v4348_v34 = vor.u32 %v5920_v26, %v4345_v27  ;;  %v4241_v27 = vld [vmem:[%s9239_s1 + $0x188] sm:$0xf0]  ;;  %v4380_v30 = vor.u32 %v5928_v19, %v4377_v20  ;;  %v4665_v19 = vld [vmem:[%s9241_s3 + $0x58] sm:$0xf0]  ;;  %v4655_v20 = vld [vmem:[%s9241_s3 + $0x40] sm:$0xf] }
  0x66   : > { %1246 = vmatpush.bf16.msra.mxu0 %v4568_v40  ;;  %v4412_v40 = vor.u32 %v5936_v28, %v4409_v29  ;;  %v5910_v28 = vld [vmem:[%s9239_s1 + $0x204] sm:$0xf]  ;;  %v4305_v29 = vld [vmem:[%s9239_s1 + $0x208] sm:$0xf0] }
  0x67   : > { %1259 = vmatpush.bf16.msra.mxu1 %v4060_v45  ;;  %v4476_v45 = vor.u32 %v5952_v33, %v4473_v35  ;;  %v4553_v33 = vld [vmem:[%s9239_s1 + $0x3f8] sm:$0xf0]  ;;  %v5988_v35 = vld [vmem:[%s9239_s1 + $0x474] sm:$0xf] }
  0x68   : > { %1272 = vmatpush.bf16.msra.mxu2 %v4124_v49  ;;  %v5900_v49 = vld [vmem:[%s9239_s1 + $0x1b4] sm:$0xf] }
  0x69   : > { %1285 = vmatpush.bf16.msra.mxu3 %v4188_v54  ;;  %v4329_v54 = vld [vmem:[%s9239_s1 + $0x238] sm:$0xf0] }
  0x6a   : > { %1247 = vmatpush.bf16.msra.mxu0 %v4560_v61  ;;  %v4268_v61 = vor.u32 %v5900_v49, %v4265_v50  ;;  %v4332_v63 = vor.u32 %v5916_v52, %v4329_v54  ;;  %v4545_v49 = vld [vmem:[%s9239_s1 + $0x3e8] sm:$0xf0]  ;;  %v5986_v50 = vld [vmem:[%s9239_s1 + $0x464] sm:$0xf]  ;;  %v4680_v52 = vor.u32 %v6005_v42, %v4679_v41  ;;  %v6004_v54 = vld [vmem:[%s9241_s3 + $0x74] sm:$0xf] }
  0x6b   : > { %1260 = vmatpush.bf16.msra.mxu1 %v4052_v0  ;;  %v4457_v0 = vld [vmem:[%s9239_s1 + $0x338] sm:$0xf0]  ;;  %v5978_v41 = vld [vmem:[%s9239_s1 + $0x424] sm:$0xf] }
  0x6c   : > { %1273 = vmatpush.bf16.msra.mxu2 %v4116_v5  ;;  %v4321_v5 = vld [vmem:[%s9239_s1 + $0x228] sm:$0xf0]  ;;  %v4460_v8 = vor.u32 %v5948_v62, %v4457_v0  ;;  %v5968_v0 = vld [vmem:[%s9239_s1 + $0x3d4] sm:$0xf] }
  0x6d   : > { %1248 = vmatmul.bf16.vlgmr.msra.gmra.mxu0 %v7017_v13  ;;  %1286 = vmatpush.bf16.msra.mxu3 %v4180_v14  ;;  %v4324_v11 = vor.u32 %v5914_v4, %v4321_v5  ;;  %v5896_v14 = vld [vmem:[%s9239_s1 + $0x194] sm:$0xf]  ;;  %v4601_v4 = vld [vmem:[%s9239_s1 + $0x458] sm:$0xf0] }
  0x6e   : > { %1292 = vmatpush.bf16.msrb.mxu0 %v4300_v1  ;;  %1261 = vmatmul.bf16.vlgmr.msra.gmra.mxu1 %v6712_v37  ;;  %v4273_v37 = vld [vmem:[%s9239_s1 + $0x1c8] sm:$0xf0]  ;;  %v5898_v1 = vld [vmem:[%s9239_s1 + $0x1a4] sm:$0xf]  ;;  %v4252_v22 = vor.u32 %v5896_v14, %v4249_v15 }
  0x6f   : > { %1305 = vmatpush.bf16.msrb.mxu1 %v4364_v6  ;;  %1274 = vmatmul.bf16.vlgmr.msra.gmra.mxu2 %v6722_v44  ;;  %v4401_v44 = vld [vmem:[%s9239_s1 + $0x2c8] sm:$0xf0]  ;;  %v4276_v46 = vor.u32 %v5902_v39, %v4273_v37  ;;  %v5930_v6 = vld [vmem:[%s9239_s1 + $0x2a4] sm:$0xf]  ;;  %v4260_v9 = vor.u32 %v5898_v1, %v4257_v2  ;;  %v4617_v39 = vld [vmem:[%s9239_s1 + $0x478] sm:$0xf0]  ;;  %v4444_v37 = vor.u32 %v5944_v23, %v4441_v24 }
  0x70   : > { %1318 = vmatpush.bf16.msrb.mxu2 %v4428_v10  ;;  %1287 = vmatmul.bf16.vlgmr.msra.gmra.mxu3 %v6710_v36  ;;  %v4465_v36 = vld [vmem:[%s9239_s1 + $0x348] sm:$0xf0]  ;;  %v4404_v51 = vor.u32 %v5934_v43, %v4401_v44  ;;  %v5946_v10 = vld [vmem:[%s9239_s1 + $0x324] sm:$0xf]  ;;  %v4388_v16 = vor.u32 %v5930_v6, %v4385_v7  ;;  %v4308_v43 = vor.u32 %v5910_v28, %v4305_v29  ;;  %v4537_v1 = vld [vmem:[%s9239_s1 + $0x3d8] sm:$0xf0] }
  0x71   : > { %1331 = vmatpush.bf16.msrb.mxu3 %v4492_v17  ;;  %v4468_v60 = vor.u32 %v5950_v47, %v4465_v36  ;;  %v5912_v17 = vld [vmem:[%s9239_s1 + $0x214] sm:$0xf]  ;;  %v5970_v36 = vld [vmem:[%s9239_s1 + $0x3e4] sm:$0xf]  ;;  %v4673_v7 = vld [vmem:[%s9241_s3 + $0x68] sm:$0xf0] }
  0x72   : > { %1293 = vmatpush.bf16.msrb.mxu0 %v4292_v18  ;;  %v4313_v18 = vld [vmem:[%s9239_s1 + $0x218] sm:$0xf0]  ;;  %v4548_v62 = vor.u32 %v5970_v36, %v4545_v49  ;;  %v5984_v2 = vld [vmem:[%s9239_s1 + $0x454] sm:$0xf]  ;;  %v6002_v6 = vld [vmem:[%s9241_s3 + $0x64] sm:$0xf] }
  0x73   : > { %1306 = vmatpush.bf16.msrb.mxu1 %v4356_v21  ;;  %v4452_v21 = vor.u32 %v5946_v10, %v4449_v12  ;;  %v4316_v26 = vor.u32 %v5912_v17, %v4313_v18  ;;  %v4942_v10 = vld [vmem:[%s9243_s5 + $0x2] sm:$0x1]  ;;  %v4529_v12 = vld [vmem:[%s9239_s1 + $0x3c8] sm:$0xf0]  ;;  %v4676_v14 = vor.u32 %v6002_v6, %v4673_v7  ;;  %v6000_v18 = vld [vmem:[%s9241_s3 + $0x54] sm:$0xf] }
  0x74   : > { %1319 = vmatpush.bf16.msrb.mxu2 %v4420_v25  ;;  %v5894_v25 = vld [vmem:[%s9239_s1 + $0x184] sm:$0xf]  ;;  %v2067_v15 = vpack.c.bf16 %v4942_v10, %v4942_v10  ;;  %v4521_v24 = vld [vmem:[%s9239_s1 + $0x3b8] sm:$0xf0]  ;;  %v5960_v49 = vld [vmem:[%s9239_s1 + $0x394] sm:$0xf] }
  0x75   : > { %1332 = vmatpush.bf16.msrb.mxu3 %v4484_v31  ;;  %v5926_v31 = vld [vmem:[%s9239_s1 + $0x284] sm:$0xf]  ;;  %v4561_v7 = vld [vmem:[%s9239_s1 + $0x408] sm:$0xf0]  ;;  %v4633_v10 = vld [vmem:[%s9241_s3 + $0x18] sm:$0xf0] }
  0x76   : > { %1294 = vmatpush.bf16.msrb.mxu0 %v4284_v32  ;;  %v5972_v32 = vld [vmem:[%s9239_s1 + $0x3f4] sm:$0xf]  ;;  %2070 = vperm.xlu1 %6306, %v2067_v15   ;;  %v5998_v29 = vld [vmem:[%s9241_s3 + $0x44] sm:$0xf] }
  0x77   : > { %1307 = vmatpush.bf16.msrb.mxu1 %v4348_v34  ;;  %v4369_v34 = vld [vmem:[%s9239_s1 + $0x288] sm:$0xf0]  ;;  %v4556_v44 = vor.u32 %v5972_v32, %v4553_v33  ;;  %v4647_v32 = vld [vmem:[%s9241_s3 + $0x30] sm:$0xf]  ;;  %v5997_v33 = vld [vmem:[%s9241_s3 + $0x34] sm:$0xf0] }
  0x78   : > { %1320 = vmatpush.bf16.msrb.mxu2 %v4412_v40  ;;  %v4244_v40 = vor.u32 %v5894_v25, %v4241_v27  ;;  %v4372_v47 = vor.u32 %v5926_v31, %v4369_v34  ;;  %v5980_v25 = vld [vmem:[%s9239_s1 + $0x434] sm:$0xf]  ;;  %v4668_v27 = vor.u32 %v6000_v18, %v4665_v19  ;;  %v5071_v31 = vld [vmem:[%s9243_s5 + $0x3] sm:$0x1]  ;;  %v5974_v6 = vld [vmem:[%s9239_s1 + $0x404] sm:$0xf] }
  0x79   : > { %1333 = vmatpush.bf16.msrb.mxu3 %v4476_v45  ;;  %v5942_v45 = vld [vmem:[%s9239_s1 + $0x304] sm:$0xf]  ;;  %v2341_v34 = vpack.c.bf16 %v5071_v31, %v5071_v31  ;;  %v6020_v15 = vld [vmem:[%s9240_s2 + $0x74] sm:$0xf] }
  0x7a   : > { %1295 = vmatpush.bf16.msrb.mxu0 %v4276_v46  ;;  %v4433_v46 = vld [vmem:[%s9239_s1 + $0x308] sm:$0xf0]  ;;  %v5990_v19 = vld [vmem:[%s9241_s3 + $0x4] sm:$0xf] }
  0x7b   : > { %1308 = vmatpush.bf16.msrb.mxu1 %v4340_v48  ;;  %v4620_v48 = vor.u32 %v5988_v35, %v4617_v39  ;;  %v4436_v59 = vor.u32 %v5942_v45, %v4433_v46  ;;  %v5996_v45 = vld [vmem:[%s9241_s3 + $0x34] sm:$0xf]  ;;  %v4649_v46 = vld [vmem:[%s9241_s3 + $0x38] sm:$0xf0] }
  0x7c   : > { %1321 = vmatpush.bf16.msrb.mxu2 %v4404_v51  ;;  %v4609_v51 = vld [vmem:[%s9239_s1 + $0x468] sm:$0xf0] }
  0x7d   : > { %1334 = vmatpush.bf16.msrb.mxu3 %v4468_v60  ;;  %v4671_v60 = vld [vmem:[%s9241_s3 + $0x60] sm:$0xf] }
  0x7e   : > { %1296 = vmatpush.bf16.msrb.mxu0 %v4268_v61  ;;  %v6003_v61 = vld [vmem:[%s9241_s3 + $0x64] sm:$0xf0]  ;;  %2344 = vperm.xlu1 %6306, %v2341_v34   ;;  %v6034_v34 = vld [vmem:[%s9240_s2 + $0xe4] sm:$0xf] }
  0x7f   : > { %1309 = vmatpush.bf16.msrb.mxu1 %v4332_v63  ;;  %v4612_v63 = vor.u32 %v5986_v50, %v4609_v51  ;;  %v4672_v5 = vor.u32 %v6003_v61, %v4671_v60  ;;  %v4505_v51 = vld [vmem:[%s9239_s1 + $0x398] sm:$0xf0]  ;;  %v5994_v60 = vld [vmem:[%s9241_s3 + $0x24] sm:$0xf]  ;;  %v4641_v61 = vld [vmem:[%s9241_s3 + $0x28] sm:$0xf0] }
  0x80   : > { %1322 = vmatpush.bf16.msrb.mxu2 %v4396_v3  ;;  %v4684_v3 = vor.u32 %v6004_v54, %v4681_v58  ;;  %v4569_v54 = vld [vmem:[%s9239_s1 + $0x418] sm:$0xf0]  ;;  %v4652_v58 = vor.u32 %v5996_v45, %v4649_v46  ;;  %v1372_v46 = vld [vmem:[%s6653_s14 + $0x4] sm:$0x1] }
  0x81   : > { %1335 = vmatpush.bf16.msrb.mxu3 %v4460_v8  ;;  %v6001_v8 = vld [vmem:[%s9241_s3 + $0x54] sm:$0xf0] }
  0x82   : > { %1297 = vmatpush.bf16.msrb.mxu0 %v4260_v9  ;;  %v4540_v9 = vor.u32 %v5968_v0, %v4537_v1  ;;  %v5993_v0 = vld [vmem:[%s9241_s3 + $0x14] sm:$0xf0] }
  0x83   : > { %1310 = vmatpush.bf16.msrb.mxu1 %v4324_v11  ;;  %v4604_v11 = vor.u32 %v5984_v2, %v4601_v4  ;;  %v4508_v2 = vor.u32 %v5960_v49, %v4505_v51  ;;  %v6033_v49 = vld [vmem:[%s9240_s2 + $0xd4] sm:$0xf0]  ;;  %v4793_v51 = vld [vmem:[%s9240_s2 + $0xd8] sm:$0xf0] }
  0x84   : > { %1323 = vmatpush.bf16.msrb.mxu2 %v4388_v16  ;;  %v4593_v16 = vld [vmem:[%s9239_s1 + $0x448] sm:$0xf0] }
  0x85   : > { %1336 = vmatpush.bf16.msrb.mxu3 %v4452_v21 }
  0x86   : > { %1298 = vmatpush.bf16.msrb.mxu0 %v4252_v22  ;;  %v5964_v22 = vld [vmem:[%s9239_s1 + $0x3b4] sm:$0xf] }
  0x87   : > { %1311 = vmatpush.bf16.msrb.mxu1 %v4316_v26  ;;  %v4585_v26 = vld [vmem:[%s9239_s1 + $0x438] sm:$0xf0]  ;;  %v4524_v35 = vor.u32 %v5964_v22, %v4521_v24  ;;  %v6037_v24 = vld [vmem:[%s9240_s2 + $0xf4] sm:$0xf0] }
  0x88   : > { %1324 = vmatpush.bf16.msrb.mxu2 %v4380_v30  ;;  %v4657_v30 = vld [vmem:[%s9241_s3 + $0x48] sm:$0xf0]  ;;  %v4588_v39 = vor.u32 %v5980_v25, %v4585_v26  ;;  %v4809_v26 = vld [vmem:[%s9240_s2 + $0xf8] sm:$0xf0] }
  0x89   : > { %1337 = vmatpush.bf16.msrb.mxu3 %v4444_v37  ;;  %v5962_v37 = vld [vmem:[%s9239_s1 + $0x3a4] sm:$0xf]  ;;  %v4660_v42 = vor.u32 %v5998_v29, %v4657_v30  ;;  %v4737_v30 = vld [vmem:[%s9240_s2 + $0x68] sm:$0xf0] }
  0x8a   : > { %1299 = vmatpush.bf16.msrb.mxu0 %v4244_v40  ;;  %v4513_v40 = vld [vmem:[%s9239_s1 + $0x3a8] sm:$0xf0]  ;;  %v6018_v29 = vld [vmem:[%s9240_s2 + $0x64] sm:$0xf] }
  0x8b   : > { %1312 = vmatpush.bf16.msrb.mxu1 %v4308_v43  ;;  %v4577_v43 = vld [vmem:[%s9239_s1 + $0x428] sm:$0xf0]  ;;  %v4516_v36 = vor.u32 %v5962_v37, %v4513_v40  ;;  %v6035_v37 = vld [vmem:[%s9240_s2 + $0xe4] sm:$0xf0]  ;;  %v4740_v40 = vor.u32 %v6018_v29, %v4737_v30  ;;  %v4695_v30 = vld [vmem:[%s9240_s2 + $0x10] sm:$0xf] }
  0x8c   : > { %1325 = vmatpush.bf16.msrb.mxu2 %v4372_v47  ;;  %v4639_v47 = vld [vmem:[%s9241_s3 + $0x20] sm:$0xf]  ;;  %v4580_v50 = vor.u32 %v5978_v41, %v4577_v43  ;;  %v4801_v41 = vld [vmem:[%s9240_s2 + $0xe8] sm:$0xf0]  ;;  %v6017_v43 = vld [vmem:[%s9240_s2 + $0x54] sm:$0xf0] }
  0x8d   : > { %1300 = vmatmul.bf16.vlgmr.msrb.gmra.mxu0 %v6714_v38  ;;  %1338 = vmatpush.bf16.msrb.mxu3 %v4436_v59  ;;  %v4663_v38 = vld [vmem:[%s9241_s3 + $0x50] sm:$0xf] }
  0x8e   : > { %1344 = vmatpush.bf16.msra.mxu0 %v4556_v44  ;;  %1313 = vmatmul.bf16.vlgmr.msrb.gmra.mxu1 %v6749_v55  ;;  %v5966_v55 = vld [vmem:[%s9239_s1 + $0x3c4] sm:$0xf]  ;;  %v4664_v17 = vor.u32 %v6001_v8, %v4663_v38  ;;  %v4648_v44 = vor.u32 %v5997_v33, %v4647_v32  ;;  %v4644_v38 = vor.u32 %v5994_v60, %v4641_v61  ;;  %v4785_v61 = vld [vmem:[%s9240_s2 + $0xc8] sm:$0xf0] }
  0x8f   : > { %1357 = vmatpush.bf16.msra.mxu1 %v4620_v48  ;;  %1326 = vmatmul.bf16.vlgmr.msrb.gmra.mxu2 %v6753_v57  ;;  %v5982_v57 = vld [vmem:[%s9239_s1 + $0x444] sm:$0xf]  ;;  %v4532_v21 = vor.u32 %v5966_v55, %v4529_v12  ;;  %v5995_v48 = vld [vmem:[%s9241_s3 + $0x24] sm:$0xf0]  ;;  %v4743_v12 = vld [vmem:[%s9240_s2 + $0x70] sm:$0xf] }
  0x90   : > { %1475 = vmatpush.bf16.msra.mxu2 %v4680_v52  ;;  %1339 = vmatmul.bf16.vlgmr.msrb.gmra.mxu3 %v6746_v53  ;;  %v5999_v53 = vld [vmem:[%s9241_s3 + $0x44] sm:$0xf0]  ;;  %v4596_v23 = vor.u32 %v5982_v57, %v4593_v16  ;;  %v5976_v52 = vld [vmem:[%s9239_s1 + $0x414] sm:$0xf]  ;;  %v4640_v59 = vor.u32 %v5995_v48, %v4639_v47  ;;  %v6021_v57 = vld [vmem:[%s9240_s2 + $0x74] sm:$0xf0]  ;;  %v4804_v47 = vor.u32 %v6034_v34, %v4801_v41 }
  0x91   : > { %1488 = vmatpush.bf16.msra.mxu3 %v4684_v3  ;;  %v4656_v28 = vor.u32 %v5999_v53, %v4655_v20  ;;  %v5958_v3 = vld [vmem:[%s9239_s1 + $0x384] sm:$0xf]  ;;  %v4572_v4 = vor.u32 %v5976_v52, %v4569_v54  ;;  %v5991_v55 = vld [vmem:[%s9241_s3 + $0x4] sm:$0xf0]  ;;  %v4745_v16 = vld [vmem:[%s9240_s2 + $0x78] sm:$0xf0]  ;;  %v4744_v22 = vor.u32 %v6021_v57, %v4743_v12 }
  0x92   : > { %1345 = vmatpush.bf16.msra.mxu0 %v4548_v62  ;;  %v5715_v62 = vld [vmem:[%s9243_s5 + $0x8] sm:$0x1]  ;;  %v4625_v20 = vld [vmem:[%s9241_s3 + $0x8] sm:$0xf0]  ;;  %v4748_v25 = vor.u32 %v6020_v15, %v4745_v16  ;;  %v6032_v48 = vld [vmem:[%s9240_s2 + $0xd4] sm:$0xf] }
  0x93   : > { %1358 = vmatpush.bf16.msra.mxu1 %v4612_v63  ;;  %v4631_v63 = vld [vmem:[%s9241_s3 + $0x10] sm:$0xf]  ;;  %v3695_v1 = vpack.c.bf16 %v5715_v62, %v5715_v62  ;;  %v4628_v31 = vor.u32 %v5990_v19, %v4625_v20  ;;  %v4719_v52 = vld [vmem:[%s9240_s2 + $0x40] sm:$0xf]  ;;  %v6015_v54 = vld [vmem:[%s9240_s2 + $0x44] sm:$0xf0] }
  0x94   : > { %1476 = vmatpush.bf16.msra.mxu2 %v4672_v5  ;;  %v4497_v5 = vld [vmem:[%s9239_s1 + $0x388] sm:$0xf0]  ;;  %v4632_v8 = vor.u32 %v5993_v0, %v4631_v63  ;;  %v6030_v60 = vld [vmem:[%s9240_s2 + $0xc4] sm:$0xf]  ;;  %v4783_v63 = vld [vmem:[%s9240_s2 + $0xc0] sm:$0xf] }
  0x95   : > { %1489 = vmatpush.bf16.msra.mxu3 %v4676_v14  ;;  %3698 = vperm.xlu1 %6306, %v3695_v1   ;;  %v4500_v14 = vor.u32 %v5958_v3, %v4497_v5  ;;  %v6031_v0 = vld [vmem:[%s9240_s2 + $0xc4] sm:$0xf0]  ;;  %v4796_v1 = vor.u32 %v6032_v48, %v4793_v51  ;;  %v4711_v3 = vld [vmem:[%s9240_s2 + $0x30] sm:$0xf]  ;;  %v6013_v5 = vld [vmem:[%s9240_s2 + $0x34] sm:$0xf0]  ;;  %v4788_v57 = vor.u32 %v6030_v60, %v4785_v61 }
  0x96   : > { %1346 = vmatpush.bf16.msra.mxu0 %v4540_v9  ;;  %v5992_v9 = vld [vmem:[%s9241_s3 + $0x14] sm:$0xf]  ;;  %v1508_v12 = vld [vmem:[#allocation2] sm:$0x77]  ;;  %v4775_v15 = vld [vmem:[%s9240_s2 + $0xb0] sm:$0xf] }
  0x97   : > { %1359 = vmatpush.bf16.msra.mxu1 %v4604_v11  ;;  %v4623_v11 = vld [vmem:[%s9241_s3] sm:$0xf]  ;;  %v4636_v18 = vor.u32 %v5992_v9, %v4633_v10  ;;  %v6028_v9 = vld [vmem:[%s9240_s2 + $0xb4] sm:$0xf]  ;;  %v4777_v10 = vld [vmem:[%s9240_s2 + $0xb8] sm:$0xf0] }
  0x98   : > { %1477 = vmatpush.bf16.msra.mxu2 %v4664_v17  ;;  %v4564_v17 = vor.u32 %v5974_v6, %v4561_v7  ;;  %v4624_v53 = vor.u32 %v5991_v55, %v4623_v11  ;;  %v5328_v6 = vld [vmem:[%s9243_s5 + $0x5] sm:$0x1]  ;;  %v6012_v7 = vld [vmem:[%s9240_s2 + $0x34] sm:$0xf]  ;;  %v4784_v11 = vor.u32 %v6031_v0, %v4783_v63  ;;  %v6029_v16 = vld [vmem:[%s9240_s2 + $0xb4] sm:$0xf0] }
  0x99   : > { %1490 = vmatpush.bf16.msra.mxu3 %v4668_v27  ;;  %v4735_v27 = vld [vmem:[%s9240_s2 + $0x60] sm:$0xf]  ;;  %v6011_v19 = vld [vmem:[%s9240_s2 + $0x24] sm:$0xf0]  ;;  %v6010_v20 = vld [vmem:[%s9240_s2 + $0x24] sm:$0xf] }
  0x9a   : > { %1347 = vmatpush.bf16.msra.mxu0 %v4532_v21  ;;  %v6036_v21 = vld [vmem:[%s9240_s2 + $0xf4] sm:$0xf]  ;;  %v5457_v34 = vld [vmem:[%s9243_s5 + $0x6] sm:$0x1]  ;;  %v4689_v48 = vld [vmem:[%s9240_s2 + $0x8] sm:$0xf0] }
  0x9b   : > { %1360 = vmatpush.bf16.msra.mxu1 %v4596_v23  ;;  %v4807_v23 = vld [vmem:[%s9240_s2 + $0xf0] sm:$0xf]  ;;  %v4812_v33 = vor.u32 %v6036_v21, %v4809_v26  ;;  %v1509_v21 = vsel %vm1507_vm6, 0, %v1508_v12  ;;  %v4751_v60 = vld [vmem:[%s9240_s2 + $0x80] sm:$0xf] }
  0x9c   : > { %1478 = vmatpush.bf16.msra.mxu2 %v4656_v28  ;;  %v6019_v28 = vld [vmem:[%s9240_s2 + $0x64] sm:$0xf0]  ;;  %v4808_v32 = vor.u32 %v6037_v24, %v4807_v23  ;;  %v4776_v23 = vor.u32 %v6029_v16, %v4775_v15  ;;  %1510 = vst [vmem:[#allocation2] sm:$0x77] %v1509_v21  ;;  %v4780_v24 = vor.u32 %v6028_v9, %v4777_v10  ;;  %v4872_v51 = vld [vmem:[%s9240_s2 + $0x170] sm:$0xf] }
  0x9d   : > { %1491 = vmatpush.bf16.msra.mxu3 %v4660_v42  ;;  %v4727_v42 = vld [vmem:[%s9240_s2 + $0x50] sm:$0xf]  ;;  %v6023_v63 = vld [vmem:[%s9240_s2 + $0x84] sm:$0xf0]  ;;  %v4864_v9 = vld [vmem:[%s9240_s2 + $0x160] sm:$0xf] }
  0x9e   : > { %1348 = vmatpush.bf16.msra.mxu0 %v4524_v35  ;;  %v4736_v35 = vor.u32 %v6019_v28, %v4735_v27  ;;  %v4767_v27 = vld [vmem:[%s9240_s2 + $0xa0] sm:$0xf]  ;;  %v6027_v28 = vld [vmem:[%s9240_s2 + $0xa4] sm:$0xf0]  ;;  %v6050_v12 = vld [vmem:[%s9240_s2 + $0x164] sm:$0xf] }
  0x9f   : > { %1361 = vmatpush.bf16.msra.mxu1 %v4588_v39  ;;  %v4799_v39 = vld [vmem:[%s9240_s2 + $0xe0] sm:$0xf]  ;;  %v6051_v10 = vld [vmem:[%s9240_s2 + $0x164] sm:$0xf0] }
  0xa0   : > { %1479 = vmatpush.bf16.msra.mxu2 %v4648_v44  ;;  %v4729_v44 = vld [vmem:[%s9240_s2 + $0x58] sm:$0xf0]  ;;  %v4800_v45 = vor.u32 %v6035_v37, %v4799_v39  ;;  %v4768_v37 = vor.u32 %v6027_v28, %v4767_v27  ;;  %v6067_v21 = vld [vmem:[%s9240_s2 + $0x1e4] sm:$0xf0]  ;;  %v4856_v28 = vld [vmem:[%s9240_s2 + $0x150] sm:$0xf] }
  0xa1   : > { %1492 = vmatpush.bf16.msra.mxu3 %v4652_v58  ;;  %v6014_v58 = vld [vmem:[%s9240_s2 + $0x44] sm:$0xf]  ;;  %v4761_v39 = vld [vmem:[%s9240_s2 + $0x98] sm:$0xf0] }
  0xa2   : > { %1349 = vmatpush.bf16.msra.mxu0 %v4516_v36  ;;  %v4791_v36 = vld [vmem:[%s9240_s2 + $0xd0] sm:$0xf] }
  0xa3   : > { %1362 = vmatpush.bf16.msra.mxu1 %v4580_v50  ;;  %v4792_v62 = vor.u32 %v6033_v49, %v4791_v36  ;;  %v6007_v36 = vld [vmem:[%s9240_s2 + $0x4] sm:$0xf0]  ;;  %v6022_v49 = vld [vmem:[%s9240_s2 + $0x84] sm:$0xf] }
  0xa4   : > { %1480 = vmatpush.bf16.msra.mxu2 %v4640_v59  ;;  %v4721_v59 = vld [vmem:[%s9240_s2 + $0x48] sm:$0xf0] }
  0xa5   : > { %1493 = vmatpush.bf16.msra.mxu3 %v4644_v38  ;;  %v4713_v38 = vld [vmem:[%s9240_s2 + $0x38] sm:$0xf0] }
  0xa6   : > { %1350 = vmatpush.bf16.msra.mxu0 %v4508_v2  ;;  %v4720_v2 = vor.u32 %v6015_v54, %v4719_v52  ;;  %v6053_v52 = vld [vmem:[%s9240_s2 + $0x174] sm:$0xf0]  ;;  %v6052_v54 = vld [vmem:[%s9240_s2 + $0x174] sm:$0xf] }
  0xa7   : > { %1363 = vmatpush.bf16.msra.mxu1 %v4572_v4  ;;  %v4724_v4 = vor.u32 %v6014_v58, %v4721_v59  ;;  %v4874_v58 = vld [vmem:[%s9240_s2 + $0x178] sm:$0xf0] }
  0xa8   : > { %1481 = vmatpush.bf16.msra.mxu2 %v4632_v8  ;;  %v2870_v8 = vpack.c.bf16 %v5328_v6, %v5328_v6  ;;  %v1525_v6 = vld [vmem:[#allocation2] sm:$0x11] }
  0xa9   : > { %1494 = vmatpush.bf16.msra.mxu3 %v4636_v18  ;;  %v4703_v18 = vld [vmem:[%s9240_s2 + $0x20] sm:$0xf] }
  0xaa   : > { %1351 = vmatpush.bf16.msra.mxu0 %v4500_v14  ;;  %v4712_v14 = vor.u32 %v6013_v5, %v4711_v3  ;;  %2873 = vperm.xlu2 %6307, %v2870_v8   ;;  %v4704_v26 = vor.u32 %v6011_v19, %v4703_v18  ;;  %v6068_v5 = vld [vmem:[%s9240_s2 + $0x1f4] sm:$0xf]  ;;  %v4938_v8 = vld [vmem:[%s9240_s2 + $0x1f8] sm:$0xf0]  ;;  %v7634_v19 = vunpack.c.l.bf16 %v1525_v6 }
  0xab   : > { %1364 = vmatpush.bf16.msra.mxu1 %v4564_v17  ;;  %v4716_v17 = vor.u32 %v6012_v7, %v4713_v38  ;;  %v4873_v7 = vor.u32 %v6053_v52, %v4872_v51  ;;  %v4877_v38 = vor.u32 %v6052_v54, %v4874_v58  ;;  %v6046_v51 = vld [vmem:[%s9240_s2 + $0x144] sm:$0xf]  ;;  %v4850_v52 = vld [vmem:[%s9240_s2 + $0x148] sm:$0xf0] }
  0xac   : > { %1482 = vmatpush.bf16.msra.mxu2 %v4624_v53  ;;  %v4705_v53 = vld [vmem:[%s9240_s2 + $0x28] sm:$0xf0] }
  0xad   : > { %1352 = vmatmul.bf16.vlgmr.msra.gmra.mxu0 %v6751_v56  ;;  %v6016_v56 = vld [vmem:[%s9240_s2 + $0x54] sm:$0xf]  ;;  %1495 = vmatpush.bf16.msra.mxu3 %v4628_v31  ;;  %v4708_v29 = vor.u32 %v6010_v20, %v4705_v53  ;;  %v6009_v31 = vld [vmem:[%s9240_s2 + $0x14] sm:$0xf0]  ;;  %v7636_v20 = vunpack.c.h.bf16 %v1525_v6  ;;  %v4928_v53 = vld [vmem:[%s9240_s2 + $0x1e0] sm:$0xf] }
  0xae   : > { %1736 = vmatpush.bf16.msrb.mxu0 %v4744_v22  ;;  %1365 = vmatmul.bf16.vlgmr.msra.gmra.mxu1 %v7017_v13  ;;  %v4728_v13 = vor.u32 %v6017_v43, %v4727_v42  ;;  %v4732_v50 = vor.u32 %v6016_v56, %v4729_v44  ;;  %v6026_v22 = vld [vmem:[%s9240_s2 + $0xa4] sm:$0xf]  ;;  %v4696_v43 = vor.u32 %v6009_v31, %v4695_v30  ;;  %v4759_v56 = vld [vmem:[%s9240_s2 + $0x90] sm:$0xf]  ;;  %v6025_v44 = vld [vmem:[%s9240_s2 + $0x94] sm:$0xf0] }
  0xaf   : > { %1749 = vmatpush.bf16.msrb.mxu1 %v4808_v32  ;;  %1483 = vmatmul.bf16.vlgmr.msra.gmra.mxu2 %v1372_v46  ;;  %v6008_v32 = vld [vmem:[%s9240_s2 + $0x14] sm:$0xf]  ;;  %v6006_v42 = vld [vmem:[%s9240_s2 + $0x4] sm:$0xf]  ;;  %v4760_v59 = vor.u32 %v6025_v44, %v4759_v56  ;;  %v4920_v56 = vld [vmem:[%s9240_s2 + $0x1d0] sm:$0xf] }
  0xb0   : > { %1762 = vmatpush.bf16.msrb.mxu2 %v4748_v25  ;;  %1496 = vmatmul.bf16.vlgmr.msra.gmra.mxu3 %v1372_v46  ;;  %v4769_v25 = vld [vmem:[%s9240_s2 + $0xa8] sm:$0xf0]  ;;  %v6048_v31 = vld [vmem:[%s9240_s2 + $0x154] sm:$0xf]  ;;  %v6065_v44 = vld [vmem:[%s9240_s2 + $0x1d4] sm:$0xf0] }
  0xb1   : > { %1775 = vmatpush.bf16.msrb.mxu3 %v4812_v33  ;;  %v4697_v33 = vld [vmem:[%s9240_s2 + $0x18] sm:$0xf0]  ;;  %v4772_v41 = vor.u32 %v6026_v22, %v4769_v25  ;;  %v4941_v22 = vor.u32 %v6068_v5, %v4938_v8  ;;  %v4921_v54 = vor.u32 %v6065_v44, %v4920_v56  ;;  %v6045_v5 = vld [vmem:[%s9240_s2 + $0x134] sm:$0xf0] }
  0xb2   : > { %1737 = vmatpush.bf16.msrb.mxu0 %v4736_v35  ;;  %v6024_v35 = vld [vmem:[%s9240_s2 + $0x94] sm:$0xf] }
  0xb3   : > { %1750 = vmatpush.bf16.msrb.mxu1 %v4800_v45  ;;  %v6317_v45 = vmov 839922192   ;;  %v4764_v61 = vor.u32 %v6024_v35, %v4761_v39  ;;  %v1531_v15 = vpop.permute.xlu0 %1530 }
  0xb4   : > { %1763 = vmatpush.bf16.msrb.mxu2 %v4740_v40  ;;  %v3146_v40 = vpack.c.bf16 %v5457_v34, %v5457_v34  ;;  %v1534_v46 = vunpack.c.l.s4 %v6317_v45  ;;  %v1145_v3 = vpop.f32.mrf.mxu0 }
  0xb5   : > { %1776 = vmatpush.bf16.msrb.mxu3 %v4804_v47  ;;  %v4700_v47 = vor.u32 %v6008_v32, %v4697_v33  ;;  %v4858_v32 = vld [vmem:[%s9240_s2 + $0x158] sm:$0xf0]  ;;  %v4929_v33 = vor.u32 %v6067_v21, %v4928_v53  ;;  %v6043_v53 = vld [vmem:[%s9240_s2 + $0x124] sm:$0xf0] }
  0xb6   : > { %1738 = vmatpush.bf16.msrb.mxu0 %v4728_v13  ;;  %v4687_v13 = vld [vmem:[%s9240_s2] sm:$0xf]  ;;  %3149 = vperm.xlu2 %6307, %v3146_v40   ;;  %v7607_v0 = vunpack.c.0.s8 %v1534_v46 }
  0xb7   : > { %1751 = vmatpush.bf16.msrb.mxu1 %v4792_v62  ;;  %v4688_v62 = vor.u32 %v6007_v36, %v4687_v13  ;;  %v4922_v13 = vld [vmem:[%s9240_s2 + $0x1d8] sm:$0xf0]  ;;  %v4848_v36 = vld [vmem:[%s9240_s2 + $0x140] sm:$0xf] }
  0xb8   : > { %1764 = vmatpush.bf16.msrb.mxu2 %v4732_v50  ;;  %v4753_v50 = vld [vmem:[%s9240_s2 + $0x88] sm:$0xf0]  ;;  %v1536_v18 = vperm.slane %v1531_v15, %v7607_v0  ;;  %v1171_v30 = vpop.f32.mrf.mxu2 }
  0xb9   : > { %1777 = vmatpush.bf16.msrb.mxu3 %v4796_v1  ;;  %v4936_v1 = vld [vmem:[%s9240_s2 + $0x1f0] sm:$0xf]  ;;  %v4756_v55 = vor.u32 %v6022_v49, %v4753_v50  ;;  %v1184_v35 = vpop.f32.mrf.mxu3  ;;  %v6047_v49 = vld [vmem:[%s9240_s2 + $0x144] sm:$0xf0] }
  0xba   : > { %1739 = vmatpush.bf16.msrb.mxu0 %v4720_v2  ;;  %v6069_v2 = vld [vmem:[%s9240_s2 + $0x1f4] sm:$0xf0]  ;;  %v1539_v27 = vunpack.c.l.bf16 %v1536_v18  ;;  %v4832_v18 = vld [vmem:[%s9240_s2 + $0x120] sm:$0xf] }
  0xbb   : > { %1752 = vmatpush.bf16.msrb.mxu1 %v4784_v11  ;;  %v1158_v11 = vpop.f32.mrf.mxu1  ;;  %v4937_v16 = vor.u32 %v6069_v2, %v4936_v1  ;;  %v4853_v1 = vor.u32 %v6046_v51, %v4850_v52  ;;  %v4914_v2 = vld [vmem:[%s9240_s2 + $0x1c8] sm:$0xf0]  ;;  %v4890_v51 = vld [vmem:[%s9240_s2 + $0x198] sm:$0xf0]  ;;  %v4816_v52 = vld [vmem:[%s9240_s2 + $0x100] sm:$0xf] }
  0xbc   : > { %1765 = vmatpush.bf16.msrb.mxu2 %v4724_v4  ;;  %v4692_v4 = vor.u32 %v6006_v42, %v4689_v48  ;;  %v1540_v39 = vmul.f32 %v1539_v27, %v7634_v19  ;;  %v1147_v40 = vpop.f32.mrf.mxu0  ;;  %v6064_v42 = vld [vmem:[%s9240_s2 + $0x1d4] sm:$0xf]  ;;  %v4861_v48 = vor.u32 %v6048_v31, %v4858_v32  ;;  %v4896_v31 = vld [vmem:[%s9240_s2 + $0x1a0] sm:$0xf]  ;;  %v6059_v32 = vld [vmem:[%s9240_s2 + $0x1a4] sm:$0xf0] }
  0xbd   : > { %1778 = vmatpush.bf16.msrb.mxu3 %v4788_v57  ;;  %v4866_v57 = vld [vmem:[%s9240_s2 + $0x168] sm:$0xf0]  ;;  %v4925_v58 = vor.u32 %v6064_v42, %v4922_v13  ;;  %v6040_v40 = vld [vmem:[%s9240_s2 + $0x114] sm:$0xf]  ;;  %v6057_v13 = vld [vmem:[%s9240_s2 + $0x194] sm:$0xf0] }
  0xbe   : > { %1740 = vmatpush.bf16.msrb.mxu0 %v4712_v14  ;;  %v4752_v14 = vor.u32 %v6023_v63, %v4751_v60  ;;  %v4869_v25 = vor.u32 %v6050_v12, %v4866_v57  ;;  %v1542_v46 = vpack.c.bf16 %v1540_v39, %v1540_v39  ;;  %v1796_v60 = vpop.permute.xlu0 %1795  ;;  %v6063_v63 = vld [vmem:[%s9240_s2 + $0x1c4] sm:$0xf0]  ;;  %v4904_v57 = vld [vmem:[%s9240_s2 + $0x1b0] sm:$0xf]  ;;  %v6041_v39 = vld [vmem:[%s9240_s2 + $0x114] sm:$0xf0] }
  0xbf   : > { %1753 = vmatpush.bf16.msrb.mxu1 %v4776_v23  ;;  %v6066_v23 = vld [vmem:[%s9240_s2 + $0x1e4] sm:$0xf] }
  0xc0   : > { %1766 = vmatpush.bf16.msrb.mxu2 %v4716_v17  ;;  %v1159_v17 = vadd.f32 %v1158_v11, %v1145_v3  ;;  %v1801_v3 = vperm.slane %v1796_v60, %v7607_v0  ;;  %v1173_v6 = vpop.f32.mrf.mxu2  ;;  %v6060_v11 = vld [vmem:[%s9240_s2 + $0x1b4] sm:$0xf] }
  0xc1   : > { %1779 = vmatpush.bf16.msrb.mxu3 %v4780_v24  ;;  %v4865_v24 = vor.u32 %v6051_v10, %v4864_v9  ;;  %v1186_v8 = vpop.f32.mrf.mxu3  ;;  %v6055_v6 = vld [vmem:[%s9240_s2 + $0x184] sm:$0xf0] }
  0xc2   : > { %1741 = vmatpush.bf16.msrb.mxu0 %v4704_v26  ;;  %v4930_v26 = vld [vmem:[%s9240_s2 + $0x1e8] sm:$0xf0]  ;;  %v1172_v34 = vadd.f32 %v1171_v30, %v1159_v17  ;;  %v4906_v17 = vld [vmem:[%s9240_s2 + $0x1b8] sm:$0xf0]  ;;  %v4833_v30 = vor.u32 %v6043_v53, %v4832_v18 }
  0xc3   : > { %1754 = vmatpush.bf16.msrb.mxu1 %v4768_v37  ;;  %v1541_v37 = vmul.f32 %v1539_v27, %v7636_v20  ;;  %v1160_v50 = vpop.f32.mrf.mxu1 }
  0xc4   : > { %1767 = vmatpush.bf16.msrb.mxu2 %v4708_v29  ;;  %v6049_v29 = vld [vmem:[%s9240_s2 + $0x154] sm:$0xf0]  ;;  %v1185_v45 = vadd.f32 %v1184_v35, %v1172_v34  ;;  %v4898_v34 = vld [vmem:[%s9240_s2 + $0x1a8] sm:$0xf0]  ;;  %v4824_v35 = vld [vmem:[%s9240_s2 + $0x110] sm:$0xf] }
  0xc5   : > { %1780 = vmatpush.bf16.msrb.mxu3 %v4772_v41  ;;  %v4933_v41 = vor.u32 %v6066_v23, %v4930_v26  ;;  %v4834_v23 = vld [vmem:[%s9240_s2 + $0x128] sm:$0xf0] }
  0xc6   : > { %1742 = vmatpush.bf16.msrb.mxu0 %v4696_v43  ;;  %v4857_v43 = vor.u32 %v6049_v29, %v4856_v28  ;;  %v4909_v28 = vor.u32 %v6060_v11, %v4906_v17  ;;  %v6084_v11 = vld [vmem:[%s9240_s2 + $0x274] sm:$0xf] }
  0xc7   : > { %1755 = vmatpush.bf16.msrb.mxu1 %v4760_v59  ;;  %v6062_v59 = vld [vmem:[%s9240_s2 + $0x1c4] sm:$0xf] }
  0xc8   : > { %1768 = vmatpush.bf16.msrb.mxu2 %v4700_v47  ;;  %v1543_v47 = vpack.c.bf16 %v1541_v37, %v1541_v37  ;;  %v4917_v10 = vor.u32 %v6062_v59, %v4914_v2  ;;  %v4818_v59 = vld [vmem:[%s9240_s2 + $0x108] sm:$0xf0]  ;;  %v4880_v2 = vld [vmem:[%s9240_s2 + $0x180] sm:$0xf] }
  0xc9   : > { %1781 = vmatpush.bf16.msrb.mxu3 %v4764_v61  ;;  %v4849_v61 = vor.u32 %v6047_v49, %v4848_v36  ;;  %v4881_v18 = vor.u32 %v6055_v6, %v4880_v2 }
  0xca   : > { %1743 = vmatpush.bf16.msrb.mxu0 %v4688_v62  ;;  %v4912_v62 = vld [vmem:[%s9240_s2 + $0x1c0] sm:$0xf]  ;;  %v1197_v15 = vpop.f32.mrf.mxu0 }
  0xcb   : > { %1756 = vmatpush.bf16.msrb.mxu1 %v4752_v14  ;;  %v4913_v9 = vor.u32 %v6063_v63, %v4912_v62  ;;  %v6061_v14 = vld [vmem:[%s9240_s2 + $0x1b4] sm:$0xf0]  ;;  %v1198_v21 = vadd.f32 %v1197_v15, %v1185_v45  ;;  %v4882_v62 = vld [vmem:[%s9240_s2 + $0x188] sm:$0xf0]  ;;  %v6100_v15 = vld [vmem:[%s9240_s2 + $0x2f4] sm:$0xf] }
  0xcc   : > { %1769 = vmatpush.bf16.msrb.mxu2 %v4692_v4  ;;  %v4840_v4 = vld [vmem:[%s9240_s2 + $0x130] sm:$0xf]  ;;  %v4905_v26 = vor.u32 %v6061_v14, %v4904_v57  ;;  %v6101_v57 = vld [vmem:[%s9240_s2 + $0x2f4] sm:$0xf0] }
  0xcd   : > { %1782 = vmatpush.bf16.msrb.mxu3 %v4756_v55  ;;  %1744 = vmatmul.bf16.vlgmr.msrb.gmra.mxu0 %v1542_v46  ;;  %v1802_v55 = vunpack.c.l.bf16 %v1801_v3  ;;  %v4841_v12 = vor.u32 %v6045_v5, %v4840_v4 }
  0xce   : > { %2010 = vmatpush.bf16.msra.mxu0 %v4873_v7  ;;  %v6044_v7 = vld [vmem:[%s9240_s2 + $0x134] sm:$0xf]  ;;  %1757 = vmatmul.bf16.vlgmr.msrb.gmra.mxu1 %v1543_v47 }
  0xcf   : > { %2023 = vmatpush.bf16.msra.mxu1 %v4937_v16  ;;  %1770 = vmatmul.bf16.vlgmr.msrb.gmra.mxu2 %v1542_v46  ;;  %v1804_v29 = vrot.slane %v1802_v55, 7  ;;  %v6056_v46 = vld [vmem:[%s9240_s2 + $0x194] sm:$0xf]  ;;  %v5003_v55 = vld [vmem:[%s9240_s2 + $0x278] sm:$0xf0] }
  0xd0   : > { %2036 = vmatpush.bf16.msra.mxu2 %v4877_v38  ;;  %1783 = vmatmul.bf16.vlgmr.msrb.gmra.mxu3 %v1543_v47  ;;  %v4842_v38 = vld [vmem:[%s9240_s2 + $0x138] sm:$0xf0]  ;;  %v4825_v47 = vor.u32 %v6041_v39, %v4824_v35  ;;  %v4893_v4 = vor.u32 %v6056_v46, %v4890_v51  ;;  %v5006_v14 = vor.u32 %v6084_v11, %v5003_v55  ;;  %v6098_v35 = vld [vmem:[%s9240_s2 + $0x2e4] sm:$0xf]  ;;  %v5059_v39 = vld [vmem:[%s9240_s2 + $0x2e8] sm:$0xf0] }
  0xd1   : > { %2049 = vmatpush.bf16.msra.mxu3 %v4941_v22  ;;  %v4845_v16 = vor.u32 %v6044_v7, %v4842_v38  ;;  %v6042_v22 = vld [vmem:[%s9240_s2 + $0x124] sm:$0xf]  ;;  %v1806_v44 = vmul.f32 %v1804_v29, %v7634_v19  ;;  %v1807_v60 = vmul.f32 %v1804_v29, %v7636_v20  ;;  %v5001_v7 = vld [vmem:[%s9240_s2 + $0x270] sm:$0xf]  ;;  %v6085_v38 = vld [vmem:[%s9240_s2 + $0x274] sm:$0xf0] }
  0xd2   : > { %2011 = vmatpush.bf16.msra.mxu0 %v4865_v24  ;;  %v1210_v24 = vpop.f32.mrf.mxu1  ;;  %v1223_v37 = vpop.f32.mrf.mxu2  ;;  %v6080_v46 = vld [vmem:[%s9240_s2 + $0x254] sm:$0xf] }
  0xd3   : > { %2024 = vmatpush.bf16.msra.mxu1 %v4929_v33  ;;  %v1211_v27 = vadd.f32 %v1210_v24, %v1198_v21  ;;  %v4837_v33 = vor.u32 %v6042_v22, %v4834_v23  ;;  %v1236_v56 = vpop.f32.mrf.mxu3  ;;  %v1199_v49 = vpop.f32.mrf.mxu0  ;;  %v1808_v3 = vpack.c.bf16 %v1806_v44, %v1806_v44  ;;  %v1809_v17 = vpack.c.bf16 %v1807_v60, %v1807_v60  ;;  %v6095_v60 = vld [vmem:[%s9240_s2 + $0x2c4] sm:$0xf0] }
  0xd4   : > { %2037 = vmatpush.bf16.msra.mxu2 %v4869_v25  ;;  %v6058_v25 = vld [vmem:[%s9240_s2 + $0x1a4] sm:$0xf]  ;;  %v5051_v49 = vld [vmem:[%s9240_s2 + $0x2d8] sm:$0xf0] }
  0xd5   : > { %2050 = vmatpush.bf16.msra.mxu3 %v4933_v41  ;;  %v4826_v41 = vld [vmem:[%s9240_s2 + $0x118] sm:$0xf0]  ;;  %v1224_v42 = vadd.f32 %v1223_v37, %v1211_v27  ;;  %v4901_v45 = vor.u32 %v6058_v25, %v4898_v34  ;;  %v1843_v53 = vshrl.u32 %v1808_v3, 16  ;;  %v1846_v25 = vshrl.u32 %v1809_v17, 16  ;;  %v6083_v27 = vld [vmem:[%s9240_s2 + $0x264] sm:$0xf0] }
  0xd6   : > { %2012 = vmatpush.bf16.msra.mxu0 %v4857_v43  ;;  %v4897_v43 = vor.u32 %v6059_v32, %v4896_v31  ;;  %v4829_v50 = vor.u32 %v6040_v40, %v4826_v41  ;;  %v6082_v31 = vld [vmem:[%s9240_s2 + $0x264] sm:$0xf]  ;;  %v4995_v34 = vld [vmem:[%s9240_s2 + $0x268] sm:$0xf0]  ;;  %v5062_v41 = vor.u32 %v6098_v35, %v5059_v39  ;;  %v5035_v17 = vld [vmem:[%s9240_s2 + $0x2b8] sm:$0xf0] }
  0xd7   : > { %2025 = vmatpush.bf16.msra.mxu1 %v4921_v54  ;;  %v7771_v36 = vadd.f32 %v1236_v56, %v1224_v42  ;;  %v6039_v54 = vld [vmem:[%s9240_s2 + $0x104] sm:$0xf0]  ;;  %v4998_v40 = vor.u32 %v6082_v31, %v4995_v34  ;;  %v4985_v42 = vld [vmem:[%s9240_s2 + $0x250] sm:$0xf]  ;;  %v6094_v3 = vld [vmem:[%s9240_s2 + $0x2c4] sm:$0xf] }
  0xd8   : > { %2038 = vmatpush.bf16.msra.mxu2 %v4861_v48  ;;  %v4888_v48 = vld [vmem:[%s9240_s2 + $0x190] sm:$0xf]  ;;  %v4817_v5 = vor.u32 %v6039_v54, %v4816_v52  ;;  %v4977_v52 = vld [vmem:[%s9240_s2 + $0x240] sm:$0xf]  ;;  %v6079_v54 = vld [vmem:[%s9240_s2 + $0x244] sm:$0xf0] }
  0xd9   : > { %2051 = vmatpush.bf16.msra.mxu3 %v4925_v58  ;;  %v6038_v58 = vld [vmem:[%s9240_s2 + $0x104] sm:$0xf]  ;;  %v5049_v56 = vld [vmem:[%s9240_s2 + $0x2d0] sm:$0xf]  ;;  %v6073_v31 = vld [vmem:[%s9240_s2 + $0x214] sm:$0xf0] }
  0xda   : > { %2013 = vmatpush.bf16.msra.mxu0 %v4849_v61  ;;  %v6054_v61 = vld [vmem:[%s9240_s2 + $0x184] sm:$0xf]  ;;  %v1212_v63 = vpop.f32.mrf.mxu1  ;;  %v4821_v8 = vor.u32 %v6038_v58, %v4818_v59  ;;  %v5041_v58 = vld [vmem:[%s9240_s2 + $0x2c0] sm:$0xf]  ;;  %v4978_v59 = vor.u32 %v6079_v54, %v4977_v52  ;;  %v5017_v35 = vld [vmem:[%s9240_s2 + $0x290] sm:$0xf] }
  0xdb   : > { %2026 = vmatpush.bf16.msra.mxu1 %v4913_v9  ;;  %v5002_v9 = vor.u32 %v6085_v38, %v5001_v7  ;;  %v4885_v21 = vor.u32 %v6054_v61, %v4882_v62  ;;  %v1238_v22 = vpop.f32.mrf.mxu3  ;;  %v6078_v61 = vld [vmem:[%s9240_s2 + $0x244] sm:$0xf]  ;;  %v4979_v62 = vld [vmem:[%s9240_s2 + $0x248] sm:$0xf0]  ;;  %v6089_v39 = vld [vmem:[%s9240_s2 + $0x294] sm:$0xf0] }
  0xdc   : > { %2039 = vmatpush.bf16.msra.mxu2 %v4853_v1  ;;  %v4889_v1 = vor.u32 %v6057_v13, %v4888_v48  ;;  %v4987_v48 = vld [vmem:[%s9240_s2 + $0x258] sm:$0xf0]  ;;  %v6096_v13 = vld [vmem:[%s9240_s2 + $0x2d4] sm:$0xf]  ;;  %v4982_v2 = vor.u32 %v6078_v61, %v4979_v62  ;;  %v5025_v22 = vld [vmem:[%s9240_s2 + $0x2a0] sm:$0xf] }
  0xdd   : > { %2052 = vmatpush.bf16.msra.mxu3 %v4917_v10  ;;  %v5065_v10 = vld [vmem:[%s9240_s2 + $0x2f0] sm:$0xf]  ;;  %v5054_v51 = vor.u32 %v6096_v13, %v5051_v49  ;;  %v5009_v13 = vld [vmem:[%s9240_s2 + $0x280] sm:$0xf]  ;;  %v6087_v49 = vld [vmem:[%s9240_s2 + $0x284] sm:$0xf0] }
  0xde   : > { %2014 = vmatpush.bf16.msra.mxu0 %v4841_v12  ;;  %v1225_v12 = vpop.f32.mrf.mxu2  ;;  %v5066_v23 = vor.u32 %v6101_v57, %v5065_v10  ;;  %v6093_v10 = vld [vmem:[%s9240_s2 + $0x2b4] sm:$0xf0]  ;;  %v6076_v57 = vld [vmem:[%s9240_s2 + $0x234] sm:$0xf]  ;;  %v4947_v54 = vld [vmem:[%s9240_s2 + $0x208] sm:$0xf0] }
  0xdf   : > { %2027 = vmatpush.bf16.msra.mxu1 %v4905_v26  ;;  %v4993_v26 = vld [vmem:[%s9240_s2 + $0x260] sm:$0xf]  ;;  %v5011_v61 = vld [vmem:[%s9240_s2 + $0x288] sm:$0xf0]  ;;  %v5194_v62 = vld [vmem:[%s9240_s2 + $0x3f0] sm:$0xf] }
  0xe0   : > { %2040 = vmatpush.bf16.msra.mxu2 %v4845_v16  ;;  %v5067_v16 = vld [vmem:[%s9240_s2 + $0x2f8] sm:$0xf0]  ;;  %v4994_v29 = vor.u32 %v6083_v27, %v4993_v26  ;;  %v4963_v26 = vld [vmem:[%s9240_s2 + $0x228] sm:$0xf0]  ;;  %v6090_v27 = vld [vmem:[%s9240_s2 + $0x2a4] sm:$0xf] }
  0xe1   : > { %2053 = vmatpush.bf16.msra.mxu3 %v4909_v28  ;;  %v5070_v24 = vor.u32 %v6100_v15, %v5067_v16  ;;  %v5057_v28 = vld [vmem:[%s9240_s2 + $0x2e0] sm:$0xf]  ;;  %v6092_v15 = vld [vmem:[%s9240_s2 + $0x2b4] sm:$0xf] }
  0xe2   : > { %2015 = vmatpush.bf16.msra.mxu0 %v4833_v30  ;;  %v6099_v30 = vld [vmem:[%s9240_s2 + $0x2e4] sm:$0xf0] }
  0xe3   : > { %2028 = vmatpush.bf16.msra.mxu1 %v4897_v43  ;;  %v6081_v43 = vld [vmem:[%s9240_s2 + $0x254] sm:$0xf0] }
  0xe4   : > { %2041 = vmatpush.bf16.msra.mxu2 %v4837_v33  ;;  %v5058_v33 = vor.u32 %v6099_v30, %v5057_v28  ;;  %v4986_v44 = vor.u32 %v6081_v43, %v4985_v42  ;;  %v5027_v28 = vld [vmem:[%s9240_s2 + $0x2a8] sm:$0xf0]  ;;  %v4953_v30 = vld [vmem:[%s9240_s2 + $0x210] sm:$0xf]  ;;  %v6088_v42 = vld [vmem:[%s9240_s2 + $0x294] sm:$0xf] }
  0xe5   : > { %2054 = vmatpush.bf16.msra.mxu3 %v4901_v45  ;;  %v6097_v45 = vld [vmem:[%s9240_s2 + $0x2d4] sm:$0xf0]  ;;  %v5030_v34 = vor.u32 %v6090_v27, %v5027_v28  ;;  %v5019_v43 = vld [vmem:[%s9240_s2 + $0x298] sm:$0xf0]  ;;  %v5114_v28 = vld [vmem:[%s9240_s2 + $0x350] sm:$0xf] }
  0xe6   : > { %2016 = vmatpush.bf16.msra.mxu0 %v4825_v47  ;;  %v5050_v47 = vor.u32 %v6097_v45, %v5049_v56  ;;  %v4945_v45 = vld [vmem:[%s9240_s2 + $0x200] sm:$0xf]  ;;  %v5022_v52 = vor.u32 %v6088_v42, %v5019_v43  ;;  %v5180_v42 = vld [vmem:[%s9240_s2 + $0x3d8] sm:$0xf0] }
  0xe7   : > { %2029 = vmatpush.bf16.msra.mxu1 %v4889_v1  ;;  %v5042_v1 = vor.u32 %v6095_v60, %v5041_v58  ;;  %v5130_v58 = vld [vmem:[%s9240_s2 + $0x370] sm:$0xf]  ;;  %v6086_v60 = vld [vmem:[%s9240_s2 + $0x284] sm:$0xf] }
  0xe8   : > { %2042 = vmatpush.bf16.msra.mxu2 %v4829_v50  ;;  %v4990_v50 = vor.u32 %v6080_v46, %v4987_v48  ;;  %v6071_v46 = vld [vmem:[%s9240_s2 + $0x204] sm:$0xf0]  ;;  %v5018_v48 = vor.u32 %v6089_v39, %v5017_v35  ;;  %v5116_v35 = vld [vmem:[%s9240_s2 + $0x358] sm:$0xf0] }
  0xe9   : > { %2055 = vmatpush.bf16.msra.mxu3 %v4893_v4  ;;  %v5043_v4 = vld [vmem:[%s9240_s2 + $0x2c8] sm:$0xf0] }
  0xea   : > { %2017 = vmatpush.bf16.msra.mxu0 %v4817_v5  ;;  %v7840_v32 = vpop.f32.mrf.mxu0  ;;  %v4969_v5 = vld [vmem:[%s9240_s2 + $0x230] sm:$0xf]  ;;  %v5046_v38 = vor.u32 %v6094_v3, %v5043_v4  ;;  %v5132_v3 = vld [vmem:[%s9240_s2 + $0x378] sm:$0xf0]  ;;  %v5010_v4 = vor.u32 %v6087_v49, %v5009_v13 }
  0xeb   : > { %2030 = vmatpush.bf16.msra.mxu1 %v4881_v18  ;;  %v7851_v37 = vpop.f32.mrf.mxu1  ;;  %v4961_v18 = vld [vmem:[%s9240_s2 + $0x220] sm:$0xf] }
  0xec   : > { %2043 = vmatpush.bf16.msra.mxu2 %v4821_v8  ;;  %v6077_v8 = vld [vmem:[%s9240_s2 + $0x234] sm:$0xf0] }
  0xed   : > { %2018 = vmatmul.bf16.vlgmr.msra.gmra.mxu0 %v1843_v53  ;;  %2056 = vmatpush.bf16.msra.mxu3 %v4885_v21  ;;  %v4970_v55 = vor.u32 %v6077_v8, %v4969_v5  ;;  %v5038_v21 = vor.u32 %v6092_v15, %v5035_v17  ;;  %v5186_v15 = vld [vmem:[%s9240_s2 + $0x3e0] sm:$0xf]  ;;  %v6131_v17 = vld [vmem:[%s9240_s2 + $0x3e4] sm:$0xf0] }
  0xee   : > { %2285 = vmatpush.bf16.msrb.mxu0 %v5002_v9  ;;  %2031 = vmatmul.bf16.vlgmr.msra.gmra.mxu1 %v1846_v25  ;;  %v5033_v9 = vld [vmem:[%s9240_s2 + $0x2b0] sm:$0xf] }
  0xef   : > { %2044 = vmatmul.bf16.vlgmr.msra.gmra.mxu2 %v1843_v53  ;;  %2298 = vmatpush.bf16.msrb.mxu1 %v5066_v23  ;;  %v5034_v12 = vor.u32 %v6093_v10, %v5033_v9  ;;  %v6075_v53 = vld [vmem:[%s9240_s2 + $0x224] sm:$0xf0]  ;;  %v5014_v9 = vor.u32 %v6086_v60, %v5011_v61 }
  0xf0   : > { %2311 = vmatpush.bf16.msrb.mxu2 %v5006_v14  ;;  %2057 = vmatmul.bf16.vlgmr.msra.gmra.mxu3 %v1846_v25  ;;  %v4971_v14 = vld [vmem:[%s9240_s2 + $0x238] sm:$0xf0]  ;;  %v6091_v23 = vld [vmem:[%s9240_s2 + $0x2a4] sm:$0xf0]  ;;  %v4962_v25 = vor.u32 %v6075_v53, %v4961_v18  ;;  %v6114_v18 = vld [vmem:[%s9240_s2 + $0x364] sm:$0xf] }
  0xf1   : > { %2324 = vmatpush.bf16.msrb.mxu3 %v5070_v24  ;;  %v4974_v16 = vor.u32 %v6076_v57, %v4971_v14  ;;  %v6074_v24 = vld [vmem:[%s9240_s2 + $0x224] sm:$0xf]  ;;  %v5122_v57 = vld [vmem:[%s9240_s2 + $0x360] sm:$0xf]  ;;  %v6115_v14 = vld [vmem:[%s9240_s2 + $0x364] sm:$0xf0] }
  0xf2   : > { %2286 = vmatpush.bf16.msrb.mxu0 %v4994_v29  ;;  %v1251_v63 = vpop.f32.mrf.mxu0  ;;  %v7904_v6 = vpop.f32.mrf.mxu2  ;;  %v5026_v29 = vor.u32 %v6091_v23, %v5025_v22  ;;  %v5124_v22 = vld [vmem:[%s9240_s2 + $0x368] sm:$0xf0]  ;;  %v6130_v23 = vld [vmem:[%s9240_s2 + $0x3e4] sm:$0xf] }
  0xf3   : > { %2299 = vmatpush.bf16.msrb.mxu1 %v5058_v33  ;;  %v1264_v7 = vpop.f32.mrf.mxu1  ;;  %v7915_v11 = vpop.f32.mrf.mxu3  ;;  %v4966_v33 = vor.u32 %v6074_v24, %v4963_v26  ;;  %v4946_v63 = vor.u32 %v6071_v46, %v4945_v45  ;;  %v5188_v24 = vld [vmem:[%s9240_s2 + $0x3e8] sm:$0xf0]  ;;  %v5127_v26 = vor.u32 %v6114_v18, %v5124_v22 }
  0xf4   : > { %2312 = vmatpush.bf16.msrb.mxu2 %v4998_v40  ;;  %v6072_v40 = vld [vmem:[%s9240_s2 + $0x214] sm:$0xf]  ;;  %v5191_v27 = vor.u32 %v6130_v23, %v5188_v24  ;;  %v5092_v18 = vld [vmem:[%s9240_s2 + $0x328] sm:$0xf0] }
  0xf5   : > { %2325 = vmatpush.bf16.msrb.mxu3 %v5062_v41  ;;  %v4955_v41 = vld [vmem:[%s9240_s2 + $0x218] sm:$0xf0]  ;;  %v6132_v7 = vld [vmem:[%s9240_s2 + $0x3f4] sm:$0xf] }
  0xf6   : > { %2287 = vmatpush.bf16.msrb.mxu0 %v4986_v44  ;;  %v4954_v44 = vor.u32 %v6073_v31, %v4953_v30  ;;  %v5178_v30 = vld [vmem:[%s9240_s2 + $0x3d0] sm:$0xf] }
  0xf7   : > { %2300 = vmatpush.bf16.msrb.mxu1 %v5050_v47 }
  0xf8   : > { %2313 = vmatpush.bf16.msrb.mxu2 %v4990_v50  ;;  %v6070_v50 = vld [vmem:[%s9240_s2 + $0x204] sm:$0xf] }
  0xf9   : > { %2326 = vmatpush.bf16.msrb.mxu3 %v5054_v51  ;;  %v4958_v51 = vor.u32 %v6072_v40, %v4955_v41  ;;  %v4950_v8 = vor.u32 %v6070_v50, %v4947_v54  ;;  %v6128_v41 = vld [vmem:[%s9240_s2 + $0x3d4] sm:$0xf]  ;;  %v6127_v50 = vld [vmem:[%s9240_s2 + $0x3c4] sm:$0xf0] }
  0xfa   : > { %2288 = vmatpush.bf16.msrb.mxu0 %v4978_v59  ;;  %v1277_v56 = vpop.f32.mrf.mxu2  ;;  %v6117_v59 = vld [vmem:[%s9240_s2 + $0x374] sm:$0xf0]  ;;  %v5183_v43 = vor.u32 %v6128_v41, %v5180_v42 }
  0xfb   : > { %2301 = vmatpush.bf16.msrb.mxu1 %v5042_v1  ;;  %v1290_v47 = vpop.f32.mrf.mxu3  ;;  %v6133_v1 = vld [vmem:[%s9240_s2 + $0x3f4] sm:$0xf0]  ;;  %v5131_v5 = vor.u32 %v6117_v59, %v5130_v58  ;;  %v5106_v56 = vld [vmem:[%s9240_s2 + $0x340] sm:$0xf]  ;;  %v6126_v58 = vld [vmem:[%s9240_s2 + $0x3c4] sm:$0xf] }
  0xfc   : > { %2314 = vmatpush.bf16.msrb.mxu2 %v4982_v2  ;;  %v6116_v2 = vld [vmem:[%s9240_s2 + $0x374] sm:$0xf]  ;;  %v5195_v10 = vor.u32 %v6133_v1, %v5194_v62  ;;  %v6111_v47 = vld [vmem:[%s9240_s2 + $0x344] sm:$0xf0]  ;;  %v5172_v59 = vld [vmem:[%s9240_s2 + $0x3c8] sm:$0xf0] }
  0xfd   : > { %2327 = vmatpush.bf16.msrb.mxu3 %v5046_v38  ;;  %v5196_v38 = vld [vmem:[%s9240_s2 + $0x3f8] sm:$0xf0]  ;;  %v5107_v49 = vor.u32 %v6111_v47, %v5106_v56  ;;  %v5175_v61 = vor.u32 %v6126_v58, %v5172_v59  ;;  %v5098_v62 = vld [vmem:[%s9240_s2 + $0x330] sm:$0xf]  ;;  %v6103_v56 = vld [vmem:[%s9240_s2 + $0x304] sm:$0xf0] }
  0xfe   : > { %2289 = vmatpush.bf16.msrb.mxu0 %v4970_v55  ;;  %v5135_v55 = vor.u32 %v6116_v2, %v5132_v3  ;;  %v5162_v1 = vld [vmem:[%s9240_s2 + $0x3b0] sm:$0xf]  ;;  %v6108_v3 = vld [vmem:[%s9240_s2 + $0x334] sm:$0xf]  ;;  %v6119_v47 = vld [vmem:[%s9240_s2 + $0x384] sm:$0xf0] }
  0xff   : > { %2302 = vmatpush.bf16.msrb.mxu1 %v5034_v12  ;;  %v5199_v12 = vor.u32 %v6132_v7, %v5196_v38  ;;  %v6124_v7 = vld [vmem:[%s9240_s2 + $0x3b4] sm:$0xf]  ;;  %v5164_v38 = vld [vmem:[%s9240_s2 + $0x3b8] sm:$0xf0] }
 0x100   : > { %2315 = vmatpush.bf16.msrb.mxu2 %v4974_v16  ;;  %v5123_v16 = vor.u32 %v6115_v14, %v5122_v57  ;;  %v6123_v57 = vld [vmem:[%s9240_s2 + $0x3a4] sm:$0xf0] }
 0x101   : > { %2328 = vmatpush.bf16.msrb.mxu3 %v5038_v21  ;;  %v5187_v21 = vor.u32 %v6131_v17, %v5186_v15  ;;  %v6106_v17 = vld [vmem:[%s9240_s2 + $0x324] sm:$0xf] }
 0x102   : > { %2290 = vmatpush.bf16.msrb.mxu0 %v4962_v25  ;;  %v5095_v23 = vor.u32 %v6106_v17, %v5092_v18 }
 0x103   : > { %2303 = vmatpush.bf16.msrb.mxu1 %v5026_v29  ;;  %v6113_v29 = vld [vmem:[%s9240_s2 + $0x354] sm:$0xf0] }
 0x104   : > { %2316 = vmatpush.bf16.msrb.mxu2 %v4966_v33  ;;  %v5115_v31 = vor.u32 %v6113_v29, %v5114_v28  ;;  %v6129_v33 = vld [vmem:[%s9240_s2 + $0x3d4] sm:$0xf0] }
 0x105   : > { %2329 = vmatpush.bf16.msrb.mxu3 %v5030_v34  ;;  %v6112_v34 = vld [vmem:[%s9240_s2 + $0x354] sm:$0xf]  ;;  %v5179_v39 = vor.u32 %v6129_v33, %v5178_v30  ;;  %v5146_v30 = vld [vmem:[%s9240_s2 + $0x390] sm:$0xf] }
 0x106   : > { %2291 = vmatpush.bf16.msrb.mxu0 %v4954_v44  ;;  %v5119_v40 = vor.u32 %v6112_v34, %v5116_v35  ;;  %v1276_v44 = vadd.f32 %v7904_v6, %v7851_v37  ;;  %v6110_v6 = vld [vmem:[%s9240_s2 + $0x344] sm:$0xf]  ;;  %v6104_v35 = vld [vmem:[%s9240_s2 + $0x314] sm:$0xf] }
 0x107   : > { %2304 = vmatpush.bf16.msrb.mxu1 %v5018_v48  ;;  %v5170_v48 = vld [vmem:[%s9240_s2 + $0x3c0] sm:$0xf] }
 0x108   : > { %2317 = vmatpush.bf16.msrb.mxu2 %v4958_v51  ;;  %v5171_v37 = vor.u32 %v6127_v50, %v5170_v48  ;;  %v1289_v60 = vadd.f32 %v7915_v11, %v1276_v44  ;;  %v6125_v11 = vld [vmem:[%s9240_s2 + $0x3b4] sm:$0xf0]  ;;  %v5138_v44 = vld [vmem:[%s9240_s2 + $0x380] sm:$0xf]  ;;  %v6102_v48 = vld [vmem:[%s9240_s2 + $0x304] sm:$0xf] }
 0x109   : > { %2330 = vmatpush.bf16.msrb.mxu3 %v5022_v52  ;;  %v5108_v52 = vld [vmem:[%s9240_s2 + $0x348] sm:$0xf0]  ;;  %v5139_v50 = vor.u32 %v6119_v47, %v5138_v44  ;;  %v6163_v44 = vld [vmem:[%s9240_s2 + $0x4e4] sm:$0xf0] }
 0x10a   : > { %2292 = vmatpush.bf16.msrb.mxu0 %v4946_v63  ;;  %v8040_v53 = vpop.f32.mrf.mxu0  ;;  %v5111_v54 = vor.u32 %v6110_v6, %v5108_v52  ;;  %v6109_v63 = vld [vmem:[%s9240_s2 + $0x334] sm:$0xf0]  ;;  %v5140_v6 = vld [vmem:[%s9240_s2 + $0x388] sm:$0xf0] }
 0x10b   : > { %2305 = vmatpush.bf16.msrb.mxu1 %v5010_v4  ;;  %v8051_v25 = vpop.f32.mrf.mxu1  ;;  %v5099_v2 = vor.u32 %v6109_v63, %v5098_v62  ;;  %v5100_v4 = vld [vmem:[%s9240_s2 + $0x338] sm:$0xf0]  ;;  %v1302_v14 = vadd.f32 %v8040_v53, %v1289_v60  ;;  %v5156_v53 = vld [vmem:[%s9240_s2 + $0x3a8] sm:$0xf0] }
 0x10c   : > { %2318 = vmatpush.bf16.msrb.mxu2 %v4950_v8  ;;  %v5090_v8 = vld [vmem:[%s9240_s2 + $0x320] sm:$0xf]  ;;  %v5252_v47 = vld [vmem:[%s9240_s2 + $0x468] sm:$0xf0] }
 0x10d   : > { %2331 = vmatpush.bf16.msrb.mxu3 %v5014_v9  ;;  %v5103_v9 = vor.u32 %v6108_v3, %v5100_v4  ;;  %v1315_v33 = vadd.f32 %v8051_v25, %v1302_v14  ;;  %v5148_v25 = vld [vmem:[%s9240_s2 + $0x398] sm:$0xf0]  ;;  %v2071_v4 = vpop.permute.xlu1 %2070 }
 0x10e   : > { %2559 = vmatpush.bf16.msra.mxu0 %v5131_v5  ;;  %v5163_v5 = vor.u32 %v6125_v11, %v5162_v1 }
 0x10f   : > { %2572 = vmatpush.bf16.msra.mxu1 %v5195_v10  ;;  %v5167_v10 = vor.u32 %v6124_v7, %v5164_v38 }
 0x110   : > { %2585 = vmatpush.bf16.msra.mxu2 %v5135_v55  ;;  %v6107_v55 = vld [vmem:[%s9240_s2 + $0x324] sm:$0xf0] }
 0x111   : > { %2598 = vmatpush.bf16.msra.mxu3 %v5199_v12  ;;  %v5154_v12 = vld [vmem:[%s9240_s2 + $0x3a0] sm:$0xf] }
 0x112   : > { %2560 = vmatpush.bf16.msra.mxu0 %v5123_v16  ;;  %v8082_v45 = vpop.f32.mrf.mxu2  ;;  %v1303_v46 = vpop.f32.mrf.mxu0  ;;  %v5091_v16 = vor.u32 %v6107_v55, %v5090_v8  ;;  %v5155_v22 = vor.u32 %v6123_v57, %v5154_v12 }
 0x113   : > { %2573 = vmatpush.bf16.msra.mxu1 %v5187_v21  ;;  %v1316_v13 = vpop.f32.mrf.mxu1  ;;  %v8093_v51 = vpop.f32.mrf.mxu3  ;;  %v6122_v21 = vld [vmem:[%s9240_s2 + $0x3a4] sm:$0xf] }
 0x114   : > { %2586 = vmatpush.bf16.msra.mxu2 %v5127_v26  ;;  %v5082_v26 = vld [vmem:[%s9240_s2 + $0x310] sm:$0xf]  ;;  %v5159_v28 = vor.u32 %v6122_v21, %v5156_v53  ;;  %v5076_v13 = vld [vmem:[%s9240_s2 + $0x308] sm:$0xf0] }
 0x115   : > { %2599 = vmatpush.bf16.msra.mxu3 %v5191_v27  ;;  %v6105_v27 = vld [vmem:[%s9240_s2 + $0x314] sm:$0xf0]  ;;  %v5079_v52 = vor.u32 %v6102_v48, %v5076_v13  ;;  %v5322_v53 = vld [vmem:[%s9240_s2 + $0x4f0] sm:$0xf]  ;;  %v6162_v48 = vld [vmem:[%s9240_s2 + $0x4e4] sm:$0xf] }
 0x116   : > { %2561 = vmatpush.bf16.msra.mxu0 %v5115_v31  ;;  %v5083_v29 = vor.u32 %v6105_v27, %v5082_v26  ;;  %v6121_v31 = vld [vmem:[%s9240_s2 + $0x394] sm:$0xf0]  ;;  %v6148_v26 = vld [vmem:[%s9240_s2 + $0x474] sm:$0xf]  ;;  %v5316_v13 = vld [vmem:[%s9240_s2 + $0x4e8] sm:$0xf0] }
 0x117   : > { %2574 = vmatpush.bf16.msra.mxu1 %v5179_v39  ;;  %v5147_v34 = vor.u32 %v6121_v31, %v5146_v30  ;;  %v5084_v39 = vld [vmem:[%s9240_s2 + $0x318] sm:$0xf0]  ;;  %v6164_v30 = vld [vmem:[%s9240_s2 + $0x4f4] sm:$0xf] }
 0x118   : > { %2587 = vmatpush.bf16.msra.mxu2 %v5119_v40  ;;  %v6120_v40 = vld [vmem:[%s9240_s2 + $0x394] sm:$0xf]  ;;  %v5087_v41 = vor.u32 %v6104_v35, %v5084_v39  ;;  %v5324_v31 = vld [vmem:[%s9240_s2 + $0x4f8] sm:$0xf0] }
 0x119   : > { %2600 = vmatpush.bf16.msra.mxu3 %v5183_v43  ;;  %v5151_v42 = vor.u32 %v6120_v40, %v5148_v25  ;;  %v5074_v43 = vld [vmem:[%s9240_s2 + $0x300] sm:$0xf]  ;;  %v6147_v25 = vld [vmem:[%s9240_s2 + $0x464] sm:$0xf0] }
 0x11a   : > { %2562 = vmatpush.bf16.msra.mxu0 %v5107_v49  ;;  %v1329_v15 = vpop.f32.mrf.mxu2  ;;  %v5075_v46 = vor.u32 %v6103_v56, %v5074_v43  ;;  %v1328_v49 = vadd.f32 %v8082_v45, %v1315_v33  ;;  %v1250_v45 = vadd.f32 %v7840_v32, %v7771_v36  ;;  %v1522_v36 = vld [vmem:[#allocation2] sm:$0x22]  ;;  %v5327_v43 = vor.u32 %v6164_v30, %v5324_v31  ;;  %v5314_v56 = vld [vmem:[%s9240_s2 + $0x4e0] sm:$0xf]  ;;  %v5290_v31 = vld [vmem:[%s9240_s2 + $0x4b0] sm:$0xf] }
 0x11b   : > { %2575 = vmatpush.bf16.msra.mxu1 %v5171_v37  ;;  %v1342_v24 = vpop.f32.mrf.mxu3  ;;  %v6118_v37 = vld [vmem:[%s9240_s2 + $0x384] sm:$0xf] }
 0x11c   : > { %2588 = vmatpush.bf16.msra.mxu2 %v5111_v54  ;;  %v5143_v54 = vor.u32 %v6118_v37, %v5140_v6  ;;  %v1341_v58 = vadd.f32 %v8093_v51, %v1328_v49  ;;  %v1370_v1 = vmax.f32 %v1250_v45, 0.0  ;;  %v6165_v24 = vld [vmem:[%s9240_s2 + $0x4f4] sm:$0xf0]  ;;  %v5315_v6 = vor.u32 %v6163_v44, %v5314_v56 }
 0x11d   : > { %2601 = vmatpush.bf16.msra.mxu3 %v5175_v61  ;;  %v5323_v40 = vor.u32 %v6165_v24, %v5322_v53  ;;  %v5319_v45 = vor.u32 %v6162_v48, %v5316_v13  ;;  %v6139_v48 = vld [vmem:[%s9240_s2 + $0x424] sm:$0xf0] }
 0x11e   : > { %2563 = vmatpush.bf16.msra.mxu0 %v5099_v2 }
 0x11f   : > { %2576 = vmatpush.bf16.msra.mxu1 %v5163_v5  ;;  %v2076_v5 = vperm.slane %v2071_v4, %v7607_v0  ;;  %v5234_v4 = vld [vmem:[%s9240_s2 + $0x440] sm:$0xf] }
 0x120   : > { %2589 = vmatpush.bf16.msra.mxu2 %v5103_v9 }
 0x121   : > { %2602 = vmatpush.bf16.msra.mxu3 %v5167_v10  ;;  %v2079_v9 = vunpack.c.l.bf16 %v2076_v5  ;;  %v6143_v5 = vld [vmem:[%s9240_s2 + $0x444] sm:$0xf0] }
 0x122   : > { %2564 = vmatpush.bf16.msra.mxu0 %v5091_v16  ;;  %v2345_v16 = vpop.permute.xlu1 %2344  ;;  %v5235_v24 = vor.u32 %v6143_v5, %v5234_v4  ;;  %v6136_v4 = vld [vmem:[%s9240_s2 + $0x414] sm:$0xf]  ;;  %v5212_v5 = vld [vmem:[%s9240_s2 + $0x418] sm:$0xf0] }
 0x123   : > { %2577 = vmatpush.bf16.msra.mxu1 %v5155_v22  ;;  %v2081_v10 = vrot.slane %v2079_v9, 6  ;;  %v2350_v17 = vperm.slane %v2345_v16, %v7607_v0  ;;  %v5258_v22 = vld [vmem:[%s9240_s2 + $0x470] sm:$0xf]  ;;  %v5300_v16 = vld [vmem:[%s9240_s2 + $0x4c8] sm:$0xf0] }
 0x124   : > { %2590 = vmatpush.bf16.msra.mxu2 %v5095_v23  ;;  %v6149_v23 = vld [vmem:[%s9240_s2 + $0x474] sm:$0xf0] }
 0x125   : > { %2603 = vmatpush.bf16.msra.mxu3 %v5159_v28  ;;  %v2351_v33 = vunpack.c.l.bf16 %v2350_v17  ;;  %v5259_v39 = vor.u32 %v6149_v23, %v5258_v22 }
 0x126   : > { %2565 = vmatpush.bf16.msra.mxu0 %v5083_v29  ;;  %v5260_v29 = vld [vmem:[%s9240_s2 + $0x478] sm:$0xf0] }
 0x127   : > { %2578 = vmatpush.bf16.msra.mxu1 %v5147_v34  ;;  %v2353_v49 = vrot.slane %v2351_v33, 7  ;;  %v6157_v33 = vld [vmem:[%s9240_s2 + $0x4b4] sm:$0xf0] }
 0x128   : > { %2591 = vmatpush.bf16.msra.mxu2 %v5087_v41  ;;  %v5250_v41 = vld [vmem:[%s9240_s2 + $0x460] sm:$0xf] }
 0x129   : > { %2604 = vmatpush.bf16.msra.mxu3 %v5151_v42  ;;  %v5263_v42 = vor.u32 %v6148_v26, %v5260_v29  ;;  %v5251_v37 = vor.u32 %v6147_v25, %v5250_v41 }
 0x12a   : > { %2566 = vmatpush.bf16.msra.mxu0 %v5075_v46  ;;  %v1353_v59 = vpop.f32.mrf.mxu0  ;;  %v6146_v46 = vld [vmem:[%s9240_s2 + $0x464] sm:$0xf] }
 0x12b   : > { %2579 = vmatpush.bf16.msra.mxu1 %v5139_v50  ;;  %v1354_v60 = vadd.f32 %v1353_v59, %v1341_v58  ;;  %v1366_v61 = vpop.f32.mrf.mxu1  ;;  %v1389_v50 = vld [vmem:[%s9242_s4] sm:$0x3]  ;;  %v5306_v58 = vld [vmem:[%s9240_s2 + $0x4d0] sm:$0xf]  ;;  %v5255_v59 = vor.u32 %v6146_v46, %v5252_v47  ;;  %v5291_v46 = vor.u32 %v6157_v33, %v5290_v31  ;;  %v6197_v31 = vld [vmem:[%s9240_s2 + $0x5f4] sm:$0xf0] }
 0x12c   : > { %2592 = vmatpush.bf16.msra.mxu2 %v5079_v52  ;;  %v5242_v52 = vld [vmem:[%s9240_s2 + $0x450] sm:$0xf]  ;;  %v1472_v22 = vperm.slane %v1389_v50, 1  ;;  %v5218_v47 = vld [vmem:[%s9240_s2 + $0x420] sm:$0xf] }
 0x12d   : > { %2605 = vmatpush.bf16.msra.mxu3 %v5143_v54  ;;  %v1367_v62 = vadd.f32 %v1366_v61, %v1354_v60  ;;  %v6145_v54 = vld [vmem:[%s9240_s2 + $0x454] sm:$0xf0]  ;;  %v6144_v61 = vld [vmem:[%s9240_s2 + $0x454] sm:$0xf] }
 0x12e   : > { %v6161_v60 = vld [vmem:[%s9240_s2 + $0x4d4] sm:$0xf0]  ;;  %v6180_v33 = vld [vmem:[%s9240_s2 + $0x574] sm:$0xf] }
 0x12f   : > { %v1371_v51 = vmax.f32 %v1367_v62, 0.0  ;;  %v5244_v62 = vld [vmem:[%s9240_s2 + $0x458] sm:$0xf0] }
 0x131   : > { %v1511_v2 = vpack.c.bf16 %v1371_v51, %v1370_v1  ;;  %v6160_v1 = vld [vmem:[%s9240_s2 + $0x4d4] sm:$0xf]  ;;  %v5308_v51 = vld [vmem:[%s9240_s2 + $0x4d8] sm:$0xf0] }
 0x132   : > { %v1355_v32 = vpop.f32.mrf.mxu0  ;;  %v8217_v38 = vpop.f32.mrf.mxu2  ;;  %v5311_v9 = vor.u32 %v6160_v1, %v5308_v51  ;;  %v5210_v51 = vld [vmem:[%s9240_s2 + $0x410] sm:$0xf] }
 0x133   : > { %v1513_v11 = vrot.slane %v1511_v2, 7  ;;  %v1368_v3 = vpop.f32.mrf.mxu1  ;;  %v8219_v8 = vpop.f32.mrf.mxu3  ;;  %v1471_v2 = vperm.slane %v1389_v50, 0  ;;  %v2356_v32 = vmul.f32 %v2353_v49, %v7636_v20  ;;  %v6159_v20 = vld [vmem:[%s9240_s2 + $0x4c4] sm:$0xf0] }
 0x134   : > { %v5307_v3 = vor.u32 %v6161_v60, %v5306_v58  ;;  %v6154_v58 = vld [vmem:[%s9240_s2 + $0x4a4] sm:$0xf] }
 0x135   : > { %v1523_v7 = vsel %vm1521_vm13, %v1513_v11, %v1522_v36  ;;  %v2355_v36 = vmul.f32 %v2353_v49, %v7634_v19  ;;  %v5243_v11 = vor.u32 %v6145_v54, %v5242_v52  ;;  %v5298_v19 = vld [vmem:[%s9240_s2 + $0x4c0] sm:$0xf]  ;;  %v1485_v17 = vadd.f32 %v8217_v38, %v1471_v2  ;;  %v5220_v54 = vld [vmem:[%s9240_s2 + $0x428] sm:$0xf0]  ;;  %v6137_v2 = vld [vmem:[%s9240_s2 + $0x414] sm:$0xf0] }
 0x136   : > { %1524 = vst [vmem:[#allocation2] sm:$0x22] %v1523_v7  ;;  %v5247_v7 = vor.u32 %v6144_v61, %v5244_v62  ;;  %v5299_v26 = vor.u32 %v6159_v20, %v5298_v19  ;;  %v5219_v62 = vor.u32 %v6139_v48, %v5218_v47  ;;  %v5202_v20 = vld [vmem:[%s9240_s2 + $0x400] sm:$0xf]  ;;  %v6179_v48 = vld [vmem:[%s9240_s2 + $0x564] sm:$0xf0] }
 0x137   : > { %v5379_v47 = vld [vmem:[%s9240_s2 + $0x560] sm:$0xf] }
 0x13a   : > { %v1486_v14 = vpop.f32.mrf.mxu2 }
 0x13b   : > { %v1499_v15 = vpop.f32.mrf.mxu3  ;;  %v5236_v14 = vld [vmem:[%s9240_s2 + $0x448] sm:$0xf0] }
 0x13c   : > { %v6158_v15 = vld [vmem:[%s9240_s2 + $0x4c4] sm:$0xf] }
 0x13d   : > { %v8221_v55 = vld [vmem:[#allocation2] sm:$0x22]  ;;  %v5303_v30 = vor.u32 %v6158_v15, %v5300_v16  ;;  %v5266_v16 = vld [vmem:[%s9240_s2 + $0x480] sm:$0xf] }
 0x13e   : > { %v8224_v12 = vunpack.c.l.bf16 %v8221_v55  ;;  %v8227_v57 = vunpack.c.h.bf16 %v8221_v55  ;;  %v6135_v15 = vld [vmem:[%s9240_s2 + $0x404] sm:$0xf0] }
 0x140   : > { %v2083_v18 = vmul.f32 %v2081_v10, %v8224_v12  ;;  %v2084_v21 = vmul.f32 %v2081_v10, %v8227_v57  ;;  %v6142_v10 = vld [vmem:[%s9240_s2 + $0x444] sm:$0xf] }
 0x141   : > { %v5239_v38 = vor.u32 %v6142_v10, %v5236_v14  ;;  %v5211_v10 = vor.u32 %v6137_v2, %v5210_v51  ;;  %v6177_v51 = vld [vmem:[%s9240_s2 + $0x554] sm:$0xf0] }
 0x142   : > { %v2085_v27 = vpack.c.bf16 %v2083_v18, %v2083_v18  ;;  %v2086_v28 = vpack.c.bf16 %v2084_v21, %v2084_v21  ;;  %v2357_v18 = vpack.c.bf16 %v2355_v36, %v2355_v36  ;;  %v2358_v21 = vpack.c.bf16 %v2356_v32, %v2356_v32 }
 0x144   : > { %v2121_v34 = vrot.slane %v2085_v27, 1  ;;  %v2122_v35 = vrot.slane %v2086_v28, 1  ;;  %v5226_v27 = vld [vmem:[%s9240_s2 + $0x430] sm:$0xf]  ;;  %v6141_v28 = vld [vmem:[%s9240_s2 + $0x434] sm:$0xf0] }
 0x145   : > { %v2395_v56 = vshrl.u32 %v2358_v21, 16  ;;  %v5227_v44 = vor.u32 %v6141_v28, %v5226_v27  ;;  %v5215_v21 = vor.u32 %v6136_v4, %v5212_v5  ;;  %v5387_v27 = vld [vmem:[%s9240_s2 + $0x570] sm:$0xf]  ;;  %v6181_v28 = vld [vmem:[%s9240_s2 + $0x574] sm:$0xf0]  ;;  %v2874_v5 = vpop.permute.xlu2 %2873 }
 0x146   : > { %2293 = vmatmul.bf16.vlgmr.msrb.gmra.mxu0 %v2121_v34  ;;  %2306 = vmatmul.bf16.vlgmr.msrb.gmra.mxu1 %v2122_v35 }
 0x147   : > { %2319 = vmatmul.bf16.vlgmr.msrb.gmra.mxu2 %v2121_v34  ;;  %2332 = vmatmul.bf16.vlgmr.msrb.gmra.mxu3 %v2122_v35  ;;  %v6140_v34 = vld [vmem:[%s9240_s2 + $0x434] sm:$0xf]  ;;  %v5228_v35 = vld [vmem:[%s9240_s2 + $0x438] sm:$0xf0] }
 0x148   : > { %2814 = vmatpush.bf16.msrb.mxu0 %v5259_v39  ;;  %2827 = vmatpush.bf16.msrb.mxu1 %v5323_v40  ;;  %v6156_v39 = vld [vmem:[%s9240_s2 + $0x4b4] sm:$0xf]  ;;  %v5292_v40 = vld [vmem:[%s9240_s2 + $0x4b8] sm:$0xf0]  ;;  %v5231_v49 = vor.u32 %v6140_v34, %v5228_v35  ;;  %v5203_v34 = vor.u32 %v6135_v15, %v5202_v20 }
 0x149   : > { %2840 = vmatpush.bf16.msrb.mxu2 %v5263_v42  ;;  %2853 = vmatpush.bf16.msrb.mxu3 %v5327_v43  ;;  %v1498_v42 = vadd.f32 %v8219_v8, %v1472_v22  ;;  %v2392_v43 = vshrl.u32 %v2357_v18, 16  ;;  %v5295_v50 = vor.u32 %v6156_v39, %v5292_v40  ;;  %v5282_v8 = vld [vmem:[%s9240_s2 + $0x4a0] sm:$0xf]  ;;  %v6196_v39 = vld [vmem:[%s9240_s2 + $0x5f4] sm:$0xf] }
 0x14a   : > { %v1745_v23 = vpop.f32.mrf.mxu0  ;;  %v5453_v40 = vld [vmem:[%s9240_s2 + $0x5f8] sm:$0xf0] }
 0x14b   : > { %v1758_v53 = vpop.f32.mrf.mxu1 }
 0x14c   : > { %2815 = vmatpush.bf16.msrb.mxu0 %v5251_v37  ;;  %2828 = vmatpush.bf16.msrb.mxu1 %v5315_v6  ;;  %v1759_v29 = vadd.f32 %v1758_v53, %v1745_v23  ;;  %v6155_v37 = vld [vmem:[%s9240_s2 + $0x4a4] sm:$0xf0]  ;;  %v6138_v6 = vld [vmem:[%s9240_s2 + $0x424] sm:$0xf]  ;;  %v5204_v53 = vld [vmem:[%s9240_s2 + $0x408] sm:$0xf0] }
 0x14d   : > { %2841 = vmatpush.bf16.msrb.mxu2 %v5255_v59  ;;  %2854 = vmatpush.bf16.msrb.mxu3 %v5319_v45  ;;  %v5284_v59 = vld [vmem:[%s9240_s2 + $0x4a8] sm:$0xf0]  ;;  %v5283_v1 = vor.u32 %v6155_v37, %v5282_v8  ;;  %v5223_v36 = vor.u32 %v6138_v6, %v5220_v54  ;;  %v6134_v23 = vld [vmem:[%s9240_s2 + $0x404] sm:$0xf]  ;;  %v6195_v8 = vld [vmem:[%s9240_s2 + $0x5e4] sm:$0xf0] }
 0x14e   : > { %v8358_v41 = vadd.f32 %v1759_v29, %v1485_v17  ;;  %v5287_v32 = vor.u32 %v6154_v58, %v5284_v59  ;;  %v6151_v17 = vld [vmem:[%s9240_s2 + $0x484] sm:$0xf0]  ;;  %v2646_v29 = vunpack.c.l.b16 %v8221_v55  ;;  %v6178_v37 = vld [vmem:[%s9240_s2 + $0x564] sm:$0xf]  ;;  %v5381_v6 = vld [vmem:[%s9240_s2 + $0x568] sm:$0xf0] }
 0x14f   : > { %v5267_v35 = vor.u32 %v6151_v17, %v5266_v16  ;;  %v5445_v54 = vld [vmem:[%s9240_s2 + $0x5e8] sm:$0xf0]  ;;  %v5384_v2 = vor.u32 %v6178_v37, %v5381_v6  ;;  %v5363_v16 = vld [vmem:[%s9240_s2 + $0x540] sm:$0xf]  ;;  %v6175_v17 = vld [vmem:[%s9240_s2 + $0x544] sm:$0xf0] }
 0x150   : > { %2816 = vmatpush.bf16.msrb.mxu0 %v5243_v11  ;;  %2829 = vmatpush.bf16.msrb.mxu1 %v5307_v3  ;;  %v5274_v11 = vld [vmem:[%s9240_s2 + $0x490] sm:$0xf]  ;;  %v6153_v3 = vld [vmem:[%s9240_s2 + $0x494] sm:$0xf0]  ;;  %v6171_v37 = vld [vmem:[%s9240_s2 + $0x524] sm:$0xf0] }
 0x151   : > { %2842 = vmatpush.bf16.msrb.mxu2 %v5247_v7  ;;  %2855 = vmatpush.bf16.msrb.mxu3 %v5311_v9  ;;  %v6152_v7 = vld [vmem:[%s9240_s2 + $0x494] sm:$0xf]  ;;  %v5276_v9 = vld [vmem:[%s9240_s2 + $0x498] sm:$0xf0]  ;;  %v5275_v14 = vor.u32 %v6153_v3, %v5274_v11  ;;  %v6193_v11 = vld [vmem:[%s9240_s2 + $0x5d4] sm:$0xf0] }
 0x152   : > { %v1771_v25 = vpop.f32.mrf.mxu2  ;;  %v1747_v60 = vpop.f32.mrf.mxu0  ;;  %v5279_v22 = vor.u32 %v6152_v7, %v5276_v9  ;;  %v6176_v3 = vld [vmem:[%s9240_s2 + $0x554] sm:$0xf]  ;;  %v5373_v7 = vld [vmem:[%s9240_s2 + $0x558] sm:$0xf0] }
 0x153   : > { %v1784_v13 = vpop.f32.mrf.mxu3  ;;  %v1760_v61 = vpop.f32.mrf.mxu1  ;;  %v6192_v9 = vld [vmem:[%s9240_s2 + $0x5d4] sm:$0xf] }
 0x154   : > { %2817 = vmatpush.bf16.msrb.mxu0 %v5235_v24  ;;  %2830 = vmatpush.bf16.msrb.mxu1 %v5299_v26  ;;  %v1785_v52 = vadd.f32 %v1784_v13, %v1771_v25  ;;  %v6150_v24 = vld [vmem:[%s9240_s2 + $0x484] sm:$0xf]  ;;  %v5268_v26 = vld [vmem:[%s9240_s2 + $0x488] sm:$0xf0]  ;;  %v5207_v25 = vor.u32 %v6134_v23, %v5204_v53  ;;  %v5380_v61 = vor.u32 %v6179_v48, %v5379_v47  ;;  %v5427_v23 = vld [vmem:[%s9240_s2 + $0x5c0] sm:$0xf] }
 0x155   : > { %2843 = vmatpush.bf16.msrb.mxu2 %v5239_v38  ;;  %2856 = vmatpush.bf16.msrb.mxu3 %v5303_v30  ;;  %v2647_v38 = vunpack.c.h.b16 %v8221_v55  ;;  %v5451_v30 = vld [vmem:[%s9240_s2 + $0x5f0] sm:$0xf]  ;;  %v5389_v55 = vld [vmem:[%s9240_s2 + $0x578] sm:$0xf0]  ;;  %v6191_v53 = vld [vmem:[%s9240_s2 + $0x5c4] sm:$0xf0] }
 0x156   : > { %2567 = vmatmul.bf16.vlgmr.msra.gmra.mxu0 %v2392_v43  ;;  %2580 = vmatmul.bf16.vlgmr.msra.gmra.mxu1 %v2395_v56  ;;  %v8385_v45 = vadd.f32 %v1785_v52, %v1498_v42  ;;  %v5271_v42 = vor.u32 %v6150_v24, %v5268_v26  ;;  %v5392_v13 = vor.u32 %v6180_v33, %v5389_v55  ;;  %v6194_v52 = vld [vmem:[%s9240_s2 + $0x5e4] sm:$0xf]  ;;  %v5355_v33 = vld [vmem:[%s9240_s2 + $0x530] sm:$0xf]  ;;  %v5421_v47 = vld [vmem:[%s9240_s2 + $0x5b8] sm:$0xf0] }
 0x157   : > { %2593 = vmatmul.bf16.vlgmr.msra.gmra.mxu2 %v2392_v43  ;;  %2606 = vmatmul.bf16.vlgmr.msra.gmra.mxu3 %v2395_v56  ;;  %v5388_v43 = vor.u32 %v6181_v28, %v5387_v27  ;;  %v5452_v56 = vor.u32 %v6197_v31, %v5451_v30  ;;  %v6174_v24 = vld [vmem:[%s9240_s2 + $0x544] sm:$0xf]  ;;  %v5429_v28 = vld [vmem:[%s9240_s2 + $0x5c8] sm:$0xf0]  ;;  %v5364_v30 = vor.u32 %v6175_v17, %v5363_v16 }
 0x158   : > { %2818 = vmatpush.bf16.msrb.mxu0 %v5227_v44  ;;  %2831 = vmatpush.bf16.msrb.mxu1 %v5291_v46  ;;  %v2648_v44 = vpack.c.b16 %v2646_v29, %v2646_v29  ;;  %v2649_v46 = vpack.c.b16 %v2647_v38, %v2647_v38  ;;  %v6190_v27 = vld [vmem:[%s9240_s2 + $0x5c4] sm:$0xf]  ;;  %v5428_v31 = vor.u32 %v6191_v53, %v5427_v23  ;;  %v6183_v23 = vld [vmem:[%s9240_s2 + $0x584] sm:$0xf0] }
 0x159   : > { %2844 = vmatpush.bf16.msrb.mxu2 %v5231_v49  ;;  %2857 = vmatpush.bf16.msrb.mxu3 %v5295_v50  ;;  %v5456_v49 = vor.u32 %v6196_v39, %v5453_v40  ;;  %v5443_v50 = vld [vmem:[%s9240_s2 + $0x5e0] sm:$0xf]  ;;  %v5432_v39 = vor.u32 %v6190_v27, %v5429_v28  ;;  %v5419_v40 = vld [vmem:[%s9240_s2 + $0x5b0] sm:$0xf]  ;;  %v6182_v27 = vld [vmem:[%s9240_s2 + $0x584] sm:$0xf] }
 0x15a   : > { %v1773_v19 = vpop.f32.mrf.mxu2  ;;  %v2650_v59 = vrot.slane %v2648_v44, 1  ;;  %v2651_v60 = vrot.slane %v2649_v46, 1  ;;  %v5357_v44 = vld [vmem:[%s9240_s2 + $0x538] sm:$0xf0]  ;;  %v6188_v46 = vld [vmem:[%s9240_s2 + $0x5b4] sm:$0xf] }
 0x15b   : > { %v1786_v18 = vpop.f32.mrf.mxu3  ;;  %v5437_v19 = vld [vmem:[%s9240_s2 + $0x5d8] sm:$0xf0] }
 0x15c   : > { %2819 = vmatpush.bf16.msrb.mxu0 %v5219_v62  ;;  %2832 = vmatpush.bf16.msrb.mxu1 %v5283_v1  ;;  %v5444_v62 = vor.u32 %v6195_v8, %v5443_v50  ;;  %v5371_v1 = vld [vmem:[%s9240_s2 + $0x550] sm:$0xf]  ;;  %v5347_v8 = vld [vmem:[%s9240_s2 + $0x520] sm:$0xf] }
 0x15d   : > { %2845 = vmatpush.bf16.msrb.mxu2 %v5223_v36  ;;  %2858 = vmatpush.bf16.msrb.mxu3 %v5287_v32  ;;  %v5448_v36 = vor.u32 %v6194_v52, %v5445_v54  ;;  %v5435_v32 = vld [vmem:[%s9240_s2 + $0x5d0] sm:$0xf]  ;;  %v5424_v52 = vor.u32 %v6188_v46, %v5421_v47  ;;  %v6187_v54 = vld [vmem:[%s9240_s2 + $0x5a4] sm:$0xf0] }
 0x15e   : > { %v5436_v15 = vor.u32 %v6193_v11, %v5435_v32 }
 0x160   : > { %2820 = vmatpush.bf16.msrb.mxu0 %v5211_v10  ;;  %2833 = vmatpush.bf16.msrb.mxu1 %v5275_v14  ;;  %v2879_v10 = vperm.slane %v2874_v5, %v7607_v0  ;;  %v5372_v14 = vor.u32 %v6177_v51, %v5371_v1  ;;  %v5348_v1 = vor.u32 %v6171_v37, %v5347_v8  ;;  %v6185_v5 = vld [vmem:[%s9240_s2 + $0x594] sm:$0xf0] }
 0x161   : > { %2846 = vmatpush.bf16.msrb.mxu2 %v5215_v21  ;;  %2859 = vmatpush.bf16.msrb.mxu3 %v5279_v22  ;;  %v5376_v21 = vor.u32 %v6176_v3, %v5373_v7  ;;  %v5440_v22 = vor.u32 %v6192_v9, %v5437_v19  ;;  %v6168_v7 = vld [vmem:[%s9240_s2 + $0x514] sm:$0xf] }
 0x162   : > { %v2880_v38 = vunpack.c.l.bf16 %v2879_v10  ;;  %v6184_v10 = vld [vmem:[%s9240_s2 + $0x594] sm:$0xf] }
 0x164   : > { %2821 = vmatpush.bf16.msrb.mxu0 %v5203_v34  ;;  %2834 = vmatpush.bf16.msrb.mxu1 %v5267_v35  ;;  %v6173_v34 = vld [vmem:[%s9240_s2 + $0x534] sm:$0xf0] }
 0x165   : > { %2847 = vmatpush.bf16.msrb.mxu2 %v5207_v25  ;;  %2860 = vmatpush.bf16.msrb.mxu3 %v5271_v42  ;;  %v6189_v25 = vld [vmem:[%s9240_s2 + $0x5b4] sm:$0xf0]  ;;  %v6172_v42 = vld [vmem:[%s9240_s2 + $0x534] sm:$0xf] }
 0x166   : > { %v5420_v50 = vor.u32 %v6189_v25, %v5419_v40  ;;  %v5360_v6 = vor.u32 %v6172_v42, %v5357_v44  ;;  %v5518_v40 = vld [vmem:[%s9240_s2 + $0x678] sm:$0xf0]  ;;  %v6228_v25 = vld [vmem:[%s9240_s2 + $0x6f4] sm:$0xf] }
 0x167   : > { %2822 = vmatmul.bf16.vlgmr.msrb.gmra.mxu0 %v2650_v59  ;;  %2835 = vmatmul.bf16.vlgmr.msrb.gmra.mxu1 %v2651_v60  ;;  %v5582_v42 = vld [vmem:[%s9240_s2 + $0x6f8] sm:$0xf0] }
 0x168   : > { %3090 = vmatpush.bf16.msra.mxu0 %v5388_v43  ;;  %3103 = vmatpush.bf16.msra.mxu1 %v5452_v56  ;;  %v5585_v37 = vor.u32 %v6228_v25, %v5582_v42 }
 0x169   : > { %3116 = vmatpush.bf16.msra.mxu2 %v5392_v13  ;;  %3129 = vmatpush.bf16.msra.mxu3 %v5456_v49  ;;  %v2882_v13 = vrot.slane %v2880_v38, 5  ;;  %v5356_v49 = vor.u32 %v6173_v34, %v5355_v33  ;;  %v5397_v38 = vld [vmem:[%s9240_s2 + $0x588] sm:$0xf0]  ;;  %v5580_v33 = vld [vmem:[%s9240_s2 + $0x6f0] sm:$0xf] }
 0x16a   : > { %v2019_v58 = vpop.f32.mrf.mxu0  ;;  %2848 = vmatmul.bf16.vlgmr.msrb.gmra.mxu2 %v2650_v59  ;;  %2861 = vmatmul.bf16.vlgmr.msrb.gmra.mxu3 %v2651_v60  ;;  %v5349_v60 = vld [vmem:[%s9240_s2 + $0x528] sm:$0xf0]  ;;  %v6229_v34 = vld [vmem:[%s9240_s2 + $0x6f4] sm:$0xf0] }
 0x16b   : > { %v2032_v4 = vpop.f32.mrf.mxu1  ;;  %v2884_v9 = vmul.f32 %v2882_v13, %v8224_v12  ;;  %v2885_v19 = vmul.f32 %v2882_v13, %v8227_v57  ;;  %v5581_v13 = vor.u32 %v6229_v34, %v5580_v33  ;;  %v5548_v33 = vld [vmem:[%s9240_s2 + $0x6b0] sm:$0xf]  ;;  %v6221_v34 = vld [vmem:[%s9240_s2 + $0x6b4] sm:$0xf0] }
 0x16c   : > { %v2033_v20 = vadd.f32 %v2032_v4, %v2019_v58  ;;  %3091 = vmatpush.bf16.msra.mxu0 %v5380_v61  ;;  %3104 = vmatpush.bf16.msra.mxu1 %v5444_v62  ;;  %v6170_v58 = vld [vmem:[%s9240_s2 + $0x524] sm:$0xf]  ;;  %v5413_v62 = vld [vmem:[%s9240_s2 + $0x5a8] sm:$0xf0]  ;;  %v5403_v4 = vld [vmem:[%s9240_s2 + $0x590] sm:$0xf] }
 0x16d   : > { %3117 = vmatpush.bf16.msra.mxu2 %v5384_v2  ;;  %3130 = vmatpush.bf16.msra.mxu3 %v5448_v36  ;;  %v6186_v61 = vld [vmem:[%s9240_s2 + $0x5a4] sm:$0xf]  ;;  %v5339_v2 = vld [vmem:[%s9240_s2 + $0x510] sm:$0xf]  ;;  %v6169_v36 = vld [vmem:[%s9240_s2 + $0x514] sm:$0xf0]  ;;  %v5352_v11 = vor.u32 %v6170_v58, %v5349_v60  ;;  %v5404_v17 = vor.u32 %v6185_v5, %v5403_v4  ;;  %v2886_v28 = vpack.c.bf16 %v2884_v9, %v2884_v9 }
 0x16e   : > { %v8517_v18 = vadd.f32 %v2033_v20, %v8358_v41  ;;  %v5365_v41 = vld [vmem:[%s9240_s2 + $0x548] sm:$0xf0]  ;;  %v5416_v3 = vor.u32 %v6186_v61, %v5413_v62  ;;  %v5341_v20 = vld [vmem:[%s9240_s2 + $0x518] sm:$0xf0]  ;;  %v5340_v16 = vor.u32 %v6169_v36, %v5339_v2  ;;  %v6226_v58 = vld [vmem:[%s9240_s2 + $0x6e4] sm:$0xf] }
 0x16f   : > { %v5368_v55 = vor.u32 %v6174_v24, %v5365_v41  ;;  %v5344_v53 = vor.u32 %v6168_v7, %v5341_v20  ;;  %v5333_v41 = vld [vmem:[%s9240_s2 + $0x508] sm:$0xf0]  ;;  %v2921_v44 = vshrl.u32 %v2886_v28, 16  ;;  %v6209_v2 = vld [vmem:[%s9240_s2 + $0x654] sm:$0xf0] }
 0x170   : > { %3092 = vmatpush.bf16.msra.mxu0 %v5372_v14  ;;  %3105 = vmatpush.bf16.msra.mxu1 %v5436_v15  ;;  %v5405_v14 = vld [vmem:[%s9240_s2 + $0x598] sm:$0xf0]  ;;  %v5331_v15 = vld [vmem:[%s9240_s2 + $0x500] sm:$0xf]  ;;  %v6208_v4 = vld [vmem:[%s9240_s2 + $0x654] sm:$0xf] }
 0x171   : > { %3118 = vmatpush.bf16.msra.mxu2 %v5376_v21  ;;  %3131 = vmatpush.bf16.msra.mxu3 %v5440_v22  ;;  %v6167_v21 = vld [vmem:[%s9240_s2 + $0x504] sm:$0xf0]  ;;  %v5395_v22 = vld [vmem:[%s9240_s2 + $0x580] sm:$0xf]  ;;  %v5408_v24 = vor.u32 %v6184_v10, %v5405_v14  ;;  %v2923_v60 = vrot.slane %v2921_v44, 1 }
 0x172   : > { %v2045_v26 = vpop.f32.mrf.mxu2  ;;  %v2021_v29 = vpop.f32.mrf.mxu0  ;;  %v5502_v5 = vld [vmem:[%s9240_s2 + $0x658] sm:$0xf0]  ;;  %v6224_v7 = vld [vmem:[%s9240_s2 + $0x6d4] sm:$0xf]  ;;  %v5492_v10 = vld [vmem:[%s9240_s2 + $0x640] sm:$0xf] }
 0x173   : > { %v2058_v35 = vpop.f32.mrf.mxu3  ;;  %v2034_v56 = vpop.f32.mrf.mxu1  ;;  %v2887_v29 = vpack.c.bf16 %v2885_v19, %v2885_v19  ;;  %v5566_v9 = vld [vmem:[%s9240_s2 + $0x6d8] sm:$0xf0]  ;;  %v6207_v14 = vld [vmem:[%s9240_s2 + $0x644] sm:$0xf0] }
 0x174   : > { %v2059_v43 = vadd.f32 %v2058_v35, %v2045_v26  ;;  %3093 = vmatpush.bf16.msra.mxu0 %v5364_v30  ;;  %3106 = vmatpush.bf16.msra.mxu1 %v5428_v31  ;;  %v6166_v26 = vld [vmem:[%s9240_s2 + $0x504] sm:$0xf]  ;;  %v5516_v30 = vld [vmem:[%s9240_s2 + $0x670] sm:$0xf]  ;;  %v6213_v31 = vld [vmem:[%s9240_s2 + $0x674] sm:$0xf0]  ;;  %v5400_v56 = vor.u32 %v6182_v27, %v5397_v38  ;;  %v5493_v27 = vor.u32 %v6207_v14, %v5492_v10 }
 0x175   : > { %3119 = vmatpush.bf16.msra.mxu2 %v5368_v55  ;;  %3132 = vmatpush.bf16.msra.mxu3 %v5432_v39  ;;  %v6212_v35 = vld [vmem:[%s9240_s2 + $0x674] sm:$0xf]  ;;  %v5332_v55 = vor.u32 %v6167_v21, %v5331_v15  ;;  %v5396_v39 = vor.u32 %v6183_v23, %v5395_v22  ;;  %v2925_v46 = vshrl.u32 %v2887_v29, 16  ;;  %v5517_v47 = vor.u32 %v6213_v31, %v5516_v30  ;;  %v3150_v15 = vpop.permute.xlu2 %3149  ;;  %v5556_v21 = vld [vmem:[%s9240_s2 + $0x6c0] sm:$0xf] }
 0x176   : > { %v8562_v48 = vadd.f32 %v2059_v43, %v8385_v45  ;;  %v5411_v45 = vld [vmem:[%s9240_s2 + $0x5a0] sm:$0xf]  ;;  %v5336_v43 = vor.u32 %v6166_v26, %v5333_v41  ;;  %v5521_v8 = vor.u32 %v6212_v35, %v5518_v40  ;;  %v6223_v22 = vld [vmem:[%s9240_s2 + $0x6c4] sm:$0xf0]  ;;  %v6206_v23 = vld [vmem:[%s9240_s2 + $0x644] sm:$0xf]  ;;  %v3155_v41 = vperm.slane %v3150_v15, %v7607_v0 }
 0x177   : > { %v5412_v51 = vor.u32 %v6187_v54, %v5411_v45  ;;  %v6210_v45 = vld [vmem:[%s9240_s2 + $0x664] sm:$0xf]  ;;  %v5510_v54 = vld [vmem:[%s9240_s2 + $0x668] sm:$0xf0]  ;;  %v2927_v61 = vrot.slane %v2925_v46, 1  ;;  %v5557_v28 = vor.u32 %v6223_v22, %v5556_v21 }
 0x178   : > { %3094 = vmatpush.bf16.msra.mxu0 %v5356_v49  ;;  %3107 = vmatpush.bf16.msra.mxu1 %v5420_v50  ;;  %v5508_v49 = vld [vmem:[%s9240_s2 + $0x660] sm:$0xf]  ;;  %v6211_v50 = vld [vmem:[%s9240_s2 + $0x664] sm:$0xf0]  ;;  %v5513_v36 = vor.u32 %v6210_v45, %v5510_v54  ;;  %v5558_v26 = vld [vmem:[%s9240_s2 + $0x6c8] sm:$0xf0]  ;;  %v3156_v25 = vunpack.c.l.bf16 %v3155_v41 }
 0x179   : > { %3120 = vmatpush.bf16.msra.mxu2 %v5360_v6  ;;  %3133 = vmatpush.bf16.msra.mxu3 %v5424_v52  ;;  %v5572_v6 = vld [vmem:[%s9240_s2 + $0x6e0] sm:$0xf]  ;;  %v6227_v52 = vld [vmem:[%s9240_s2 + $0x6e4] sm:$0xf0]  ;;  %v5509_v62 = vor.u32 %v6211_v50, %v5508_v49  ;;  %v5484_v29 = vld [vmem:[%s9240_s2 + $0x630] sm:$0xf] }
 0x17a   : > { %v2047_v59 = vpop.f32.mrf.mxu2  ;;  %v6205_v38 = vld [vmem:[%s9240_s2 + $0x634] sm:$0xf0]  ;;  %v6204_v35 = vld [vmem:[%s9240_s2 + $0x634] sm:$0xf]  ;;  %v5550_v40 = vld [vmem:[%s9240_s2 + $0x6b8] sm:$0xf0] }
 0x17b   : > { %v2060_v32 = vpop.f32.mrf.mxu3  ;;  %v5574_v59 = vld [vmem:[%s9240_s2 + $0x6e8] sm:$0xf0]  ;;  %v5485_v42 = vor.u32 %v6205_v38, %v5484_v29  ;;  %v6203_v44 = vld [vmem:[%s9240_s2 + $0x624] sm:$0xf0]  ;;  %v6202_v50 = vld [vmem:[%s9240_s2 + $0x624] sm:$0xf] }
 0x17c   : > { %3095 = vmatpush.bf16.msra.mxu0 %v5348_v1  ;;  %3108 = vmatpush.bf16.msra.mxu1 %v5412_v51  ;;  %v5573_v1 = vor.u32 %v6227_v52, %v5572_v6  ;;  %v5500_v51 = vld [vmem:[%s9240_s2 + $0x650] sm:$0xf]  ;;  %v5577_v32 = vor.u32 %v6226_v58, %v5574_v59  ;;  %v6219_v49 = vld [vmem:[%s9240_s2 + $0x6a4] sm:$0xf0]  ;;  %v5542_v6 = vld [vmem:[%s9240_s2 + $0x6a8] sm:$0xf0] }
 0x17d   : > { %3121 = vmatpush.bf16.msra.mxu2 %v5352_v11  ;;  %3134 = vmatpush.bf16.msra.mxu3 %v5416_v3  ;;  %v5564_v11 = vld [vmem:[%s9240_s2 + $0x6d0] sm:$0xf]  ;;  %v6225_v3 = vld [vmem:[%s9240_s2 + $0x6d4] sm:$0xf0]  ;;  %v5501_v19 = vor.u32 %v6209_v2, %v5500_v51  ;;  %v3158_v52 = vrot.slane %v3156_v25, 6 }
 0x17e   : > { %v5565_v20 = vor.u32 %v6225_v3, %v5564_v11  ;;  %v5468_v58 = vld [vmem:[%s9240_s2 + $0x610] sm:$0xf]  ;;  %v6201_v59 = vld [vmem:[%s9240_s2 + $0x614] sm:$0xf0]  ;;  %v6200_v51 = vld [vmem:[%s9240_s2 + $0x614] sm:$0xf] }
 0x17f   : > { %v5470_v2 = vld [vmem:[%s9240_s2 + $0x618] sm:$0xf0]  ;;  %v5460_v11 = vld [vmem:[%s9240_s2 + $0x600] sm:$0xf]  ;;  %v5469_v3 = vor.u32 %v6201_v59, %v5468_v58  ;;  %v6198_v10 = vld [vmem:[%s9240_s2 + $0x604] sm:$0xf] }
 0x180   : > { %3096 = vmatpush.bf16.msra.mxu0 %v5340_v16  ;;  %3109 = vmatpush.bf16.msra.mxu1 %v5404_v17  ;;  %v5505_v16 = vor.u32 %v6208_v4, %v5502_v5  ;;  %v5569_v17 = vor.u32 %v6224_v7, %v5566_v9  ;;  %v6199_v5 = vld [vmem:[%s9240_s2 + $0x604] sm:$0xf0]  ;;  %v5524_v7 = vld [vmem:[%s9240_s2 + $0x680] sm:$0xf]  ;;  %v5462_v14 = vld [vmem:[%s9240_s2 + $0x608] sm:$0xf0] }
 0x181   : > { %3122 = vmatpush.bf16.msra.mxu2 %v5344_v53  ;;  %3135 = vmatpush.bf16.msra.mxu3 %v5408_v24  ;;  %v5494_v53 = vld [vmem:[%s9240_s2 + $0x648] sm:$0xf0]  ;;  %v6222_v24 = vld [vmem:[%s9240_s2 + $0x6c4] sm:$0xf]  ;;  %v6215_v9 = vld [vmem:[%s9240_s2 + $0x684] sm:$0xf0]  ;;  %v5461_v41 = vor.u32 %v6199_v5, %v5460_v11  ;;  %v3422_v11 = vpop.permute.xlu0 %3421 }
 0x182   : > { %v5497_v30 = vor.u32 %v6206_v23, %v5494_v53  ;;  %v5561_v31 = vor.u32 %v6222_v24, %v5558_v26  ;;  %v6214_v15 = vld [vmem:[%s9240_s2 + $0x684] sm:$0xf]  ;;  %v5526_v21 = vld [vmem:[%s9240_s2 + $0x688] sm:$0xf0]  ;;  %v5645_v22 = vld [vmem:[%s9240_s2 + $0x770] sm:$0xf] }
 0x183   : > { %v6245_v23 = vld [vmem:[%s9240_s2 + $0x774] sm:$0xf0]  ;;  %v5709_v53 = vld [vmem:[%s9240_s2 + $0x7f0] sm:$0xf]  ;;  %v6244_v26 = vld [vmem:[%s9240_s2 + $0x774] sm:$0xf] }
 0x184   : > { %3097 = vmatpush.bf16.msra.mxu0 %v5332_v55  ;;  %3110 = vmatpush.bf16.msra.mxu1 %v5396_v39  ;;  %v5486_v55 = vld [vmem:[%s9240_s2 + $0x638] sm:$0xf0]  ;;  %v6220_v39 = vld [vmem:[%s9240_s2 + $0x6b4] sm:$0xf]  ;;  %v6261_v24 = vld [vmem:[%s9240_s2 + $0x7f4] sm:$0xf0] }
 0x185   : > { %3123 = vmatpush.bf16.msra.mxu2 %v5336_v43  ;;  %3136 = vmatpush.bf16.msra.mxu3 %v5400_v56  ;;  %v5549_v43 = vor.u32 %v6221_v34, %v5548_v33  ;;  %v5476_v56 = vld [vmem:[%s9240_s2 + $0x620] sm:$0xf]  ;;  %v5489_v46 = vor.u32 %v6204_v35, %v5486_v55  ;;  %v6260_v29 = vld [vmem:[%s9240_s2 + $0x7f4] sm:$0xf]  ;;  %v5711_v38 = vld [vmem:[%s9240_s2 + $0x7f8] sm:$0xf0]  ;;  %v5646_v35 = vor.u32 %v6245_v23, %v5645_v22 }
 0x186   : > { %v5477_v45 = vor.u32 %v6203_v44, %v5476_v56  ;;  %v5710_v55 = vor.u32 %v6261_v24, %v5709_v53  ;;  %v6259_v56 = vld [vmem:[%s9240_s2 + $0x7e4] sm:$0xf0]  ;;  %v6242_v44 = vld [vmem:[%s9240_s2 + $0x764] sm:$0xf]  ;;  %v5693_v58 = vld [vmem:[%s9240_s2 + $0x7d0] sm:$0xf] }
 0x187   : > { %3098 = vmatmul.bf16.vlgmr.msra.gmra.mxu0 %v2923_v60  ;;  %3111 = vmatmul.bf16.vlgmr.msra.gmra.mxu1 %v2927_v61  ;;  %v6257_v59 = vld [vmem:[%s9240_s2 + $0x7d4] sm:$0xf0]  ;;  %v5685_v5 = vld [vmem:[%s9240_s2 + $0x7c0] sm:$0xf]  ;;  %v5677_v53 = vld [vmem:[%s9240_s2 + $0x7b0] sm:$0xf] }
 0x188   : > { %3362 = vmatpush.bf16.msrb.mxu0 %v5517_v47  ;;  %3375 = vmatpush.bf16.msrb.mxu1 %v5581_v13  ;;  %v5553_v47 = vor.u32 %v6220_v39, %v5550_v40  ;;  %v5540_v13 = vld [vmem:[%s9240_s2 + $0x6a0] sm:$0xf]  ;;  %v6243_v40 = vld [vmem:[%s9240_s2 + $0x764] sm:$0xf0]  ;;  %v6253_v24 = vld [vmem:[%s9240_s2 + $0x7b4] sm:$0xf0] }
 0x189   : > { %3388 = vmatpush.bf16.msrb.mxu2 %v5521_v8  ;;  %3401 = vmatpush.bf16.msrb.mxu3 %v5585_v37  ;;  %v5478_v8 = vld [vmem:[%s9240_s2 + $0x628] sm:$0xf0]  ;;  %v6218_v37 = vld [vmem:[%s9240_s2 + $0x6a4] sm:$0xf]  ;;  %v5541_v54 = vor.u32 %v6219_v49, %v5540_v13  ;;  %v5637_v39 = vld [vmem:[%s9240_s2 + $0x760] sm:$0xf] }
 0x18a   : > { %3124 = vmatmul.bf16.vlgmr.msra.gmra.mxu2 %v2923_v60  ;;  %3137 = vmatmul.bf16.vlgmr.msra.gmra.mxu3 %v2927_v61  ;;  %v5481_v60 = vor.u32 %v6202_v50, %v5478_v8  ;;  %v5545_v61 = vor.u32 %v6218_v37, %v5542_v6  ;;  %v5703_v13 = vld [vmem:[%s9240_s2 + $0x7e8] sm:$0xf0]  ;;  %v5638_v8 = vor.u32 %v6243_v40, %v5637_v39  ;;  %v5629_v6 = vld [vmem:[%s9240_s2 + $0x750] sm:$0xf]  ;;  %v6251_v39 = vld [vmem:[%s9240_s2 + $0x7a4] sm:$0xf0] }
 0x18b   : > { %v6234_v40 = vld [vmem:[%s9240_s2 + $0x724] sm:$0xf] }
 0x18c   : > { %3363 = vmatpush.bf16.msrb.mxu0 %v5509_v62  ;;  %3376 = vmatpush.bf16.msrb.mxu1 %v5573_v1  ;;  %v5532_v62 = vld [vmem:[%s9240_s2 + $0x690] sm:$0xf]  ;;  %v6217_v1 = vld [vmem:[%s9240_s2 + $0x694] sm:$0xf0] }
 0x18d   : > { %3389 = vmatpush.bf16.msrb.mxu2 %v5513_v36  ;;  %3402 = vmatpush.bf16.msrb.mxu3 %v5577_v32  ;;  %v6216_v36 = vld [vmem:[%s9240_s2 + $0x694] sm:$0xf]  ;;  %v5534_v32 = vld [vmem:[%s9240_s2 + $0x698] sm:$0xf0]  ;;  %v5533_v4 = vor.u32 %v6217_v1, %v5532_v62 }
 0x18e   : > { %v6256_v62 = vld [vmem:[%s9240_s2 + $0x7d4] sm:$0xf]  ;;  %v5695_v1 = vld [vmem:[%s9240_s2 + $0x7d8] sm:$0xf0] }
 0x190   : > { %3364 = vmatpush.bf16.msrb.mxu0 %v5501_v19  ;;  %3377 = vmatpush.bf16.msrb.mxu1 %v5565_v20  ;;  %v5473_v19 = vor.u32 %v6200_v51, %v5470_v2  ;;  %v5537_v20 = vor.u32 %v6216_v36, %v5534_v32  ;;  %v5694_v2 = vor.u32 %v6257_v59, %v5693_v58  ;;  %v5621_v36 = vld [vmem:[%s9240_s2 + $0x740] sm:$0xf]  ;;  %v6239_v32 = vld [vmem:[%s9240_s2 + $0x744] sm:$0xf0] }
 0x191   : > { %3390 = vmatpush.bf16.msrb.mxu2 %v5505_v16  ;;  %3403 = vmatpush.bf16.msrb.mxu3 %v5569_v17  ;;  %v3160_v16 = vmul.f32 %v3158_v52, %v8224_v12  ;;  %v3161_v17 = vmul.f32 %v3158_v52, %v8227_v57  ;;  %v6241_v52 = vld [vmem:[%s9240_s2 + $0x754] sm:$0xf0] }
 0x192   : > { %v5630_v51 = vor.u32 %v6241_v52, %v5629_v6  ;;  %v6232_v6 = vld [vmem:[%s9240_s2 + $0x714] sm:$0xf]  ;;  %v5599_v52 = vld [vmem:[%s9240_s2 + $0x718] sm:$0xf0] }
 0x193   : > { %v3162_v33 = vpack.c.bf16 %v3160_v16, %v3160_v16  ;;  %v3163_v34 = vpack.c.bf16 %v3161_v17, %v3161_v17  ;;  %v5613_v17 = vld [vmem:[%s9240_s2 + $0x730] sm:$0xf] }
 0x194   : > { %3365 = vmatpush.bf16.msrb.mxu0 %v5493_v27  ;;  %3378 = vmatpush.bf16.msrb.mxu1 %v5557_v28  ;;  %v5525_v27 = vor.u32 %v6215_v9, %v5524_v7  ;;  %v5647_v28 = vld [vmem:[%s9240_s2 + $0x778] sm:$0xf0]  ;;  %v6255_v7 = vld [vmem:[%s9240_s2 + $0x7c4] sm:$0xf0]  ;;  %v6238_v9 = vld [vmem:[%s9240_s2 + $0x744] sm:$0xf] }
 0x195   : > { %3391 = vmatpush.bf16.msrb.mxu2 %v5497_v30  ;;  %3404 = vmatpush.bf16.msrb.mxu3 %v5561_v31  ;;  %v5465_v30 = vor.u32 %v6198_v10, %v5462_v14  ;;  %v5529_v31 = vor.u32 %v6214_v15, %v5526_v21  ;;  %v5650_v25 = vor.u32 %v6244_v26, %v5647_v28  ;;  %v3198_v49 = vrot.slane %v3162_v33, 1  ;;  %v5687_v10 = vld [vmem:[%s9240_s2 + $0x7c8] sm:$0xf0]  ;;  %v6237_v21 = vld [vmem:[%s9240_s2 + $0x734] sm:$0xf0] }
 0x196   : > { %v3199_v50 = vrot.slane %v3163_v34, 1  ;;  %v3427_v14 = vperm.slane %v3422_v11, %v7607_v0  ;;  %v5622_v15 = vor.u32 %v6239_v32, %v5621_v36  ;;  %v5686_v16 = vor.u32 %v6255_v7, %v5685_v5  ;;  %v6236_v26 = vld [vmem:[%s9240_s2 + $0x734] sm:$0xf]  ;;  %v5679_v28 = vld [vmem:[%s9240_s2 + $0x7b8] sm:$0xf0] }
 0x197   : > { %v6235_v33 = vld [vmem:[%s9240_s2 + $0x724] sm:$0xf0]  ;;  %v6230_v36 = vld [vmem:[%s9240_s2 + $0x704] sm:$0xf]  ;;  %v5591_v32 = vld [vmem:[%s9240_s2 + $0x708] sm:$0xf0] }
 0x198   : > { %3366 = vmatpush.bf16.msrb.mxu0 %v5485_v42  ;;  %3379 = vmatpush.bf16.msrb.mxu1 %v5549_v43  ;;  %v5714_v42 = vor.u32 %v6260_v29, %v5711_v38  ;;  %v5701_v43 = vld [vmem:[%s9240_s2 + $0x7e0] sm:$0xf]  ;;  %v3428_v29 = vunpack.c.l.bf16 %v3427_v14  ;;  %v5614_v38 = vor.u32 %v6237_v21, %v5613_v17  ;;  %v6246_v11 = vld [vmem:[%s9240_s2 + $0x784] sm:$0xf]  ;;  %v6277_v5 = vld [vmem:[%s9240_s2 + $0x874] sm:$0xf0] }
 0x199   : > { %3392 = vmatpush.bf16.msrb.mxu2 %v5489_v46  ;;  %3405 = vmatpush.bf16.msrb.mxu3 %v5553_v47  ;;  %v5639_v46 = vld [vmem:[%s9240_s2 + $0x768] sm:$0xf0]  ;;  %v6258_v47 = vld [vmem:[%s9240_s2 + $0x7e4] sm:$0xf]  ;;  %v5702_v37 = vor.u32 %v6259_v56, %v5701_v43  ;;  %v6292_v17 = vld [vmem:[%s9240_s2 + $0x8f4] sm:$0xf] }
 0x19a   : > { %v5671_v43 = vld [vmem:[%s9240_s2 + $0x7a8] sm:$0xf0]  ;;  %v3430_v56 = vrot.slane %v3428_v29, 5  ;;  %v5840_v21 = vld [vmem:[%s9240_s2 + $0x8f8] sm:$0xf0] }
 0x19c   : > { %3367 = vmatpush.bf16.msrb.mxu0 %v5477_v45  ;;  %3380 = vmatpush.bf16.msrb.mxu1 %v5541_v54  ;;  %v5642_v45 = vor.u32 %v6242_v44, %v5639_v46  ;;  %v5706_v54 = vor.u32 %v6258_v47, %v5703_v13  ;;  %v5597_v47 = vld [vmem:[%s9240_s2 + $0x710] sm:$0xf]  ;;  %v6233_v13 = vld [vmem:[%s9240_s2 + $0x714] sm:$0xf0]  ;;  %v3432_v58 = vmul.f32 %v3430_v56, %v8224_v12  ;;  %v6247_v12 = vld [vmem:[%s9240_s2 + $0x784] sm:$0xf0] }
 0x19d   : > { %3393 = vmatpush.bf16.msrb.mxu2 %v5481_v60  ;;  %3406 = vmatpush.bf16.msrb.mxu3 %v5545_v61  ;;  %v6240_v60 = vld [vmem:[%s9240_s2 + $0x754] sm:$0xf]  ;;  %v5631_v61 = vld [vmem:[%s9240_s2 + $0x758] sm:$0xf0]  ;;  %v3433_v59 = vmul.f32 %v3430_v56, %v8227_v57  ;;  %v5602_v57 = vor.u32 %v6232_v6, %v5599_v52  ;;  %v6273_v56 = vld [vmem:[%s9240_s2 + $0x854] sm:$0xf0] }
 0x19e   : > { %v3434_v7 = vpack.c.bf16 %v3432_v58, %v3432_v58 }
 0x1a0   : > { %3368 = vmatpush.bf16.msrb.mxu0 %v5469_v3  ;;  %3381 = vmatpush.bf16.msrb.mxu1 %v5533_v4  ;;  %v5634_v3 = vor.u32 %v6240_v60, %v5631_v61  ;;  %v5698_v4 = vor.u32 %v6256_v62, %v5695_v1  ;;  %v5589_v60 = vld [vmem:[%s9240_s2 + $0x700] sm:$0xf]  ;;  %v5598_v61 = vor.u32 %v6233_v13, %v5597_v47  ;;  %v6231_v1 = vld [vmem:[%s9240_s2 + $0x704] sm:$0xf0]  ;;  %v5822_v47 = vld [vmem:[%s9240_s2 + $0x8d0] sm:$0xf] }
 0x1a1   : > { %3394 = vmatpush.bf16.msrb.mxu2 %v5473_v19  ;;  %3407 = vmatpush.bf16.msrb.mxu3 %v5537_v20  ;;  %v5623_v19 = vld [vmem:[%s9240_s2 + $0x748] sm:$0xf0]  ;;  %v6254_v20 = vld [vmem:[%s9240_s2 + $0x7c4] sm:$0xf]  ;;  %v5590_v14 = vor.u32 %v6231_v1, %v5589_v60  ;;  %v6289_v13 = vld [vmem:[%s9240_s2 + $0x8d4] sm:$0xf0] }
 0x1a2   : > { %v5626_v22 = vor.u32 %v6238_v9, %v5623_v19  ;;  %v5690_v23 = vor.u32 %v6254_v20, %v5687_v10  ;;  %v3435_v9 = vpack.c.bf16 %v3433_v59, %v3433_v59  ;;  %v5838_v19 = vld [vmem:[%s9240_s2 + $0x8f0] sm:$0xf]  ;;  %v6293_v20 = vld [vmem:[%s9240_s2 + $0x8f4] sm:$0xf0]  ;;  %v6276_v10 = vld [vmem:[%s9240_s2 + $0x874] sm:$0xf]  ;;  %v5823_v58 = vor.u32 %v6289_v13, %v5822_v47 }
 0x1a3   : > { %v5750_v60 = vld [vmem:[%s9240_s2 + $0x840] sm:$0xf] }
 0x1a4   : > { %3369 = vmatpush.bf16.msrb.mxu0 %v5461_v41  ;;  %3382 = vmatpush.bf16.msrb.mxu1 %v5525_v27  ;;  %v5615_v41 = vld [vmem:[%s9240_s2 + $0x738] sm:$0xf0]  ;;  %v6252_v27 = vld [vmem:[%s9240_s2 + $0x7b4] sm:$0xf] }
 0x1a5   : > { %3395 = vmatpush.bf16.msrb.mxu2 %v5465_v30  ;;  %3408 = vmatpush.bf16.msrb.mxu3 %v5529_v31  ;;  %v5678_v30 = vor.u32 %v6253_v24, %v5677_v53  ;;  %v5605_v31 = vld [vmem:[%s9240_s2 + $0x720] sm:$0xf]  ;;  %v5618_v34 = vor.u32 %v6236_v26, %v5615_v41  ;;  %v5839_v24 = vor.u32 %v6293_v20, %v5838_v19  ;;  %v3469_v26 = vshrl.u32 %v3434_v7, 16  ;;  %v6269_v7 = vld [vmem:[%s9240_s2 + $0x834] sm:$0xf0] }
 0x1a6   : > { %v5606_v44 = vor.u32 %v6235_v33, %v5605_v31  ;;  %v3473_v41 = vshrl.u32 %v3435_v9, 16  ;;  %v6291_v31 = vld [vmem:[%s9240_s2 + $0x8e4] sm:$0xf0]  ;;  %v6274_v33 = vld [vmem:[%s9240_s2 + $0x864] sm:$0xf] }
 0x1a7   : > { %3370 = vmatmul.bf16.vlgmr.msrb.gmra.mxu0 %v3198_v49  ;;  %3383 = vmatmul.bf16.vlgmr.msrb.gmra.mxu1 %v3199_v50  ;;  %v6285_v20 = vld [vmem:[%s9240_s2 + $0x8b4] sm:$0xf0] }
 0x1a8   : > { %3638 = vmatpush.bf16.msra.mxu0 %v5646_v35  ;;  %3651 = vmatpush.bf16.msra.mxu1 %v5710_v55  ;;  %v5682_v35 = vor.u32 %v6252_v27, %v5679_v28  ;;  %v5669_v55 = vld [vmem:[%s9240_s2 + $0x7a0] sm:$0xf]  ;;  %v6275_v28 = vld [vmem:[%s9240_s2 + $0x864] sm:$0xf0] }
 0x1a9   : > { %3664 = vmatpush.bf16.msra.mxu2 %v5650_v25  ;;  %3677 = vmatpush.bf16.msra.mxu3 %v5714_v42  ;;  %v5607_v25 = vld [vmem:[%s9240_s2 + $0x728] sm:$0xf0]  ;;  %v6250_v42 = vld [vmem:[%s9240_s2 + $0x7a4] sm:$0xf]  ;;  %v5670_v46 = vor.u32 %v6251_v39, %v5669_v55  ;;  %v5766_v27 = vld [vmem:[%s9240_s2 + $0x860] sm:$0xf] }
 0x1aa   : > { %3396 = vmatmul.bf16.vlgmr.msrb.gmra.mxu2 %v3198_v49  ;;  %3409 = vmatmul.bf16.vlgmr.msrb.gmra.mxu3 %v3199_v50  ;;  %v5610_v49 = vor.u32 %v6234_v40, %v5607_v25  ;;  %v5674_v50 = vor.u32 %v6250_v42, %v5671_v43  ;;  %v5832_v55 = vld [vmem:[%s9240_s2 + $0x8e8] sm:$0xf0]  ;;  %v3471_v39 = vrot.slane %v3469_v26, 1  ;;  %v3475_v40 = vrot.slane %v3473_v41, 1  ;;  %v5758_v43 = vld [vmem:[%s9240_s2 + $0x850] sm:$0xf] }
 0x1ab   : > { %v5767_v25 = vor.u32 %v6275_v28, %v5766_v27  ;;  %v3692_v26 = vld [vmem:[#allocation2] sm:$0x44]  ;;  %v5734_v28 = vld [vmem:[%s9240_s2 + $0x820] sm:$0xf] }
 0x1ac   : > { %3639 = vmatpush.bf16.msra.mxu0 %v5638_v8  ;;  %3652 = vmatpush.bf16.msra.mxu1 %v5702_v37  ;;  %v5661_v8 = vld [vmem:[%s9240_s2 + $0x790] sm:$0xf]  ;;  %v6249_v37 = vld [vmem:[%s9240_s2 + $0x794] sm:$0xf0] }
 0x1ad   : > { %3665 = vmatpush.bf16.msra.mxu2 %v5642_v45  ;;  %3678 = vmatpush.bf16.msra.mxu3 %v5706_v54  ;;  %v6248_v45 = vld [vmem:[%s9240_s2 + $0x794] sm:$0xf]  ;;  %v5663_v54 = vld [vmem:[%s9240_s2 + $0x798] sm:$0xf0]  ;;  %v5662_v62 = vor.u32 %v6249_v37, %v5661_v8 }
 0x1ae   : > { %v6288_v8 = vld [vmem:[%s9240_s2 + $0x8d4] sm:$0xf]  ;;  %v5824_v37 = vld [vmem:[%s9240_s2 + $0x8d8] sm:$0xf0] }
 0x1af   : > { %v5827_v1 = vor.u32 %v6288_v8, %v5824_v37  ;;  %v6264_v8 = vld [vmem:[%s9240_s2 + $0x814] sm:$0xf] }
 0x1b0   : > { %3640 = vmatpush.bf16.msra.mxu0 %v5630_v51  ;;  %3653 = vmatpush.bf16.msra.mxu1 %v5694_v2  ;;  %v5653_v51 = vld [vmem:[%s9240_s2 + $0x780] sm:$0xf]  ;;  %v5666_v2 = vor.u32 %v6248_v45, %v5663_v54  ;;  %v3699_v45 = vpop.permute.xlu1 %3698  ;;  %v5759_v54 = vor.u32 %v6273_v56, %v5758_v43  ;;  %v5726_v56 = vld [vmem:[%s9240_s2 + $0x810] sm:$0xf] }
 0x1b1   : > { %3666 = vmatpush.bf16.msra.mxu2 %v5634_v3  ;;  %3679 = vmatpush.bf16.msra.mxu3 %v5698_v4  ;;  %v5655_v3 = vld [vmem:[%s9240_s2 + $0x788] sm:$0xf0]  ;;  %v5774_v4 = vld [vmem:[%s9240_s2 + $0x870] sm:$0xf] }
 0x1b2   : > { %v5775_v53 = vor.u32 %v6277_v5, %v5774_v4 }
 0x1b4   : > { %3641 = vmatpush.bf16.msra.mxu0 %v5622_v15  ;;  %3654 = vmatpush.bf16.msra.mxu1 %v5686_v16  ;;  %v5654_v15 = vor.u32 %v6247_v12, %v5653_v51  ;;  %v5776_v16 = vld [vmem:[%s9240_s2 + $0x878] sm:$0xf0]  ;;  %v5814_v51 = vld [vmem:[%s9240_s2 + $0x8c0] sm:$0xf]  ;;  %v6287_v12 = vld [vmem:[%s9240_s2 + $0x8c4] sm:$0xf0] }
 0x1b5   : > { %3667 = vmatpush.bf16.msra.mxu2 %v5626_v22  ;;  %3680 = vmatpush.bf16.msra.mxu3 %v5690_v23  ;;  %v5594_v22 = vor.u32 %v6230_v36, %v5591_v32  ;;  %v5658_v23 = vor.u32 %v6246_v11, %v5655_v3  ;;  %v5779_v29 = vor.u32 %v6276_v10, %v5776_v16  ;;  %v5752_v36 = vld [vmem:[%s9240_s2 + $0x848] sm:$0xf0]  ;;  %v6286_v32 = vld [vmem:[%s9240_s2 + $0x8c4] sm:$0xf]  ;;  %v6268_v10 = vld [vmem:[%s9240_s2 + $0x834] sm:$0xf] }
 0x1b6   : > { %v5816_v11 = vld [vmem:[%s9240_s2 + $0x8c8] sm:$0xf0]  ;;  %v3704_v3 = vperm.slane %v3699_v45, %v7607_v0  ;;  %v5815_v5 = vor.u32 %v6287_v12, %v5814_v51  ;;  %v5806_v0 = vld [vmem:[%s9240_s2 + $0x8b0] sm:$0xf]  ;;  %v5744_v16 = vld [vmem:[%s9240_s2 + $0x838] sm:$0xf0] }
 0x1b7   : > { %v5819_v19 = vor.u32 %v6286_v32, %v5816_v11  ;;  %v5807_v27 = vor.u32 %v6285_v20, %v5806_v0  ;;  %v6280_v45 = vld [vmem:[%s9240_s2 + $0x894] sm:$0xf]  ;;  %v5718_v51 = vld [vmem:[%s9240_s2 + $0x800] sm:$0xf]  ;;  %v6263_v12 = vld [vmem:[%s9240_s2 + $0x804] sm:$0xf0] }
 0x1b8   : > { %3642 = vmatpush.bf16.msra.mxu0 %v5614_v38  ;;  %3655 = vmatpush.bf16.msra.mxu1 %v5678_v30  ;;  %v5843_v38 = vor.u32 %v6292_v17, %v5840_v21  ;;  %v5830_v30 = vld [vmem:[%s9240_s2 + $0x8e0] sm:$0xf]  ;;  %v6284_v17 = vld [vmem:[%s9240_s2 + $0x8b4] sm:$0xf]  ;;  %v5808_v21 = vld [vmem:[%s9240_s2 + $0x8b8] sm:$0xf0]  ;;  %v5719_v0 = vor.u32 %v6263_v12, %v5718_v51 }
 0x1b9   : > { %3668 = vmatpush.bf16.msra.mxu2 %v5618_v34  ;;  %3681 = vmatpush.bf16.msra.mxu3 %v5682_v35  ;;  %v5768_v34 = vld [vmem:[%s9240_s2 + $0x868] sm:$0xf0]  ;;  %v6290_v35 = vld [vmem:[%s9240_s2 + $0x8e4] sm:$0xf]  ;;  %v5831_v42 = vor.u32 %v6291_v31, %v5830_v30  ;;  %v5747_v30 = vor.u32 %v6268_v10, %v5744_v16  ;;  %v5811_v31 = vor.u32 %v6284_v17, %v5808_v21  ;;  %v5782_v11 = vld [vmem:[%s9240_s2 + $0x880] sm:$0xf] }
 0x1bc   : > { %3643 = vmatpush.bf16.msra.mxu0 %v5606_v44  ;;  %3656 = vmatpush.bf16.msra.mxu1 %v5670_v46  ;;  %v5771_v44 = vor.u32 %v6274_v33, %v5768_v34  ;;  %v5835_v46 = vor.u32 %v6290_v35, %v5832_v55  ;;  %v5798_v33 = vld [vmem:[%s9240_s2 + $0x8a0] sm:$0xf]  ;;  %v6283_v34 = vld [vmem:[%s9240_s2 + $0x8a4] sm:$0xf0]  ;;  %v6266_v35 = vld [vmem:[%s9240_s2 + $0x824] sm:$0xf] }
 0x1bd   : > { %3669 = vmatpush.bf16.msra.mxu2 %v5610_v49  ;;  %3682 = vmatpush.bf16.msra.mxu3 %v5674_v50  ;;  %v6272_v49 = vld [vmem:[%s9240_s2 + $0x854] sm:$0xf]  ;;  %v5760_v50 = vld [vmem:[%s9240_s2 + $0x858] sm:$0xf0]  ;;  %v5736_v55 = vld [vmem:[%s9240_s2 + $0x828] sm:$0xf0]  ;;  %v5799_v43 = vor.u32 %v6283_v34, %v5798_v33 }
 0x1be   : > { %v5739_v47 = vor.u32 %v6266_v35, %v5736_v55 }
 0x1c0   : > { %3644 = vmatpush.bf16.msra.mxu0 %v5598_v61  ;;  %3657 = vmatpush.bf16.msra.mxu1 %v5662_v62  ;;  %v6271_v61 = vld [vmem:[%s9240_s2 + $0x844] sm:$0xf0]  ;;  %v5763_v62 = vor.u32 %v6272_v49, %v5760_v50  ;;  %v5790_v49 = vld [vmem:[%s9240_s2 + $0x890] sm:$0xf]  ;;  %v6281_v50 = vld [vmem:[%s9240_s2 + $0x894] sm:$0xf0] }
 0x1c1   : > { %3670 = vmatpush.bf16.msra.mxu2 %v5602_v57  ;;  %3683 = vmatpush.bf16.msra.mxu3 %v5666_v2  ;;  %v6270_v57 = vld [vmem:[%s9240_s2 + $0x844] sm:$0xf]  ;;  %v5751_v4 = vor.u32 %v6271_v61, %v5750_v60 }
 0x1c2   : > { %v5755_v9 = vor.u32 %v6270_v57, %v5752_v36 }
 0x1c3   : > { %v2294_v6 = vpop.f32.mrf.mxu0  ;;  %v2307_v52 = vpop.f32.mrf.mxu1 }
 0x1c4   : > { %3645 = vmatpush.bf16.msra.mxu0 %v5590_v14  ;;  %3658 = vmatpush.bf16.msra.mxu1 %v5654_v15  ;;  %v2308_v59 = vadd.f32 %v2307_v52, %v2294_v6  ;;  %v5728_v52 = vld [vmem:[%s9240_s2 + $0x818] sm:$0xf0] }
 0x1c5   : > { %3671 = vmatpush.bf16.msra.mxu2 %v5594_v22  ;;  %3684 = vmatpush.bf16.msra.mxu3 %v5658_v23  ;;  %v3707_v22 = vunpack.c.l.bf16 %v3704_v3  ;;  %v5731_v36 = vor.u32 %v6264_v8, %v5728_v52  ;;  %v6279_v3 = vld [vmem:[%s9240_s2 + $0x884] sm:$0xf0] }
 0x1c6   : > { %v9116_v2 = vadd.f32 %v2308_v59, %v8517_v18  ;;  %v5742_v18 = vld [vmem:[%s9240_s2 + $0x830] sm:$0xf]  ;;  %v5783_v20 = vor.u32 %v6279_v3, %v5782_v11 }
 0x1c7   : > { %3646 = vmatmul.bf16.vlgmr.msra.gmra.mxu0 %v3471_v39  ;;  %3659 = vmatmul.bf16.vlgmr.msra.gmra.mxu1 %v3475_v40  ;;  %v5743_v41 = vor.u32 %v6269_v7, %v5742_v18  ;;  %v5720_v18 = vld [vmem:[%s9240_s2 + $0x808] sm:$0xf0]  ;;  %v6278_v7 = vld [vmem:[%s9240_s2 + $0x884] sm:$0xf] }
 0x1c8   : > { %3913 = vmatpush.bf16.msrb.mxu0 %v5775_v53  ;;  %3926 = vmatpush.bf16.msrb.mxu1 %v5839_v24 }
 0x1c9   : > { %3939 = vmatpush.bf16.msrb.mxu2 %v5779_v29  ;;  %3952 = vmatpush.bf16.msrb.mxu3 %v5843_v38  ;;  %v6267_v29 = vld [vmem:[%s9240_s2 + $0x824] sm:$0xf0] }
 0x1ca   : > { %3672 = vmatmul.bf16.vlgmr.msra.gmra.mxu2 %v3471_v39  ;;  %3685 = vmatmul.bf16.vlgmr.msra.gmra.mxu3 %v3475_v40  ;;  %v2320_v14 = vpop.f32.mrf.mxu2  ;;  %v2333_v15 = vpop.f32.mrf.mxu3  ;;  %v5800_v39 = vld [vmem:[%s9240_s2 + $0x8a8] sm:$0xf0]  ;;  %v3705_v40 = vunpack.c.l.bf16 %v3692_v26 }
 0x1cb   : > { %v2334_v23 = vadd.f32 %v2333_v15, %v2320_v14  ;;  %v2296_v53 = vpop.f32.mrf.mxu0  ;;  %v2309_v24 = vpop.f32.mrf.mxu1 }
 0x1cc   : > { %3914 = vmatpush.bf16.msrb.mxu0 %v5767_v25  ;;  %3927 = vmatpush.bf16.msrb.mxu1 %v5831_v42  ;;  %v3709_v25 = vrot.slane %v3707_v22, 4  ;;  %v5735_v42 = vor.u32 %v6267_v29, %v5734_v28 }
 0x1cd   : > { %3940 = vmatpush.bf16.msrb.mxu2 %v5771_v44  ;;  %3953 = vmatpush.bf16.msrb.mxu3 %v5835_v46  ;;  %v9159_v38 = vadd.f32 %v2334_v23, %v8562_v48  ;;  %v6282_v48 = vld [vmem:[%s9240_s2 + $0x8a4] sm:$0xf]  ;;  %v6265_v44 = vld [vmem:[%s9240_s2 + $0x814] sm:$0xf0]  ;;  %v3706_v46 = vunpack.c.h.bf16 %v3692_v26 }
 0x1ce   : > { %v5803_v13 = vor.u32 %v6282_v48, %v5800_v39  ;;  %v5727_v61 = vor.u32 %v6265_v44, %v5726_v56 }
 0x1cf   : > { %v3712_v57 = vmul.f32 %v3709_v25, %v3706_v46 }
 0x1d0   : > { %3915 = vmatpush.bf16.msrb.mxu0 %v5759_v54  ;;  %3928 = vmatpush.bf16.msrb.mxu1 %v5823_v58  ;;  %v5792_v54 = vld [vmem:[%s9240_s2 + $0x898] sm:$0xf0]  ;;  %v3711_v58 = vmul.f32 %v3709_v25, %v3705_v40 }
 0x1d1   : > { %3941 = vmatpush.bf16.msrb.mxu2 %v5763_v62  ;;  %3954 = vmatpush.bf16.msrb.mxu3 %v5827_v1  ;;  %v5791_v62 = vor.u32 %v6281_v50, %v5790_v49  ;;  %v5795_v32 = vor.u32 %v6280_v45, %v5792_v54  ;;  %v3714_v10 = vpack.c.bf16 %v3712_v57, %v3712_v57 }
 0x1d2   : > { %v2322_v37 = vpop.f32.mrf.mxu2  ;;  %v2335_v6 = vpop.f32.mrf.mxu3 }
 0x1d3   : > { %v2568_v59 = vpop.f32.mrf.mxu0  ;;  %v2581_v60 = vpop.f32.mrf.mxu1  ;;  %v3750_v53 = vrot.slane %v3714_v10, 2 }
 0x1d4   : > { %3916 = vmatpush.bf16.msrb.mxu0 %v5751_v4  ;;  %3929 = vmatpush.bf16.msrb.mxu1 %v5815_v5  ;;  %v2582_v1 = vadd.f32 %v2581_v60, %v2568_v59  ;;  %v6262_v4 = vld [vmem:[%s9240_s2 + $0x804] sm:$0xf] }
 0x1d5   : > { %3942 = vmatpush.bf16.msrb.mxu2 %v5755_v9  ;;  %3955 = vmatpush.bf16.msrb.mxu3 %v5819_v19  ;;  %v5784_v9 = vld [vmem:[%s9240_s2 + $0x888] sm:$0xf0]  ;;  %v3713_v19 = vpack.c.bf16 %v3711_v58, %v3711_v58 }
 0x1d6   : > { %v2611_v5 = vadd.f32 %v2582_v1, %v9116_v2  ;;  %v5723_v2 = vor.u32 %v6262_v4, %v5720_v18  ;;  %v5787_v14 = vor.u32 %v6278_v7, %v5784_v9 }
 0x1d7   : > { %v3749_v23 = vrot.slane %v3713_v19, 2 }
 0x1d8   : > { %3917 = vmatpush.bf16.msrb.mxu0 %v5743_v41  ;;  %3930 = vmatpush.bf16.msrb.mxu1 %v5807_v27 }
 0x1d9   : > { %3943 = vmatpush.bf16.msrb.mxu2 %v5747_v30  ;;  %3956 = vmatpush.bf16.msrb.mxu3 %v5811_v31 }
 0x1da   : > { %v2594_v15 = vpop.f32.mrf.mxu2  ;;  %v2607_v16 = vpop.f32.mrf.mxu3 }
 0x1db   : > { %v2608_v17 = vadd.f32 %v2607_v16, %v2594_v15  ;;  %v2570_v21 = vpop.f32.mrf.mxu0  ;;  %v2583_v22 = vpop.f32.mrf.mxu1 }
 0x1dc   : > { %3918 = vmatpush.bf16.msrb.mxu0 %v5735_v42  ;;  %3931 = vmatpush.bf16.msrb.mxu1 %v5799_v43 }
 0x1dd   : > { %3944 = vmatpush.bf16.msrb.mxu2 %v5739_v47  ;;  %3957 = vmatpush.bf16.msrb.mxu3 %v5803_v13  ;;  %v2612_v24 = vadd.f32 %v2608_v17, %v9159_v38 }
 0x1e0   : > { %3919 = vmatpush.bf16.msrb.mxu0 %v5727_v61  ;;  %3932 = vmatpush.bf16.msrb.mxu1 %v5791_v62 }
 0x1e1   : > { %3945 = vmatpush.bf16.msrb.mxu2 %v5731_v36  ;;  %3958 = vmatpush.bf16.msrb.mxu3 %v5795_v32 }
 0x1e2   : > { %v2596_v26 = vpop.f32.mrf.mxu2  ;;  %v2609_v41 = vpop.f32.mrf.mxu3 }
 0x1e4   : > { %3920 = vmatpush.bf16.msrb.mxu0 %v5719_v0  ;;  %3933 = vmatpush.bf16.msrb.mxu1 %v5783_v20  ;;  %v2823_v27 = vpop.f32.mrf.mxu0  ;;  %v2836_v28 = vpop.f32.mrf.mxu1 }
 0x1e5   : > { %3946 = vmatpush.bf16.msrb.mxu2 %v5723_v2  ;;  %3959 = vmatpush.bf16.msrb.mxu3 %v5787_v14  ;;  %v2837_v29 = vadd.f32 %v2836_v28, %v2823_v27 }
 0x1e7   : > { %3921 = vmatmul.bf16.vlgmr.msrb.gmra.mxu0 %v3749_v23  ;;  %3934 = vmatmul.bf16.vlgmr.msrb.gmra.mxu1 %v3750_v53  ;;  %v2866_v30 = vadd.f32 %v2837_v29, %v2611_v5 }
 0x1e8   : > { %3947 = vmatmul.bf16.vlgmr.msrb.gmra.mxu2 %v3749_v23  ;;  %3960 = vmatmul.bf16.vlgmr.msrb.gmra.mxu3 %v3750_v53 }
 0x1ec   : > { %v2825_v35 = vpop.f32.mrf.mxu0  ;;  %v2838_v55 = vpop.f32.mrf.mxu1 }
 0x1ed   : > { %v2849_v31 = vpop.f32.mrf.mxu2  ;;  %v2862_v33 = vpop.f32.mrf.mxu3 }
 0x1ee   : > { %v2863_v34 = vadd.f32 %v2862_v33, %v2849_v31 }
 0x1f0   : > { %v2867_v48 = vadd.f32 %v2863_v34, %v2612_v24 }
 0x1f5   : > { %v2851_v39 = vpop.f32.mrf.mxu2  ;;  %v2864_v40 = vpop.f32.mrf.mxu3 }
 0x204   : > { %v3099_v25 = vpop.f32.mrf.mxu0  ;;  %v3112_v38 = vpop.f32.mrf.mxu1 }
 0x205   : > { %v3113_v42 = vadd.f32 %v3112_v38, %v3099_v25 }
 0x207   : > { %v3142_v43 = vadd.f32 %v3113_v42, %v2866_v30  ;;  %v3983_v30 = vld [vmem:[%s246_s13] sm:$0x3] }
 0x20c   : > { %v3101_v47 = vpop.f32.mrf.mxu0  ;;  %v3114_v13 = vpop.f32.mrf.mxu1 }
 0x20d   : > { %v3125_v56 = vpop.f32.mrf.mxu2  ;;  %v3138_v44 = vpop.f32.mrf.mxu3 }
 0x20e   : > { %v3139_v46 = vadd.f32 %v3138_v44, %v3125_v56 }
 0x210   : > { %v3143_v49 = vadd.f32 %v3139_v46, %v2867_v48 }
 0x215   : > { %v3127_v50 = vpop.f32.mrf.mxu2  ;;  %v3140_v8 = vpop.f32.mrf.mxu3 }
 0x224   : > { %v3371_v37 = vpop.f32.mrf.mxu0  ;;  %v3384_v6 = vpop.f32.mrf.mxu1 }
 0x225   : > { %v3385_v11 = vadd.f32 %v3384_v6, %v3371_v37 }
 0x227   : > { %v3414_v18 = vadd.f32 %v3385_v11, %v3142_v43 }
 0x22c   : > { %v3373_v54 = vpop.f32.mrf.mxu0  ;;  %v3386_v58 = vpop.f32.mrf.mxu1 }
 0x22d   : > { %v3397_v52 = vpop.f32.mrf.mxu2  ;;  %v3410_v45 = vpop.f32.mrf.mxu3 }
 0x22e   : > { %v3411_v7 = vadd.f32 %v3410_v45, %v3397_v52 }
 0x230   : > { %v3415_v20 = vadd.f32 %v3411_v7, %v3143_v49 }
 0x235   : > { %v3399_v59 = vpop.f32.mrf.mxu2  ;;  %v3412_v60 = vpop.f32.mrf.mxu3 }
 0x244   : > { %v3647_v61 = vpop.f32.mrf.mxu0  ;;  %v3660_v62 = vpop.f32.mrf.mxu1 }
 0x245   : > { %v3661_v3 = vadd.f32 %v3660_v62, %v3647_v61 }
 0x247   : > { %v3690_v19 = vadd.f32 %v3661_v3, %v3414_v18 }
 0x24c   : > { %v3649_v12 = vpop.f32.mrf.mxu0  ;;  %v3662_v57 = vpop.f32.mrf.mxu1 }
 0x24d   : > { %v3673_v1 = vpop.f32.mrf.mxu2  ;;  %v3686_v51 = vpop.f32.mrf.mxu3 }
 0x24e   : > { %v3687_v0 = vadd.f32 %v3686_v51, %v3673_v1 }
 0x250   : > { %v3691_v15 = vadd.f32 %v3687_v0, %v3415_v20 }
 0x255   : > { %v3675_v36 = vpop.f32.mrf.mxu2  ;;  %v3688_v32 = vpop.f32.mrf.mxu3 }
 0x264   : > { %v3922_v4 = vpop.f32.mrf.mxu0  ;;  %v3935_v5 = vpop.f32.mrf.mxu1 }
 0x265   : > { %v3936_v9 = vadd.f32 %v3935_v5, %v3922_v4 }
 0x267   : > { %v3965_v10 = vadd.f32 %v3936_v9, %v3690_v19 }
 0x269   : > { %v3967_v22 = vmax.f32 %v3965_v10, 0.0 }
 0x26b   : > { %v3948_v2 = vpop.f32.mrf.mxu2  ;;  %v3961_v14 = vpop.f32.mrf.mxu3  ;;  %v3969_v24 = vmul.f32 0.999995, %v3967_v22 }
 0x26c   : > { %v3962_v16 = vadd.f32 %v3961_v14, %v3948_v2  ;;  %v3924_v17 = vpop.f32.mrf.mxu0  ;;  %v3937_v21 = vpop.f32.mrf.mxu1 }
 0x26e   : > { %v3966_v23 = vadd.f32 %v3962_v16, %v3691_v15 }
 0x270   : > { %v3968_v53 = vmax.f32 %v3966_v23, 0.0 }
 0x272   : > { %v3970_v26 = vmul.f32 0.999995, %v3968_v53 }
 0x273   : > { %v3950_v41 = vpop.f32.mrf.mxu2  ;;  %v3963_v27 = vpop.f32.mrf.mxu3 }
 0x274   : > { %v3971_v28 = vpack.c.bf16 %v3970_v26, %v3969_v24 }
 0x276   : > { %v3973_v29 = vrot.slane %v3971_v28, 3 }
 0x278   : > { %v3977_v31 = vsel %vm3974_vm14, %v3971_v28, %v3973_v29 }
 0x279   : > { %v3984_v33 = vsel %vm3982_vm1, %v3977_v31, %v3983_v30 }
 0x27a   : > { %3985 = vst [vmem:[%s246_s13] sm:$0x3] %v3984_v33 }
 0x27b PF: > { %s16_s21 = sadd.s32 1, %s6314_s21  }
 0x27c   : > { %p13_p4 = scmp.ge.s32.totalorder %s16_s21, 4  }
 0x27e   :  { %15 = sbr.rel (!%p13_p4) target bundleno = 1 (0x1), region = 81 }

</bundles_post_ra>
